<compile_context>
chip_gen: v6e
topology: v6e:2x2x1
jax: 0.10.0
libtpu: 0.0.40
codegen_flags: <defaults>
</compile_context>

<pallas_src>
import functools
import math

import jax
import jax.numpy as jnp
from jax.experimental import pallas as pl
from jax.experimental.pallas import tpu as pltpu


def _round_up(v, m):
    return ((v + m - 1) // m) * m


def _conv_bn_act_kernel(x_ref, w_ref, scale_ref, shift_ref, o_ref, *,
                        offsets, apply_relu):
    x = x_ref[...]                                   # (tm, Cin) f32
    tm = x.shape[0]

    def shift_rows(v, off):
        # y[r] = v[(r + off) % tm]; wrapped rows only land on discarded outputs.
        # (pltpu.roll(v, tm - off, axis=0) is the XLU-rotate equivalent.)
        if off == 0:
            return v
        return jnp.concatenate([v[off:, :], v[:off, :]], axis=0)

    # In-VMEM "im2col": KH*KW shifted views concatenated on the feature axis,
    # then a single fused GEMM on the MXU (bf16 operands, f32 accumulation).
    patches = jnp.concatenate([shift_rows(x, off) for off in offsets], axis=-1)
    patches = patches.astype(jnp.bfloat16)
    y = jnp.dot(patches, w_ref[...], preferred_element_type=jnp.float32)

    # Epilogue: folded conv-bias / BatchNorm scale+shift, then ReLU.
    y = y * scale_ref[...] + shift_ref[...]
    if apply_relu:
        y = jnp.maximum(y, 0.0)
    o_ref[...] = y.astype(o_ref.dtype)               # lane-dense (128k) store


def conv_batch_active(x, weight, *, stride=1, padding=0, bias=None,
                      bn_params=None, active=True, eps=1e-5,
                      target_rows_per_tile=512):
    """Fused Conv2d(+bias) -> optional BatchNorm2d (eval) -> optional ReLU.

    x:         (N, Cin, H, W) float32  (PyTorch NCHW)
    weight:    (Cout, Cin, KH, KW) float32  (PyTorch OIHW)
    bias:      (Cout,) float32 or None
    bn_params: (gamma, beta, running_mean, running_var) each (Cout,) or None
    Returns:   (N, Cout, Ho, Wo) float32
    """
    N, Cin, H, W = x.shape
    Cout, Cin_w, KH, KW = weight.shape
    assert Cin_w == Cin
    s, p = int(stride), int(padding)

    Ho = (H + 2 * p - KH) // s + 1
    Wo = (W + 2 * p - KW) // s + 1
    Hp, Wp = H + 2 * p, W + 2 * p

    # ---- fold conv bias + eval-mode BatchNorm into per-channel scale/shift ----
    if bn_params is not None:
        gamma, beta, mean, var = bn_params
        scale = gamma / jnp.sqrt(var + eps)
        shift = beta - mean * scale
        if bias is not None:
            shift = shift + bias * scale
    else:
        scale = jnp.ones((Cout,), jnp.float32)
        shift = bias if bias is not None else jnp.zeros((Cout,), jnp.float32)
    # TODO(synk): training-mode BatchNorm (batch statistics) is not computed
    # in-kernel; this folds eval-mode running stats like a deployed conv-bn.

    # ---- layout: NHWC, zero spatial pad, flatten each image row-major ----
    x_nhwc = jnp.transpose(x, (0, 2, 3, 1)).astype(jnp.float32)
    x_pad = jnp.pad(x_nhwc, ((0, 0), (p, p), (p, p), (0, 0)))
    R = _round_up(Hp * Wp, 8)                 # rows per image, sublane-aligned

    ipt = max(1, target_rows_per_tile // R)   # whole images per grid step
    n_tiles = pl.cdiv(N, ipt)                 # cdiv grid + zero-pad tail batch
    N_pad = n_tiles * ipt
    grid = (n_tiles,)
    tm = ipt * R                              # rows fed to the MXU per step

    x_flat = x_pad.reshape(N, Hp * Wp, Cin)
    x_flat = jnp.pad(x_flat, ((0, N_pad - N), (0, R - Hp * Wp), (0, 0)))
    x2 = x_flat.reshape(N_pad * R, Cin)

    # ---- weights: (Cout,Cin,KH,KW) -> (KH*KW*Cin, Cout_p) bf16, lane-dense ----
    Cout_p = _round_up(Cout, 128)
    KKC = KH * KW * Cin
    w_gemm = jnp.transpose(weight, (2, 3, 1, 0)).reshape(KKC, Cout)
    w_gemm = jnp.pad(w_gemm, ((0, 0), (0, Cout_p - Cout))).astype(jnp.bfloat16)
    scale_p = jnp.pad(scale.astype(jnp.float32), (0, Cout_p - Cout)).reshape(1, Cout_p)
    shift_p = jnp.pad(shift.astype(jnp.float32), (0, Cout_p - Cout)).reshape(1, Cout_p)

    offsets = tuple(kh * Wp + kw for kh in range(KH) for kw in range(KW))
    kernel = functools.partial(_conv_bn_act_kernel, offsets=offsets,
                               apply_relu=bool(active))

    def run(const_pipeline_mode):
        const_kw = ({} if const_pipeline_mode is None
                    else dict(pipeline_mode=const_pipeline_mode))
        out = pl.pallas_call(
            kernel,
            out_shape=jax.ShapeDtypeStruct((N_pad * R, Cout_p), jnp.float32),
            grid_spec=pltpu.PrefetchScalarGridSpec(
                num_scalar_prefetch=0,
                grid=grid,
                in_specs=[
                    pl.BlockSpec((tm, Cin), lambda i: (i, 0)),          # x rows
                    pl.BlockSpec((KKC, Cout_p), lambda i: (0, 0), **const_kw),
                    pl.BlockSpec((1, Cout_p), lambda i: (0, 0), **const_kw),
                    pl.BlockSpec((1, Cout_p), lambda i: (0, 0), **const_kw),
                ],
                out_specs=pl.BlockSpec((tm, Cout_p), lambda i: (i, 0)),
            ),
            compiler_params=pltpu.CompilerParams(
                dimension_semantics=("parallel",),      # image tiles -> megacore
                vmem_limit_bytes=48 * 1024 * 1024,      # explicit budget (v7x-safe)
            ),
        )(x2, w_gemm, scale_p, shift_p)
        return jax.block_until_ready(out)

    try:
        # Constant weight/scale/shift blocks: single-buffered (no re-DMA, saves VMEM).
        y2 = run(pl.Buffered(1))
    except Exception:
        y2 = run(None)   # fallback if this JAX version rejects pipeline_mode hints

    # ---- un-flatten, drop padding, subsample for stride, back to NCHW ----
    z = y2.reshape(N_pad, R, Cout_p)[:N, :Hp * Wp, :Cout]
    z = z.reshape(N, Hp, Wp, Cout)
    z = z[:, : (Ho - 1) * s + 1 : s, : (Wo - 1) * s + 1 : s, :]
    # TODO(synk): stride > 1 computes the full stride-1 map and subsamples; a
    # strided gather in the index_map would remove the s^2 extra work.
    return jnp.transpose(z, (0, 3, 1, 2))


def reference(x, weight, *, stride=1, padding=0, bias=None, bn_params=None,
              active=True, eps=1e-5, matmul_dtype=None):
    xr = x if matmul_dtype is None else x.astype(matmul_dtype)
    wr = weight if matmul_dtype is None else weight.astype(matmul_dtype)
    y = jax.lax.conv_general_dilated(
        xr, wr, window_strides=(stride, stride),
        padding=[(padding, padding), (padding, padding)],
        dimension_numbers=("NCHW", "OIHW", "NCHW"),
        preferred_element_type=jnp.float32)
    if bias is not None:
        y = y + bias[None, :, None, None]
    if bn_params is not None:
        gamma, beta, mean, var = bn_params
        sc = (gamma / jnp.sqrt(var + eps))[None, :, None, None]
        y = (y - mean[None, :, None, None]) * sc + beta[None, :, None, None]
    if active:
        y = jnp.maximum(y, 0.0)
    return y


if __name__ == "__main__":
    key = jax.random.PRNGKey(0)
    kx, kw, kg, kbe, km, kv = jax.random.split(key, 6)

    # Conv_Batch_Active(cin=4, out=8, kernel=3, ...) on x of shape (2, 4, 16, 16).
    N, Cin, H, W = 2, 4, 16, 16
    Cout, K = 8, 3

    x = jax.random.normal(kx, (N, Cin, H, W), jnp.float32)
    bound = 1.0 / math.sqrt(Cin * K * K)
    weight = jax.random.uniform(kw, (Cout, Cin, K, K), jnp.float32, -bound, bound)
    bn_params = (
        jax.random.uniform(kg, (Cout,), jnp.float32, 0.5, 1.5),    # gamma
        jax.random.uniform(kbe, (Cout,), jnp.float32, -0.5, 0.5),  # beta
        jax.random.uniform(km, (Cout,), jnp.float32, -0.5, 0.5),   # running mean
        jax.random.uniform(kv, (Cout,), jnp.float32, 0.5, 1.5),    # running var
    )

    configs = [
        dict(stride=1, padding=1, bias=None, bn_params=bn_params, active=True),
        dict(stride=2, padding=0, bias=None, bn_params=None, active=True),
    ]
    for cfg in configs:
        y = jax.block_until_ready(conv_batch_active(x, weight, **cfg))
        # Tight check vs a reference using the same bf16 matmul operands ...
        y_bf16 = reference(x, weight, matmul_dtype=jnp.bfloat16, **cfg)
        # ... and a loose sanity bound vs the full-f32 reference.
        y_f32 = reference(x, weight, **cfg)
        assert y.shape == y_f32.shape
        assert jnp.allclose(y, y_bf16, atol=2e-3, rtol=2e-3), "mismatch (bf16 ref)"
        assert jnp.allclose(y, y_f32, atol=1e-1, rtol=1e-1), "mismatch (f32 ref)"

    print("KERNEL_OK")
</pallas_src>

<mosaic_0001>
module attributes {stable_mosaic.version = 11 : i64} {
  func.func @_conv_bn_act_kernel(%arg0: i32, %arg1: memref<328x4xf32, #tpu.memory_space<vmem>>, %arg2: memref<36x128xbf16, #tpu.memory_space<vmem>>, %arg3: memref<1x128xf32, #tpu.memory_space<vmem>>, %arg4: memref<1x128xf32, #tpu.memory_space<vmem>>, %arg5: memref<328x128xf32, #tpu.memory_space<vmem>>) attributes {dimension_semantics = [#tpu.dimension_semantics<parallel>], iteration_bounds = array<i64: 2>, scalar_prefetch = 0 : i64, scratch_operands = 0 : i64, tpu.core_type = #tpu.core_type<tc>, window_params = [{transform_indices = @transform_0, window_bounds = array<i64: 328, 4>}, {pipeline_mode = #tpu.pipeline_mode<synchronous>, transform_indices = @transform_1, window_bounds = array<i64: 36, 128>}, {pipeline_mode = #tpu.pipeline_mode<synchronous>, transform_indices = @transform_2, window_bounds = array<i64: 1, 128>}, {pipeline_mode = #tpu.pipeline_mode<synchronous>, transform_indices = @transform_3, window_bounds = array<i64: 1, 128>}, {transform_indices = @transform_4, window_bounds = array<i64: 328, 128>}]} {
    %c0 = arith.constant 0 : index
    %c0_0 = arith.constant 0 : index
    %0 = vector.load %arg1[%c0, %c0_0] : memref<328x4xf32, #tpu.memory_space<vmem>>, vector<328x4xf32>
    %1 = vector.extract_strided_slice %0 {offsets = [1, 0], sizes = [327, 4], strides = [1, 1]} : vector<328x4xf32> to vector<327x4xf32>
    %2 = vector.extract_strided_slice %0 {offsets = [0, 0], sizes = [1, 4], strides = [1, 1]} : vector<328x4xf32> to vector<1x4xf32>
    %3 = tpu.concatenate %1, %2 in 0 : vector<327x4xf32>, vector<1x4xf32> -> vector<328x4xf32>
    %4 = vector.extract_strided_slice %0 {offsets = [2, 0], sizes = [326, 4], strides = [1, 1]} : vector<328x4xf32> to vector<326x4xf32>
    %5 = vector.extract_strided_slice %0 {offsets = [0, 0], sizes = [2, 4], strides = [1, 1]} : vector<328x4xf32> to vector<2x4xf32>
    %6 = tpu.concatenate %4, %5 in 0 : vector<326x4xf32>, vector<2x4xf32> -> vector<328x4xf32>
    %7 = vector.extract_strided_slice %0 {offsets = [18, 0], sizes = [310, 4], strides = [1, 1]} : vector<328x4xf32> to vector<310x4xf32>
    %8 = vector.extract_strided_slice %0 {offsets = [0, 0], sizes = [18, 4], strides = [1, 1]} : vector<328x4xf32> to vector<18x4xf32>
    %9 = tpu.concatenate %7, %8 in 0 : vector<310x4xf32>, vector<18x4xf32> -> vector<328x4xf32>
    %10 = vector.extract_strided_slice %0 {offsets = [19, 0], sizes = [309, 4], strides = [1, 1]} : vector<328x4xf32> to vector<309x4xf32>
    %11 = vector.extract_strided_slice %0 {offsets = [0, 0], sizes = [19, 4], strides = [1, 1]} : vector<328x4xf32> to vector<19x4xf32>
    %12 = tpu.concatenate %10, %11 in 0 : vector<309x4xf32>, vector<19x4xf32> -> vector<328x4xf32>
    %13 = vector.extract_strided_slice %0 {offsets = [20, 0], sizes = [308, 4], strides = [1, 1]} : vector<328x4xf32> to vector<308x4xf32>
    %14 = vector.extract_strided_slice %0 {offsets = [0, 0], sizes = [20, 4], strides = [1, 1]} : vector<328x4xf32> to vector<20x4xf32>
    %15 = tpu.concatenate %13, %14 in 0 : vector<308x4xf32>, vector<20x4xf32> -> vector<328x4xf32>
    %16 = vector.extract_strided_slice %0 {offsets = [36, 0], sizes = [292, 4], strides = [1, 1]} : vector<328x4xf32> to vector<292x4xf32>
    %17 = vector.extract_strided_slice %0 {offsets = [0, 0], sizes = [36, 4], strides = [1, 1]} : vector<328x4xf32> to vector<36x4xf32>
    %18 = tpu.concatenate %16, %17 in 0 : vector<292x4xf32>, vector<36x4xf32> -> vector<328x4xf32>
    %19 = vector.extract_strided_slice %0 {offsets = [37, 0], sizes = [291, 4], strides = [1, 1]} : vector<328x4xf32> to vector<291x4xf32>
    %20 = vector.extract_strided_slice %0 {offsets = [0, 0], sizes = [37, 4], strides = [1, 1]} : vector<328x4xf32> to vector<37x4xf32>
    %21 = tpu.concatenate %19, %20 in 0 : vector<291x4xf32>, vector<37x4xf32> -> vector<328x4xf32>
    %22 = vector.extract_strided_slice %0 {offsets = [38, 0], sizes = [290, 4], strides = [1, 1]} : vector<328x4xf32> to vector<290x4xf32>
    %23 = vector.extract_strided_slice %0 {offsets = [0, 0], sizes = [38, 4], strides = [1, 1]} : vector<328x4xf32> to vector<38x4xf32>
    %24 = tpu.concatenate %22, %23 in 0 : vector<290x4xf32>, vector<38x4xf32> -> vector<328x4xf32>
    %25 = tpu.concatenate %0, %3, %6, %9, %12, %15, %18, %21, %24 in 1 : vector<328x4xf32>, vector<328x4xf32>, vector<328x4xf32>, vector<328x4xf32>, vector<328x4xf32>, vector<328x4xf32>, vector<328x4xf32>, vector<328x4xf32>, vector<328x4xf32> -> vector<328x36xf32>
    %26 = arith.truncf %25 : vector<328x36xf32> to vector<328x36xbf16>
    %c0_1 = arith.constant 0 : index
    %c0_2 = arith.constant 0 : index
    %27 = vector.load %arg2[%c0_1, %c0_2] : memref<36x128xbf16, #tpu.memory_space<vmem>>, vector<36x128xbf16>
    %cst = arith.constant dense<0.000000e+00> : vector<328x128xf32>
    %28 = tpu.matmul %26, %27, %cst {dimension_numbers = #tpu.dot_dimension_numbers<[1], [0], [0], [1], [0, 0, 1, 1], [], []>} : vector<328x36xbf16>, vector<36x128xbf16>, vector<328x128xf32> -> vector<328x128xf32>
    %c0_3 = arith.constant 0 : index
    %c0_4 = arith.constant 0 : index
    %29 = vector.load %arg3[%c0_3, %c0_4] : memref<1x128xf32, #tpu.memory_space<vmem>>, vector<1x128xf32>
    %30 = vector.broadcast %29 : vector<1x128xf32> to vector<328x128xf32>
    %31 = arith.mulf %28, %30 : vector<328x128xf32>
    %c0_5 = arith.constant 0 : index
    %c0_6 = arith.constant 0 : index
    %32 = vector.load %arg4[%c0_5, %c0_6] : memref<1x128xf32, #tpu.memory_space<vmem>>, vector<1x128xf32>
    %33 = vector.broadcast %32 : vector<1x128xf32> to vector<328x128xf32>
    %34 = arith.addf %31, %33 : vector<328x128xf32>
    %cst_7 = arith.constant 0.000000e+00 : f32
    %35 = vector.broadcast %cst_7 : f32 to vector<328x128xf32>
    %36 = arith.maximumf %34, %35 : vector<328x128xf32>
    %c0_8 = arith.constant 0 : index
    %c0_9 = arith.constant 0 : index
    %37 = vector.load %arg5[%c0_8, %c0_9] : memref<328x128xf32, #tpu.memory_space<vmem>>, vector<328x128xf32>
    tpu.vector_store %arg5[%c0_8, %c0_9], %36 {strides = array<i32>} : memref<328x128xf32, #tpu.memory_space<vmem>>, vector<328x128xf32>,
    return
  }
  func.func @transform_0(%arg0: i32) -> (i32, i32) {
    %c0_i32 = arith.constant 0 : i32
    %c0_i32_0 = arith.constant 0 : i32
    return %arg0, %c0_i32 : i32, i32
  }
  func.func @transform_1(%arg0: i32) -> (i32, i32) {
    %c0_i32 = arith.constant 0 : i32
    %c0_i32_0 = arith.constant 0 : i32
    %c0_i32_1 = arith.constant 0 : i32
    return %c0_i32, %c0_i32_0 : i32, i32
  }
  func.func @transform_2(%arg0: i32) -> (i32, i32) {
    %c0_i32 = arith.constant 0 : i32
    %c0_i32_0 = arith.constant 0 : i32
    %c0_i32_1 = arith.constant 0 : i32
    return %c0_i32, %c0_i32_0 : i32, i32
  }
  func.func @transform_3(%arg0: i32) -> (i32, i32) {
    %c0_i32 = arith.constant 0 : i32
    %c0_i32_0 = arith.constant 0 : i32
    %c0_i32_1 = arith.constant 0 : i32
    return %c0_i32, %c0_i32_0 : i32, i32
  }
  func.func @transform_4(%arg0: i32) -> (i32, i32) {
    %c0_i32 = arith.constant 0 : i32
    %c0_i32_0 = arith.constant 0 : i32
    return %arg0, %c0_i32 : i32, i32
  }
}

module attributes {stable_mosaic.version = 11 : i64} {
  func.func @_conv_bn_act_kernel(%arg0: i32, %arg1: memref<328x4xf32, #tpu.memory_space<vmem>>, %arg2: memref<36x128xbf16, #tpu.memory_space<vmem>>, %arg3: memref<1x128xf32, #tpu.memory_space<vmem>>, %arg4: memref<1x128xf32, #tpu.memory_space<vmem>>, %arg5: memref<328x128xf32, #tpu.memory_space<vmem>>) attributes {dimension_semantics = [#tpu.dimension_semantics<parallel>], iteration_bounds = array<i64: 2>, scalar_prefetch = 0 : i64, scratch_operands = 0 : i64, tpu.core_type = #tpu.core_type<tc>, window_params = [{transform_indices = @transform_0, window_bounds = array<i64: 328, 4>}, {pipeline_mode = #tpu.pipeline_mode<synchronous>, transform_indices = @transform_1, window_bounds = array<i64: 36, 128>}, {pipeline_mode = #tpu.pipeline_mode<synchronous>, transform_indices = @transform_2, window_bounds = array<i64: 1, 128>}, {pipeline_mode = #tpu.pipeline_mode<synchronous>, transform_indices = @transform_3, window_bounds = array<i64: 1, 128>}, {transform_indices = @transform_4, window_bounds = array<i64: 328, 128>}]} {
    %c0 = arith.constant 0 : index
    %c0_0 = arith.constant 0 : index
    %0 = vector.load %arg1[%c0, %c0_0] : memref<328x4xf32, #tpu.memory_space<vmem>>, vector<328x4xf32>
    %1 = vector.extract_strided_slice %0 {offsets = [1, 0], sizes = [327, 4], strides = [1, 1]} : vector<328x4xf32> to vector<327x4xf32>
    %2 = vector.extract_strided_slice %0 {offsets = [0, 0], sizes = [1, 4], strides = [1, 1]} : vector<328x4xf32> to vector<1x4xf32>
    %3 = tpu.concatenate %1, %2 in 0 : vector<327x4xf32>, vector<1x4xf32> -> vector<328x4xf32>
    %4 = vector.extract_strided_slice %0 {offsets = [2, 0], sizes = [326, 4], strides = [1, 1]} : vector<328x4xf32> to vector<326x4xf32>
    %5 = vector.extract_strided_slice %0 {offsets = [0, 0], sizes = [2, 4], strides = [1, 1]} : vector<328x4xf32> to vector<2x4xf32>
    %6 = tpu.concatenate %4, %5 in 0 : vector<326x4xf32>, vector<2x4xf32> -> vector<328x4xf32>
    %7 = vector.extract_strided_slice %0 {offsets = [18, 0], sizes = [310, 4], strides = [1, 1]} : vector<328x4xf32> to vector<310x4xf32>
    %8 = vector.extract_strided_slice %0 {offsets = [0, 0], sizes = [18, 4], strides = [1, 1]} : vector<328x4xf32> to vector<18x4xf32>
    %9 = tpu.concatenate %7, %8 in 0 : vector<310x4xf32>, vector<18x4xf32> -> vector<328x4xf32>
    %10 = vector.extract_strided_slice %0 {offsets = [19, 0], sizes = [309, 4], strides = [1, 1]} : vector<328x4xf32> to vector<309x4xf32>
    %11 = vector.extract_strided_slice %0 {offsets = [0, 0], sizes = [19, 4], strides = [1, 1]} : vector<328x4xf32> to vector<19x4xf32>
    %12 = tpu.concatenate %10, %11 in 0 : vector<309x4xf32>, vector<19x4xf32> -> vector<328x4xf32>
    %13 = vector.extract_strided_slice %0 {offsets = [20, 0], sizes = [308, 4], strides = [1, 1]} : vector<328x4xf32> to vector<308x4xf32>
    %14 = vector.extract_strided_slice %0 {offsets = [0, 0], sizes = [20, 4], strides = [1, 1]} : vector<328x4xf32> to vector<20x4xf32>
    %15 = tpu.concatenate %13, %14 in 0 : vector<308x4xf32>, vector<20x4xf32> -> vector<328x4xf32>
    %16 = vector.extract_strided_slice %0 {offsets = [36, 0], sizes = [292, 4], strides = [1, 1]} : vector<328x4xf32> to vector<292x4xf32>
    %17 = vector.extract_strided_slice %0 {offsets = [0, 0], sizes = [36, 4], strides = [1, 1]} : vector<328x4xf32> to vector<36x4xf32>
    %18 = tpu.concatenate %16, %17 in 0 : vector<292x4xf32>, vector<36x4xf32> -> vector<328x4xf32>
    %19 = vector.extract_strided_slice %0 {offsets = [37, 0], sizes = [291, 4], strides = [1, 1]} : vector<328x4xf32> to vector<291x4xf32>
    %20 = vector.extract_strided_slice %0 {offsets = [0, 0], sizes = [37, 4], strides = [1, 1]} : vector<328x4xf32> to vector<37x4xf32>
    %21 = tpu.concatenate %19, %20 in 0 : vector<291x4xf32>, vector<37x4xf32> -> vector<328x4xf32>
    %22 = vector.extract_strided_slice %0 {offsets = [38, 0], sizes = [290, 4], strides = [1, 1]} : vector<328x4xf32> to vector<290x4xf32>
    %23 = vector.extract_strided_slice %0 {offsets = [0, 0], sizes = [38, 4], strides = [1, 1]} : vector<328x4xf32> to vector<38x4xf32>
    %24 = tpu.concatenate %22, %23 in 0 : vector<290x4xf32>, vector<38x4xf32> -> vector<328x4xf32>
    %25 = tpu.concatenate %0, %3, %6, %9, %12, %15, %18, %21, %24 in 1 : vector<328x4xf32>, vector<328x4xf32>, vector<328x4xf32>, vector<328x4xf32>, vector<328x4xf32>, vector<328x4xf32>, vector<328x4xf32>, vector<328x4xf32>, vector<328x4xf32> -> vector<328x36xf32>
    %26 = arith.truncf %25 : vector<328x36xf32> to vector<328x36xbf16>
    %c0_1 = arith.constant 0 : index
    %c0_2 = arith.constant 0 : index
    %27 = vector.load %arg2[%c0_1, %c0_2] : memref<36x128xbf16, #tpu.memory_space<vmem>>, vector<36x128xbf16>
    %cst = arith.constant dense<0.000000e+00> : vector<328x128xf32>
    %28 = tpu.matmul %26, %27, %cst {dimension_numbers = #tpu.dot_dimension_numbers<[1], [0], [0], [1], [0, 0, 1, 1], [], []>} : vector<328x36xbf16>, vector<36x128xbf16>, vector<328x128xf32> -> vector<328x128xf32>
    %c0_3 = arith.constant 0 : index
    %c0_4 = arith.constant 0 : index
    %29 = vector.load %arg3[%c0_3, %c0_4] : memref<1x128xf32, #tpu.memory_space<vmem>>, vector<1x128xf32>
    %30 = vector.broadcast %29 : vector<1x128xf32> to vector<328x128xf32>
    %31 = arith.mulf %28, %30 : vector<328x128xf32>
    %c0_5 = arith.constant 0 : index
    %c0_6 = arith.constant 0 : index
    %32 = vector.load %arg4[%c0_5, %c0_6] : memref<1x128xf32, #tpu.memory_space<vmem>>, vector<1x128xf32>
    %33 = vector.broadcast %32 : vector<1x128xf32> to vector<328x128xf32>
    %34 = arith.addf %31, %33 : vector<328x128xf32>
    %cst_7 = arith.constant 0.000000e+00 : f32
    %35 = vector.broadcast %cst_7 : f32 to vector<328x128xf32>
    %36 = arith.maximumf %34, %35 : vector<328x128xf32>
    %c0_8 = arith.constant 0 : index
    %c0_9 = arith.constant 0 : index
    %37 = vector.load %arg5[%c0_8, %c0_9] : memref<328x128xf32, #tpu.memory_space<vmem>>, vector<328x128xf32>
    tpu.vector_store %arg5[%c0_8, %c0_9], %36 {strides = array<i32>} : memref<328x128xf32, #tpu.memory_space<vmem>>, vector<328x128xf32>,
    return
  }
  func.func @transform_0(%arg0: i32) -> (i32, i32) {
    %c0_i32 = arith.constant 0 : i32
    %c0_i32_0 = arith.constant 0 : i32
    return %arg0, %c0_i32 : i32, i32
  }
  func.func @transform_1(%arg0: i32) -> (i32, i32) {
    %c0_i32 = arith.constant 0 : i32
    %c0_i32_0 = arith.constant 0 : i32
    %c0_i32_1 = arith.constant 0 : i32
    return %c0_i32, %c0_i32_0 : i32, i32
  }
  func.func @transform_2(%arg0: i32) -> (i32, i32) {
    %c0_i32 = arith.constant 0 : i32
    %c0_i32_0 = arith.constant 0 : i32
    %c0_i32_1 = arith.constant 0 : i32
    return %c0_i32, %c0_i32_0 : i32, i32
  }
  func.func @transform_3(%arg0: i32) -> (i32, i32) {
    %c0_i32 = arith.constant 0 : i32
    %c0_i32_0 = arith.constant 0 : i32
    %c0_i32_1 = arith.constant 0 : i32
    return %c0_i32, %c0_i32_0 : i32, i32
  }
  func.func @transform_4(%arg0: i32) -> (i32, i32) {
    %c0_i32 = arith.constant 0 : i32
    %c0_i32_0 = arith.constant 0 : i32
    return %arg0, %c0_i32 : i32, i32
  }
}

</mosaic_0001>

<bundles_post_ra>
// kernel: tpu_custom_call.1
= control target key start
LH: loop header
LB: loop body
LE: loop exit
PB: predicated region body
PF: predicated region fallthrough
CT: control target
= control target key end

     0   :  { %9 = vsyncpa [#allocation3], 0  ;;  %s6643_s0 = inlined_call_operand.vmem [shape: f32[656,4], index: 0, kind: input, shape index: {}]   ;;  %s6644_s1 = inlined_call_operand.vmem [shape: bf16[36,128], index: 1, kind: input, shape index: {}]   ;;  %s6645_s2 = inlined_call_operand.vmem [shape: f32[1,128], index: 2, kind: input, shape index: {}]   ;;  %s6646_s3 = inlined_call_operand.vmem [shape: f32[1,128], index: 3, kind: input, shape index: {}]   ;;  %s6647_s4 = inlined_call_operand.hbm [shape: f32[656,128], index: 4, kind: output, shape index: {}]  }
   0x1   :  { %11 = vsyncpa [#allocation3 + $0x1], 0  ;;  %s3829_s15 = smov 0   ;;  %s3831_s16 = smov 0  }
   0x2   :  { %s3833_s17 = smov 0   ;;  %s3835_s18 = smov 0  }
   0x3 LB: > { %s3850_s19 = sadd.s32 4294967295, %s3790_s18   ;;  %s2680_s20 = sadd.s32 4294967294, %s3790_s18   ;;  %s3790_s18 = sphi %s3835_s18, %s7071_s18   ;;  %s3786_s17 = sphi %s3833_s17, %s7070_s17   ;;  %s3782_s16 = sphi %s3831_s16, %s7069_s16   ;;  %s3778_s15 = sphi %s3829_s15, %s7068_s15  }
   0x4   : > { %s3854_s21 = sadd.s32 1, %s3790_s18   ;;  %s113_s22 = sadd.s32 1, %s3786_s17 }
   0x5   : > { %s110_s23 = ssub.s32 %s3790_s18, %s3854_s21  ;;  %p123_p0 = scmp.ne.s32.totalorder %s3786_s17, %s3782_s16 }
   0x6   : > { %p111_p1 = scmp.eq.s32.totalorder %s110_s23, 0  ;;  %p124_p2 = scmp.eq.s32.totalorder %s3850_s19, 1 }
   0x7   : > { %p129_p3 = scmp.ne.s32.totalorder %s3782_s16, %s3778_s15  ;;  %p130_p4 = scmp.eq.s32.totalorder %s2680_s20, 1 }
   0x8   : > { %s3865_s24 = scalar_select %p111_p1, %s3786_s17, %s113_s22  }
   0x9   : > { %p3867_p5 = por %p124_p2, %p123_p0  ;;  %p3871_p6 = por %p130_p4, %p129_p3 }
   0xa   : > { %p2683_p7 = scmp.ge.s32.totalorder %s3790_s18, 1  ;;  %p166_p8 = scmp.lt.s32.totalorder %s3790_s18, 3 }
   0xc   : > { %p167_p9 = pnand %p2683_p7, %p166_p8 }
   0xe   : > { %170 = sbr.rel (%p167_p9) target bundleno = 713 (0x2c9), region = 36 }
  0x13   : > { %s192_s27 = smul.u32 41, %s3850_s19  ;;  %vm282_vm0 = vcmask 1046528   ;;  %s3792_s6 = smov 4   ;;  %vm367_vm1 = vcmask 1045504   ;;  %vm537_vm2 = vcmask 1043456   ;;  %vm452_vm3 = vcmask 1044480  }
  0x14   : > { %s3793_s7 = smov 8   ;;  %s3794_s8 = smov 12   ;;  %vm622_vm4 = vcmask 1042432   ;;  %vm707_vm5 = vcmask 1041408   ;;  %vm1782_vm6 = vcmask 31744   ;;  %vm1824_vm7 = vcmask 64512  }
  0x15   : > { %p193_p10 = scmp.lt.s32.totalorder %s192_s27, 81  ;;  %s3795_s9 = smov 16   ;;  %vm3801_vm8 = vmmov 0   ;;  %vm1866_vm9 = vcmask 97280   ;;  %vm1908_vm10 = vcmask 130048   ;;  %vm1950_vm11 = vcmask 162816  }
  0x16   : > { %s3796_s12 = smov 20   ;;  %s3798_s20 = smov 28   ;;  %vm1992_vm12 = vcmask 195584   ;;  %vm2034_vm13 = vcmask 228352   ;;  %vm2076_vm14 = vcmask 261120   ;;  %vm2159_vm15 = vcmask 293888  }
  0x17   : > { %s7073_s27 = smov (!%p193_p10, %s192_s27), 81  ;;  %s3799_s22 = smov 24  }
  0x18   : > { %s2684_s28 = sshll.u32 %s7073_s27, 3  ;;  %s189_s29 = sand.u32 1, %s3782_s16  }
  0x19   : > { %s3881_s5 = scalar_lea.vmem %s6643_s0, %s2684_s28  ;;  %s3800_s28 = smov 32  }
  0x1a   : > { %v3884_v0 = vld [vmem:[%s3881_s5 + $0x20] sm:$0xff]  ;;  %v3887_v1 = vld [vmem:[%s3881_s5 + $0x28] sm:$0xff]  ;;  %v3890_v2 = vld [vmem:[%s3881_s5 + $0x30] sm:$0xff]  ;;  %s2714_s11 = smul.u32 5248, %s3850_s19  ;;  %s6602_s19 = scalar_lea.sflag [#allocation3], %s189_s29 }
  0x1b   : > { %6745 = vst [vmem:[#allocation5_spill] sm:$0xff] %v3884_v0  ;;  %v290_v3 = vrot.slane %v3884_v0, 1  ;;  %v292_v4 = vrot.slane %v3887_v1, 1  ;;  %v294_v5 = vrot.slane %v3890_v2, 1  ;;  %v3896_v6 = vld [vmem:[%s3881_s5] sm:$0xff]  ;;  %v3899_v7 = vld [vmem:[%s3881_s5 + $0x8] sm:$0xff] }
  0x1c   : > { %6746 = vst [vmem:[#allocation6_spill] sm:$0xff] %v3899_v7  ;;  %v3902_v8 = vld [vmem:[%s3881_s5 + $0x10] sm:$0xff]  ;;  %v283_v9 = vrot.slane %v3896_v6, 1  ;;  %v284_v10 = vrot.slane %v3899_v7, 1  ;;  %v3908_v12 = vld [vmem:[%s3881_s5 + $0x38] sm:$0xff]  ;;  %v3911_v13 = vld [vmem:[%s3881_s5 + $0x40] sm:$0xff] }
  0x1d   : > { %6747 = vst [vmem:[#allocation7_spill] sm:$0xff] %v3902_v8  ;;  %v286_v11 = vrot.slane %v3902_v8, 1  ;;  %v3914_v14 = vld [vmem:[%s3881_s5 + $0x18] sm:$0xff]  ;;  %v293_v15 = vsel %vm282_vm0, %v290_v3, %v292_v4  ;;  %v295_v16 = vsel %vm282_vm0, %v292_v4, %v294_v5  ;;  %v296_v17 = vrot.slane %v3908_v12, 1  ;;  %v3921_v19 = vld [vmem:[%s3881_s5 + $0x50] sm:$0xff]  ;;  %v3932_v25 = vld [vmem:[%s3881_s5 + $0x60] sm:$0xff] }
  0x1e   : > { %v298_v18 = vrot.slane %v3911_v13, 1  ;;  %v3924_v20 = vld [vmem:[%s3881_s5 + $0x58] sm:$0xff]  ;;  %v2896_v21 = vpack.i.bf16 %v295_v16, %v293_v15  ;;  %v285_v22 = vsel %vm282_vm0, %v283_v9, %v284_v10  ;;  %v288_v24 = vrot.slane %v3914_v14, 1  ;;  %v3935_v26 = vld [vmem:[%s3881_s5 + $0x48] sm:$0xff]  ;;  %v3938_v27 = vld [vmem:[%s3881_s5 + $0x70] sm:$0xff]  ;;  %s3802_s23 = smov [#allocation2]  }
  0x1f   : > { %v287_v23 = vsel %vm282_vm0, %v284_v10, %v286_v11  ;;  %v297_v29 = vsel %vm282_vm0, %v294_v5, %v296_v17  ;;  %v302_v31 = vrot.slane %v3921_v19, 1  ;;  %v3944_v32 = vld [vmem:[%s3881_s5 + $0x78] sm:$0xff]  ;;  %v3947_v33 = vld [vmem:[%s3881_s5 + $0x80] sm:$0xff]  ;;  %v3950_v34 = vld [vmem:[%s3881_s5 + $0x68] sm:$0xff]  ;;  %v304_v38 = vrot.slane %v3924_v20, 1  ;;  %s3734_s27 = sshll.u32 %s3802_s23, 4  ;;  %s3735_s27 = int_to_ptr.vmem [resolvable:$false] %s3734_s27 }
  0x20   : > { %v2886_v28 = vpack.i.bf16 %v287_v23, %v285_v22  ;;  %v299_v30 = vsel %vm282_vm0, %v296_v17, %v298_v18  ;;  %2897 = vrot.lane.b32.xlu1 %v2896_v21, %s3792_s6  ;;  %v289_v36 = vsel %vm282_vm0, %v286_v11, %v288_v24  ;;  %v291_v37 = vsel %vm282_vm0, %v288_v24, %v290_v3  ;;  %v3961_v43 = vld [vmem:[%s3881_s5 + $0x90] sm:$0xff]  ;;  %v3968_v48 = vld [vmem:[%s3881_s5 + $0x98] sm:$0xff]  ;;  %v3974_v52 = vld [vmem:[%s3881_s5 + $0xa0] sm:$0xff] }
  0x21   : > { %v2901_v35 = vpack.i.bf16 %v299_v30, %v297_v29  ;;  %v2891_v39 = vpack.i.bf16 %v291_v37, %v289_v36  ;;  %v306_v40 = vrot.slane %v3932_v25, 1  ;;  %v300_v41 = vrot.slane %v3935_v26, 1  ;;  %6748 = vst [vmem:[#allocation8_spill] sm:$0xff] %v3974_v52  ;;  %v3977_v53 = vld [vmem:[%s3881_s5 + $0x88] sm:$0xff]  ;;  %v3984_v58 = vld [vmem:[%s3881_s5 + $0xb0] sm:$0xff]  ;;  %v3989_v61 = vld [vmem:[%s3881_s5 + $0xb8] sm:$0xff] }
  0x22   : > { %2887 = vrot.lane.b32.xlu0 %v2886_v28, %s3792_s6  ;;  %v310_v42 = vrot.slane %v3938_v27, 1  ;;  %v305_v44 = vsel %vm282_vm0, %v302_v31, %v304_v38  ;;  %v312_v45 = vrot.slane %v3944_v32, 1  ;;  %v314_v46 = vrot.slane %v3947_v33, 1  ;;  %6749 = vst [vmem:[#allocation9_spill] sm:$0xff] %v3977_v53  ;;  %6750 = vst [vmem:[#allocation10_spill] sm:$0xff] %v3984_v58  ;;  %v3992_v62 = vld [vmem:[%s3881_s5 + $0xc0] sm:$0xff] }
  0x23   : > { %v308_v47 = vrot.slane %v3950_v34, 1  ;;  %v307_v49 = vsel %vm282_vm0, %v304_v38, %v306_v40  ;;  %v301_v50 = vsel %vm282_vm0, %v298_v18, %v300_v41  ;;  %v303_v51 = vsel %vm282_vm0, %v300_v41, %v302_v31  ;;  %6751 = vst [vmem:[#allocation11_spill] sm:$0xff] %v3992_v62  ;;  %v4000_v15 = vld [vmem:[%s3881_s5 + $0xa8] sm:$0xff]  ;;  %v4008_v22 = vld [vmem:[%s3881_s5 + $0xd0] sm:$0xff]  ;;  %v4012_v24 = vld [vmem:[%s3881_s5 + $0xd8] sm:$0xff] }
  0x24   : > { %2902 = vrot.lane.b32.xlu1 %v2901_v35, %s3792_s6  ;;  %v2911_v54 = vpack.i.bf16 %v307_v49, %v305_v44  ;;  %v313_v55 = vsel %vm282_vm0, %v310_v42, %v312_v45  ;;  %v315_v56 = vsel %vm282_vm0, %v312_v45, %v314_v46  ;;  %v318_v57 = vrot.slane %v3961_v43, 1  ;;  %6752 = vst [vmem:[#allocation12_spill] sm:$0xff] %v4000_v15  ;;  %v4015_v28 = vld [vmem:[%s3881_s5 + $0xe0] sm:$0xff]  ;;  %v4022_v37 = vld [vmem:[%s3881_s5 + $0xc8] sm:$0xff]  ;;  %v4033_v44 = vld [vmem:[%s3881_s5 + $0xf8] sm:$0xff] }
  0x25   : > { %v2906_v59 = vpack.i.bf16 %v303_v51, %v301_v50  ;;  %v320_v60 = vrot.slane %v3968_v48, 1  ;;  %v309_v63 = vsel %vm282_vm0, %v306_v40, %v308_v47  ;;  %v311_v3 = vsel %vm282_vm0, %v308_v47, %v310_v42  ;;  %6753 = vst [vmem:[#allocation13_spill] sm:$0xff] %v4008_v22  ;;  %6754 = vst [vmem:[#allocation14_spill] sm:$0xff] %v4015_v28  ;;  %v4030_v42 = vld [vmem:[%s3881_s5 + $0xf0] sm:$0xff]  ;;  %v4040_v47 = vld [vmem:[%s3881_s5 + $0xe8] sm:$0xff] }
  0x26   : > { %2892 = vrot.lane.b32.xlu0 %v2891_v39, %s3792_s6  ;;  %v322_v4 = vrot.slane %v3974_v52, 1  ;;  %v316_v5 = vrot.slane %v3977_v53, 1  ;;  %v2921_v10 = vpack.i.bf16 %v315_v56, %v313_v55  ;;  %v326_v11 = vrot.slane %v3984_v58, 1  ;;  %6756 = vst [vmem:[#allocation16_spill] sm:$0xff] %v4040_v47 }
  0x27   : > { %v321_v16 = vsel %vm282_vm0, %v318_v57, %v320_v60  ;;  %v328_v18 = vrot.slane %v3989_v61, 1  ;;  %v330_v21 = vrot.slane %v3992_v62, 1  ;;  %v2916_v23 = vpack.i.bf16 %v311_v3, %v309_v63  ;;  %v4053_v3 = vld [vmem:[%s3881_s5 + $0x110] sm:$0xff] }
  0x28   : > { %2912 = vrot.lane.b32.xlu1 %v2911_v54, %s3792_s6  ;;  %v323_v17 = vsel %vm282_vm0, %v320_v60, %v322_v4  ;;  %v317_v29 = vsel %vm282_vm0, %v314_v46, %v316_v5  ;;  %v319_v30 = vsel %vm282_vm0, %v316_v5, %v318_v57  ;;  %v324_v31 = vrot.slane %v4000_v15, 1  ;;  %v4037_v46 = vld [vmem:[%s3881_s5 + $0x100] sm:$0xff]  ;;  %6757 = vst [vmem:[#allocation17_spill] sm:$0xff] %v4053_v3  ;;  %v4057_v5 = vld [vmem:[%s3881_s5 + $0x118] sm:$0xff] }
  0x29   : > { %v2931_v35 = vpack.i.bf16 %v323_v17, %v321_v16  ;;  %v334_v36 = vrot.slane %v4008_v22, 1  ;;  %v329_v38 = vsel %vm282_vm0, %v326_v11, %v328_v18  ;;  %v331_v39 = vsel %vm282_vm0, %v328_v18, %v330_v21  ;;  %6755 = vst [vmem:[#allocation15_spill] sm:$0xff] %v4037_v46  ;;  %v4062_v16 = vld [vmem:[%s3881_s5 + $0x120] sm:$0xff]  ;;  %v4065_v17 = vld [vmem:[%s3881_s5 + $0x108] sm:$0xff] }
  0x2a   : > { %2907 = vrot.lane.b32.xlu0 %v2906_v59, %s3792_s6  ;;  %v336_v40 = vrot.slane %v4012_v24, 1  ;;  %v338_v41 = vrot.slane %v4015_v28, 1  ;;  %v2926_v45 = vpack.i.bf16 %v319_v30, %v317_v29  ;;  %v325_v49 = vsel %vm282_vm0, %v322_v4, %v324_v31  ;;  %6758 = vst [vmem:[#allocation18_spill] sm:$0xff] %v4065_v17 }
  0x2b   : > { %v327_v50 = vsel %vm282_vm0, %v324_v31, %v326_v11  ;;  %v332_v51 = vrot.slane %v4022_v37, 1  ;;  %v2941_v54 = vpack.i.bf16 %v331_v39, %v329_v38  ;;  %v342_v55 = vrot.slane %v4030_v42, 1 }
  0x2c   : > { %2922 = vrot.lane.b32.xlu1 %v2921_v10, %s3792_s6  ;;  %v344_v56 = vrot.slane %v4033_v44, 1  ;;  %v337_v57 = vsel %vm282_vm0, %v334_v36, %v336_v40  ;;  %v339_v59 = vsel %vm282_vm0, %v336_v40, %v338_v41  ;;  %v346_v60 = vrot.slane %v4037_v46, 1  ;;  %v4078_v40 = vld [vmem:[%s3881_s5 + $0x130] sm:$0xff] }
  0x2d   : > { %v340_v63 = vrot.slane %v4040_v47, 1  ;;  %v2936_v4 = vpack.i.bf16 %v327_v50, %v325_v49  ;;  %v333_v10 = vsel %vm282_vm0, %v330_v21, %v332_v51  ;;  %v335_v11 = vsel %vm282_vm0, %v332_v51, %v334_v36  ;;  %v4084_v49 = vld [vmem:[%s3881_s5 + $0x140] sm:$0xff]  ;;  %v4087_v50 = vld [vmem:[%s3881_s5 + $0x128] sm:$0xff] }
  0x2e   : > { %2917 = vrot.lane.b32.xlu0 %v2916_v23, %s3792_s6  ;;  %v2951_v18 = vpack.i.bf16 %v339_v59, %v337_v57  ;;  %v345_v23 = vsel %vm282_vm0, %v342_v55, %v344_v56  ;;  %v350_v29 = vrot.slane %v4053_v3, 1  ;;  %v347_v30 = vsel %vm282_vm0, %v344_v56, %v346_v60 }
  0x2f   : > { %v341_v21 = vsel %vm282_vm0, %v338_v41, %v340_v63  ;;  %v343_v31 = vsel %vm282_vm0, %v340_v63, %v342_v55  ;;  %v2946_v36 = vpack.i.bf16 %v335_v11, %v333_v10  ;;  %v354_v38 = vrot.slane %v4062_v16, 1 }
  0x30   : > { %2932 = vrot.lane.b32.xlu1 %v2931_v35, %s3792_s6  ;;  %v352_v35 = vrot.slane %v4057_v5, 1  ;;  %v348_v39 = vrot.slane %v4065_v17, 1  ;;  %v2961_v41 = vpack.i.bf16 %v347_v30, %v345_v23  ;;  %v2956_v51 = vpack.i.bf16 %v343_v31, %v341_v21 }
  0x31   : > { %v358_v55 = vrot.slane %v4078_v40, 1  ;;  %v362_v57 = vrot.slane %v4084_v49, 1  ;;  %v356_v10 = vrot.slane %v4087_v50, 1  ;;  %v6648_v11 = vrot.slane %v3896_v6, 2 }
  0x32   : > { %2927 = vrot.lane.b32.xlu0 %v2926_v45, %s3792_s6  ;;  %v4081_v45 = vld [vmem:[%s3881_s5 + $0x138] sm:$0xff]  ;;  %v355_v59 = vsel %vm282_vm0, %v352_v35, %v354_v38  ;;  %v349_v63 = vsel %vm282_vm0, %v346_v60, %v348_v39 }
  0x33   : > { %v360_v56 = vrot.slane %v4081_v45, 1  ;;  %v357_v31 = vsel %vm282_vm0, %v354_v38, %v356_v10  ;;  %v359_v60 = vsel %vm282_vm0, %v356_v10, %v358_v55  ;;  %v387_v10 = vrot.slane %v3921_v19, 2 }
  0x34   : > { %2942 = vrot.lane.b32.xlu1 %v2941_v54, %s3792_s6  ;;  %v353_v54 = vsel %vm282_vm0, %v350_v29, %v352_v35  ;;  %v371_v35 = vrot.slane %v3902_v8, 2 }
  0x35   : > { %v361_v30 = vsel %vm282_vm0, %v358_v55, %v360_v56  ;;  %v363_v21 = vsel %vm282_vm0, %v360_v56, %v362_v57  ;;  %v379_v55 = vrot.slane %v3890_v2, 2  ;;  %v373_v56 = vrot.slane %v3914_v14, 2 }
  0x36   : > { %2937 = vrot.lane.b32.xlu0 %v2936_v4, %s3792_s6  ;;  %v351_v4 = vsel %vm282_vm0, %v348_v39, %v350_v29  ;;  %v369_v29 = vrot.slane %v3899_v7, 2  ;;  %v2976_v39 = vpack.i.bf16 %v359_v60, %v357_v31  ;;  %v381_v60 = vrot.slane %v3908_v12, 2 }
  0x37   : > { %v2966_v23 = vpack.i.bf16 %v351_v4, %v349_v63  ;;  %v383_v63 = vrot.slane %v3911_v13, 2  ;;  %v385_v4 = vrot.slane %v3935_v26, 2 }
  0x38   : > { %2952 = vrot.lane.b32.xlu1 %v2951_v18, %s3792_s6  ;;  %v2971_v18 = vpack.i.bf16 %v355_v59, %v353_v54  ;;  %v4117_v38 = vsel %vm367_vm1, %v369_v29, %v371_v35  ;;  %v377_v54 = vrot.slane %v3887_v1, 2 }
  0x3a   : > { %2947 = vrot.lane.b32.xlu0 %v2946_v36, %s3792_s6  ;;  %v2981_v36 = vpack.i.bf16 %v363_v21, %v361_v30  ;;  %v366_v30 = vsel %vm282_vm0, %v362_v57, %v283_v9  ;;  %v374_v21 = vsel %vm367_vm1, %v371_v35, %v373_v56  ;;  %v391_v9 = vrot.slane %v3932_v25, 2 }
  0x3b   : > { %v393_v57 = vrot.slane %v3950_v34, 2  ;;  %v395_v35 = vrot.slane %v3938_v27, 2 }
  0x3c   : > { %2962 = vrot.lane.b32.xlu1 %v2961_v41, %s3792_s6  ;;  %v375_v41 = vrot.slane %v3884_v0, 2 }
  0x3e   : > { %2957 = vrot.lane.b32.xlu0 %v2956_v51, %s3792_s6  ;;  %v4114_v51 = vsel %vm367_vm1, %v6648_v11, %v369_v29  ;;  %v376_v31 = vsel %vm367_vm1, %v373_v56, %v375_v41  ;;  %v384_v56 = vsel %vm367_vm1, %v381_v60, %v383_v63 }
  0x3f   : > { %v2986_v59 = vpack.i.bf16 %v4117_v38, %v4114_v51 }
  0x40   : > { %2972 = vrot.lane.b32.xlu1 %v2971_v18, %s3792_s6  ;;  %v378_v18 = vsel %vm367_vm1, %v375_v41, %v377_v54  ;;  %v382_v41 = vsel %vm367_vm1, %v379_v55, %v381_v60 }
  0x42   : > { %2967 = vrot.lane.b32.xlu0 %v2966_v23, %s3792_s6  ;;  %v380_v23 = vsel %vm367_vm1, %v377_v54, %v379_v55  ;;  %v4143_v54 = vpack.i.bf16 %v376_v31, %v374_v21  ;;  %v4160_v21 = vpack.i.bf16 %v384_v56, %v382_v41  ;;  %v394_v55 = vsel %vm367_vm1, %v391_v9, %v393_v57 }
  0x43   : > { %v4138_v29 = vpack.i.bf16 %v380_v23, %v378_v18  ;;  %v399_v18 = vrot.slane %v3947_v33, 2  ;;  %v401_v23 = vrot.slane %v3977_v53, 2  ;;  %v419_v53 = vrot.slane %v4008_v22, 2 }
  0x44   : > { %2982 = vrot.lane.b32.xlu1 %v2981_v36, %s3792_s6  ;;  %v386_v36 = vsel %vm367_vm1, %v383_v63, %v385_v4  ;;  %v396_v63 = vsel %vm367_vm1, %v393_v57, %v395_v35  ;;  %v411_v57 = vrot.slane %v3984_v58, 2 }
  0x45   : > { %v402_v11 = vsel %vm367_vm1, %v399_v18, %v401_v23 }
  0x46   : > { %2977 = vrot.lane.b32.xlu0 %v2976_v39, %s3792_s6  ;;  %v388_v39 = vsel %vm367_vm1, %v385_v4, %v387_v10 }
  0x47   : > { %v4153_v4 = vpack.i.bf16 %v388_v39, %v386_v36  ;;  %v397_v36 = vrot.slane %v3944_v32, 2  ;;  %v4169_v39 = vpack.i.bf16 %v396_v63, %v394_v55  ;;  %v405_v63 = vrot.slane %v3968_v48, 2 }
  0x48   : > { %2987 = vrot.lane.b32.xlu1 %v2986_v59, %s3793_s7  ;;  %v389_v59 = vrot.slane %v3924_v20, 2 }
  0x49   : > { %v400_v55 = vsel %vm367_vm1, %v397_v36, %v399_v18 }
  0x4a   : > { %873 = vrot.lane.b32.xlu0 %v366_v30, %s3792_s6  ;;  %v403_v30 = vrot.slane %v3961_v43, 2  ;;  %v390_v31 = vsel %vm367_vm1, %v387_v10, %v389_v59  ;;  %v392_v60 = vsel %vm367_vm1, %v389_v59, %v391_v9  ;;  %v407_v10 = vrot.slane %v3974_v52, 2  ;;  %s2835_s6 = smul.u32 328, %s189_s29 }
  0x4b   : > { %v4175_v56 = vpack.i.bf16 %v392_v60, %v390_v31  ;;  %v409_v9 = vrot.slane %v4000_v15, 2  ;;  %v398_v59 = vsel %vm367_vm1, %v395_v35, %v397_v36  ;;  %v415_v31 = vrot.slane %v3992_v62, 2 }
  0x4c   : > { %2997 = vrot.lane.b32.xlu1 %v4138_v29, %s3793_s7  ;;  %v404_v41 = vsel %vm367_vm1, %v401_v23, %v403_v30  ;;  %v417_v60 = vrot.slane %v4022_v37, 2  ;;  %v4192_v15 = vpack.i.bf16 %v400_v55, %v398_v59  ;;  %v406_v36 = vsel %vm367_vm1, %v403_v30, %v405_v63  ;;  %s6469_s10 = scalar_lea.vmem [#allocation2], %s2835_s6 }
  0x4d   : > { %v4185_v23 = vpack.i.bf16 %v404_v41, %v402_v11  ;;  %v410_v35 = vsel %vm367_vm1, %v407_v10, %v409_v9  ;;  %v412_v18 = vsel %vm367_vm1, %v409_v9, %v411_v57  ;;  %v408_v11 = vsel %vm367_vm1, %v405_v63, %v407_v10 }
  0x4e   : > { %2992 = vrot.lane.b32.xlu0 %v4143_v54, %s3793_s7  ;;  %v413_v41 = vrot.slane %v3989_v61, 2  ;;  %v4201_v58 = vpack.i.bf16 %v412_v18, %v410_v35  ;;  %v418_v52 = vsel %vm367_vm1, %v415_v31, %v417_v60  ;;  %v420_v59 = vsel %vm367_vm1, %v417_v60, %v419_v53 }
  0x4f   : > { %v4207_v55 = vpack.i.bf16 %v408_v11, %v406_v36  ;;  %v423_v30 = vrot.slane %v4015_v28, 2  ;;  %v425_v10 = vrot.slane %v4040_v47, 2  ;;  %v427_v9 = vrot.slane %v4030_v42, 2 }
  0x50   : > { %3007 = vrot.lane.b32.xlu1 %v4153_v4, %s3793_s7  ;;  %v414_v63 = vsel %vm367_vm1, %v411_v57, %v413_v41  ;;  %v416_v35 = vsel %vm367_vm1, %v413_v41, %v415_v31  ;;  %v421_v18 = vrot.slane %v4012_v24, 2  ;;  %v4217_v60 = vpack.i.bf16 %v420_v59, %v418_v52 }
  0x51   : > { %v431_v36 = vrot.slane %v4037_v46, 2  ;;  %v433_v11 = vrot.slane %v4065_v17, 2  ;;  %v435_v28 = vrot.slane %v4053_v3, 2  ;;  %v4224_v47 = vpack.i.bf16 %v416_v35, %v414_v63 }
  0x52   : > { %3002 = vrot.lane.b32.xlu0 %v4160_v21, %s3793_s7  ;;  %v426_v57 = vsel %vm367_vm1, %v423_v30, %v425_v10  ;;  %v428_v31 = vsel %vm367_vm1, %v425_v10, %v427_v9  ;;  %v422_v41 = vsel %vm367_vm1, %v419_v53, %v421_v18  ;;  %v424_v52 = vsel %vm367_vm1, %v421_v18, %v423_v30 }
  0x53   : > { %v429_v59 = vrot.slane %v4033_v44, 2  ;;  %v3056_v17 = vpack.i.bf16 %v428_v31, %v426_v57  ;;  %v434_v3 = vsel %vm367_vm1, %v431_v36, %v433_v11  ;;  %v436_v46 = vsel %vm367_vm1, %v433_v11, %v435_v28 }
  0x54   : > { %3017 = vrot.lane.b32.xlu1 %v4169_v39, %s3793_s7  ;;  %v3051_v63 = vpack.i.bf16 %v424_v52, %v422_v41  ;;  %v439_v10 = vrot.slane %v4062_v16, 2  ;;  %v441_v53 = vrot.slane %v4087_v50, 2  ;;  %v443_v30 = vrot.slane %v4078_v40, 2 }
  0x55   : > { %v430_v35 = vsel %vm367_vm1, %v427_v9, %v429_v59  ;;  %v432_v18 = vsel %vm367_vm1, %v429_v59, %v431_v36  ;;  %v437_v57 = vrot.slane %v4057_v5, 2  ;;  %v3066_v31 = vpack.i.bf16 %v436_v46, %v434_v3 }
  0x56   : > { %3012 = vrot.lane.b32.xlu0 %v4175_v56, %s3793_s7  ;;  %v3061_v11 = vpack.i.bf16 %v432_v18, %v430_v35  ;;  %v442_v41 = vsel %vm367_vm1, %v439_v10, %v441_v53  ;;  %v444_v16 = vsel %vm367_vm1, %v441_v53, %v443_v30  ;;  %v447_v50 = vrot.slane %v4084_v49, 2 }
  0x57   : > { %v438_v40 = vsel %vm367_vm1, %v435_v28, %v437_v57  ;;  %v440_v9 = vsel %vm367_vm1, %v437_v57, %v439_v10  ;;  %v445_v36 = vrot.slane %v4081_v45, 2  ;;  %v538_v5 = vrot.slane %v3902_v8, 4 }
  0x58   : > { %3027 = vrot.lane.b32.xlu1 %v4185_v23, %s3793_s7  ;;  %v539_v46 = vrot.slane %v3914_v14, 4  ;;  %v6663_v3 = vrot.slane %v3899_v7, 4  ;;  %v3076_v52 = vpack.i.bf16 %v444_v16, %v442_v41  ;;  %v3071_v59 = vpack.i.bf16 %v440_v9, %v438_v40 }
  0x59   : > { %v446_v49 = vsel %vm367_vm1, %v443_v30, %v445_v36  ;;  %v448_v10 = vsel %vm367_vm1, %v445_v36, %v447_v50  ;;  %v6761_v35 = vrot.slane %v3896_v6, 2  ;;  %v6662_v30 = vrot.slane %v3992_v62, 4 }
  0x5a   : > { %3022 = vrot.lane.b32.xlu0 %v4192_v15, %s3793_s7  ;;  %v4259_v28 = vsel %vm537_vm2, %v538_v5, %v539_v46  ;;  %v4264_v45 = vsel %vm537_vm2, %v6663_v3, %v538_v5  ;;  %v3081_v57 = vpack.i.bf16 %v448_v10, %v446_v49  ;;  %v583_v41 = vrot.slane %v4022_v37, 4 }
  0x5b   : > { %6759 = vst [vmem:[#allocation19_spill] sm:$0xff] %v4259_v28  ;;  %6760 = vst [vmem:[#allocation20_spill] sm:$0xff] %v4264_v45  ;;  %v451_v18 = vsel %vm367_vm1, %v447_v50, %v6761_v35  ;;  %v585_v16 = vrot.slane %v4008_v22, 4  ;;  %v466_v36 = vrot.slane %v3935_v26, 3 }
  0x5c   : > { %3037 = vrot.lane.b32.xlu1 %v4201_v58, %s3793_s7  ;;  %v584_v40 = vsel %vm537_vm2, %v6662_v30, %v583_v41 }
  0x5d   : > { %v586_v6 = vsel %vm537_vm2, %v583_v41, %v585_v16  ;;  %v480_v41 = vrot.slane %v3947_v33, 3 }
  0x5e   : > { %3032 = vrot.lane.b32.xlu0 %v4207_v55, %s3793_s7  ;;  %v4288_v50 = vpack.i.bf16 %v586_v6, %v584_v40 }
  0x60   : > { %3047 = vrot.lane.b32.xlu1 %v4217_v60, %s3793_s7  ;;  %6762 = vst [vmem:[#allocation21_spill] sm:$0xff] %v4288_v50 }
  0x62   : > { %3042 = vrot.lane.b32.xlu0 %v4224_v47, %s3793_s7 }
  0x64   : > { %3057 = vrot.lane.b32.xlu1 %v3056_v17, %s3793_s7 }
  0x66   : > { %3052 = vrot.lane.b32.xlu0 %v3051_v63, %s3793_s7 }
  0x68   : > { %3067 = vrot.lane.b32.xlu1 %v3066_v31, %s3793_s7 }
  0x6a   : > { %3062 = vrot.lane.b32.xlu0 %v3061_v11, %s3793_s7 }
  0x6c   : > { %3077 = vrot.lane.b32.xlu1 %v3076_v52, %s3793_s7 }
  0x6e   : > { %3072 = vrot.lane.b32.xlu0 %v3071_v59, %s3793_s7 }
  0x70   : > { %997 = vrot.lane.b32.xlu1 %v451_v18, %s3793_s7 }
  0x72   : > { %3082 = vrot.lane.b32.xlu0 %v3081_v57, %s3793_s7 }
  0x74   : > { %3092 = vrot.lane.b32.xlu1 %v4138_v29, %s3794_s8  ;;  %v456_v29 = vrot.slane %v3884_v0, 3 }
  0x76   : > { %3087 = vrot.lane.b32.xlu0 %v4143_v54, %s3794_s8 }
  0x78   : > { %3102 = vrot.lane.b32.xlu1 %v4153_v4, %s3794_s8 }
  0x7a   : > { %3097 = vrot.lane.b32.xlu0 %v4160_v21, %s3794_s8 }
  0x7c   : > { %3112 = vrot.lane.b32.xlu1 %v4169_v39, %s3794_s8 }
  0x7e   : > { %3107 = vrot.lane.b32.xlu0 %v4175_v56, %s3794_s8  ;;  %v462_v56 = vrot.slane %v3908_v12, 3 }
  0x80   : > { %3122 = vrot.lane.b32.xlu1 %v4185_v23, %s3794_s8  ;;  %v464_v23 = vrot.slane %v3911_v13, 3 }
  0x82   : > { %3117 = vrot.lane.b32.xlu0 %v4192_v15, %s3794_s8  ;;  %v6661_v15 = vrot.slane %v3902_v8, 3  ;;  %v467_v6 = vsel %vm452_vm3, %v464_v23, %v466_v36  ;;  %v6784_v8 = vrot.slane %v3911_v13, 4 }
  0x84   : > { %3132 = vrot.lane.b32.xlu1 %v4201_v58, %s3794_s8  ;;  %v454_v58 = vrot.slane %v3914_v14, 3 }
  0x86   : > { %3127 = vrot.lane.b32.xlu0 %v4207_v55, %s3794_s8  ;;  %v455_v21 = vsel %vm452_vm3, %v6661_v15, %v454_v58  ;;  %v457_v39 = vsel %vm452_vm3, %v454_v58, %v456_v29 }
  0x87   : > { %v3186_v9 = vpack.i.bf16 %v457_v39, %v455_v21 }
  0x88   : > { %3142 = vrot.lane.b32.xlu1 %v4217_v60, %s3794_s8  ;;  %v468_v60 = vrot.slane %v3921_v19, 3 }
  0x8a   : > { %3137 = vrot.lane.b32.xlu0 %v4224_v47, %s3794_s8  ;;  %v3181_v47 = vpack.i.bf16 %v4114_v51, %v451_v18  ;;  %v458_v51 = vrot.slane %v3887_v1, 3  ;;  %v476_v18 = vrot.slane %v3938_v27, 3  ;;  %v469_v58 = vsel %vm452_vm3, %v466_v36, %v468_v60  ;;  %v6766_v36 = vld [vmem:[#allocation10_spill] sm:$0xff] }
  0x8b   : > { %v3201_v33 = vpack.i.bf16 %v469_v58, %v467_v6 }
  0x8c   : > { %3152 = vrot.lane.b32.xlu1 %v3056_v17, %s3794_s8  ;;  %v460_v17 = vrot.slane %v3890_v2, 3  ;;  %v459_v49 = vsel %vm452_vm3, %v456_v29, %v458_v51  ;;  %v474_v29 = vrot.slane %v3950_v34, 3 }
  0x8e   : > { %3147 = vrot.lane.b32.xlu0 %v3051_v63, %s3794_s8  ;;  %v470_v63 = vrot.slane %v3924_v20, 3  ;;  %v463_v5 = vsel %vm452_vm3, %v460_v17, %v462_v56  ;;  %v461_v20 = vsel %vm452_vm3, %v458_v51, %v460_v17  ;;  %v6764_v51 = vld [vmem:[#allocation8_spill] sm:$0xff] }
  0x90   : > { %3162 = vrot.lane.b32.xlu1 %v3066_v31, %s3794_s8  ;;  %v471_v10 = vsel %vm452_vm3, %v468_v60, %v470_v63  ;;  %v488_v60 = vrot.slane %v6764_v51, 3 }
  0x92   : > { %3157 = vrot.lane.b32.xlu0 %v3061_v11, %s3794_s8  ;;  %v4319_v54 = vpop.permute.xlu1 %2897  ;;  %v472_v11 = vrot.slane %v3932_v25, 3 }
  0x94   : > { %v4321_v4 = vpop.permute.xlu0 %2887  ;;  %3172 = vrot.lane.b32.xlu1 %v3076_v52, %s3794_s8  ;;  %v465_v52 = vsel %vm452_vm3, %v462_v56, %v464_v23  ;;  %v473_v35 = vsel %vm452_vm3, %v470_v63, %v472_v11  ;;  %v484_v56 = vrot.slane %v3961_v43, 3  ;;  %v475_v34 = vsel %vm452_vm3, %v472_v11, %v474_v29  ;;  %v6765_v63 = vld [vmem:[#allocation9_spill] sm:$0xff] }
  0x95   : > { %v3196_v40 = vpack.i.bf16 %v465_v52, %v463_v5  ;;  %v3206_v27 = vpack.i.bf16 %v473_v35, %v471_v10  ;;  %v477_v23 = vsel %vm452_vm3, %v474_v29, %v476_v18  ;;  %v492_v5 = vrot.slane %v6766_v36, 3  ;;  %v6771_v36 = vld [vmem:[#allocation16_spill] sm:$0xff] }
  0x96   : > { %3167 = vrot.lane.b32.xlu0 %v3071_v59, %s3794_s8  ;;  %v4333_v55 = vpop.permute.xlu1 %2902  ;;  %v494_v52 = vrot.slane %v3989_v61, 3  ;;  %v496_v43 = vrot.slane %v3992_v62, 3  ;;  %v3211_v6 = vpack.i.bf16 %v477_v23, %v475_v34  ;;  %v498_v29 = vrot.slane %v4022_v37, 3 }
  0x97   : > { %v508_v23 = vrot.slane %v4030_v42, 3  ;;  %v510_v37 = vrot.slane %v4033_v44, 3  ;;  %v672_v45 = vrot.slane %v6771_v36, 5 }
  0x98   : > { %v4338_v31 = vpop.permute.xlu0 %2892  ;;  %3182 = vrot.lane.b32.xlu1 %v3181_v47, %s3794_s8  ;;  %v3191_v47 = vpack.i.bf16 %v461_v20, %v459_v49  ;;  %v6767_v20 = vld [vmem:[#allocation12_spill] sm:$0xff]  ;;  %v497_v51 = vsel %vm452_vm3, %v494_v52, %v496_v43 }
  0x99   : > { %v490_v11 = vrot.slane %v6767_v20, 3 }
  0x9a   : > { %3177 = vrot.lane.b32.xlu0 %v3081_v57, %s3794_s8  ;;  %v4346_v59 = vpop.permute.xlu1 %2912  ;;  %v478_v57 = vrot.slane %v3944_v32, 3 }
  0x9b   : > { %v493_v34 = vsel %vm452_vm3, %v490_v11, %v492_v5  ;;  %v2915_v7 = vunpack.i.h.bf16 %v4346_v59 }
  0x9c   : > { %v4351_v25 = vpop.permute.xlu0 %2907  ;;  %3187 = vrot.lane.b32.xlu1 %v3186_v9, %s3795_s9  ;;  %v479_v21 = vsel %vm452_vm3, %v476_v18, %v478_v57  ;;  %v481_v39 = vsel %vm452_vm3, %v478_v57, %v480_v41  ;;  %v482_v9 = vrot.slane %v6765_v63, 3  ;;  %v502_v18 = vrot.slane %v4012_v24, 3  ;;  %v6768_v57 = vld [vmem:[#allocation14_spill] sm:$0xff] }
  0x9d   : > { %6763 = vst [vmem:[#allocation22_spill] sm:$0xff] %v4351_v25  ;;  %v3216_v35 = vpack.i.bf16 %v481_v39, %v479_v21  ;;  %v495_v39 = vsel %vm452_vm3, %v492_v5, %v494_v52  ;;  %v506_v52 = vrot.slane %v6771_v36, 3  ;;  %v4795_v25 = vld [vmem:[%s3881_s5 + $0x98] sm:$0xff] }
  0x9e   : > { %1120 = vrot.lane.b32.xlu0 %v4117_v38, %s3794_s8  ;;  %v4363_v17 = vpop.permute.xlu1 %2922  ;;  %v486_v38 = vrot.slane %v3968_v48, 3  ;;  %v500_v48 = vrot.slane %v4008_v22, 3  ;;  %v485_v21 = vsel %vm452_vm3, %v482_v9, %v484_v56  ;;  %v3236_v15 = vpack.i.bf16 %v497_v51, %v495_v39  ;;  %6805 = vst [vmem:[#allocation28_spill] sm:$0xff] %v4795_v25 }
  0x9f   : > { %v624_v39 = vrot.slane %v3887_v1, 5  ;;  %v543_v51 = vrot.slane %v3887_v1, 4 }
  0xa0   : > { %v4365_v32 = vpop.permute.xlu0 %2917  ;;  %3197 = vrot.lane.b32.xlu1 %v3196_v40, %s3795_s9  ;;  %v504_v40 = vrot.slane %v6768_v57, 3  ;;  %v487_v61 = vsel %vm452_vm3, %v484_v56, %v486_v38  ;;  %v489_v58 = vsel %vm452_vm3, %v486_v38, %v488_v60  ;;  %v6770_v56 = vld [vmem:[#allocation15_spill] sm:$0xff]  ;;  %v501_v5 = vsel %vm452_vm3, %v498_v29, %v500_v48 }
  0xa1   : > { %v3226_v20 = vpack.i.bf16 %v489_v58, %v487_v61  ;;  %v6774_v61 = vld [vmem:[#allocation18_spill] sm:$0xff] }
  0xa2   : > { %3192 = vrot.lane.b32.xlu0 %v3191_v47, %s3795_s9  ;;  %v4380_v49 = vpop.permute.xlu1 %2932  ;;  %v483_v47 = vsel %vm452_vm3, %v480_v41, %v482_v9  ;;  %v503_v41 = vsel %vm452_vm3, %v500_v48, %v502_v18  ;;  %v512_v9 = vrot.slane %v6770_v56, 3  ;;  %v4425_v48 = vsel %vm452_vm3, %v506_v52, %v508_v23 }
  0xa3   : > { %v3221_v44 = vpack.i.bf16 %v485_v21, %v483_v47  ;;  %v514_v58 = vrot.slane %v6774_v61, 3  ;;  %v6664_v21 = vrot.slane %v3884_v0, 5 }
  0xa4   : > { %v4383_v10 = vpop.permute.xlu0 %2927  ;;  %3207 = vrot.lane.b32.xlu1 %v3206_v27, %s3795_s9  ;;  %v491_v27 = vsel %vm452_vm3, %v488_v60, %v490_v11  ;;  %v499_v60 = vsel %vm452_vm3, %v496_v43, %v498_v29  ;;  %v4422_v43 = vsel %vm452_vm3, %v504_v40, %v506_v52  ;;  %v6775_v29 = vld [vmem:[#allocation17_spill] sm:$0xff] }
  0xa5   : > { %v3231_v53 = vpack.i.bf16 %v493_v34, %v491_v27  ;;  %v3241_v3 = vpack.i.bf16 %v501_v5, %v499_v60  ;;  %v6666_v47 = vrot.slane %v6775_v29, 3  ;;  %v545_v34 = vrot.slane %v3890_v2, 4 }
  0xa6   : > { %3202 = vrot.lane.b32.xlu0 %v3201_v33, %s3795_s9  ;;  %v4397_v63 = vpop.permute.xlu1 %2942  ;;  %v505_v33 = vsel %vm452_vm3, %v502_v18, %v504_v40  ;;  %v4416_v18 = vsel %vm452_vm3, %v508_v23, %v510_v37  ;;  %v626_v40 = vrot.slane %v3890_v2, 5  ;;  %v6665_v23 = vrot.slane %v3884_v0, 6 }
  0xa7   : > { %6769 = vst [vmem:[#allocation8_spill] sm:$0xff] %v4397_v63  ;;  %v3246_v30 = vpack.i.bf16 %v505_v33, %v503_v41  ;;  %v711_v41 = vrot.slane %v3890_v2, 6  ;;  %v6667_v60 = vrot.slane %v3911_v13, 5  ;;  %v3251_v5 = vpack.i.bf16 %v4425_v48, %v4422_v43  ;;  %v4773_v63 = vld [vmem:[%s3881_s5 + $0xf8] sm:$0xff] }
  0xa8   : > { %v4403_v38 = vpop.permute.xlu0 %2937  ;;  %3217 = vrot.lane.b32.xlu1 %v3216_v35, %s3795_s9  ;;  %v513_v35 = vsel %vm452_vm3, %v510_v37, %v512_v9  ;;  %v709_v37 = vrot.slane %v3887_v1, 6  ;;  %v547_v2 = vrot.slane %v3908_v12, 4  ;;  %v4468_v14 = vsel %vm622_vm4, %v624_v39, %v626_v40 }
  0xa9   : > { %v3256_v52 = vpack.i.bf16 %v513_v35, %v4416_v18  ;;  %v515_v18 = vsel %vm452_vm3, %v512_v9, %v514_v58  ;;  %v4465_v35 = vsel %vm622_vm4, %v6664_v21, %v624_v39 }
  0xaa   : > { %3212 = vrot.lane.b32.xlu0 %v3211_v6, %s3795_s9  ;;  %v4413_v11 = vpop.permute.xlu1 %2952  ;;  %v541_v6 = vrot.slane %v3884_v0, 4  ;;  %v4477_v9 = vsel %vm707_vm5, %v6665_v23, %v709_v37  ;;  %v4480_v48 = vsel %vm707_vm5, %v709_v37, %v711_v41  ;;  %v548_v23 = vsel %vm537_vm2, %v545_v34, %v547_v2 }
  0xab   : > { %6772 = vst [vmem:[#allocation9_spill] sm:$0xff] %v4413_v11  ;;  %v2934_v11 = vunpack.i.l.bf16 %v4380_v49 }
  0xac   : > { %v4418_v56 = vpop.permute.xlu0 %2947  ;;  %3227 = vrot.lane.b32.xlu1 %v3226_v20, %s3795_s9  ;;  %v628_v20 = vrot.slane %v3908_v12, 5  ;;  %v4453_v1 = vsel %vm537_vm2, %v539_v46, %v541_v6  ;;  %v544_v43 = vsel %vm537_vm2, %v541_v6, %v543_v51  ;;  %v713_v6 = vrot.slane %v3908_v12, 6 }
  0xad   : > { %6773 = vst [vmem:[#allocation10_spill] sm:$0xff] %v4418_v56  ;;  %6776 = vst [vmem:[#allocation12_spill] sm:$0xff] %v4453_v1  ;;  %v3266_v37 = vpack.i.bf16 %v4453_v1, %v4259_v28  ;;  %v6668_v12 = vrot.slane %v4008_v22, 5  ;;  %v6677_v1 = vmov 0.0  }
  0xae   : > { %3222 = vrot.lane.b32.xlu0 %v3221_v44, %s3795_s9  ;;  %v4436_v27 = vpop.permute.xlu1 %2962  ;;  %v6669_v44 = vrot.slane %v3911_v13, 4  ;;  %v4490_v39 = vsel %vm622_vm4, %v628_v20, %v6667_v60  ;;  %2739 = vmatprep.subr.bf16.mxu0 %v6677_v1 }
  0xaf   : > { %2829 = vmatprep.subr.bf16.mxu1 %v6677_v1 }
  0xb0   : > { %v4442_v33 = vpop.permute.xlu0 %2957  ;;  %3237 = vrot.lane.b32.xlu1 %v3236_v15, %s3795_s9  ;;  %v517_v15 = vsel %vm452_vm3, %v514_v58, %v6666_v47  ;;  %v4485_v58 = vsel %vm622_vm4, %v626_v40, %v628_v20  ;;  %v550_v40 = vsel %vm537_vm2, %v547_v2, %v6669_v44  ;;  %v3276_v20 = vpack.i.bf16 %v4468_v14, %v4465_v35 }
  0xb1   : > { %v3261_v21 = vpack.i.bf16 %v517_v15, %v515_v18  ;;  %v668_v47 = vrot.slane %v4012_v24, 5  ;;  %v4517_v15 = vpack.i.bf16 %v550_v40, %v548_v23  ;;  %v4520_v35 = vsel %vm707_vm5, %v711_v41, %v713_v6 }
  0xb2   : > { %3232 = vrot.lane.b32.xlu0 %v3231_v53, %s3795_s9  ;;  %v4470_v46 = vpop.permute.xlu1 %2972  ;;  %v546_v53 = vsel %vm537_vm2, %v543_v51, %v545_v34  ;;  %v715_v51 = vrot.slane %v3911_v13, 6  ;;  %v753_v2 = vrot.slane %v4012_v24, 6  ;;  %v551_v44 = vrot.slane %v3935_v26, 4 }
  0xb3   : > { %v4509_v18 = vpack.i.bf16 %v546_v53, %v544_v43  ;;  %v587_v43 = vrot.slane %v4012_v24, 4  ;;  %v4534_v23 = vsel %vm622_vm4, %v6668_v12, %v668_v47  ;;  %v3686_v24 = vld [vmem:[%s6644_s1 + $0x10] ss:$0 sps:$4 sm:$0x33]   ;;  %v6778_v12 = vrot.slane %v6768_v57, 4 }
  0xb4   : > { %v4482_v61 = vpop.permute.xlu0 %2967  ;;  %3247 = vrot.lane.b32.xlu1 %v3246_v30, %s3795_s9  ;;  %v6670_v30 = vrot.slane %v6768_v57, 5  ;;  %v4523_v14 = vsel %vm707_vm5, %v713_v6, %v715_v51  ;;  %v632_v6 = vrot.slane %v3935_v26, 5  ;;  %v6780_v53 = vrot.slane %v6768_v57, 6 }
  0xb6   : > { %3242 = vrot.lane.b32.xlu0 %v3241_v3, %s3795_s9  ;;  %v4507_v60 = vpop.permute.xlu1 %2982  ;;  %v4539_v41 = vsel %vm622_vm4, %v668_v47, %v6670_v30  ;;  %v590_v47 = vsel %vm537_vm2, %v587_v43, %v6778_v12  ;;  %v4576_v34 = vsel %vm707_vm5, %v753_v2, %v6780_v53  ;;  %v2224_v12 = vsel %vm707_vm5, %v3686_v24, 0  ;;  %v3687_v24 = vld [vmem:[%s6644_s1 + $0x8] sm:$0xff]  }
  0xb7   : > { %v6785_v53 = vrot.slane %v3921_v19, 4  ;;  %2740 = vmatpush3.bf16.msra.mxu0 %v2224_v12  ;;  %2832 = vmatpush3.bf16.msra.mxu1 %v2224_v12 }
  0xb8   : > { %v4515_v3 = vpop.permute.xlu0 %2977  ;;  %3257 = vrot.lane.b32.xlu1 %v3256_v52, %s3795_s9  ;;  %v717_v52 = vrot.slane %v3935_v26, 6  ;;  %v6779_v26 = vrot.slane %v4008_v22, 6  ;;  %v4659_v22 = vld [vmem:[%s3881_s5 + $0x60] sm:$0xff] }
  0xba   : > { %3252 = vrot.lane.b32.xlu0 %v3251_v5, %s3795_s9  ;;  %v4546_v40 = vpop.permute.xlu1 %2987  ;;  %v588_v5 = vsel %vm537_vm2, %v585_v16, %v587_v43  ;;  %v6781_v16 = vrot.slane %v3911_v13, 5  ;;  %v6783_v43 = vrot.slane %v3921_v19, 5 }
  0xbb   : > { %6777 = vst [vmem:[#allocation14_spill] sm:$0xff] %v4546_v40  ;;  %v4617_v12 = vpack.i.bf16 %v590_v47, %v588_v5  ;;  %v6793_v47 = vrot.slane %v6768_v57, 4 }
  0xbc   : > { %v4553_v30 = vpop.permute.xlu0 %873  ;;  %3267 = vrot.lane.b32.xlu1 %v3266_v37, %s3796_s12  ;;  %v4571_v37 = vsel %vm707_vm5, %v6779_v26, %v753_v2  ;;  %v4581_v0 = vsel %vm622_vm4, %v6781_v16, %v632_v6  ;;  %v4590_v26 = vsel %vm622_vm4, %v632_v6, %v6783_v43  ;;  %v552_v2 = vsel %vm537_vm2, %v6784_v8, %v551_v44 }
  0xbd   : > { %v554_v16 = vsel %vm537_vm2, %v551_v44, %v6785_v53  ;;  %v4605_v6 = vsel %vm707_vm5, %v715_v51, %v717_v52  ;;  %v6787_v8 = vrot.slane %v3921_v19, 6  ;;  %v591_v43 = vrot.slane %v6771_v36, 4 }
  0xbe   : > { %3262 = vrot.lane.b32.xlu0 %v3261_v21, %s3795_s9  ;;  %v4585_v21 = vpop.permute.xlu1 %2997  ;;  %v6788_v53 = vmov 0.0   ;;  %v4627_v44 = vpack.i.bf16 %v554_v16, %v552_v2  ;;  %v6792_v16 = vrot.slane %v4030_v42, 5 }
  0xbf   : > { %6782 = vst [vmem:[#allocation15_spill] sm:$0xff] %v4585_v21  ;;  %v4610_v13 = vsel %vm707_vm5, %v717_v52, %v6787_v8  ;;  %2741 = vmatprep.subr.bf16.mxu0 %v6788_v53  ;;  %2830 = vmatprep.subr.bf16.mxu1 %v6788_v53  ;;  %v757_v52 = vrot.slane %v6771_v36, 6  ;;  %v6790_v36 = vrot.slane %v6768_v57, 5  ;;  %v3688_v8 = vld [vmem:[%s6644_s1] sm:$0xff]   ;;  %v4652_v28 = vsel %vm537_vm2, %v6793_v47, %v591_v43  ;;  %v3692_v21 = vld [vmem:[%s3881_s5 + $0x50] sm:$0xff] }
  0xc0   : > { %v4602_v1 = vpop.permute.xlu0 %2992  ;;  %3277 = vrot.lane.b32.xlu1 %v3276_v20, %s3798_s20  ;;  %2742 = vmatpush3.bf16.msra.mxu0 %v3687_v24  ;;  %v4647_v20 = vsel %vm622_vm4, %v672_v45, %v6792_v16  ;;  %v2919_v16 = vunpack.i.l.bf16 %v4365_v32  ;;  %v6794_v47 = vrot.slane %v4030_v42, 4 }
  0xc1   : > { %6786 = vst [vmem:[#allocation16_spill] sm:$0xff] %v4602_v1  ;;  %v4637_v51 = vsel %vm622_vm4, %v6790_v36, %v672_v45  ;;  %2833 = vmatpush3.bf16.msra.mxu1 %v3687_v24  ;;  %v4655_v36 = vld [vmem:[%s3881_s5 + $0x58] sm:$0xff]  ;;  %2743 = vmatprep.subr.bf16.mxu0 %v6788_v53  ;;  %v2920_v45 = vunpack.i.h.bf16 %v4365_v32  ;;  %v6796_v32 = vpack.i.bf16 %v4480_v48, %v4477_v9  ;;  %v2930_v9 = vunpack.i.h.bf16 %v4383_v10 }
  0xc2   : > { %3272 = vrot.lane.b32.xlu0 %v4509_v18, %s3799_s22  ;;  %v4630_v5 = vpop.permute.xlu1 %3007  ;;  %2831 = vmatprep.subr.bf16.mxu1 %v6788_v53  ;;  %v4671_v62 = vsel %vm537_vm2, %v591_v43, %v6794_v47  ;;  %v2924_v47 = vunpack.i.l.bf16 %v4363_v17  ;;  %v2929_v48 = vunpack.i.l.bf16 %v4383_v10  ;;  %v1795_v10 = vsel %vm1782_vm6, %v4659_v22, %v2919_v16 }
  0xc3   : > { %6789 = vst [vmem:[#allocation18_spill] sm:$0xff] %v4630_v5  ;;  %v6795_v5 = vrot.slane %v6768_v57, 6  ;;  %2745 = vmatprep.mubr.msk.bf16.mxu0 %vm3801_vm8, %v6788_v53  ;;  %2789 = vmatprep.mubr.msk.bf16.mxu1 %vm3801_vm8, %v6788_v53  ;;  %v6798_v57 = vpack.i.bf16 %v4490_v39, %v4485_v58  ;;  %v1794_v53 = vsel %vm1782_vm6, %v4655_v36, %v2915_v7  ;;  %v4728_v39 = vld [vmem:[%s3881_s5 + $0x70] sm:$0xff]  ;;  %v721_v29 = vrot.slane %v4655_v36, 6 }
  0xc4   : > { %v4642_v2 = vpop.permute.xlu0 %3002  ;;  %3287 = vrot.lane.b32.xlu1 %v4509_v18, %s3796_s12  ;;  %v6797_v18 = vrot.slane %v4030_v42, 6  ;;  %2744 = vmatpush3.bf16.msra.mxu0 %v3688_v8  ;;  %v1797_v7 = vsel %vm1782_vm6, %v4728_v39, %v2924_v47 }
  0xc5   : > { %6791 = vst [vmem:[#allocation23_spill] sm:$0xff] %v4642_v2  ;;  %v4676_v24 = vsel %vm707_vm5, %v6795_v5, %v757_v52  ;;  %v2914_v2 = vunpack.i.l.bf16 %v4346_v59  ;;  %v2925_v5 = vunpack.i.h.bf16 %v4363_v17  ;;  %2834 = vmatpush3.bf16.msra.mxu1 %v3688_v8  ;;  %v4700_v17 = vld [vmem:[%s3881_s5 + $0x68] sm:$0xff] }
  0xc6   : > { %3282 = vrot.lane.b32.xlu0 %v6796_v32, %s3800_s28  ;;  %v4687_v43 = vsel %vm707_vm5, %v757_v52, %v6797_v18  ;;  %v3018_v1 = vpop.permute.xlu1 %3017  ;;  %v1796_v8 = vsel %vm1782_vm6, %v4700_v17, %v2920_v45 }
  0xc7   : > { %v3020_v32 = vunpack.i.h.bf16 %v3018_v1  ;;  %v3019_v52 = vunpack.i.l.bf16 %v3018_v1  ;;  %v1793_v40 = vsel %vm1782_vm6, %v3692_v21, %v2914_v2 }
  0xc8   : > { %v3013_v18 = vpop.permute.xlu0 %3012  ;;  %3297 = vrot.lane.b32.xlu1 %v6798_v57, %s3798_s20 }
  0xc9   : > { %v3015_v59 = vunpack.i.h.bf16 %v3013_v18  ;;  %v3014_v1 = vunpack.i.l.bf16 %v3013_v18  ;;  %v4715_v45 = vsel %vm1824_vm7, %v1795_v10, %v3019_v52  ;;  %v4718_v16 = vsel %vm1824_vm7, %v1796_v8, %v3020_v32  ;;  %v4723_v18 = vld [vmem:[%s3881_s5 + $0x78] sm:$0xff]  ;;  %v4739_v32 = vld [vmem:[%s3881_s5 + $0x88] sm:$0xff]  ;;  %v4744_v8 = vld [vmem:[%s3881_s5 + $0x80] sm:$0xff] }
  0xca   : > { %3292 = vrot.lane.b32.xlu0 %v4517_v15, %s3799_s22  ;;  %v1798_v58 = vsel %vm1782_vm6, %v4723_v18, %v2925_v5  ;;  %v3028_v57 = vpop.permute.xlu1 %3027  ;;  %6799 = vst [vmem:[#allocation24_spill] sm:$0xff] %v4739_v32  ;;  %v1800_v52 = vsel %vm1782_vm6, %v4739_v32, %v2930_v9  ;;  %v1799_v5 = vsel %vm1782_vm6, %v4744_v8, %v2929_v48  ;;  %v2935_v9 = vunpack.i.h.bf16 %v4380_v49 }
  0xcb   : > { %v4733_v21 = vsel %vm1824_vm7, %v1794_v53, %v3015_v59  ;;  %v4736_v2 = vsel %vm1824_vm7, %v1793_v40, %v3014_v1  ;;  %v3030_v10 = vunpack.i.h.bf16 %v3028_v57  ;;  %v3029_v56 = vunpack.i.l.bf16 %v3028_v57 }
  0xcc   : > { %v3023_v47 = vpop.permute.xlu0 %3022  ;;  %v2940_v53 = vunpack.i.h.bf16 %v4403_v38  ;;  %v2939_v59 = vunpack.i.l.bf16 %v4403_v38  ;;  %3307 = vrot.lane.b32.xlu1 %v4288_v50, %s3796_s12  ;;  %v6801_v38 = vpack.i.bf16 %v4523_v14, %v4520_v35  ;;  %v676_v35 = vrot.slane %v4773_v63, 5  ;;  %v4777_v14 = vld [vmem:[%s3881_s5 + $0x100] sm:$0xff] }
  0xcd   : > { %v3025_v40 = vunpack.i.h.bf16 %v3023_v47  ;;  %v3024_v1 = vunpack.i.l.bf16 %v3023_v47  ;;  %v4755_v48 = vsel %vm1824_vm7, %v1799_v5, %v3029_v56  ;;  %v4758_v57 = vsel %vm1824_vm7, %v1800_v52, %v3030_v10 }
  0xce   : > { %6800 = vst [vmem:[#allocation25_spill] sm:$0xff] %v4758_v57  ;;  %3302 = vrot.lane.b32.xlu0 %v6801_v38, %s3800_s28  ;;  %v3038_v49 = vpop.permute.xlu1 %3037  ;;  %v6804_v32 = vpack.i.bf16 %v4539_v41, %v4534_v23  ;;  %v4800_v57 = vld [vmem:[%s3881_s5 + $0x90] sm:$0xff] }
  0xcf   : > { %v4765_v47 = vsel %vm1824_vm7, %v1798_v58, %v3025_v40  ;;  %v4768_v50 = vsel %vm1824_vm7, %v1797_v7, %v3024_v1  ;;  %v3040_v52 = vunpack.i.h.bf16 %v3038_v49  ;;  %v3039_v5 = vunpack.i.l.bf16 %v3038_v49  ;;  %v4781_v7 = vld [vmem:[%s3881_s5 + $0xa8] sm:$0xff]  ;;  %v4786_v1 = vld [vmem:[%s3881_s5 + $0xa0] sm:$0xff] }
  0xd0   : > { %v3033_v10 = vpop.permute.xlu0 %3032  ;;  %6802 = vst [vmem:[#allocation26_spill] sm:$0xff] %v4781_v7  ;;  %v1804_v40 = vsel %vm1782_vm6, %v4781_v7, %v2940_v53  ;;  %6803 = vst [vmem:[#allocation27_spill] sm:$0xff] %v4786_v1  ;;  %v1803_v38 = vsel %vm1782_vm6, %v4786_v1, %v2939_v59  ;;  %3317 = vrot.lane.b32.xlu1 %v6804_v32, %s3798_s20  ;;  %v1802_v58 = vsel %vm1782_vm6, %v4795_v25, %v2935_v9  ;;  %v3704_v25 = vld [vmem:[%s3881_s5 + $0xe0] sm:$0xff] }
  0xd1   : > { %v3035_v49 = vunpack.i.h.bf16 %v3033_v10  ;;  %v3034_v56 = vunpack.i.l.bf16 %v3033_v10  ;;  %v1801_v53 = vsel %vm1782_vm6, %v4800_v57, %v2934_v11  ;;  %v4805_v7 = vsel %vm1824_vm7, %v1803_v38, %v3039_v5 }
  0xd2   : > { %v4808_v59 = vsel %vm1824_vm7, %v1804_v40, %v3040_v52  ;;  %3312 = vrot.lane.b32.xlu0 %v4617_v12, %s3799_s22  ;;  %v4818_v32 = vpop.permute.xlu1 %3047  ;;  %v4824_v9 = vpack.i.bf16 %v4671_v62, %v4652_v28  ;;  %v6808_v5 = vrot.slane %v4655_v36, 5  ;;  %v6809_v10 = vrot.slane %v3921_v19, 5 }
  0xd3   : > { %v4813_v23 = vsel %vm1824_vm7, %v1802_v58, %v3035_v49  ;;  %v4816_v41 = vsel %vm1824_vm7, %v1801_v53, %v3034_v56  ;;  %6806 = vst [vmem:[#allocation29_spill] sm:$0xff] %v4818_v32  ;;  %v6810_v56 = vrot.slane %v4659_v22, 5  ;;  %v6812_v49 = vrot.slane %v4655_v36, 4 }
  0xd4   : > { %v4826_v52 = vpop.permute.xlu0 %3042  ;;  %v4833_v58 = vsel %vm622_vm4, %v6809_v10, %v6808_v5  ;;  %v6811_v40 = vmov %v6808_v5  ;;  %v6813_v62 = vrot.slane %v3921_v19, 4  ;;  %v6814_v53 = vrot.slane %v4659_v22, 4  ;;  %3327 = vrot.lane.b32.xlu1 %v4517_v15, %s3796_s12 }
  0xd5   : > { %6807 = vst [vmem:[#allocation30_spill] sm:$0xff] %v4826_v52  ;;  %v4840_v38 = vsel %vm622_vm4, %v6811_v40, %v6810_v56  ;;  %v6815_v11 = vmov %v6812_v49  ;;  %v2960_v10 = vunpack.i.h.bf16 %v4442_v33  ;;  %v2959_v52 = vunpack.i.l.bf16 %v4442_v33 }
  0xd6   : > { %v556_v28 = vsel %vm537_vm2, %v6813_v62, %v6812_v49  ;;  %v558_v5 = vsel %vm537_vm2, %v6815_v11, %v6814_v53  ;;  %v6816_v40 = vpack.i.bf16 %v4576_v34, %v4571_v37  ;;  %v6817_v36 = vrot.slane %v3921_v19, 6  ;;  %v3058_v19 = vpop.permute.xlu1 %3057 }
  0xd7   : > { %v6818_v49 = vrot.slane %v4659_v22, 6  ;;  %v6819_v15 = vrot.slane %v4030_v42, 5  ;;  %v6820_v34 = vrot.slane %v4777_v14, 5  ;;  %v3060_v56 = vunpack.i.h.bf16 %v3058_v19 }
  0xd8   : > { %3322 = vrot.lane.b32.xlu0 %v6816_v40, %s3800_s28  ;;  %v4865_v11 = vsel %vm707_vm5, %v6817_v36, %v721_v29  ;;  %v4884_v40 = vpack.i.bf16 %v558_v5, %v556_v28  ;;  %v6707_v36 = vrot.slane %v4773_v63, 4  ;;  %v3059_v32 = vunpack.i.l.bf16 %v3058_v19  ;;  %v4890_v1 = vpop.permute.xlu0 %3052 }
  0xd9   : > { %v4870_v33 = vsel %vm707_vm5, %v721_v29, %v6818_v49  ;;  %v4875_v62 = vsel %vm622_vm4, %v6819_v15, %v676_v35  ;;  %v4880_v37 = vsel %vm622_vm4, %v676_v35, %v6820_v34  ;;  %v2970_v49 = vunpack.i.h.bf16 %v4482_v61  ;;  %6821 = vst [vmem:[#allocation31_spill] sm:$0xff] %v4890_v1  ;;  %v3703_v35 = vld [vmem:[%s3881_s5 + $0xe8] sm:$0xff] }
  0xda   : > { %v2969_v15 = vunpack.i.l.bf16 %v4482_v61  ;;  %v1812_v34 = vsel %vm1782_vm6, %v3703_v35, %v2960_v10  ;;  %v1811_v28 = vsel %vm1782_vm6, %v3704_v25, %v2959_v52  ;;  %v6822_v5 = vpack.i.bf16 %v4590_v26, %v4581_v0  ;;  %v3068_v52 = vpop.permute.xlu1 %3067 }
  0xdb   : > { %v2965_v19 = vunpack.i.h.bf16 %v4436_v27  ;;  %v2964_v29 = vunpack.i.l.bf16 %v4436_v27  ;;  %v4907_v10 = vsel %vm1824_vm7, %v1811_v28, %v3059_v32  ;;  %v4910_v25 = vsel %vm1824_vm7, %v1812_v34, %v3060_v56  ;;  %v4925_v56 = vld [vmem:[%s3881_s5 + $0x108] sm:$0xff]  ;;  %v3706_v32 = vld [vmem:[%s3881_s5 + $0xf0] sm:$0xff] }
  0xdc   : > { %3337 = vrot.lane.b32.xlu1 %v6822_v5, %s3798_s20  ;;  %6823 = vst [vmem:[#allocation32_spill] sm:$0xff] %v4910_v25  ;;  %3332 = vrot.lane.b32.xlu0 %v4627_v44, %s3799_s22  ;;  %v2975_v0 = vunpack.i.h.bf16 %v4470_v46  ;;  %v2974_v26 = vunpack.i.l.bf16 %v4470_v46  ;;  %v6824_v35 = vrot.slane %v4030_v42, 4  ;;  %v1816_v34 = vsel %vm1782_vm6, %v4925_v56, %v2970_v49  ;;  %v3063_v61 = vpop.permute.xlu0 %3062 }
  0xdd   : > { %v1815_v28 = vsel %vm1782_vm6, %v4777_v14, %v2969_v15  ;;  %v3070_v46 = vunpack.i.h.bf16 %v3068_v52  ;;  %v3069_v5 = vunpack.i.l.bf16 %v3068_v52  ;;  %v2980_v53 = vunpack.i.h.bf16 %v4515_v3 }
  0xde   : > { %v4921_v27 = vsel %vm537_vm2, %v6824_v35, %v6707_v36  ;;  %v2979_v1 = vunpack.i.l.bf16 %v4515_v3  ;;  %v3065_v35 = vunpack.i.h.bf16 %v3063_v61  ;;  %v3064_v36 = vunpack.i.l.bf16 %v3063_v61 }
  0xdf   : > { %v1814_v49 = vsel %vm1782_vm6, %v4773_v63, %v2965_v19  ;;  %v1813_v15 = vsel %vm1782_vm6, %v3706_v32, %v2964_v29  ;;  %v4940_v52 = vsel %vm1824_vm7, %v1815_v28, %v3069_v5  ;;  %v4943_v25 = vsel %vm1824_vm7, %v1816_v34, %v3070_v46  ;;  %v3078_v29 = vpop.permute.xlu1 %3077  ;;  %v4958_v28 = vld [vmem:[%s3881_s5 + $0x118] sm:$0xff]  ;;  %v4963_v46 = vld [vmem:[%s3881_s5 + $0x110] sm:$0xff] }
  0xe0   : > { %3347 = vrot.lane.b32.xlu1 %v4617_v12, %s3796_s12  ;;  %6825 = vst [vmem:[#allocation33_spill] sm:$0xff] %v4940_v52  ;;  %6826 = vst [vmem:[#allocation34_spill] sm:$0xff] %v4943_v25  ;;  %v6827_v3 = vpack.i.bf16 %v4610_v13, %v4605_v6  ;;  %v4950_v12 = vsel %vm1824_vm7, %v1814_v49, %v3065_v35  ;;  %v4953_v61 = vsel %vm1824_vm7, %v1813_v15, %v3064_v36  ;;  %v3073_v36 = vpop.permute.xlu0 %3072  ;;  %v4968_v35 = vld [vmem:[%s3881_s5 + $0x128] sm:$0xff]  ;;  %v4973_v15 = vld [vmem:[%s3881_s5 + $0x120] sm:$0xff] }
  0xe1   : > { %v640_v32 = vrot.slane %v4700_v17, 5  ;;  %v1818_v34 = vsel %vm1782_vm6, %v4958_v28, %v2975_v0  ;;  %v1817_v6 = vsel %vm1782_vm6, %v4963_v46, %v2974_v26  ;;  %v3080_v13 = vunpack.i.h.bf16 %v3078_v29 }
  0xe2   : > { %3342 = vrot.lane.b32.xlu0 %v6827_v3, %s3800_s28  ;;  %v3079_v5 = vunpack.i.l.bf16 %v3078_v29  ;;  %v1820_v49 = vsel %vm1782_vm6, %v4968_v35, %v2980_v53  ;;  %v1819_v3 = vsel %vm1782_vm6, %v4973_v15, %v2979_v1  ;;  %v3075_v0 = vunpack.i.h.bf16 %v3073_v36  ;;  %v4992_v1 = vld [vmem:[%s3881_s5 + $0x140] sm:$0xff] }
  0xe3   : > { %v3074_v19 = vunpack.i.l.bf16 %v3073_v36  ;;  %v6828_v26 = vpack.i.bf16 %v4647_v20, %v4637_v51  ;;  %v2985_v29 = vunpack.i.h.bf16 %v4507_v60  ;;  %v2984_v25 = vunpack.i.l.bf16 %v4507_v60  ;;  %6829 = vst [vmem:[#allocation35_spill] sm:$0xff] %v4992_v1 }
  0xe4   : > { %v4984_v52 = vsel %vm1824_vm7, %v1819_v3, %v3079_v5  ;;  %v4987_v53 = vsel %vm1824_vm7, %v1820_v49, %v3080_v13  ;;  %v1823_v51 = vsel %vm1782_vm6, %v4992_v1, %v4553_v30  ;;  %v4998_v20 = vsel %vm1824_vm7, %v1818_v34, %v3075_v0  ;;  %v998_v5 = vpop.permute.xlu1 %997  ;;  %v3083_v49 = vpop.permute.xlu0 %3082 }
  0xe5   : > { %3357 = vrot.lane.b32.xlu1 %v6828_v26, %s3798_s20  ;;  %v5001_v60 = vsel %vm1824_vm7, %v1817_v6, %v3074_v19  ;;  %v642_v13 = vrot.slane %v4728_v39, 5  ;;  %v5005_v36 = vsel %vm1824_vm7, %v1823_v51, %v998_v5  ;;  %v559_v3 = vrot.slane %v4700_v17, 4  ;;  %v5019_v5 = vld [vmem:[%s3881_s5 + $0x138] sm:$0xff] }
  0xe6   : > { %3352 = vrot.lane.b32.xlu0 %v4824_v9, %s3799_s22  ;;  %6830 = vst [vmem:[#allocation36_spill] sm:$0xff] %v5005_v36  ;;  %v725_v30 = vrot.slane %v4700_v17, 6  ;;  %v3085_v1 = vunpack.i.h.bf16 %v3083_v49  ;;  %v3084_v34 = vunpack.i.l.bf16 %v3083_v49  ;;  %v6831_v19 = vrot.slane %v4777_v14, 4  ;;  %6833 = vst [vmem:[#allocation37_spill] sm:$0xff] %v5019_v5  ;;  %v5024_v36 = vld [vmem:[%s3881_s5 + $0x130] sm:$0xff] }
  0xe7   : > { %v6832_v6 = vrot.slane %v4773_v63, 4  ;;  %v1822_v26 = vsel %vm1782_vm6, %v5019_v5, %v2985_v29  ;;  %v1821_v17 = vsel %vm1782_vm6, %v5024_v36, %v2984_v25  ;;  %v6835_v49 = vrot.slane %v4773_v63, 6 }
  0xe8   : > { %v6837_v51 = vrot.slane %v4777_v14, 6  ;;  %v5047_v25 = vsel %vm1824_vm7, %v1822_v26, %v3085_v1  ;;  %v5062_v63 = vpop.permute.xlu0 %3087  ;;  %v6843_v26 = vrot.slane %v4728_v39, 4 }
  0xe9   : > { %3367 = vrot.lane.b32.xlu1 %v4627_v44, %s3796_s12  ;;  %v598_v0 = vsel %vm537_vm2, %v6832_v6, %v6831_v19  ;;  %v6834_v44 = vpack.i.bf16 %v4687_v43, %v4676_v24  ;;  %v6836_v19 = vrot.slane %v4030_v42, 6  ;;  %v6838_v29 = vmov %v6835_v49  ;;  %v5052_v43 = vpop.permute.xlu1 %3092  ;;  %6841 = vst [vmem:[#allocation39_spill] sm:$0xff] %v5062_v63 }
  0xea   : > { %v5044_v5 = vsel %vm707_vm5, %v6838_v29, %v6837_v51  ;;  %v5050_v24 = vsel %vm1824_vm7, %v1821_v17, %v3084_v34  ;;  %6839 = vst [vmem:[#allocation38_spill] sm:$0xff] %v5052_v43  ;;  %v6840_v42 = vrot.slane %v4659_v22, 5  ;;  %v6842_v51 = vrot.slane %v4659_v22, 4 }
  0xeb   : > { %3362 = vrot.lane.b32.xlu0 %v6834_v44, %s3800_s28  ;;  %v5037_v6 = vsel %vm707_vm5, %v6836_v19, %v6835_v49  ;;  %v5060_v49 = vsel %vm622_vm4, %v640_v32, %v642_v13  ;;  %v562_v34 = vsel %vm537_vm2, %v559_v3, %v6843_v26  ;;  %v6844_v17 = vrot.slane %v4659_v22, 6 }
  0xec   : > { %v5057_v44 = vsel %vm622_vm4, %v6840_v42, %v640_v32  ;;  %v560_v1 = vsel %vm537_vm2, %v6842_v51, %v559_v3  ;;  %v680_v29 = vrot.slane %v4925_v56, 5  ;;  %v6845_v32 = vpack.i.bf16 %v4840_v38, %v4833_v58  ;;  %v5102_v3 = vpop.permute.xlu0 %3097 }
  0xed   : > { %v5073_v19 = vsel %vm707_vm5, %v6844_v17, %v725_v30  ;;  %v6846_v42 = vrot.slane %v4728_v39, 6  ;;  %v599_v22 = vrot.slane %v4925_v56, 4  ;;  %v5091_v17 = vpack.i.bf16 %v598_v0, %v4921_v27  ;;  %6848 = vst [vmem:[#allocation41_spill] sm:$0xff] %v5102_v3 }
  0xee   : > { %3377 = vrot.lane.b32.xlu1 %v6845_v32, %s3798_s20  ;;  %v765_v58 = vrot.slane %v4925_v56, 6  ;;  %v5095_v32 = vpop.permute.xlu1 %3102  ;;  %v644_v26 = vrot.slane %v4723_v18, 5  ;;  %v5104_v43 = vpack.i.bf16 %v562_v34, %v560_v1  ;;  %v6849_v0 = vrot.slane %v4777_v14, 5 }
  0xef   : > { %v5083_v51 = vsel %vm707_vm5, %v725_v30, %v6846_v42  ;;  %3372 = vrot.lane.b32.xlu0 %v4884_v40, %s3799_s22  ;;  %6847 = vst [vmem:[#allocation40_spill] sm:$0xff] %v5095_v32  ;;  %v3401_v30 = vpack.i.bf16 %v5044_v5, %v5037_v6  ;;  %v6850_v6 = vrot.slane %v4963_v46, 5  ;;  %v6851_v1 = vrot.slane %v4777_v14, 4 }
  0xf0   : > { %v5114_v5 = vsel %vm622_vm4, %v6849_v0, %v680_v29  ;;  %v6852_v27 = vrot.slane %v4963_v46, 4  ;;  %v6854_v0 = vrot.slane %v4777_v14, 6  ;;  %v5147_v14 = vsel %vm622_vm4, %v642_v13, %v644_v26 }
  0xf1   : > { %v5119_v42 = vsel %vm622_vm4, %v680_v29, %v6850_v6  ;;  %v600_v34 = vsel %vm537_vm2, %v6851_v1, %v599_v22  ;;  %v6855_v29 = vrot.slane %v4963_v46, 6  ;;  %v563_v1 = vrot.slane %v4723_v18, 4 }
  0xf2   : > { %3387 = vrot.lane.b32.xlu1 %v4824_v9, %s3796_s12  ;;  %v602_v56 = vsel %vm537_vm2, %v599_v22, %v6852_v27  ;;  %v6853_v9 = vpack.i.bf16 %v4870_v33, %v4865_v11  ;;  %v5134_v38 = vsel %vm707_vm5, %v6854_v0, %v765_v58  ;;  %v2900_v22 = vunpack.i.h.bf16 %v4319_v54  ;;  %v3113_v33 = vpop.permute.xlu1 %3112 }
  0xf3   : > { %v5139_v6 = vsel %vm707_vm5, %v765_v58, %v6855_v29  ;;  %v2899_v27 = vunpack.i.l.bf16 %v4319_v54  ;;  %v2890_v11 = vunpack.i.h.bf16 %v4321_v4  ;;  %v3115_v58 = vunpack.i.h.bf16 %v3113_v33  ;;  %v5150_v29 = vpop.permute.xlu0 %3107 }
  0xf4   : > { %3382 = vrot.lane.b32.xlu0 %v6853_v9, %s3800_s28  ;;  %v2889_v9 = vunpack.i.l.bf16 %v4321_v4  ;;  %v3114_v0 = vunpack.i.l.bf16 %v3113_v33  ;;  %6856 = vst [vmem:[#allocation42_spill] sm:$0xff] %v5150_v29  ;;  %v6857_v32 = vrot.slane %v4744_v8, 5  ;;  %v6858_v54 = vpack.i.bf16 %v4880_v37, %v4875_v62 }
  0xf5   : > { %v5163_v4 = vpack.i.bf16 %v602_v56, %v600_v34  ;;  %v729_v33 = vrot.slane %v4723_v18, 6  ;;  %v6861_v62 = vrot.slane %v4728_v39, 4  ;;  %v3714_v18 = vld [vmem:[%s3881_s5 + $0x28] sm:$0xff] }
  0xf6   : > { %v5155_v3 = vsel %vm622_vm4, %v644_v26, %v6857_v32  ;;  %3397 = vrot.lane.b32.xlu1 %v6858_v54, %s3798_s20  ;;  %v5168_v29 = vsel %vm1866_vm9, %v4736_v2, %v3114_v0  ;;  %v5172_v26 = vsel %vm1866_vm9, %v4733_v21, %v3115_v58  ;;  %v6862_v32 = vrot.slane %v4744_v8, 4  ;;  %v3715_v2 = vld [vmem:[%s3881_s5 + $0x20] sm:$0xff]  ;;  %v3123_v21 = vpop.permute.xlu1 %3122 }
  0xf7   : > { %6859 = vst [vmem:[#allocation43_spill] sm:$0xff] %v5168_v29  ;;  %6860 = vst [vmem:[#allocation44_spill] sm:$0xff] %v5172_v26  ;;  %v564_v37 = vsel %vm537_vm2, %v6861_v62, %v563_v1  ;;  %v5184_v34 = vsel %vm1782_vm6, %v3714_v18, %v2900_v22  ;;  %v5188_v0 = vsel %vm1782_vm6, %v3715_v2, %v2899_v27  ;;  %v5195_v62 = vld [vmem:[%s3881_s5 + $0x8] sm:$0xff]  ;;  %v3125_v27 = vunpack.i.h.bf16 %v3123_v21  ;;  %v3118_v2 = vpop.permute.xlu0 %3117 }
  0xf8   : > { %3392 = vrot.lane.b32.xlu0 %v5091_v17, %s3799_s22  ;;  %v566_v56 = vsel %vm537_vm2, %v563_v1, %v6862_v32  ;;  %6863 = vst [vmem:[#allocation45_spill] sm:$0xff] %v5195_v62  ;;  %v5199_v1 = vsel %vm1782_vm6, %v5195_v62, %v2890_v11  ;;  %v5202_v32 = vld [vmem:[%s3881_s5] sm:$0xff]  ;;  %v3124_v18 = vunpack.i.l.bf16 %v3123_v21  ;;  %v3120_v13 = vunpack.i.h.bf16 %v3118_v2 }
  0xf9   : > { %v5206_v22 = vsel %vm1782_vm6, %v5202_v32, %v2889_v9  ;;  %v3119_v58 = vunpack.i.l.bf16 %v3118_v2  ;;  %v5210_v54 = vpack.i.bf16 %v566_v56, %v564_v37  ;;  %v6864_v26 = vrot.slane %v4728_v39, 6 }
  0xfa   : > { %3407 = vrot.lane.b32.xlu1 %v4884_v40, %s3796_s12  ;;  %v2905_v29 = vunpack.i.h.bf16 %v4333_v55  ;;  %v2904_v9 = vunpack.i.l.bf16 %v4333_v55  ;;  %v5221_v21 = vsel %vm1866_vm9, %v4768_v50, %v3124_v18  ;;  %v5225_v2 = vsel %vm1866_vm9, %v4765_v47, %v3125_v27 }
  0xfb   : > { %v5215_v11 = vsel %vm707_vm5, %v6864_v26, %v729_v33  ;;  %v5230_v39 = vsel %vm1866_vm9, %v4715_v45, %v3119_v58  ;;  %v5234_v40 = vsel %vm1866_vm9, %v4718_v16, %v3120_v13  ;;  %v3133_v26 = vpop.permute.xlu1 %3132  ;;  %v684_v50 = vrot.slane %v4958_v28, 5  ;;  %v3128_v47 = vpop.permute.xlu0 %3127 }
  0xfc   : > { %3402 = vrot.lane.b32.xlu0 %v3401_v30, %s3800_s28  ;;  %6865 = vst [vmem:[#allocation46_spill] sm:$0xff] %v5230_v39  ;;  %6866 = vst [vmem:[#allocation47_spill] sm:$0xff] %v5234_v40  ;;  %v3135_v37 = vunpack.i.h.bf16 %v3133_v26  ;;  %v3134_v56 = vunpack.i.l.bf16 %v3133_v26  ;;  %v603_v30 = vrot.slane %v4958_v28, 4  ;;  %v2895_v45 = vunpack.i.h.bf16 %v4338_v31  ;;  %v3718_v40 = vld [vmem:[%s3881_s5 + $0x38] sm:$0xff] }
  0xfd   : > { %v3130_v58 = vunpack.i.h.bf16 %v3128_v47  ;;  %v3129_v18 = vunpack.i.l.bf16 %v3128_v47  ;;  %v6867_v16 = vpack.i.bf16 %v5060_v49, %v5057_v44  ;;  %v769_v47 = vrot.slane %v4958_v28, 6 }
  0xfe   : > { %v5248_v55 = vsel %vm1866_vm9, %v4816_v41, %v3134_v56  ;;  %v5252_v26 = vsel %vm1866_vm9, %v4813_v23, %v3135_v37  ;;  %v5260_v44 = vsel %vm1782_vm6, %v3718_v40, %v2905_v29  ;;  %v2894_v49 = vunpack.i.l.bf16 %v4338_v31  ;;  %v6869_v56 = vld [vmem:[#allocation25_spill] sm:$0xff] }
  0xff   : > { %3417 = vrot.lane.b32.xlu1 %v6867_v16, %s3798_s20  ;;  %6868 = vst [vmem:[#allocation48_spill] sm:$0xff] %v5260_v44  ;;  %v5265_v41 = vsel %vm1866_vm9, %v4755_v48, %v3129_v18  ;;  %v5269_v23 = vsel %vm1866_vm9, %v6869_v56, %v3130_v58  ;;  %v5271_v37 = vpop.permute.xlu1 %3142  ;;  %v3138_v16 = vpop.permute.xlu0 %3137  ;;  %v6871_v13 = vrot.slane %v4744_v8, 6  ;;  %v6872_v29 = vrot.slane %v4963_v46, 5  ;;  %v6875_v56 = vld [vmem:[#allocation22_spill] sm:$0xff]  ;;  %v3722_v44 = vld [vmem:[%s3881_s5 + $0x48] sm:$0xff] }
 0x100   : > { %3412 = vrot.lane.b32.xlu0 %v5104_v43, %s3799_s22  ;;  %6870 = vst [vmem:[#allocation25_spill] sm:$0xff] %v5271_v37  ;;  %v6873_v48 = vrot.slane %v4973_v15, 5  ;;  %v6874_v58 = vrot.slane %v4963_v46, 4  ;;  %v2910_v39 = vunpack.i.h.bf16 %v6875_v56  ;;  %v3140_v37 = vunpack.i.h.bf16 %v3138_v16 }
 0x101   : > { %v5276_v27 = vsel %vm707_vm5, %v729_v33, %v6871_v13  ;;  %v5281_v31 = vsel %vm622_vm4, %v6872_v29, %v684_v50  ;;  %v3139_v33 = vunpack.i.l.bf16 %v3138_v16  ;;  %v6876_v13 = vrot.slane %v4973_v15, 4 }
 0x102   : > { %v5286_v40 = vsel %vm622_vm4, %v684_v50, %v6873_v48  ;;  %v604_v18 = vsel %vm537_vm2, %v6874_v58, %v603_v30  ;;  %v6877_v50 = vpack.i.bf16 %v5083_v51, %v5073_v19  ;;  %v6878_v48 = vrot.slane %v4963_v46, 6 }
 0x103   : > { %3427 = vrot.lane.b32.xlu1 %v5091_v17, %s3796_s12  ;;  %v606_v29 = vsel %vm537_vm2, %v603_v30, %v6876_v13  ;;  %v6879_v16 = vrot.slane %v4973_v15, 6  ;;  %v6880_v17 = vld [vmem:[#allocation24_spill] sm:$0xff]  ;;  %v5315_v30 = vsel %vm1866_vm9, %v4805_v7, %v3139_v33  ;;  %v5319_v19 = vsel %vm1866_vm9, %v4808_v59, %v3140_v37  ;;  %v5321_v46 = vpop.permute.xlu1 %3152  ;;  %v3719_v13 = vld [vmem:[%s3881_s5 + $0x30] sm:$0xff]  ;;  %v5343_v37 = vpop.permute.xlu0 %3147 }
 0x104   : > { %3422 = vrot.lane.b32.xlu0 %v6877_v50, %s3800_s28  ;;  %v5304_v58 = vsel %vm707_vm5, %v6878_v48, %v769_v47  ;;  %v648_v62 = vrot.slane %v6880_v17, 5  ;;  %6881 = vst [vmem:[#allocation24_spill] sm:$0xff] %v5321_v46  ;;  %v567_v51 = vrot.slane %v6880_v17, 4  ;;  %v5327_v50 = vsel %vm1782_vm6, %v3719_v13, %v2904_v9  ;;  %v5330_v48 = vld [vmem:[%s3881_s5 + $0x18] sm:$0xff]  ;;  %v5337_v33 = vld [vmem:[%s3881_s5 + $0x10] sm:$0xff]  ;;  %6884 = vst [vmem:[#allocation51_spill] sm:$0xff] %v5343_v37 }
 0x105   : > { %v5309_v63 = vsel %vm707_vm5, %v769_v47, %v6879_v16  ;;  %6882 = vst [vmem:[#allocation49_spill] sm:$0xff] %v5330_v48  ;;  %v5334_v7 = vsel %vm1782_vm6, %v5330_v48, %v2895_v45  ;;  %6883 = vst [vmem:[#allocation50_spill] sm:$0xff] %v5337_v33  ;;  %v5341_v59 = vsel %vm1782_vm6, %v5337_v33, %v2894_v49  ;;  %v733_v47 = vrot.slane %v6880_v17, 6 }
 0x106   : > { %v6885_v13 = vpack.i.bf16 %v5119_v42, %v5114_v5  ;;  %v5357_v49 = vsel %vm1782_vm6, %v3722_v44, %v2910_v39  ;;  %v5361_v16 = vpack.i.bf16 %v606_v29, %v604_v18  ;;  %v6888_v17 = vrot.slane %v4800_v57, 5  ;;  %v6891_v42 = vld [vmem:[#allocation8_spill] sm:$0xff] }
 0x107   : > { %6886 = vst [vmem:[#allocation52_spill] sm:$0xff] %v5357_v49  ;;  %v3163_v5 = vpop.permute.xlu1 %3162  ;;  %v6889_v44 = vrot.slane %v4744_v8, 4  ;;  %v6890_v29 = vrot.slane %v4800_v57, 4  ;;  %v2945_v49 = vunpack.i.h.bf16 %v6891_v42  ;;  %v2944_v56 = vunpack.i.l.bf16 %v6891_v42  ;;  %v3158_v37 = vpop.permute.xlu0 %3157 }
 0x108   : > { %3437 = vrot.lane.b32.xlu1 %v6885_v13, %s3798_s20  ;;  %3432 = vrot.lane.b32.xlu0 %v5163_v4, %s3799_s22  ;;  %v6887_v13 = vrot.slane %v4744_v8, 5  ;;  %v5374_v39 = vsel %vm622_vm4, %v648_v62, %v6888_v17  ;;  %v3165_v46 = vunpack.i.h.bf16 %v3163_v5  ;;  %v3160_v48 = vunpack.i.h.bf16 %v3158_v37 }
 0x109   : > { %v568_v18 = vsel %vm537_vm2, %v6889_v44, %v567_v51  ;;  %v570_v9 = vsel %vm537_vm2, %v567_v51, %v6890_v29  ;;  %v3159_v33 = vunpack.i.l.bf16 %v3158_v37  ;;  %v518_v51 = vrot.slane %v4958_v28, 3  ;;  %v6897_v44 = vld [vmem:[#allocation32_spill] sm:$0xff]  ;;  %v5423_v29 = vld [vmem:[%s3881_s5 + $0xb8] sm:$0xff] }
 0x10a   : > { %v5369_v45 = vsel %vm622_vm4, %v6887_v13, %v648_v62  ;;  %v3164_v13 = vunpack.i.l.bf16 %v3163_v5  ;;  %v6892_v62 = vrot.slane %v4744_v8, 6  ;;  %v5398_v5 = vsel %vm1866_vm9, %v4950_v12, %v3165_v46 }
 0x10b   : > { %6894 = vst [vmem:[#allocation53_spill] sm:$0xff] %v5398_v5  ;;  %v6895_v37 = vpack.i.bf16 %v5139_v6, %v5134_v38  ;;  %v6896_v8 = vrot.slane %v4800_v57, 6  ;;  %v6727_v28 = vrot.slane %v4973_v15, 3  ;;  %v5416_v12 = vsel %vm1866_vm9, %v6897_v44, %v3160_v48  ;;  %v3173_v46 = vpop.permute.xlu1 %3172 }
 0x10c   : > { %3447 = vrot.lane.b32.xlu1 %v5104_v43, %s3796_s12  ;;  %v5389_v17 = vsel %vm707_vm5, %v6892_v62, %v733_v47  ;;  %v5394_v42 = vsel %vm1866_vm9, %v4953_v61, %v3164_v13  ;;  %v5412_v61 = vsel %vm1866_vm9, %v4907_v10, %v3159_v33  ;;  %v5420_v6 = vpack.i.bf16 %v570_v9, %v568_v18  ;;  %v5430_v13 = vld [vmem:[%s3881_s5 + $0xb0] sm:$0xff]  ;;  %v3168_v62 = vpop.permute.xlu0 %3167 }
 0x10d   : > { %6893 = vst [vmem:[#allocation8_spill] sm:$0xff] %v5394_v42  ;;  %3442 = vrot.lane.b32.xlu0 %v6895_v37, %s3800_s28  ;;  %v5407_v43 = vsel %vm707_vm5, %v733_v47, %v6896_v8  ;;  %v5427_v47 = vsel %vm1782_vm6, %v5423_v29, %v2945_v49  ;;  %v5434_v10 = vsel %vm1782_vm6, %v5430_v13, %v2944_v56  ;;  %v3175_v48 = vunpack.i.h.bf16 %v3173_v46  ;;  %v6899_v18 = vld [vmem:[#allocation17_spill] sm:$0xff] }
 0x10e   : > { %v3174_v33 = vunpack.i.l.bf16 %v3173_v46  ;;  %v3170_v37 = vunpack.i.h.bf16 %v3168_v62  ;;  %v3169_v8 = vunpack.i.l.bf16 %v3168_v62  ;;  %v6898_v9 = vpack.i.bf16 %v5155_v3, %v5147_v14  ;;  %v6903_v62 = vld [vmem:[#allocation9_spill] sm:$0xff] }
 0x10f   : > { %v6900_v44 = vrot.slane %v6899_v18, 3  ;;  %v5453_v46 = vsel %vm1866_vm9, %v4998_v20, %v3175_v48  ;;  %v5460_v3 = vsel %vm452_vm3, %v518_v51, %v6727_v28  ;;  %v607_v14 = vrot.slane %v4968_v35, 4  ;;  %v6906_v20 = vld [vmem:[#allocation34_spill] sm:$0xff] }
 0x110   : > { %3457 = vrot.lane.b32.xlu1 %v6898_v9, %s3798_s20  ;;  %v5449_v56 = vsel %vm1866_vm9, %v5001_v60, %v3174_v33  ;;  %6902 = vst [vmem:[#allocation17_spill] sm:$0xff] %v5453_v46  ;;  %v2955_v9 = vunpack.i.h.bf16 %v6903_v62  ;;  %v6904_v60 = vld [vmem:[#allocation33_spill] sm:$0xff]  ;;  %v5471_v48 = vsel %vm1866_vm9, %v6906_v20, %v3170_v37  ;;  %v773_v28 = vrot.slane %v4968_v35, 6  ;;  %v6935_v62 = vld [vmem:[#allocation14_spill] sm:$0xff] }
 0x111   : > { %v5445_v38 = vsel %vm452_vm3, %v6900_v44, %v518_v51  ;;  %6901 = vst [vmem:[#allocation32_spill] sm:$0xff] %v5449_v56  ;;  %3452 = vrot.lane.b32.xlu0 %v5210_v54, %s3799_s22  ;;  %v5467_v33 = vsel %vm1866_vm9, %v6904_v60, %v3169_v8  ;;  %6907 = vst [vmem:[#allocation34_spill] sm:$0xff] %v5471_v48  ;;  %v3183_v44 = vpop.permute.xlu1 %3182  ;;  %v3178_v56 = vpop.permute.xlu0 %3177  ;;  %v688_v60 = vrot.slane %v4968_v35, 5 }
 0x112   : > { %6905 = vst [vmem:[#allocation33_spill] sm:$0xff] %v5467_v33  ;;  %v3185_v49 = vunpack.i.h.bf16 %v3183_v44  ;;  %v3184_v46 = vunpack.i.l.bf16 %v3183_v44  ;;  %v3180_v5 = vunpack.i.h.bf16 %v3178_v56  ;;  %v3179_v42 = vunpack.i.l.bf16 %v3178_v56  ;;  %v6911_v44 = vld [vmem:[#allocation28_spill] sm:$0xff] }
 0x113   : > { %v6910_v56 = vpack.i.bf16 %v5276_v27, %v5215_v11  ;;  %v571_v18 = vrot.slane %v6911_v44, 4  ;;  %v6915_v27 = vld [vmem:[#allocation10_spill] sm:$0xff] }
 0x114   : > { %3467 = vrot.lane.b32.xlu1 %v5163_v4, %s3796_s12  ;;  %v5481_v37 = vsel %vm1866_vm9, %v5050_v24, %v3184_v46  ;;  %v5485_v20 = vsel %vm1866_vm9, %v5047_v25, %v3185_v49  ;;  %v5495_v8 = vsel %vm1866_vm9, %v4984_v52, %v3179_v42  ;;  %v5499_v24 = vsel %vm1866_vm9, %v4987_v53, %v3180_v5  ;;  %v6914_v49 = vld [vmem:[#allocation27_spill] sm:$0xff]  ;;  %v3725_v42 = vld [vmem:[%s3881_s5 + $0xd8] sm:$0xff]  ;;  %v6918_v5 = vld [vmem:[#allocation36_spill] sm:$0xff] }
 0x115   : > { %6908 = vst [vmem:[#allocation54_spill] sm:$0xff] %v5481_v37  ;;  %6909 = vst [vmem:[#allocation55_spill] sm:$0xff] %v5485_v20  ;;  %3462 = vrot.lane.b32.xlu0 %v6910_v56, %s3800_s28  ;;  %v5501_v46 = vpop.permute.xlu1 %3187  ;;  %v2950_v56 = vunpack.i.h.bf16 %v6915_v27  ;;  %v2949_v4 = vunpack.i.l.bf16 %v6915_v27  ;;  %v1121_v51 = vpop.permute.xlu0 %1120  ;;  %v6916_v20 = vrot.slane %v4973_v15, 4  ;;  %v5513_v53 = vsel %vm1782_vm6, %v3725_v42, %v2955_v9 }
 0x116   : > { %6912 = vst [vmem:[#allocation28_spill] sm:$0xff] %v5495_v8  ;;  %6913 = vst [vmem:[#allocation56_spill] sm:$0xff] %v5499_v24  ;;  %v5517_v37 = vsel %vm1866_vm9, %v6918_v5, %v1121_v51  ;;  %v6920_v25 = vpack.i.bf16 %v5286_v40, %v5281_v31  ;;  %v6921_v27 = vrot.slane %v5024_v36, 4  ;;  %v6923_v9 = vrot.slane %v5024_v36, 6  ;;  %v5560_v8 = vld [vmem:[%s3881_s5 + $0xc8] sm:$0xff] }
 0x117   : > { %v608_v52 = vsel %vm537_vm2, %v6916_v20, %v607_v14  ;;  %6917 = vst [vmem:[#allocation27_spill] sm:$0xff] %v5513_v53  ;;  %6919 = vst [vmem:[#allocation10_spill] sm:$0xff] %v5517_v37  ;;  %v6922_v20 = vrot.slane %v4973_v15, 6  ;;  %v6924_v31 = vrot.slane %v4973_v15, 5  ;;  %v6926_v42 = vrot.slane %v4800_v57, 4 }
 0x118   : > { %3477 = vrot.lane.b32.xlu1 %v6920_v25, %s3798_s20  ;;  %v610_v11 = vsel %vm537_vm2, %v607_v14, %v6921_v27  ;;  %v5536_v51 = vsel %vm707_vm5, %v773_v28, %v6923_v9  ;;  %v6925_v14 = vrot.slane %v5024_v36, 5  ;;  %v522_v9 = vrot.slane %v4968_v35, 3  ;;  %6929 = vst [vmem:[#allocation57_spill] sm:$0xff] %v5560_v8  ;;  %v6933_v35 = vld [vmem:[#allocation37_spill] sm:$0xff] }
 0x119   : > { %v5529_v24 = vsel %vm707_vm5, %v6922_v20, %v773_v28  ;;  %3472 = vrot.lane.b32.xlu0 %v5361_v16, %s3799_s22  ;;  %v5541_v40 = vsel %vm622_vm4, %v6924_v31, %v688_v60  ;;  %v572_v5 = vsel %vm537_vm2, %v6926_v42, %v571_v18  ;;  %v5551_v27 = vpop.permute.xlu1 %3197  ;;  %v6928_v20 = vrot.slane %v6914_v49, 4  ;;  %v5573_v48 = vpop.permute.xlu0 %3192 }
 0x11a   : > { %v5546_v25 = vsel %vm622_vm4, %v688_v60, %v6925_v14  ;;  %6927 = vst [vmem:[#allocation36_spill] sm:$0xff] %v5551_v27  ;;  %v652_v37 = vrot.slane %v6911_v44, 5  ;;  %v5564_v60 = vsel %vm1782_vm6, %v5560_v8, %v2950_v56  ;;  %v5567_v14 = vld [vmem:[%s3881_s5 + $0xc0] sm:$0xff]  ;;  %6931 = vst [vmem:[#allocation59_spill] sm:$0xff] %v5573_v48  ;;  %v737_v31 = vrot.slane %v6911_v44, 6 }
 0x11b   : > { %v574_v28 = vsel %vm537_vm2, %v571_v18, %v6928_v20  ;;  %6930 = vst [vmem:[#allocation58_spill] sm:$0xff] %v5567_v14  ;;  %v5571_v42 = vsel %vm1782_vm6, %v5567_v14, %v2949_v4  ;;  %v5575_v18 = vpack.i.bf16 %v610_v11, %v608_v52  ;;  %v6932_v11 = vpack.i.bf16 %v5309_v63, %v5304_v58 }
 0x11c   : > { %3487 = vrot.lane.b32.xlu1 %v5210_v54, %s3796_s12  ;;  %v5590_v52 = vpack.i.bf16 %v574_v28, %v572_v5  ;;  %v692_v33 = vrot.slane %v6933_v35, 5  ;;  %v6934_v54 = vld [vmem:[#allocation35_spill] sm:$0xff]  ;;  %v2989_v20 = vunpack.i.l.bf16 %v6935_v62  ;;  %v6937_v56 = vrot.slane %v4973_v15, 3 }
 0x11d   : > { %3482 = vrot.lane.b32.xlu0 %v6932_v11, %s3800_s28  ;;  %v5595_v8 = vpop.permute.xlu1 %3207  ;;  %v6938_v4 = vrot.slane %v5024_v36, 3  ;;  %v6939_v58 = vrot.slane %v4800_v57, 5  ;;  %v2990_v28 = vunpack.i.h.bf16 %v6935_v62  ;;  %v5613_v11 = vpop.permute.xlu0 %3202  ;;  %v6941_v53 = vrot.slane %v6914_v49, 5 }
 0x11e   : > { %6936 = vst [vmem:[#allocation37_spill] sm:$0xff] %v5595_v8  ;;  %v5600_v44 = vsel %vm452_vm3, %v6937_v56, %v522_v9  ;;  %6940 = vst [vmem:[#allocation35_spill] sm:$0xff] %v5613_v11  ;;  %v611_v56 = vrot.slane %v6933_v35, 4  ;;  %v6943_v62 = vpack.i.bf16 %v5374_v39, %v5369_v45  ;;  %v6946_v8 = vld [vmem:[#allocation16_spill] sm:$0xff]  ;;  %v6947_v45 = vrot.slane %v5024_v36, 5 }
 0x11f   : > { %v5605_v63 = vsel %vm452_vm3, %v522_v9, %v6938_v4  ;;  %v5610_v5 = vsel %vm622_vm4, %v6939_v58, %v652_v37  ;;  %v5618_v15 = vsel %vm622_vm4, %v652_v37, %v6941_v53  ;;  %v6942_v9 = vld [vmem:[#allocation15_spill] sm:$0xff]  ;;  %v6944_v58 = vrot.slane %v4800_v57, 6 }
 0x120   : > { %v3000_v4 = vunpack.i.h.bf16 %v6942_v9  ;;  %v2999_v27 = vunpack.i.l.bf16 %v6942_v9  ;;  %3497 = vrot.lane.b32.xlu1 %v6943_v62, %s3798_s20  ;;  %v6945_v37 = vrot.slane %v6914_v49, 6  ;;  %v2995_v48 = vunpack.i.h.bf16 %v6946_v8 }
 0x121   : > { %v5631_v11 = vsel %vm707_vm5, %v6944_v58, %v737_v31  ;;  %v2994_v9 = vunpack.i.l.bf16 %v6946_v8  ;;  %3492 = vrot.lane.b32.xlu0 %v5420_v6, %s3799_s22  ;;  %v5645_v39 = vsel %vm622_vm4, %v6947_v45, %v692_v33  ;;  %v6948_v57 = vrot.slane %v6934_v54, 5  ;;  %v5656_v58 = vpop.permute.xlu1 %3217  ;;  %v5666_v14 = vpop.permute.xlu0 %3212 }
 0x122   : > { %v5636_v53 = vsel %vm707_vm5, %v737_v31, %v6945_v37  ;;  %v5654_v31 = vsel %vm1824_vm7, %v5206_v22, %v2989_v20  ;;  %6949 = vst [vmem:[#allocation14_spill] sm:$0xff] %v5656_v58  ;;  %v5664_v45 = vsel %vm1824_vm7, %v5199_v1, %v2990_v28  ;;  %6950 = vst [vmem:[#allocation15_spill] sm:$0xff] %v5666_v14  ;;  %v6951_v22 = vrot.slane %v5024_v36, 4 }
 0x123   : > { %v5650_v62 = vsel %vm622_vm4, %v692_v33, %v6948_v57  ;;  %v6952_v57 = vrot.slane %v6934_v54, 4  ;;  %v5678_v37 = vsel %vm1824_vm7, %v5184_v34, %v3000_v4  ;;  %v5682_v1 = vsel %vm1824_vm7, %v5188_v0, %v2999_v27 }
 0x124   : > { %v612_v20 = vsel %vm537_vm2, %v6951_v22, %v611_v56  ;;  %v6953_v28 = vpack.i.bf16 %v5407_v43, %v5389_v17  ;;  %v777_v33 = vrot.slane %v6933_v35, 6  ;;  %v5697_v34 = vsel %vm1824_vm7, %v5334_v7, %v2995_v48  ;;  %v6955_v43 = vld [vmem:[#allocation23_spill] sm:$0xff] }
 0x125   : > { %v614_v8 = vsel %vm537_vm2, %v611_v56, %v6952_v57  ;;  %v5693_v56 = vsel %vm1824_vm7, %v5341_v59, %v2994_v9  ;;  %v6954_v0 = vpack.i.bf16 %v5460_v3, %v5445_v38  ;;  %v6739_v17 = vrot.slane %v6934_v54, 6  ;;  %v3228_v57 = vpop.permute.xlu1 %3227  ;;  %v6956_v59 = vld [vmem:[#allocation26_spill] sm:$0xff]  ;;  %v3223_v7 = vpop.permute.xlu0 %3222 }
 0x126   : > { %3507 = vrot.lane.b32.xlu1 %v6953_v28, %s3800_s28  ;;  %v3005_v27 = vunpack.i.h.bf16 %v6955_v43  ;;  %v3004_v4 = vunpack.i.l.bf16 %v6955_v43  ;;  %v5706_v28 = vpack.i.bf16 %v614_v8, %v612_v20  ;;  %v656_v9 = vrot.slane %v6956_v59, 5 }
 0x127   : > { %3502 = vrot.lane.b32.xlu0 %v6954_v0, %s3795_s9  ;;  %v3230_v22 = vunpack.i.h.bf16 %v3228_v57  ;;  %v3229_v58 = vunpack.i.l.bf16 %v3228_v57  ;;  %v575_v14 = vrot.slane %v6956_v59, 4  ;;  %v3225_v38 = vunpack.i.h.bf16 %v3223_v7 }
 0x128   : > { %v3224_v3 = vunpack.i.l.bf16 %v3223_v7  ;;  %v6957_v0 = vrot.slane %v5024_v36, 6  ;;  %v5732_v7 = vsel %vm707_vm5, %v777_v33, %v6739_v17 }
 0x129   : > { %v5721_v20 = vsel %vm1908_vm10, %v5265_v41, %v3229_v58  ;;  %v5725_v57 = vsel %vm1908_vm10, %v5269_v23, %v3230_v22  ;;  %v5741_v41 = vsel %vm1908_vm10, %v5225_v2, %v3225_v38  ;;  %v3238_v23 = vpop.permute.xlu1 %3237  ;;  %v6962_v58 = vrot.slane %v6914_v49, 5  ;;  %v3233_v48 = vpop.permute.xlu0 %3232 }
 0x12a   : > { %3517 = vrot.lane.b32.xlu1 %v5575_v18, %s3799_s22  ;;  %v5716_v43 = vsel %vm707_vm5, %v6957_v0, %v777_v33  ;;  %6958 = vst [vmem:[#allocation16_spill] sm:$0xff] %v5721_v20  ;;  %6959 = vst [vmem:[#allocation23_spill] sm:$0xff] %v5725_v57  ;;  %v741_v0 = vrot.slane %v6956_v59, 6  ;;  %v5737_v8 = vsel %vm1908_vm10, %v5221_v21, %v3224_v3  ;;  %v3240_v33 = vunpack.i.h.bf16 %v3238_v23 }
 0x12b   : > { %3512 = vrot.lane.b32.xlu0 %v5361_v16, %s3796_s12  ;;  %6960 = vst [vmem:[#allocation26_spill] sm:$0xff] %v5737_v8  ;;  %6961 = vst [vmem:[#allocation60_spill] sm:$0xff] %v5741_v41  ;;  %v5746_v16 = vsel %vm622_vm4, %v6962_v58, %v656_v9  ;;  %v3239_v17 = vunpack.i.l.bf16 %v3238_v23  ;;  %v6963_v59 = vrot.slane %v5430_v13, 5  ;;  %v6964_v3 = vrot.slane %v6914_v49, 4 }
 0x12c   : > { %v3235_v38 = vunpack.i.h.bf16 %v3233_v48  ;;  %v3234_v57 = vunpack.i.l.bf16 %v3233_v48  ;;  %v6965_v58 = vpack.i.bf16 %v5536_v51, %v5529_v24  ;;  %v6966_v22 = vrot.slane %v5430_v13, 4 }
 0x12d   : > { %v5752_v21 = vsel %vm622_vm4, %v656_v9, %v6963_v59  ;;  %v576_v2 = vsel %vm537_vm2, %v6964_v3, %v575_v14  ;;  %v526_v20 = vrot.slane %v6933_v35, 3  ;;  %v5767_v9 = vsel %vm1908_vm10, %v5315_v30, %v3239_v17  ;;  %v5791_v35 = vpop.permute.xlu1 %3247  ;;  %v6974_v17 = vld [vmem:[#allocation48_spill] sm:$0xff] }
 0x12e   : > { %3527 = vrot.lane.b32.xlu1 %v6965_v58, %s3800_s28  ;;  %v578_v23 = vsel %vm537_vm2, %v575_v14, %v6966_v22  ;;  %6967 = vst [vmem:[#allocation61_spill] sm:$0xff] %v5767_v9  ;;  %v5771_v59 = vsel %vm1908_vm10, %v5319_v19, %v3240_v33  ;;  %v6969_v48 = vpack.i.bf16 %v5546_v25, %v5541_v40  ;;  %v6970_v24 = vrot.slane %v6914_v49, 6  ;;  %v6977_v58 = vld [vmem:[#allocation30_spill] sm:$0xff] }
 0x12f   : > { %6968 = vst [vmem:[#allocation62_spill] sm:$0xff] %v5771_v59  ;;  %v6740_v14 = vrot.slane %v6934_v54, 3  ;;  %v5785_v30 = vsel %vm1908_vm10, %v5248_v55, %v3234_v57  ;;  %v5789_v19 = vsel %vm1908_vm10, %v5252_v26, %v3235_v38  ;;  %v6973_v40 = vrot.slane %v5430_v13, 6  ;;  %v5807_v57 = vpop.permute.xlu0 %3242 }
 0x130   : > { %3522 = vrot.lane.b32.xlu0 %v6969_v48, %s3798_s20  ;;  %v5780_v51 = vsel %vm707_vm5, %v6970_v24, %v741_v0  ;;  %6971 = vst [vmem:[#allocation63_spill] sm:$0xff] %v5785_v30  ;;  %6972 = vst [vmem:[#allocation64_spill] sm:$0xff] %v5789_v19  ;;  %v616_v49 = vrot.slane %v5202_v32, 4  ;;  %v5801_v22 = vsel %vm1824_vm7, %v6974_v17, %v3005_v27  ;;  %v3045_v48 = vunpack.i.h.bf16 %v6977_v58  ;;  %v6978_v17 = vld [vmem:[#allocation6_spill] sm:$0xff]  ;;  %v6981_v24 = vld [vmem:[#allocation45_spill] sm:$0xff] }
 0x131   : > { %v5796_v25 = vsel %vm707_vm5, %v741_v0, %v6973_v40  ;;  %v5805_v55 = vsel %vm1824_vm7, %v5327_v50, %v3004_v4  ;;  %v6975_v0 = vld [vmem:[#allocation29_spill] sm:$0xff]  ;;  %v5817_v27 = vpack.i.bf16 %v578_v23, %v576_v2  ;;  %v6976_v50 = vrot.slane %v5024_v36, 3  ;;  %v3258_v23 = vpop.permute.xlu1 %3257 }
 0x132   : > { %v3050_v3 = vunpack.i.h.bf16 %v6975_v0  ;;  %v3049_v38 = vunpack.i.l.bf16 %v6975_v0  ;;  %3537 = vrot.lane.b32.xlu1 %v5590_v52, %s3799_s22  ;;  %v5832_v40 = vsel %vm452_vm3, %v526_v20, %v6740_v14  ;;  %v782_v2 = vrot.slane %v5202_v32, 6 }
 0x133   : > { %v5822_v4 = vsel %vm452_vm3, %v6976_v50, %v526_v20  ;;  %v3044_v36 = vunpack.i.l.bf16 %v6977_v58  ;;  %v6979_v0 = vrot.slane %v6978_v17, 4  ;;  %v6741_v26 = vrot.slane %v6981_v24, 6  ;;  %v5843_v20 = vpop.permute.xlu0 %3252 }
 0x134   : > { %3532 = vrot.lane.b32.xlu0 %v5420_v6, %s3796_s12  ;;  %v6980_v6 = vrot.slane %v6934_v54, 4  ;;  %v3260_v59 = vunpack.i.h.bf16 %v3258_v23  ;;  %v3259_v9 = vunpack.i.l.bf16 %v3258_v23  ;;  %v697_v14 = vrot.slane %v5202_v32, 5 }
 0x135   : > { %v618_v50 = vsel %vm537_vm2, %v616_v49, %v6979_v0  ;;  %v6742_v58 = vrot.slane %v6981_v24, 5  ;;  %v5849_v17 = vsel %vm1824_vm7, %v5571_v42, %v3049_v38  ;;  %v5853_v0 = vsel %vm1824_vm7, %v5564_v60, %v3050_v3 }
 0x136   : > { %v621_v33 = vsel %vm537_vm2, %v6980_v6, %v616_v49  ;;  %v6982_v49 = vpack.i.bf16 %v5605_v63, %v5600_v44  ;;  %v5863_v6 = vsel %vm1824_vm7, %v5427_v47, %v3045_v48  ;;  %v5867_v42 = vsel %vm1908_vm10, %v5412_v61, %v3259_v9  ;;  %v3268_v47 = vpop.permute.xlu1 %3267 }
 0x137   : > { %v5871_v60 = vsel %vm1908_vm10, %v5416_v12, %v3260_v59  ;;  %v6983_v44 = vpack.i.bf16 %v5618_v15, %v5610_v5  ;;  %v5877_v63 = vpack.i.bf16 %v618_v50, %v621_v33  ;;  %v5881_v3 = vsel %vm1824_vm7, %v5434_v10, %v3044_v36  ;;  %v6985_v15 = vld [vmem:[#allocation39_spill] sm:$0xff]  ;;  %v3263_v10 = vpop.permute.xlu0 %3262 }
 0x138   : > { %3547 = vrot.lane.b32.xlu1 %v6982_v49, %s3795_s9  ;;  %v5886_v61 = vsel %vm707_vm5, %v782_v2, %v6741_v26  ;;  %v6984_v12 = vrot.slane %v6934_v54, 6  ;;  %v579_v5 = vrot.slane %v5423_v29, 4  ;;  %v3090_v59 = vunpack.i.h.bf16 %v6985_v15 }
 0x139   : > { %3542 = vrot.lane.b32.xlu0 %v6983_v44, %s3798_s20  ;;  %v3089_v33 = vunpack.i.l.bf16 %v6985_v15  ;;  %v5899_v38 = vsel %vm622_vm4, %v697_v14, %v6742_v58  ;;  %v6986_v48 = vrot.slane %v6934_v54, 5  ;;  %v3189_v50 = vunpack.i.l.bf16 %v5501_v46 }
 0x13a   : > { %v5891_v9 = vsel %vm707_vm5, %v6984_v12, %v782_v2  ;;  %v3190_v2 = vunpack.i.h.bf16 %v5501_v46  ;;  %v3265_v49 = vunpack.i.h.bf16 %v3263_v10  ;;  %v3264_v44 = vunpack.i.l.bf16 %v3263_v10  ;;  %v6987_v12 = vld [vmem:[#allocation31_spill] sm:$0xff]  ;;  %v6990_v10 = vld [vmem:[#allocation53_spill] sm:$0xff] }
 0x13b   : > { %v5904_v36 = vsel %vm622_vm4, %v6986_v48, %v697_v14  ;;  %v3270_v26 = vunpack.i.h.bf16 %v3268_v47  ;;  %v3269_v23 = vunpack.i.l.bf16 %v3268_v47  ;;  %v6988_v58 = vpack.i.bf16 %v5636_v53, %v5631_v11  ;;  %v6989_v48 = vld [vmem:[#allocation8_spill] sm:$0xff] }
 0x13c   : > { %3557 = vrot.lane.b32.xlu1 %v5575_v18, %s3796_s12  ;;  %v5919_v46 = vsel %vm1908_vm10, %v6989_v48, %v3264_v44  ;;  %v5923_v19 = vsel %vm1908_vm10, %v6990_v10, %v3265_v49  ;;  %v3278_v18 = vpop.permute.xlu1 %3277  ;;  %v6991_v15 = vrot.slane %v5430_v13, 4  ;;  %v1867_v53 = vsel %vm1866_vm9, %v5654_v31, %v3089_v33  ;;  %v3273_v44 = vpop.permute.xlu0 %3272  ;;  %v6992_v48 = vld [vmem:[#allocation11_spill] sm:$0xff] }
 0x13d   : > { %3552 = vrot.lane.b32.xlu0 %v6988_v58, %s3800_s28  ;;  %v1868_v58 = vsel %vm1866_vm9, %v5664_v45, %v3090_v59  ;;  %v6993_v14 = vrot.slane %v6992_v48, 4  ;;  %v531_v10 = vrot.slane %v5202_v32, 3  ;;  %v1909_v30 = vsel %vm1908_vm10, %v1867_v53, %v3189_v50 }
 0x13e   : > { %v580_v11 = vsel %vm537_vm2, %v6991_v15, %v579_v5  ;;  %v1910_v47 = vsel %vm1908_vm10, %v1868_v58, %v3190_v2  ;;  %v3275_v41 = vunpack.i.h.bf16 %v3273_v44  ;;  %v3274_v8 = vunpack.i.l.bf16 %v3273_v44 }
 0x13f   : > { %v582_v49 = vsel %vm537_vm2, %v579_v5, %v6993_v14  ;;  %v6994_v31 = vpack.i.bf16 %v5650_v62, %v5645_v39  ;;  %v1951_v45 = vsel %vm1950_vm11, %v1909_v30, %v3269_v23  ;;  %v1952_v59 = vsel %vm1950_vm11, %v1910_v47, %v3270_v26  ;;  %v6995_v39 = vld [vmem:[#allocation38_spill] sm:$0xff] }
 0x140   : > { %v3280_v33 = vunpack.i.h.bf16 %v3278_v18  ;;  %v3279_v15 = vunpack.i.l.bf16 %v3278_v18  ;;  %v1993_v32 = vsel %vm1992_vm12, %v1951_v45, %v3274_v8  ;;  %v1994_v5 = vsel %vm1992_vm12, %v1952_v59, %v3275_v41  ;;  %v3288_v2 = vpop.permute.xlu1 %3287  ;;  %v3283_v23 = vpop.permute.xlu0 %3282  ;;  %v6997_v47 = vld [vmem:[#allocation58_spill] sm:$0xff]  ;;  %v6998_v8 = vld [vmem:[#allocation59_spill] sm:$0xff] }
 0x141   : > { %3567 = vrot.lane.b32.xlu1 %v6994_v31, %s3798_s20  ;;  %3562 = vrot.lane.b32.xlu0 %v5706_v28, %s3799_s22  ;;  %v532_v50 = vrot.slane %v6981_v24, 3  ;;  %v660_v14 = vrot.slane %v5423_v29, 5  ;;  %v3095_v62 = vunpack.i.h.bf16 %v6995_v39  ;;  %v3094_v30 = vunpack.i.l.bf16 %v6995_v39 }
 0x142   : > { %v6996_v26 = vrot.slane %v6934_v54, 3  ;;  %v3195_v58 = vunpack.i.h.bf16 %v6998_v8  ;;  %v3194_v41 = vunpack.i.l.bf16 %v6998_v8  ;;  %v3285_v44 = vunpack.i.h.bf16 %v3283_v23 }
 0x143   : > { %v3284_v48 = vunpack.i.l.bf16 %v3283_v23  ;;  %v3290_v31 = vunpack.i.h.bf16 %v3288_v2  ;;  %v3289_v45 = vunpack.i.l.bf16 %v3288_v2  ;;  %v2035_v59 = vsel %vm2034_vm13, %v1993_v32, %v3279_v15 }
 0x144   : > { %v5957_v18 = vsel %vm452_vm3, %v6996_v26, %v531_v10  ;;  %v2036_v54 = vsel %vm2034_vm13, %v1994_v5, %v3280_v33  ;;  %v6999_v39 = vpack.i.bf16 %v5732_v7, %v5716_v43  ;;  %v3298_v53 = vpop.permute.xlu1 %3297  ;;  %v7000_v2 = vrot.slane %v5430_v13, 5  ;;  %v3293_v32 = vpop.permute.xlu0 %3292 }
 0x145   : > { %3577 = vrot.lane.b32.xlu1 %v5590_v52, %s3796_s12  ;;  %v2077_v26 = vsel %vm2076_vm14, %v2035_v59, %v3284_v48  ;;  %v2078_v8 = vsel %vm2076_vm14, %v2036_v54, %v3285_v44  ;;  %v5975_v52 = vsel %vm452_vm3, %v531_v10, %v532_v50  ;;  %v1869_v33 = vsel %vm1866_vm9, %v5693_v56, %v3094_v30 }
 0x146   : > { %3572 = vrot.lane.b32.xlu0 %v6999_v39, %s3800_s28  ;;  %v5980_v15 = vsel %vm622_vm4, %v7000_v2, %v660_v14  ;;  %v1870_v43 = vsel %vm1866_vm9, %v5697_v34, %v3095_v62  ;;  %v2118_v7 = vpack.c.bf16 %v2078_v8, %v2077_v26  ;;  %v7001_v5 = vrot.slane %v6997_v47, 5 }
 0x147   : > { %v1911_v10 = vsel %vm1908_vm10, %v1869_v33, %v3194_v41  ;;  %v1912_v44 = vsel %vm1908_vm10, %v1870_v43, %v3195_v58  ;;  %v3295_v48 = vunpack.i.h.bf16 %v3293_v32  ;;  %v3294_v59 = vunpack.i.l.bf16 %v3293_v32 }
 0x148   : > { %v5989_v23 = vsel %vm622_vm4, %v660_v14, %v7001_v5  ;;  %v7002_v56 = vpack.i.bf16 %v5752_v21, %v5746_v16  ;;  %v1953_v34 = vsel %vm1950_vm11, %v1911_v10, %v3289_v45  ;;  %v1954_v62 = vsel %vm1950_vm11, %v1912_v44, %v3290_v31  ;;  %2746 = vmatmul.mubr.msk.bf16.vlgmr.msra.gmra.mxu0 %vm2159_vm15, %v2118_v7  ;;  %v3308_v41 = vpop.permute.xlu1 %3307  ;;  %v7004_v21 = vld [vmem:[#allocation25_spill] sm:$0xff] }
 0x149   : > { %v3300_v30 = vunpack.i.h.bf16 %v3298_v53  ;;  %v3299_v54 = vunpack.i.l.bf16 %v3298_v53  ;;  %v1995_v14 = vsel %vm1992_vm12, %v1953_v34, %v3294_v59  ;;  %v1996_v58 = vsel %vm1992_vm12, %v1954_v62, %v3295_v48  ;;  %v3303_v53 = vpop.permute.xlu0 %3302 }
 0x14a   : > { %3587 = vrot.lane.b32.xlu1 %v7002_v56, %s3798_s20  ;;  %3582 = vrot.lane.b32.xlu0 %v5817_v27, %s3799_s22  ;;  %v7003_v39 = vmov 0.0   ;;  %v6006_v16 = vpack.i.bf16 %v582_v49, %v580_v11  ;;  %v3145_v45 = vunpack.i.h.bf16 %v7004_v21  ;;  %v3144_v31 = vunpack.i.l.bf16 %v7004_v21 }
 0x14b   : > { %2749 = vmatprep.mubr.msk.bf16.mxu0 %vm3801_vm8, %v7003_v39  ;;  %v3636_v26 = vpack.i.bf16 %v5975_v52, %v5957_v18  ;;  %v3631_v8 = vpack.i.bf16 %v5989_v23, %v5980_v15  ;;  %v3245_v2 = vunpack.i.h.bf16 %v5807_v57  ;;  %v3244_v33 = vunpack.i.l.bf16 %v5807_v57  ;;  %v7017_v52 = vld [vmem:[#allocation57_spill] sm:$0xff] }
 0x14c   : > { %v3305_v43 = vunpack.i.h.bf16 %v3303_v53  ;;  %v3304_v7 = vunpack.i.l.bf16 %v3303_v53  ;;  %v7005_v11 = vpack.i.bf16 %v5796_v25, %v5780_v51  ;;  %v3310_v49 = vunpack.i.h.bf16 %v3308_v41  ;;  %v3318_v59 = vpop.permute.xlu1 %3317 }
 0x14d   : > { %v3309_v32 = vunpack.i.l.bf16 %v3308_v41  ;;  %v2037_v5 = vsel %vm2034_vm13, %v1995_v14, %v3299_v54  ;;  %v2038_v10 = vsel %vm2034_vm13, %v1996_v58, %v3300_v30  ;;  %v7006_v44 = vpack.i.bf16 %v5832_v40, %v5822_v4  ;;  %v3313_v62 = vpop.permute.xlu0 %3312 }
 0x14e   : > { %3597 = vrot.lane.b32.xlu1 %v7005_v11, %s3800_s28  ;;  %v2079_v57 = vsel %vm2076_vm14, %v2037_v5, %v3304_v7  ;;  %v2080_v48 = vsel %vm2076_vm14, %v2038_v10, %v3305_v43  ;;  %v745_v56 = vrot.slane %v5423_v29, 6  ;;  %v1889_v51 = vsel %vm1866_vm9, %v5881_v3, %v3144_v31  ;;  %v7007_v31 = vld [vmem:[#allocation50_spill] sm:$0xff]  ;;  %v7009_v43 = vld [vmem:[#allocation41_spill] sm:$0xff]  ;;  %v7011_v5 = vld [vmem:[#allocation36_spill] sm:$0xff] }
 0x14f   : > { %3592 = vrot.lane.b32.xlu0 %v7006_v44, %s3795_s9  ;;  %v1890_v25 = vsel %vm1866_vm9, %v5863_v6, %v3145_v45  ;;  %v2119_v34 = vpack.c.bf16 %v2080_v48, %v2079_v57  ;;  %v747_v30 = vrot.slane %v6997_v47, 6  ;;  %v1931_v4 = vsel %vm1908_vm10, %v1889_v51, %v3244_v33 }
 0x150   : > { %v1932_v40 = vsel %vm1908_vm10, %v1890_v25, %v3245_v2  ;;  %v3315_v54 = vunpack.i.h.bf16 %v3313_v62  ;;  %v3314_v14 = vunpack.i.l.bf16 %v3313_v62  ;;  %v1973_v29 = vsel %vm1950_vm11, %v1931_v4, %v3309_v32  ;;  %v3328_v45 = vpop.permute.xlu1 %3327  ;;  %v7008_v2 = vld [vmem:[#allocation49_spill] sm:$0xff] }
 0x151   : > { %v1974_v3 = vsel %vm1950_vm11, %v1932_v40, %v3310_v49  ;;  %v3320_v58 = vunpack.i.h.bf16 %v3318_v59  ;;  %v3319_v41 = vunpack.i.l.bf16 %v3318_v59  ;;  %2750 = vmatmul.mubr.msk.bf16.gmra.mxu0 %vm2159_vm15, %v2119_v34  ;;  %v700_v53 = vrot.slane %v7007_v31, 5  ;;  %v3323_v49 = vpop.permute.xlu0 %3322 }
 0x152   : > { %3607 = vrot.lane.b32.xlu1 %v5877_v63, %s3799_s22  ;;  %v2015_v6 = vsel %vm1992_vm12, %v1973_v29, %v3314_v14  ;;  %v2016_v21 = vsel %vm1992_vm12, %v1974_v3, %v3315_v54  ;;  %2753 = vmatprep.mubr.msk.bf16.mxu0 %vm3801_vm8, %v7003_v39  ;;  %v702_v33 = vrot.slane %v7008_v2, 5  ;;  %v3100_v7 = vunpack.i.h.bf16 %v7009_v43 }
 0x153   : > { %3602 = vrot.lane.b32.xlu0 %v5706_v28, %s3796_s12  ;;  %v3099_v11 = vunpack.i.l.bf16 %v7009_v43  ;;  %v7010_v28 = vrot.slane %v5430_v13, 6  ;;  %v3200_v10 = vunpack.i.h.bf16 %v7011_v5  ;;  %v3199_v44 = vunpack.i.l.bf16 %v7011_v5  ;;  %v7015_v5 = vld [vmem:[#allocation51_spill] sm:$0xff] }
 0x154   : > { %v3325_v57 = vunpack.i.h.bf16 %v3323_v49  ;;  %v3324_v48 = vunpack.i.l.bf16 %v3323_v49  ;;  %v7012_v59 = vpack.i.bf16 %v5886_v61, %v5891_v9  ;;  %v3330_v51 = vunpack.i.h.bf16 %v3328_v45  ;;  %v3338_v54 = vpop.permute.xlu1 %3337 }
 0x155   : > { %v6054_v32 = vsel %vm707_vm5, %v7010_v28, %v745_v56  ;;  %v3329_v25 = vunpack.i.l.bf16 %v3328_v45  ;;  %v2057_v34 = vsel %vm2034_vm13, %v2015_v6, %v3319_v41  ;;  %v2058_v13 = vsel %vm2034_vm13, %v2016_v21, %v3320_v58  ;;  %v3333_v3 = vpop.permute.xlu0 %3332 }
 0x156   : > { %3617 = vrot.lane.b32.xlu1 %v7012_v59, %s3800_s28  ;;  %v7013_v62 = vpack.i.bf16 %v5899_v38, %v5904_v36  ;;  %v2099_v4 = vsel %vm2076_vm14, %v2057_v34, %v3324_v48  ;;  %v2100_v40 = vsel %vm2076_vm14, %v2058_v13, %v3325_v57  ;;  %v748_v61 = vsel %vm707_vm5, %v745_v56, %v747_v30 }
 0x157   : > { %v7014_v9 = vrot.slane %v6981_v24, 5  ;;  %v1872_v29 = vsel %vm1866_vm9, %v5678_v37, %v3100_v7  ;;  %v1871_v38 = vsel %vm1866_vm9, %v5682_v1, %v3099_v11  ;;  %v2129_v36 = vpack.c.bf16 %v2100_v40, %v2099_v4 }
 0x158   : > { %3612 = vrot.lane.b32.xlu0 %v7013_v62, %s3798_s20  ;;  %v6085_v58 = vsel %vm622_vm4, %v700_v53, %v702_v33  ;;  %v1913_v56 = vsel %vm1908_vm10, %v1871_v38, %v3199_v44  ;;  %v1914_v41 = vsel %vm1908_vm10, %v1872_v29, %v3200_v10  ;;  %v3335_v6 = vunpack.i.h.bf16 %v3333_v3  ;;  %v3348_v11 = vpop.permute.xlu1 %3347 }
 0x159   : > { %v6076_v14 = vsel %vm622_vm4, %v7014_v9, %v700_v53  ;;  %v3334_v21 = vunpack.i.l.bf16 %v3333_v3  ;;  %v1955_v37 = vsel %vm1950_vm11, %v1913_v56, %v3329_v25  ;;  %v1956_v1 = vsel %vm1950_vm11, %v1914_v41, %v3330_v51  ;;  %2790 = vmatmul.mubr.msk.bf16.vlgmr.msra.gmra.mxu1 %vm2159_vm15, %v2129_v36  ;;  %v3343_v57 = vpop.permute.xlu0 %3342 }
 0x15a   : > { %3627 = vrot.lane.b32.xlu1 %v6006_v16, %s3799_s22  ;;  %v3340_v45 = vunpack.i.h.bf16 %v3338_v54  ;;  %v3339_v43 = vunpack.i.l.bf16 %v3338_v54  ;;  %v1998_v7 = vsel %vm1992_vm12, %v1956_v1, %v3335_v6  ;;  %v3641_v49 = vpack.i.bf16 %v748_v61, %v6054_v32  ;;  %2793 = vmatprep.mubr.msk.bf16.mxu1 %vm3801_vm8, %v7003_v39 }
 0x15b   : > { %v1997_v53 = vsel %vm1992_vm12, %v1955_v37, %v3334_v21  ;;  %v785_v28 = vrot.slane %v7007_v31, 6  ;;  %v3150_v10 = vunpack.i.h.bf16 %v7015_v5  ;;  %v3149_v44 = vunpack.i.l.bf16 %v7015_v5  ;;  %v7018_v37 = vld [vmem:[#allocation40_spill] sm:$0xff]  ;;  %v7022_v5 = vld [vmem:[#allocation35_spill] sm:$0xff] }
 0x15c   : > { %3622 = vrot.lane.b32.xlu0 %v5817_v27, %s3796_s12  ;;  %v3656_v27 = vpack.i.bf16 %v6085_v58, %v6076_v14  ;;  %v787_v48 = vrot.slane %v7008_v2, 6  ;;  %v3250_v59 = vunpack.i.h.bf16 %v5791_v35  ;;  %v3249_v51 = vunpack.i.l.bf16 %v5791_v35  ;;  %v3358_v40 = vpop.permute.xlu1 %3357 }
 0x15d   : > { %v3345_v32 = vunpack.i.h.bf16 %v3343_v57  ;;  %v3344_v25 = vunpack.i.l.bf16 %v3343_v57  ;;  %v3350_v31 = vunpack.i.h.bf16 %v3348_v11  ;;  %v3349_v34 = vunpack.i.l.bf16 %v3348_v11  ;;  %v3353_v15 = vpop.permute.xlu0 %3352  ;;  %v7020_v11 = vld [vmem:[#allocation13_spill] sm:$0xff] }
 0x15e   : > { %3637 = vrot.lane.b32.xlu1 %v3636_v26, %s3795_s9  ;;  %v2039_v13 = vsel %vm2034_vm13, %v1997_v53, %v3339_v43  ;;  %v2040_v62 = vsel %vm2034_vm13, %v1998_v7, %v3340_v45  ;;  %v7016_v54 = vrot.slane %v6981_v24, 6  ;;  %v664_v26 = vrot.slane %v7017_v52, 5 }
 0x15f   : > { %v2081_v35 = vsel %vm2076_vm14, %v2039_v13, %v3344_v25  ;;  %v2082_v4 = vsel %vm2076_vm14, %v2040_v62, %v3345_v32  ;;  %v1891_v61 = vsel %vm1866_vm9, %v5849_v17, %v3149_v44  ;;  %v1892_v9 = vsel %vm1866_vm9, %v5853_v0, %v3150_v10  ;;  %v7024_v13 = vld [vmem:[#allocation20_spill] sm:$0xff] }
 0x160   : > { %3632 = vrot.lane.b32.xlu0 %v3631_v8, %s3798_s20  ;;  %v786_v18 = vsel %vm707_vm5, %v7016_v54, %v785_v28  ;;  %v2120_v14 = vpack.c.bf16 %v2082_v4, %v2081_v35  ;;  %v788_v23 = vsel %vm707_vm5, %v785_v28, %v787_v48  ;;  %v1933_v8 = vsel %vm1908_vm10, %v1891_v61, %v3249_v51  ;;  %v3368_v6 = vpop.permute.xlu1 %3367 }
 0x161   : > { %v1934_v29 = vsel %vm1908_vm10, %v1892_v9, %v3250_v59  ;;  %v3355_v38 = vunpack.i.h.bf16 %v3353_v15  ;;  %v3354_v36 = vunpack.i.l.bf16 %v3353_v15  ;;  %v1975_v17 = vsel %vm1950_vm11, %v1933_v8, %v3349_v34  ;;  %v3363_v43 = vpop.permute.xlu0 %3362  ;;  %v7023_v34 = vld [vmem:[#allocation19_spill] sm:$0xff] }
 0x162   : > { %3647 = vrot.lane.b32.xlu1 %v5877_v63, %s3796_s12  ;;  %v1976_v3 = vsel %vm1950_vm11, %v1934_v29, %v3350_v31  ;;  %v3360_v0 = vunpack.i.h.bf16 %v3358_v40  ;;  %v3359_v58 = vunpack.i.l.bf16 %v3358_v40  ;;  %2754 = vmatmul.mubr.msk.bf16.gmra.mxu0 %vm2159_vm15, %v2120_v14  ;;  %v3661_v21 = vpack.i.bf16 %v788_v23, %v786_v18 }
 0x163   : > { %v2017_v56 = vsel %vm1992_vm12, %v1975_v17, %v3354_v36  ;;  %v2018_v41 = vsel %vm1992_vm12, %v1976_v3, %v3355_v38  ;;  %2757 = vmatprep.mubr.msk.bf16.mxu0 %vm3801_vm8, %v7003_v39  ;;  %v749_v63 = vrot.slane %v7017_v52, 6  ;;  %v3105_v1 = vunpack.i.h.bf16 %v7018_v37  ;;  %v3728_v38 = vld [vmem:[%s3881_s5 + $0xd0] sm:$0xff] }
 0x164   : > { %3642 = vrot.lane.b32.xlu0 %v3641_v49, %s3800_s28  ;;  %v3104_v45 = vunpack.i.l.bf16 %v7018_v37  ;;  %v7019_v53 = vrot.slane %v6997_v47, 5  ;;  %v7021_v49 = vrot.slane %v7020_v11, 5  ;;  %v3205_v10 = vunpack.i.h.bf16 %v7022_v5  ;;  %v3378_v40 = vpop.permute.xlu1 %3377  ;;  %v7027_v36 = vld [vmem:[#allocation9_spill] sm:$0xff] }
 0x165   : > { %v3204_v44 = vunpack.i.l.bf16 %v7022_v5  ;;  %v3365_v57 = vunpack.i.h.bf16 %v3363_v43  ;;  %v3364_v59 = vunpack.i.l.bf16 %v3363_v43  ;;  %v3370_v51 = vunpack.i.h.bf16 %v3368_v6  ;;  %v3373_v61 = vpop.permute.xlu0 %3372 }
 0x166   : > { %v665_v7 = vsel %vm622_vm4, %v7019_v53, %v664_v26  ;;  %v667_v28 = vsel %vm622_vm4, %v664_v26, %v7021_v49  ;;  %3657 = vrot.lane.b32.xlu1 %v3656_v27, %s3798_s20  ;;  %v3369_v32 = vunpack.i.l.bf16 %v3368_v6  ;;  %v2059_v25 = vsel %vm2034_vm13, %v2017_v56, %v3359_v58  ;;  %v7030_v6 = vld [vmem:[#allocation27_spill] sm:$0xff] }
 0x167   : > { %v2060_v31 = vsel %vm2034_vm13, %v2018_v41, %v3360_v0  ;;  %v7025_v62 = vpack.i.bf16 %v7023_v34, %v7024_v13  ;;  %v2101_v35 = vsel %vm2076_vm14, %v2059_v25, %v3364_v59  ;;  %v3676_v54 = vpack.i.bf16 %v667_v28, %v665_v7  ;;  %v7035_v34 = vld [vmem:[#allocation18_spill] sm:$0xff] }
 0x168   : > { %v2102_v4 = vsel %vm2076_vm14, %v2060_v31, %v3365_v57  ;;  %v750_v27 = vsel %vm707_vm5, %v747_v30, %v749_v63  ;;  %v1873_v18 = vsel %vm1866_vm9, %v5805_v55, %v3104_v45  ;;  %v1874_v52 = vsel %vm1866_vm9, %v5801_v22, %v3105_v1  ;;  %v3388_v56 = vpop.permute.xlu1 %3387 }
 0x169   : > { %3652 = vrot.lane.b32.xlu0 %v7025_v62, %s3799_s22  ;;  %v2130_v26 = vpack.c.bf16 %v2102_v4, %v2101_v35  ;;  %v7026_v9 = vrot.slane %v7020_v11, 6  ;;  %v1915_v15 = vsel %vm1908_vm10, %v1873_v18, %v3204_v44  ;;  %v1916_v23 = vsel %vm1908_vm10, %v1874_v52, %v3205_v10  ;;  %v3383_v45 = vpop.permute.xlu0 %3382  ;;  %v7032_v44 = vld [vmem:[#allocation21_spill] sm:$0xff] }
 0x16a   : > { %v3375_v47 = vunpack.i.h.bf16 %v3373_v61  ;;  %v3374_v8 = vunpack.i.l.bf16 %v3373_v61  ;;  %3667 = vrot.lane.b32.xlu1 %v6006_v16, %s3796_s12  ;;  %v1957_v55 = vsel %vm1950_vm11, %v1915_v15, %v3369_v32  ;;  %v1958_v30 = vsel %vm1950_vm11, %v1916_v23, %v3370_v51  ;;  %v7033_v32 = vld [vmem:[#allocation7_spill] sm:$0xff]  ;;  %v7036_v15 = vld [vmem:[#allocation22_spill] sm:$0xff] }
 0x16b   : > { %v752_v14 = vsel %vm707_vm5, %v749_v63, %v7026_v9  ;;  %v3380_v22 = vunpack.i.h.bf16 %v3378_v40  ;;  %v3379_v29 = vunpack.i.l.bf16 %v3378_v40  ;;  %2794 = vmatmul.mubr.msk.bf16.gmra.mxu1 %vm2159_vm15, %v2130_v26  ;;  %v7028_v17 = vunpack.i.l.bf16 %v7027_v36  ;;  %v7031_v63 = vld [vmem:[#allocation24_spill] sm:$0xff] }
 0x16c   : > { %v3054_v0 = vunpack.i.l.bf16 %v6987_v12  ;;  %v1999_v58 = vsel %vm1992_vm12, %v1957_v55, %v3374_v8  ;;  %v2000_v16 = vsel %vm1992_vm12, %v1958_v30, %v3375_v47  ;;  %2797 = vmatprep.mubr.msk.bf16.mxu1 %vm3801_vm8, %v7003_v39  ;;  %v7029_v41 = vunpack.i.h.bf16 %v6987_v12 }
 0x16d   : > { %3662 = vrot.lane.b32.xlu0 %v3661_v21, %s3800_s28  ;;  %v1809_v3 = vsel %vm1782_vm6, %v3728_v38, %v7028_v17  ;;  %v3155_v37 = vunpack.i.h.bf16 %v7031_v63  ;;  %v3154_v1 = vunpack.i.l.bf16 %v7031_v63  ;;  %v3681_v43 = vpack.i.bf16 %v752_v14, %v750_v27  ;;  %v3729_v14 = vld [vmem:[%s3881_s5 + $0x40] sm:$0xff]  ;;  %v7038_v38 = vld [vmem:[#allocation42_spill] sm:$0xff] }
 0x16e   : > { %v1852_v21 = vsel %vm1824_vm7, %v7030_v6, %v7029_v41  ;;  %v3255_v53 = vunpack.i.h.bf16 %v5843_v20  ;;  %v3254_v7 = vunpack.i.l.bf16 %v5843_v20  ;;  %v3385_v11 = vunpack.i.h.bf16 %v3383_v45  ;;  %3677 = vrot.lane.b32.xlu1 %v3676_v54, %s3798_s20  ;;  %v3398_v20 = vpop.permute.xlu1 %3397  ;;  %v3393_v54 = vpop.permute.xlu0 %3392 }
 0x16f   : > { %v3384_v49 = vunpack.i.l.bf16 %v3383_v45  ;;  %v3390_v28 = vunpack.i.h.bf16 %v3388_v56  ;;  %v3389_v5 = vunpack.i.l.bf16 %v3388_v56  ;;  %v2041_v12 = vsel %vm2034_vm13, %v1999_v58, %v3379_v29  ;;  %v7041_v56 = vld [vmem:[#allocation37_spill] sm:$0xff] }
 0x170   : > { %v2042_v10 = vsel %vm2034_vm13, %v2000_v16, %v3380_v22  ;;  %v1851_v57 = vsel %vm1824_vm7, %v1809_v3, %v3054_v0  ;;  %v7034_v25 = vrot.slane %v7033_v32, 3  ;;  %v3009_v62 = vunpack.i.l.bf16 %v7035_v34  ;;  %v7039_v0 = vld [vmem:[#allocation5_spill] sm:$0xff] }
 0x171   : > { %3672 = vrot.lane.b32.xlu0 %v7032_v44, %s3799_s22  ;;  %v2083_v59 = vsel %vm2076_vm14, %v2041_v12, %v3384_v49  ;;  %v2084_v51 = vsel %vm2076_vm14, %v2042_v10, %v3385_v11  ;;  %v1893_v35 = vsel %vm1866_vm9, %v1851_v57, %v3154_v1  ;;  %v1894_v4 = vsel %vm1866_vm9, %v1852_v21, %v3155_v37  ;;  %v7042_v37 = vld [vmem:[#allocation12_spill] sm:$0xff] }
 0x172   : > { %v534_v31 = vsel %vm452_vm3, %v532_v50, %v7034_v25  ;;  %v2121_v40 = vpack.c.bf16 %v2084_v51, %v2083_v59  ;;  %v1935_v27 = vsel %vm1908_vm10, %v1893_v35, %v3254_v7  ;;  %v1936_v18 = vsel %vm1908_vm10, %v1894_v4, %v3255_v53  ;;  %3682 = vrot.lane.b32.xlu1 %v3681_v43, %s3800_s28  ;;  %v3408_v22 = vpop.permute.xlu1 %3407  ;;  %v3403_v3 = vpop.permute.xlu0 %3402  ;;  %v7043_v7 = vld [vmem:[#allocation52_spill] sm:$0xff] }
 0x173   : > { %v3395_v52 = vunpack.i.h.bf16 %v3393_v54  ;;  %v3394_v26 = vunpack.i.l.bf16 %v3393_v54  ;;  %v1977_v24 = vsel %vm1950_vm11, %v1935_v27, %v3389_v5  ;;  %v1978_v50 = vsel %vm1950_vm11, %v1936_v18, %v3390_v28 }
 0x174   : > { %v3400_v61 = vunpack.i.h.bf16 %v3398_v20  ;;  %v3399_v9 = vunpack.i.l.bf16 %v3398_v20  ;;  %2758 = vmatmul.mubr.msk.bf16.gmra.mxu0 %vm2159_vm15, %v2121_v40  ;;  %v7037_v23 = vunpack.i.l.bf16 %v7036_v15  ;;  %v3010_v8 = vunpack.i.h.bf16 %v7035_v34 }
 0x175   : > { %1244 = vrot.lane.b32.xlu0 %v534_v31, %s3795_s9  ;;  %v2019_v55 = vsel %vm1992_vm12, %v1977_v24, %v3394_v26  ;;  %v2020_v30 = vsel %vm1992_vm12, %v1978_v50, %v3395_v52  ;;  %2761 = vmatprep.mubr.msk.bf16.mxu0 %vm3801_vm8, %v7003_v39  ;;  %v3110_v36 = vunpack.i.h.bf16 %v7038_v38  ;;  %v3109_v17 = vunpack.i.l.bf16 %v7038_v38 }
 0x176   : > { %v1791_v47 = vsel %vm1782_vm6, %v3729_v14, %v7037_v23  ;;  %v7040_v58 = vrot.slane %v7039_v0, 6  ;;  %v3210_v41 = vunpack.i.h.bf16 %v7041_v56  ;;  %v3209_v6 = vunpack.i.l.bf16 %v7041_v56  ;;  %1491 = vrot.lane.b32.xlu1 %v7042_v37, %s3799_s22  ;;  %v3418_v28 = vpop.permute.xlu1 %3417 }
 0x177   : > { %v1833_v29 = vsel %vm1824_vm7, %v1791_v47, %v3009_v62  ;;  %v3405_v21 = vunpack.i.h.bf16 %v3403_v3  ;;  %v3404_v63 = vunpack.i.l.bf16 %v3403_v3  ;;  %v3410_v1 = vunpack.i.h.bf16 %v3408_v22 }
 0x178   : > { %v789_v16 = vsel %vm707_vm5, %v787_v48, %v7040_v58  ;;  %v3409_v45 = vunpack.i.l.bf16 %v3408_v22  ;;  %v2061_v43 = vsel %vm2034_vm13, %v2019_v55, %v3399_v9  ;;  %v2062_v53 = vsel %vm2034_vm13, %v2020_v30, %v3400_v61 }
 0x179   : > { %1368 = vrot.lane.b32.xlu0 %v7024_v13, %s3796_s12  ;;  %v1834_v48 = vsel %vm1824_vm7, %v7043_v7, %v3010_v8  ;;  %v2103_v11 = vsel %vm2076_vm14, %v2061_v43, %v3404_v63  ;;  %v2104_v49 = vsel %vm2076_vm14, %v2062_v53, %v3405_v21  ;;  %v7044_v5 = vrot.slane %v7039_v0, 5  ;;  %v3413_v13 = vpop.permute.xlu0 %3412  ;;  %v7047_v53 = vld [vmem:[#allocation44_spill] sm:$0xff]  ;;  %s2618_s12 = sshll.u32 %s6469_s10, 4  ;;  %s6597_s12 = int_to_ptr.vmem [resolvable:$true] %s2618_s12 }
 0x17a   : > { %v1875_v10 = vsel %vm1866_vm9, %v1833_v29, %v3109_v17  ;;  %v1876_v44 = vsel %vm1866_vm9, %v1834_v48, %v3110_v36  ;;  %v2131_v57 = vpack.c.bf16 %v2104_v49, %v2103_v11  ;;  %v3415_v20 = vunpack.i.h.bf16 %v3413_v13  ;;  %1739 = vrot.lane.b32.xlu1 %v789_v16, %s3800_s28  ;;  %v3428_v35 = vpop.permute.xlu1 %3427  ;;  %v7045_v17 = vld [vmem:[#allocation15_spill] sm:$0xff]  ;;  %s3730_s22 = scalar_lea.vmem %s6597_s12, 5248  ;;  %s3736_s28 = scalar_lea.vmem %s3735_s27, 10496 }
 0x17b   : > { %v704_v12 = vsel %vm622_vm4, %v702_v33, %v7044_v5  ;;  %v1917_v59 = vsel %vm1908_vm10, %v1875_v10, %v3209_v6  ;;  %v1918_v51 = vsel %vm1908_vm10, %v1876_v44, %v3210_v41  ;;  %v3414_v32 = vunpack.i.l.bf16 %v3413_v13  ;;  %p3731_p11 = scmp.ne.s32.totalorder %s6597_s12, %s3730_s22  ;;  %p3737_p0 = scmp.lt.s32.totalorder %s6597_s12, %s3735_s27 }
 0x17c   : > { %v1959_v25 = vsel %vm1950_vm11, %v1917_v59, %v3409_v45  ;;  %v1960_v2 = vsel %vm1950_vm11, %v1918_v51, %v3410_v1  ;;  %v3420_v31 = vunpack.i.h.bf16 %v3418_v28  ;;  %v3419_v33 = vunpack.i.l.bf16 %v3418_v28  ;;  %2798 = vmatmul.mubr.msk.bf16.gmra.mxu1 %vm2159_vm15, %v2131_v57  ;;  %v7046_v45 = vld [vmem:[#allocation43_spill] sm:$0xff]  ;;  %p3738_p1 = scmp.lt.s32.totalorder %s3736_s28, %s3730_s22 }
 0x17d   : > { %1615 = vrot.lane.b32.xlu0 %v704_v12, %s3798_s20  ;;  %v2001_v34 = vsel %vm1992_vm12, %v1959_v25, %v3414_v32  ;;  %v2002_v62 = vsel %vm1992_vm12, %v1960_v2, %v3415_v20  ;;  %2801 = vmatprep.mubr.msk.bf16.mxu1 %vm3801_vm8, %v7003_v39  ;;  %v3423_v4 = vpop.permute.xlu0 %3422  ;;  %v3430_v27 = vunpack.i.h.bf16 %v3428_v35  ;;  %v3429_v18 = vunpack.i.l.bf16 %v3428_v35  ;;  %s6595_s20 = scalar_lea.hbm %s6647_s4, %s2714_s11  ;;  %p3732_p12 = pnand %p3731_p11, %p3867_p5 }
 0x17e   : > { %v3425_v40 = vunpack.i.h.bf16 %v3423_v4  ;;  %v3424_v54 = vunpack.i.l.bf16 %v3423_v4  ;;  %v2043_v52 = vsel %vm2034_vm13, %v2001_v34, %v3419_v33  ;;  %v2044_v26 = vsel %vm2034_vm13, %v2002_v62, %v3420_v31  ;;  %v3438_v61 = vpop.permute.xlu1 %3437  ;;  %p3739_p2 = por %p3738_p1, %p3737_p0 }
 0x17f   : > { %v1979_v47 = vsel %vm1950_vm11, %v5867_v42, %v3429_v18  ;;  %v1980_v8 = vsel %vm1950_vm11, %v5871_v60, %v3430_v27  ;;  %v3440_v55 = vunpack.i.h.bf16 %v3438_v61  ;;  %v3439_v30 = vunpack.i.l.bf16 %v3438_v61  ;;  %v7048_v61 = vld [vmem:[#allocation14_spill] sm:$0xff]  ;;  %p3733_p13 = pneg %p3732_p12 }
 0x180   : > { %v2085_v24 = vsel %vm2076_vm14, %v2043_v52, %v3424_v54  ;;  %v2086_v50 = vsel %vm2076_vm14, %v2044_v26, %v3425_v40  ;;  %v3215_v3 = vunpack.i.h.bf16 %v7045_v17  ;;  %v3214_v42 = vunpack.i.l.bf16 %v7045_v17  ;;  %v7050_v17 = vld [vmem:[#allocation47_spill] sm:$0xff] }
 0x181   : > { %v2122_v9 = vpack.c.bf16 %v2086_v50, %v2085_v24  ;;  %v3433_v14 = vpop.permute.xlu0 %3432  ;;  %p3740_p3 = pnand %p3739_p2, %p3733_p13 }
 0x182   : > { %v3435_v15 = vunpack.i.h.bf16 %v3433_v14  ;;  %v3434_v23 = vunpack.i.l.bf16 %v3433_v14  ;;  %v3448_v38 = vpop.permute.xlu1 %3447  ;;  %v1919_v43 = vsel %vm1908_vm10, %v7046_v45, %v3214_v42  ;;  %v1920_v7 = vsel %vm1908_vm10, %v7047_v53, %v3215_v3 }
 0x183   : > { %2762 = vmatmul.mubr.msk.bf16.gmra.mxu0 %vm2159_vm15, %v2122_v9  ;;  %v3450_v60 = vunpack.i.h.bf16 %v3448_v38  ;;  %v3449_v16 = vunpack.i.l.bf16 %v3448_v38  ;;  %v3220_v9 = vunpack.i.h.bf16 %v7048_v61  ;;  %v3219_v14 = vunpack.i.l.bf16 %v7048_v61  ;;  %v7049_v38 = vld [vmem:[#allocation46_spill] sm:$0xff] }
 0x184   : > { %v2021_v22 = vsel %vm1992_vm12, %v1979_v47, %v3434_v23  ;;  %v2022_v29 = vsel %vm1992_vm12, %v1980_v8, %v3435_v15  ;;  %2765 = vmatprep.mubr.msk.bf16.mxu0 %vm3801_vm8, %v7003_v39 }
 0x185   : > { %v3443_v36 = vpop.permute.xlu0 %3442  ;;  %v2063_v56 = vsel %vm2034_vm13, %v2021_v22, %v3439_v30  ;;  %v2064_v41 = vsel %vm2034_vm13, %v2022_v29, %v3440_v55  ;;  %v1961_v49 = vsel %vm1950_vm11, %v1919_v43, %v3449_v16  ;;  %v1962_v28 = vsel %vm1950_vm11, %v1920_v7, %v3450_v60 }
 0x186   : > { %v3445_v0 = vunpack.i.h.bf16 %v3443_v36  ;;  %v3444_v58 = vunpack.i.l.bf16 %v3443_v36  ;;  %v3458_v63 = vpop.permute.xlu1 %3457  ;;  %v1921_v36 = vsel %vm1908_vm10, %v7049_v38, %v3219_v14  ;;  %v1922_v3 = vsel %vm1908_vm10, %v7050_v17, %v3220_v9 }
 0x187   : > { %v3460_v5 = vunpack.i.h.bf16 %v3458_v63  ;;  %v3459_v12 = vunpack.i.l.bf16 %v3458_v63 }
 0x188   : > { %v2105_v6 = vsel %vm2076_vm14, %v2063_v56, %v3444_v58  ;;  %v2106_v21 = vsel %vm2076_vm14, %v2064_v41, %v3445_v0 }
 0x189   : > { %v2132_v37 = vpack.c.bf16 %v2106_v21, %v2105_v6  ;;  %v3453_v1 = vpop.permute.xlu0 %3452 }
 0x18a   : > { %v3455_v48 = vunpack.i.h.bf16 %v3453_v1  ;;  %v3454_v11 = vunpack.i.l.bf16 %v3453_v1  ;;  %v3468_v57 = vpop.permute.xlu1 %3467 }
 0x18b   : > { %2802 = vmatmul.mubr.msk.bf16.gmra.mxu1 %vm2159_vm15, %v2132_v37  ;;  %v3470_v20 = vunpack.i.h.bf16 %v3468_v57  ;;  %v3469_v32 = vunpack.i.l.bf16 %v3468_v57 }
 0x18c   : > { %v2003_v10 = vsel %vm1992_vm12, %v1961_v49, %v3454_v11  ;;  %v2004_v44 = vsel %vm1992_vm12, %v1962_v28, %v3455_v48  ;;  %2805 = vmatprep.mubr.msk.bf16.mxu1 %vm3801_vm8, %v7003_v39 }
 0x18d   : > { %v3463_v13 = vpop.permute.xlu0 %3462  ;;  %v2045_v25 = vsel %vm2034_vm13, %v2003_v10, %v3459_v12  ;;  %v2046_v2 = vsel %vm2034_vm13, %v2004_v44, %v3460_v5  ;;  %v1981_v54 = vsel %vm1950_vm11, %v5919_v46, %v3469_v32  ;;  %v1982_v27 = vsel %vm1950_vm11, %v5923_v19, %v3470_v20 }
 0x18e   : > { %v3465_v59 = vunpack.i.h.bf16 %v3463_v13  ;;  %v3464_v51 = vunpack.i.l.bf16 %v3463_v13  ;;  %v3478_v34 = vpop.permute.xlu1 %3477  ;;  %v7051_v13 = vld [vmem:[#allocation33_spill] sm:$0xff] }
 0x18f   : > { %v3480_v18 = vunpack.i.h.bf16 %v3478_v34  ;;  %v3479_v52 = vunpack.i.l.bf16 %v3478_v34 }
 0x190   : > { %v2087_v31 = vsel %vm2076_vm14, %v2045_v25, %v3464_v51  ;;  %v2088_v33 = vsel %vm2076_vm14, %v2046_v2, %v3465_v59  ;;  %v7052_v51 = vld [vmem:[#allocation34_spill] sm:$0xff] }
 0x191   : > { %v2123_v62 = vpack.c.bf16 %v2088_v33, %v2087_v31  ;;  %v3473_v35 = vpop.permute.xlu0 %3472 }
 0x192   : > { %v3475_v4 = vunpack.i.h.bf16 %v3473_v35  ;;  %v3474_v40 = vunpack.i.l.bf16 %v3473_v35  ;;  %v3488_v50 = vpop.permute.xlu1 %3487 }
 0x193   : > { %2766 = vmatmul.mubr.msk.bf16.gmra.mxu0 %vm2159_vm15, %v2123_v62  ;;  %v3490_v19 = vunpack.i.h.bf16 %v3488_v50  ;;  %v3489_v47 = vunpack.i.l.bf16 %v3488_v50 }
 0x194   : > { %v2023_v26 = vsel %vm1992_vm12, %v1981_v54, %v3474_v40  ;;  %v2024_v24 = vsel %vm1992_vm12, %v1982_v27, %v3475_v4  ;;  %2769 = vmatprep.mubr.msk.bf16.mxu0 %vm3801_vm8, %v7003_v39 }
 0x195   : > { %v3483_v46 = vpop.permute.xlu0 %3482  ;;  %v2065_v8 = vsel %vm2034_vm13, %v2023_v26, %v3479_v52  ;;  %v2066_v55 = vsel %vm2034_vm13, %v2024_v24, %v3480_v18  ;;  %v1963_v41 = vsel %vm1950_vm11, %v1921_v36, %v3489_v47  ;;  %v1964_v6 = vsel %vm1950_vm11, %v1922_v3, %v3490_v19 }
 0x196   : > { %v3485_v15 = vunpack.i.h.bf16 %v3483_v46  ;;  %v3484_v23 = vunpack.i.l.bf16 %v3483_v46  ;;  %v3498_v29 = vpop.permute.xlu1 %3497 }
 0x197   : > { %v3500_v58 = vunpack.i.h.bf16 %v3498_v29  ;;  %v3499_v60 = vunpack.i.l.bf16 %v3498_v29 }
 0x198   : > { %v2107_v30 = vsel %vm2076_vm14, %v2065_v8, %v3484_v23  ;;  %v2108_v22 = vsel %vm2076_vm14, %v2066_v55, %v3485_v15  ;;  %v7053_v8 = vld [vmem:[#allocation26_spill] sm:$0xff] }
 0x199   : > { %v2133_v42 = vpack.c.bf16 %v2108_v22, %v2107_v30  ;;  %v3493_v0 = vpop.permute.xlu0 %3492  ;;  %v7054_v30 = vld [vmem:[#allocation60_spill] sm:$0xff] }
 0x19a   : > { %v3495_v16 = vunpack.i.h.bf16 %v3493_v0  ;;  %v3494_v56 = vunpack.i.l.bf16 %v3493_v0  ;;  %v3508_v37 = vpop.permute.xlu1 %3507 }
 0x19b   : > { %2806 = vmatmul.mubr.msk.bf16.gmra.mxu1 %vm2159_vm15, %v2133_v42  ;;  %v3510_v1 = vunpack.i.h.bf16 %v3508_v37  ;;  %v3509_v45 = vunpack.i.l.bf16 %v3508_v37 }
 0x19c   : > { %v2005_v21 = vsel %vm1992_vm12, %v1963_v41, %v3494_v56  ;;  %v2006_v63 = vsel %vm1992_vm12, %v1964_v6, %v3495_v16  ;;  %2809 = vmatprep.mubr.msk.bf16.mxu1 %vm3801_vm8, %v7003_v39 }
 0x19d   : > { %v3503_v43 = vpop.permute.xlu0 %3502  ;;  %v2047_v53 = vsel %vm2034_vm13, %v2005_v21, %v3499_v60  ;;  %v2048_v7 = vsel %vm2034_vm13, %v2006_v63, %v3500_v58 }
 0x19e   : > { %v2089_v48 = vsel %vm2076_vm14, %v2047_v53, %v3509_v45  ;;  %v2090_v11 = vsel %vm2076_vm14, %v2048_v7, %v3510_v1  ;;  %v3505_v49 = vunpack.i.h.bf16 %v3503_v43  ;;  %v3504_v28 = vunpack.i.l.bf16 %v3503_v43  ;;  %v3518_v12 = vpop.permute.xlu1 %3517  ;;  %v7055_v53 = vld [vmem:[#allocation32_spill] sm:$0xff] }
 0x19f   : > { %v2124_v5 = vpack.c.bf16 %v2090_v11, %v2089_v48  ;;  %v3520_v32 = vunpack.i.h.bf16 %v3518_v12  ;;  %v3519_v25 = vunpack.i.l.bf16 %v3518_v12  ;;  %v7056_v48 = vld [vmem:[#allocation17_spill] sm:$0xff] }
 0x1a0   : > { %v1941_v59 = vsel %vm1908_vm10, %v7051_v13, %v3504_v28  ;;  %v1942_v20 = vsel %vm1908_vm10, %v7052_v51, %v3505_v49 }
 0x1a1   : > { %v3513_v10 = vpop.permute.xlu0 %3512  ;;  %2770 = vmatmul.mubr.msk.bf16.gmra.mxu0 %vm2159_vm15, %v2124_v5 }
 0x1a2   : > { %v3515_v44 = vunpack.i.h.bf16 %v3513_v10  ;;  %v3514_v57 = vunpack.i.l.bf16 %v3513_v10  ;;  %2773 = vmatprep.mubr.msk.bf16.mxu0 %vm3801_vm8, %v7003_v39  ;;  %v3528_v33 = vpop.permute.xlu1 %3527 }
 0x1a3   : > { %v3530_v34 = vunpack.i.h.bf16 %v3528_v33  ;;  %v3529_v62 = vunpack.i.l.bf16 %v3528_v33 }
 0x1a4   : > { %v1983_v2 = vsel %vm1950_vm11, %v1941_v59, %v3514_v57  ;;  %v1984_v31 = vsel %vm1950_vm11, %v1942_v20, %v3515_v44 }
 0x1a5   : > { %v3523_v35 = vpop.permute.xlu0 %3522  ;;  %v2025_v54 = vsel %vm1992_vm12, %v1983_v2, %v3519_v25  ;;  %v2026_v27 = vsel %vm1992_vm12, %v1984_v31, %v3520_v32 }
 0x1a6   : > { %v3525_v4 = vunpack.i.h.bf16 %v3523_v35  ;;  %v3524_v40 = vunpack.i.l.bf16 %v3523_v35  ;;  %v3538_v26 = vpop.permute.xlu1 %3537 }
 0x1a7   : > { %v3540_v19 = vunpack.i.h.bf16 %v3538_v26  ;;  %v3539_v47 = vunpack.i.l.bf16 %v3538_v26  ;;  %v7057_v26 = vld [vmem:[#allocation16_spill] sm:$0xff] }
 0x1a8   : > { %v2067_v18 = vsel %vm2034_vm13, %v2025_v54, %v3524_v40  ;;  %v2068_v52 = vsel %vm2034_vm13, %v2026_v27, %v3525_v4 }
 0x1a9   : > { %v3533_v24 = vpop.permute.xlu0 %3532  ;;  %v2109_v50 = vsel %vm2076_vm14, %v2067_v18, %v3529_v62  ;;  %v2110_v61 = vsel %vm2076_vm14, %v2068_v52, %v3530_v34 }
 0x1aa   : > { %v2134_v9 = vpack.c.bf16 %v2110_v61, %v2109_v50  ;;  %v3535_v14 = vunpack.i.h.bf16 %v3533_v24  ;;  %v3534_v46 = vunpack.i.l.bf16 %v3533_v24  ;;  %v3548_v15 = vpop.permute.xlu1 %3547  ;;  %v7058_v50 = vld [vmem:[#allocation23_spill] sm:$0xff] }
 0x1ab   : > { %v3550_v17 = vunpack.i.h.bf16 %v3548_v15  ;;  %v3549_v3 = vunpack.i.l.bf16 %v3548_v15 }
 0x1ac   : > { %2810 = vmatmul.mubr.msk.bf16.gmra.mxu1 %vm2159_vm15, %v2134_v9  ;;  %v1965_v55 = vsel %vm1950_vm11, %v7053_v8, %v3534_v46  ;;  %v1966_v22 = vsel %vm1950_vm11, %v7054_v30, %v3535_v14 }
 0x1ad   : > { %v3543_v23 = vpop.permute.xlu0 %3542  ;;  %2813 = vmatprep.mubr.msk.bf16.mxu1 %vm3801_vm8, %v7003_v39  ;;  %v2007_v0 = vsel %vm1992_vm12, %v1965_v55, %v3539_v47  ;;  %v2008_v58 = vsel %vm1992_vm12, %v1966_v22, %v3540_v19  ;;  %v1943_v7 = vsel %vm1908_vm10, %v7055_v53, %v3549_v3  ;;  %v1944_v11 = vsel %vm1908_vm10, %v7056_v48, %v3550_v17 }
 0x1ae   : > { %v3545_v29 = vunpack.i.h.bf16 %v3543_v23  ;;  %v3544_v38 = vunpack.i.l.bf16 %v3543_v23  ;;  %v3558_v36 = vpop.permute.xlu1 %3557 }
 0x1af   : > { %v3560_v6 = vunpack.i.h.bf16 %v3558_v36  ;;  %v3559_v21 = vunpack.i.l.bf16 %v3558_v36 }
 0x1b0   : > { %v2049_v56 = vsel %vm2034_vm13, %v2007_v0, %v3544_v38  ;;  %v2050_v41 = vsel %vm2034_vm13, %v2008_v58, %v3545_v29  ;;  %v7059_v0 = vld [vmem:[#allocation28_spill] sm:$0xff] }
 0x1b1   : > { %v3553_v42 = vpop.permute.xlu0 %3552  ;;  %v1985_v5 = vsel %vm1950_vm11, %v1943_v7, %v3559_v21  ;;  %v1986_v12 = vsel %vm1950_vm11, %v1944_v11, %v3560_v6 }
 0x1b2   : > { %v3555_v60 = vunpack.i.h.bf16 %v3553_v42  ;;  %v3554_v16 = vunpack.i.l.bf16 %v3553_v42 }
 0x1b3   : > { %v3568_v1 = vpop.permute.xlu1 %3567 }
 0x1b4   : > { %v2091_v63 = vsel %vm2076_vm14, %v2049_v56, %v3554_v16  ;;  %v2092_v37 = vsel %vm2076_vm14, %v2050_v41, %v3555_v60  ;;  %v3570_v10 = vunpack.i.h.bf16 %v3568_v1  ;;  %v3569_v44 = vunpack.i.l.bf16 %v3568_v1  ;;  %v7060_v60 = vld [vmem:[#allocation56_spill] sm:$0xff] }
 0x1b5   : > { %v2125_v45 = vpack.c.bf16 %v2092_v37, %v2091_v63  ;;  %v3563_v43 = vpop.permute.xlu0 %3562 }
 0x1b6   : > { %v3565_v49 = vunpack.i.h.bf16 %v3563_v43  ;;  %v3564_v28 = vunpack.i.l.bf16 %v3563_v43 }
 0x1b7   : > { %2774 = vmatmul.mubr.msk.bf16.gmra.mxu0 %vm2159_vm15, %v2125_v45  ;;  %v3578_v59 = vpop.permute.xlu1 %3577 }
 0x1b8   : > { %v2027_v57 = vsel %vm1992_vm12, %v1985_v5, %v3564_v28  ;;  %v2028_v13 = vsel %vm1992_vm12, %v1986_v12, %v3565_v49  ;;  %2777 = vmatprep.mubr.msk.bf16.mxu0 %vm3801_vm8, %v7003_v39  ;;  %v3580_v25 = vunpack.i.h.bf16 %v3578_v59  ;;  %v3579_v2 = vunpack.i.l.bf16 %v3578_v59 }
 0x1b9   : > { %v3573_v51 = vpop.permute.xlu0 %3572  ;;  %v2069_v31 = vsel %vm2034_vm13, %v2027_v57, %v3569_v44  ;;  %v2070_v33 = vsel %vm2034_vm13, %v2028_v13, %v3570_v10 }
 0x1ba   : > { %v3575_v20 = vunpack.i.h.bf16 %v3573_v51  ;;  %v3574_v32 = vunpack.i.l.bf16 %v3573_v51  ;;  %v1967_v24 = vsel %vm1950_vm11, %v7057_v26, %v3579_v2  ;;  %v1968_v61 = vsel %vm1950_vm11, %v7058_v50, %v3580_v25  ;;  %v7061_v25 = vld [vmem:[#allocation63_spill] sm:$0xff] }
 0x1bc   : > { %v2111_v34 = vsel %vm2076_vm14, %v2069_v31, %v3574_v32  ;;  %v2112_v62 = vsel %vm2076_vm14, %v2070_v33, %v3575_v20  ;;  %v3588_v35 = vpop.permute.xlu1 %3587  ;;  %v7062_v31 = vld [vmem:[#allocation64_spill] sm:$0xff] }
 0x1bd   : > { %v2135_v4 = vpack.c.bf16 %v2112_v62, %v2111_v34  ;;  %v3583_v40 = vpop.permute.xlu0 %3582  ;;  %v3590_v54 = vunpack.i.h.bf16 %v3588_v35  ;;  %v3589_v27 = vunpack.i.l.bf16 %v3588_v35 }
 0x1be   : > { %v3585_v18 = vunpack.i.h.bf16 %v3583_v40  ;;  %v3584_v52 = vunpack.i.l.bf16 %v3583_v40 }
 0x1bf   : > { %2814 = vmatmul.mubr.msk.bf16.gmra.mxu1 %vm2159_vm15, %v2135_v4 }
 0x1c0   : > { %v2009_v9 = vsel %vm1992_vm12, %v1967_v24, %v3584_v52  ;;  %v2010_v14 = vsel %vm1992_vm12, %v1968_v61, %v3585_v18  ;;  %v3598_v46 = vpop.permute.xlu1 %3597  ;;  %2817 = vmatprep.mubr.msk.bf16.mxu1 %vm3801_vm8, %v7003_v39 }
 0x1c1   : > { %v3600_v15 = vunpack.i.h.bf16 %v3598_v46  ;;  %v3599_v23 = vunpack.i.l.bf16 %v3598_v46  ;;  %v3593_v19 = vpop.permute.xlu0 %3592  ;;  %v2051_v47 = vsel %vm2034_vm13, %v2009_v9, %v3589_v27  ;;  %v2052_v8 = vsel %vm2034_vm13, %v2010_v14, %v3590_v54 }
 0x1c2   : > { %v3595_v22 = vunpack.i.h.bf16 %v3593_v19  ;;  %v3594_v29 = vunpack.i.l.bf16 %v3593_v19 }
 0x1c3   : > { %v2093_v55 = vsel %vm2076_vm14, %v2051_v47, %v3599_v23  ;;  %v2094_v30 = vsel %vm2076_vm14, %v2052_v8, %v3600_v15  ;;  %v7063_v47 = vld [vmem:[#allocation54_spill] sm:$0xff] }
 0x1c4   : > { %v2126_v38 = vpack.c.bf16 %v2094_v30, %v2093_v55  ;;  %v3608_v36 = vpop.permute.xlu1 %3607  ;;  %v1945_v58 = vsel %vm1908_vm10, %v7059_v0, %v3594_v29  ;;  %v1946_v16 = vsel %vm1908_vm10, %v7060_v60, %v3595_v22  ;;  %v7064_v55 = vld [vmem:[#allocation55_spill] sm:$0xff] }
 0x1c5   : > { %v3603_v17 = vpop.permute.xlu0 %3602  ;;  %v3610_v56 = vunpack.i.h.bf16 %v3608_v36  ;;  %v3609_v41 = vunpack.i.l.bf16 %v3608_v36 }
 0x1c6   : > { %v3605_v3 = vunpack.i.h.bf16 %v3603_v17  ;;  %v3604_v42 = vunpack.i.l.bf16 %v3603_v17  ;;  %2778 = vmatmul.mubr.msk.bf16.gmra.mxu0 %vm2159_vm15, %v2126_v38 }
 0x1c7   : > { %2781 = vmatprep.mubr.msk.bf16.mxu0 %vm3801_vm8, %v7003_v39 }
 0x1c8   : > { %v1987_v6 = vsel %vm1950_vm11, %v1945_v58, %v3604_v42  ;;  %v1988_v21 = vsel %vm1950_vm11, %v1946_v16, %v3605_v3  ;;  %v3618_v63 = vpop.permute.xlu1 %3617 }
 0x1c9   : > { %v3620_v37 = vunpack.i.h.bf16 %v3618_v63  ;;  %v3619_v1 = vunpack.i.l.bf16 %v3618_v63  ;;  %v2029_v7 = vsel %vm1992_vm12, %v1987_v6, %v3609_v41  ;;  %v2030_v48 = vsel %vm1992_vm12, %v1988_v21, %v3610_v56 }
 0x1ca   : > { %v3613_v45 = vpop.permute.xlu0 %3612 }
 0x1cb   : > { %v3615_v43 = vunpack.i.h.bf16 %v3613_v45  ;;  %v3614_v53 = vunpack.i.l.bf16 %v3613_v45 }
 0x1cc   : > { %v3628_v28 = vpop.permute.xlu1 %3627 }
 0x1cd   : > { %v2071_v11 = vsel %vm2034_vm13, %v2029_v7, %v3614_v53  ;;  %v2072_v49 = vsel %vm2034_vm13, %v2030_v48, %v3615_v43  ;;  %v3630_v20 = vunpack.i.h.bf16 %v3628_v28  ;;  %v3629_v32 = vunpack.i.l.bf16 %v3628_v28  ;;  %v7065_v28 = vld [vmem:[#allocation61_spill] sm:$0xff] }
 0x1ce   : > { %v3623_v5 = vpop.permute.xlu0 %3622  ;;  %v2113_v12 = vsel %vm2076_vm14, %v2071_v11, %v3619_v1  ;;  %v2114_v10 = vsel %vm2076_vm14, %v2072_v49, %v3620_v37 }
 0x1cf   : > { %v2136_v44 = vpack.c.bf16 %v2114_v10, %v2113_v12  ;;  %v3625_v57 = vunpack.i.h.bf16 %v3623_v5  ;;  %v3624_v13 = vunpack.i.l.bf16 %v3623_v5  ;;  %v7066_v12 = vld [vmem:[#allocation62_spill] sm:$0xff] }
 0x1d0   : > { %v3638_v59 = vpop.permute.xlu1 %3637 }
 0x1d1   : > { %2818 = vmatmul.mubr.msk.bf16.gmra.mxu1 %vm2159_vm15, %v2136_v44  ;;  %v1969_v2 = vsel %vm1950_vm11, %v7061_v25, %v3624_v13  ;;  %v1970_v33 = vsel %vm1950_vm11, %v7062_v31, %v3625_v57  ;;  %v3640_v4 = vunpack.i.h.bf16 %v3638_v59  ;;  %v3639_v40 = vunpack.i.l.bf16 %v3638_v59 }
 0x1d2   : > { %v3633_v51 = vpop.permute.xlu0 %3632  ;;  %2821 = vmatprep.mubr.msk.bf16.mxu1 %vm3801_vm8, %v7003_v39  ;;  %v2011_v27 = vsel %vm1992_vm12, %v1969_v2, %v3629_v32  ;;  %v2012_v18 = vsel %vm1992_vm12, %v1970_v33, %v3630_v20 }
 0x1d3   : > { %v3635_v34 = vunpack.i.h.bf16 %v3633_v51  ;;  %v3634_v62 = vunpack.i.l.bf16 %v3633_v51  ;;  %v1947_v8 = vsel %vm1908_vm10, %v7063_v47, %v3639_v40  ;;  %v1948_v30 = vsel %vm1908_vm10, %v7064_v55, %v3640_v4 }
 0x1d4   : > { %v3648_v35 = vpop.permute.xlu1 %3647 }
 0x1d5   : > { %v2053_v24 = vsel %vm2034_vm13, %v2011_v27, %v3634_v62  ;;  %v2054_v50 = vsel %vm2034_vm13, %v2012_v18, %v3635_v34  ;;  %v3650_v61 = vunpack.i.h.bf16 %v3648_v35  ;;  %v3649_v9 = vunpack.i.l.bf16 %v3648_v35  ;;  %v7067_v62 = vld [vmem:[#allocation10_spill] sm:$0xff] }
 0x1d6   : > { %v3643_v54 = vpop.permute.xlu0 %3642 }
 0x1d7   : > { %v3645_v52 = vunpack.i.h.bf16 %v3643_v54  ;;  %v3644_v26 = vunpack.i.l.bf16 %v3643_v54  ;;  %v1989_v38 = vsel %vm1950_vm11, %v1947_v8, %v3649_v9  ;;  %v1990_v36 = vsel %vm1950_vm11, %v1948_v30, %v3650_v61  ;;  %v6464_v61 = vld [vmem:[%s6646_s3] ss:$0 sm:$0xff] }
 0x1d8   : > { %v3658_v15 = vpop.permute.xlu1 %3657 }
 0x1d9   : > { %v2095_v14 = vsel %vm2076_vm14, %v2053_v24, %v3644_v26  ;;  %v2096_v46 = vsel %vm2076_vm14, %v2054_v50, %v3645_v52  ;;  %v3660_v17 = vunpack.i.h.bf16 %v3658_v15  ;;  %v3659_v3 = vunpack.i.l.bf16 %v3658_v15  ;;  %v6457_v24 = vld [vmem:[%s6645_s2] ss:$0 sm:$0xff] }
 0x1da   : > { %v2127_v23 = vpack.c.bf16 %v2096_v46, %v2095_v14 }
 0x1db   : > { %v3653_v19 = vpop.permute.xlu0 %3652 }
 0x1dc   : > { %v3655_v22 = vunpack.i.h.bf16 %v3653_v19  ;;  %v3654_v29 = vunpack.i.l.bf16 %v3653_v19  ;;  %2782 = vmatmul.mubr.msk.bf16.gmra.mxu0 %vm2159_vm15, %v2127_v23  ;;  %v3668_v58 = vpop.permute.xlu1 %3667 }
 0x1dd   : > { %2785 = vmatprep.mubr.msk.bf16.mxu0 %vm3801_vm8, %v7003_v39  ;;  %v3670_v41 = vunpack.i.h.bf16 %v3668_v58  ;;  %v3669_v6 = vunpack.i.l.bf16 %v3668_v58 }
 0x1de   : > { %v2031_v42 = vsel %vm1992_vm12, %v1989_v38, %v3654_v29  ;;  %v2032_v0 = vsel %vm1992_vm12, %v1990_v36, %v3655_v22 }
 0x1df   : > { %v3663_v60 = vpop.permute.xlu0 %3662  ;;  %v2073_v21 = vsel %vm2034_vm13, %v2031_v42, %v3659_v3  ;;  %v2074_v63 = vsel %vm2034_vm13, %v2032_v0, %v3660_v17  ;;  %v1971_v5 = vsel %vm1950_vm11, %v7065_v28, %v3669_v6  ;;  %v1972_v10 = vsel %vm1950_vm11, %v7066_v12, %v3670_v41 }
 0x1e0   : > { %v3665_v16 = vunpack.i.h.bf16 %v3663_v60  ;;  %v3664_v56 = vunpack.i.l.bf16 %v3663_v60  ;;  %v3678_v45 = vpop.permute.xlu1 %3677 }
 0x1e1   : > { %v3680_v7 = vunpack.i.h.bf16 %v3678_v45  ;;  %v3679_v48 = vunpack.i.l.bf16 %v3678_v45 }
 0x1e2   : > { %v2115_v37 = vsel %vm2076_vm14, %v2073_v21, %v3664_v56  ;;  %v2116_v1 = vsel %vm2076_vm14, %v2074_v63, %v3665_v16 }
 0x1e3   : > { %v2137_v43 = vpack.c.bf16 %v2116_v1, %v2115_v37  ;;  %v3673_v53 = vpop.permute.xlu0 %3672 }
 0x1e4   : > { %v3675_v11 = vunpack.i.h.bf16 %v3673_v53  ;;  %v3674_v49 = vunpack.i.l.bf16 %v3673_v53  ;;  %v3683_v13 = vpop.permute.xlu1 %3682 }
 0x1e5   : > { %2822 = vmatmul.mubr.msk.bf16.gmra.mxu1 %vm2159_vm15, %v2137_v43  ;;  %v3685_v59 = vunpack.i.h.bf16 %v3683_v13  ;;  %v3684_v51 = vunpack.i.l.bf16 %v3683_v13 }
 0x1e6   : > { %v2013_v44 = vsel %vm1992_vm12, %v1971_v5, %v3674_v49  ;;  %v2014_v57 = vsel %vm1992_vm12, %v1972_v10, %v3675_v11  ;;  %2825 = vmatprep.mubr.msk.bf16.mxu1 %vm3801_vm8, %v7003_v39 }
 0x1e7   : > { %v1245_v20 = vpop.permute.xlu0 %1244  ;;  %v2055_v32 = vsel %vm2034_vm13, %v2013_v44, %v3679_v48  ;;  %v2056_v25 = vsel %vm2034_vm13, %v2014_v57, %v3680_v7 }
 0x1e8   : > { %v2097_v2 = vsel %vm2076_vm14, %v2055_v32, %v3684_v51  ;;  %v2098_v31 = vsel %vm2076_vm14, %v2056_v25, %v3685_v59  ;;  %v1492_v34 = vpop.permute.xlu1 %1491  ;;  %v1949_v35 = vsel %vm1908_vm10, %v7067_v62, %v1245_v20 }
 0x1e9   : > { %v2128_v33 = vpack.c.bf16 %v2098_v31, %v2097_v2 }
 0x1eb   : > { %v1369_v4 = vpop.permute.xlu0 %1368  ;;  %2786 = vmatmul.mubr.msk.bf16.gmra.mxu0 %vm2159_vm15, %v2128_v33 }
 0x1ec   : > { %v1991_v39 = vsel %vm1950_vm11, %v1949_v35, %v1369_v4  ;;  %v1740_v40 = vpop.permute.xlu1 %1739 }
 0x1ed   : > { %v2033_v54 = vsel %vm1992_vm12, %v1991_v39, %v1492_v34 }
 0x1ef   : > { %v1616_v27 = vpop.permute.xlu0 %1615 }
 0x1f0   : > { %v2075_v18 = vsel %vm2034_vm13, %v2033_v54, %v1616_v27 }
 0x1f1   : > { %v2117_v52 = vsel %vm2076_vm14, %v2075_v18, %v1740_v40 }
 0x1f2   : > { %v2138_v26 = vpack.c.bf16 %v2117_v52, %v2117_v52 }
 0x1f4   : > { %2826 = vmatmul.mubr.msk.bf16.gmra.mxu1 %vm2159_vm15, %v2138_v26 }
 0x208   : > { %v2260_v50 = vpop.f32.mrf.mxu0 }
 0x209   : > { %v2433_v9 = vmul.f32 %v6457_v24, %v2260_v50 }
 0x20a   : > { %v2747_v14 = vpop.f32.mrf.mxu0 }
 0x20b   : > { %v2481_v46 = vadd.f32 %v6464_v61, %v2433_v9 }
 0x20c   : > { %v2263_v15 = vpop.f32.mrf.mxu0 }
 0x20d   : > { %v2522_v23 = vmax.f32 %v2481_v46, 0.0  ;;  %v2434_v19 = vmul.f32 %v6457_v24, %v2263_v15 }
 0x20e   : > { %v2748_v47 = vpop.f32.mrf.mxu0 }
 0x20f   : > { %2563 = vst [vmem:[%s6469_s10] sm:$0xff] %v2522_v23  ;;  %v2482_v8 = vadd.f32 %v6464_v61, %v2434_v19 }
 0x211   : > { %v2268_v55 = vpop.f32.mrf.mxu0  ;;  %v2523_v30 = vmax.f32 %v2482_v8, 0.0 }
 0x212   : > { %v2435_v22 = vmul.f32 %v6457_v24, %v2268_v55 }
 0x213   : > { %v2751_v29 = vpop.f32.mrf.mxu0  ;;  %2564 = vst [vmem:[%s6469_s10 + $0x8] sm:$0xff] %v2523_v30 }
 0x214   : > { %v2483_v38 = vadd.f32 %v6464_v61, %v2435_v22 }
 0x215   : > { %v2271_v36 = vpop.f32.mrf.mxu0 }
 0x216   : > { %v2524_v17 = vmax.f32 %v2483_v38, 0.0  ;;  %v2436_v3 = vmul.f32 %v6457_v24, %v2271_v36 }
 0x217   : > { %v2752_v42 = vpop.f32.mrf.mxu0 }
 0x218   : > { %2565 = vst [vmem:[%s6469_s10 + $0x10] sm:$0xff] %v2524_v17  ;;  %v2484_v0 = vadd.f32 %v6464_v61, %v2436_v3 }
 0x219   : > { %v2348_v58 = vpop.f32.mrf.mxu1 }
 0x21a   : > { %v2525_v60 = vmax.f32 %v2484_v0, 0.0  ;;  %v2455_v16 = vmul.f32 %v6457_v24, %v2348_v58 }
 0x21b   : > { %v2791_v56 = vpop.f32.mrf.mxu1 }
 0x21c   : > { %2566 = vst [vmem:[%s6469_s10 + $0x18] sm:$0xff] %v2525_v60  ;;  %v2503_v41 = vadd.f32 %v6464_v61, %v2455_v16 }
 0x21d   : > { %v2351_v6 = vpop.f32.mrf.mxu1 }
 0x21e   : > { %v2544_v21 = vmax.f32 %v2503_v41, 0.0  ;;  %v2456_v63 = vmul.f32 %v6457_v24, %v2351_v6 }
 0x21f   : > { %v2792_v37 = vpop.f32.mrf.mxu1 }
 0x220   : > { %2585 = vst [vmem:[%s6469_s10 + $0xb0] sm:$0xff] %v2544_v21  ;;  %v2504_v1 = vadd.f32 %v6464_v61, %v2456_v63 }
 0x222   : > { %v2276_v45 = vpop.f32.mrf.mxu0  ;;  %v2545_v43 = vmax.f32 %v2504_v1, 0.0 }
 0x223   : > { %v2437_v53 = vmul.f32 %v6457_v24, %v2276_v45 }
 0x224   : > { %v2755_v7 = vpop.f32.mrf.mxu0  ;;  %2586 = vst [vmem:[%s6469_s10 + $0xb8] sm:$0xff] %v2545_v43 }
 0x225   : > { %v2485_v48 = vadd.f32 %v6464_v61, %v2437_v53 }
 0x226   : > { %v2279_v11 = vpop.f32.mrf.mxu0 }
 0x227   : > { %v2526_v49 = vmax.f32 %v2485_v48, 0.0  ;;  %v2438_v28 = vmul.f32 %v6457_v24, %v2279_v11 }
 0x228   : > { %v2756_v5 = vpop.f32.mrf.mxu0 }
 0x229   : > { %2567 = vst [vmem:[%s6469_s10 + $0x20] sm:$0xff] %v2526_v49  ;;  %v2486_v12 = vadd.f32 %v6464_v61, %v2438_v28 }
 0x22b   : > { %v2356_v10 = vpop.f32.mrf.mxu1  ;;  %v2527_v44 = vmax.f32 %v2486_v12, 0.0 }
 0x22c   : > { %v2457_v57 = vmul.f32 %v6457_v24, %v2356_v10 }
 0x22d   : > { %v2795_v13 = vpop.f32.mrf.mxu1  ;;  %2568 = vst [vmem:[%s6469_s10 + $0x28] sm:$0xff] %v2527_v44 }
 0x22e   : > { %v2505_v59 = vadd.f32 %v6464_v61, %v2457_v57 }
 0x22f   : > { %v2359_v51 = vpop.f32.mrf.mxu1 }
 0x230   : > { %v2546_v20 = vmax.f32 %v2505_v59, 0.0  ;;  %v2458_v32 = vmul.f32 %v6457_v24, %v2359_v51 }
 0x231   : > { %v2796_v25 = vpop.f32.mrf.mxu1 }
 0x232   : > { %2587 = vst [vmem:[%s6469_s10 + $0xc0] sm:$0xff] %v2546_v20  ;;  %v2506_v2 = vadd.f32 %v6464_v61, %v2458_v32 }
 0x234   : > { %v2284_v31 = vpop.f32.mrf.mxu0  ;;  %v2547_v33 = vmax.f32 %v2506_v2, 0.0 }
 0x235   : > { %v2439_v34 = vmul.f32 %v6457_v24, %v2284_v31 }
 0x236   : > { %v2759_v62 = vpop.f32.mrf.mxu0  ;;  %2588 = vst [vmem:[%s6469_s10 + $0xc8] sm:$0xff] %v2547_v33 }
 0x237   : > { %v2487_v35 = vadd.f32 %v6464_v61, %v2439_v34 }
 0x238   : > { %v2287_v4 = vpop.f32.mrf.mxu0 }
 0x239   : > { %v2528_v39 = vmax.f32 %v2487_v35, 0.0  ;;  %v2440_v40 = vmul.f32 %v6457_v24, %v2287_v4 }
 0x23a   : > { %v2760_v54 = vpop.f32.mrf.mxu0 }
 0x23b   : > { %2569 = vst [vmem:[%s6469_s10 + $0x30] sm:$0xff] %v2528_v39  ;;  %v2488_v27 = vadd.f32 %v6464_v61, %v2440_v40 }
 0x23c   : > { %v2364_v18 = vpop.f32.mrf.mxu1 }
 0x23d   : > { %v2529_v52 = vmax.f32 %v2488_v27, 0.0  ;;  %v2459_v26 = vmul.f32 %v6457_v24, %v2364_v18 }
 0x23e   : > { %v2799_v50 = vpop.f32.mrf.mxu1 }
 0x23f   : > { %2570 = vst [vmem:[%s6469_s10 + $0x38] sm:$0xff] %v2529_v52  ;;  %v2507_v9 = vadd.f32 %v6464_v61, %v2459_v26 }
 0x240   : > { %v2367_v14 = vpop.f32.mrf.mxu1 }
 0x241   : > { %v2548_v46 = vmax.f32 %v2507_v9, 0.0  ;;  %v2460_v15 = vmul.f32 %v6457_v24, %v2367_v14 }
 0x242   : > { %v2800_v23 = vpop.f32.mrf.mxu1 }
 0x243   : > { %2589 = vst [vmem:[%s6469_s10 + $0xd0] sm:$0xff] %v2548_v46  ;;  %v2508_v19 = vadd.f32 %v6464_v61, %v2460_v15  ;;  %v2292_v47 = vpop.f32.mrf.mxu0 }
 0x244   : > { %v2441_v55 = vmul.f32 %v6457_v24, %v2292_v47 }
 0x245   : > { %v2549_v8 = vmax.f32 %v2508_v19, 0.0  ;;  %v2763_v30 = vpop.f32.mrf.mxu0 }
 0x246   : > { %v2489_v22 = vadd.f32 %v6464_v61, %v2441_v55 }
 0x247   : > { %2590 = vst [vmem:[%s6469_s10 + $0xd8] sm:$0xff] %v2549_v8  ;;  %v2295_v29 = vpop.f32.mrf.mxu0 }
 0x248   : > { %v2530_v38 = vmax.f32 %v2489_v22, 0.0  ;;  %v2442_v36 = vmul.f32 %v6457_v24, %v2295_v29 }
 0x249   : > { %v2764_v17 = vpop.f32.mrf.mxu0 }
 0x24a   : > { %2571 = vst [vmem:[%s6469_s10 + $0x40] sm:$0xff] %v2530_v38  ;;  %v2490_v3 = vadd.f32 %v6464_v61, %v2442_v36 }
 0x24b   : > { %v2372_v42 = vpop.f32.mrf.mxu1 }
 0x24c   : > { %v2531_v0 = vmax.f32 %v2490_v3, 0.0  ;;  %v2461_v58 = vmul.f32 %v6457_v24, %v2372_v42 }
 0x24d   : > { %v2803_v60 = vpop.f32.mrf.mxu1 }
 0x24e   : > { %2572 = vst [vmem:[%s6469_s10 + $0x48] sm:$0xff] %v2531_v0  ;;  %v2509_v16 = vadd.f32 %v6464_v61, %v2461_v58 }
 0x24f   : > { %v2375_v56 = vpop.f32.mrf.mxu1 }
 0x250   : > { %v2550_v41 = vmax.f32 %v2509_v16, 0.0  ;;  %v2462_v6 = vmul.f32 %v6457_v24, %v2375_v56 }
 0x251   : > { %v2804_v21 = vpop.f32.mrf.mxu1 }
 0x252   : > { %2591 = vst [vmem:[%s6469_s10 + $0xe0] sm:$0xff] %v2550_v41  ;;  %v2510_v63 = vadd.f32 %v6464_v61, %v2462_v6 }
 0x253   : > { %v2300_v37 = vpop.f32.mrf.mxu0 }
 0x254   : > { %v2551_v1 = vmax.f32 %v2510_v63, 0.0  ;;  %v2443_v45 = vmul.f32 %v6457_v24, %v2300_v37 }
 0x255   : > { %v2767_v43 = vpop.f32.mrf.mxu0 }
 0x256   : > { %2592 = vst [vmem:[%s6469_s10 + $0xe8] sm:$0xff] %v2551_v1  ;;  %v2491_v53 = vadd.f32 %v6464_v61, %v2443_v45 }
 0x257   : > { %v2303_v7 = vpop.f32.mrf.mxu0 }
 0x258   : > { %v2532_v48 = vmax.f32 %v2491_v53, 0.0  ;;  %v2444_v11 = vmul.f32 %v6457_v24, %v2303_v7 }
 0x259   : > { %v2768_v49 = vpop.f32.mrf.mxu0 }
 0x25a   : > { %2573 = vst [vmem:[%s6469_s10 + $0x50] sm:$0xff] %v2532_v48  ;;  %v2492_v28 = vadd.f32 %v6464_v61, %v2444_v11 }
 0x25b   : > { %v2380_v5 = vpop.f32.mrf.mxu1 }
 0x25c   : > { %v2533_v12 = vmax.f32 %v2492_v28, 0.0  ;;  %v2463_v10 = vmul.f32 %v6457_v24, %v2380_v5 }
 0x25d   : > { %v2807_v44 = vpop.f32.mrf.mxu1 }
 0x25e   : > { %2574 = vst [vmem:[%s6469_s10 + $0x58] sm:$0xff] %v2533_v12  ;;  %v2511_v57 = vadd.f32 %v6464_v61, %v2463_v10 }
 0x25f   : > { %v2383_v13 = vpop.f32.mrf.mxu1 }
 0x260   : > { %v2552_v59 = vmax.f32 %v2511_v57, 0.0  ;;  %v2464_v51 = vmul.f32 %v6457_v24, %v2383_v13 }
 0x261   : > { %v2808_v20 = vpop.f32.mrf.mxu1  ;;  %v2308_v25 = vpop.f32.mrf.mxu0 }
 0x262   : > { %2593 = vst [vmem:[%s6469_s10 + $0xf0] sm:$0xff] %v2552_v59  ;;  %v2512_v32 = vadd.f32 %v6464_v61, %v2464_v51  ;;  %v2445_v2 = vmul.f32 %v6457_v24, %v2308_v25 }
 0x263   : > { %v2771_v33 = vpop.f32.mrf.mxu0 }
 0x264   : > { %v2553_v31 = vmax.f32 %v2512_v32, 0.0  ;;  %v2493_v34 = vadd.f32 %v6464_v61, %v2445_v2 }
 0x265   : > { %v2311_v62 = vpop.f32.mrf.mxu0 }
 0x266   : > { %2594 = vst [vmem:[%s6469_s10 + $0xf8] sm:$0xff] %v2553_v31  ;;  %v2534_v35 = vmax.f32 %v2493_v34, 0.0  ;;  %v2446_v4 = vmul.f32 %v6457_v24, %v2311_v62 }
 0x267   : > { %v2772_v39 = vpop.f32.mrf.mxu0 }
 0x268   : > { %2575 = vst [vmem:[%s6469_s10 + $0x60] sm:$0xff] %v2534_v35  ;;  %v2494_v40 = vadd.f32 %v6464_v61, %v2446_v4 }
 0x26a   : > { %v2535_v54 = vmax.f32 %v2494_v40, 0.0 }
 0x26c   : > { %v2388_v27 = vpop.f32.mrf.mxu1  ;;  %2576 = vst [vmem:[%s6469_s10 + $0x68] sm:$0xff] %v2535_v54 }
 0x26d   : > { %v2465_v18 = vmul.f32 %v6457_v24, %v2388_v27 }
 0x26e   : > { %v2811_v52 = vpop.f32.mrf.mxu1 }
 0x26f   : > { %v2513_v26 = vadd.f32 %v6464_v61, %v2465_v18 }
 0x270   : > { %v2391_v50 = vpop.f32.mrf.mxu1 }
 0x271   : > { %v2554_v9 = vmax.f32 %v2513_v26, 0.0  ;;  %v2466_v14 = vmul.f32 %v6457_v24, %v2391_v50 }
 0x272   : > { %v2812_v46 = vpop.f32.mrf.mxu1 }
 0x273   : > { %2595 = vst [vmem:[%s6469_s10 + $0x100] sm:$0xff] %v2554_v9  ;;  %v2514_v15 = vadd.f32 %v6464_v61, %v2466_v14 }
 0x275   : > { %v2555_v23 = vmax.f32 %v2514_v15, 0.0 }
 0x277   : > { %2596 = vst [vmem:[%s6469_s10 + $0x108] sm:$0xff] %v2555_v23  ;;  %v2316_v19 = vpop.f32.mrf.mxu0 }
 0x278   : > { %v2447_v47 = vmul.f32 %v6457_v24, %v2316_v19 }
 0x279   : > { %v2775_v8 = vpop.f32.mrf.mxu0 }
 0x27a   : > { %v2495_v55 = vadd.f32 %v6464_v61, %v2447_v47 }
 0x27b   : > { %v2319_v30 = vpop.f32.mrf.mxu0 }
 0x27c   : > { %v2536_v22 = vmax.f32 %v2495_v55, 0.0  ;;  %v2448_v29 = vmul.f32 %v6457_v24, %v2319_v30 }
 0x27d   : > { %v2776_v38 = vpop.f32.mrf.mxu0 }
 0x27e   : > { %2577 = vst [vmem:[%s6469_s10 + $0x70] sm:$0xff] %v2536_v22  ;;  %v2496_v36 = vadd.f32 %v6464_v61, %v2448_v29 }
 0x27f   : > { %v2396_v17 = vpop.f32.mrf.mxu1 }
 0x280   : > { %v2537_v3 = vmax.f32 %v2496_v36, 0.0  ;;  %v2467_v42 = vmul.f32 %v6457_v24, %v2396_v17 }
 0x281   : > { %v2815_v0 = vpop.f32.mrf.mxu1 }
 0x282   : > { %2578 = vst [vmem:[%s6469_s10 + $0x78] sm:$0xff] %v2537_v3  ;;  %v2515_v58 = vadd.f32 %v6464_v61, %v2467_v42 }
 0x283   : > { %v2399_v60 = vpop.f32.mrf.mxu1 }
 0x284   : > { %v2556_v16 = vmax.f32 %v2515_v58, 0.0  ;;  %v2468_v56 = vmul.f32 %v6457_v24, %v2399_v60 }
 0x285   : > { %v2816_v41 = vpop.f32.mrf.mxu1 }
 0x286   : > { %2597 = vst [vmem:[%s6469_s10 + $0x110] sm:$0xff] %v2556_v16  ;;  %v2516_v6 = vadd.f32 %v6464_v61, %v2468_v56  ;;  %v2324_v21 = vpop.f32.mrf.mxu0 }
 0x287   : > { %v2449_v63 = vmul.f32 %v6457_v24, %v2324_v21 }
 0x288   : > { %v2557_v37 = vmax.f32 %v2516_v6, 0.0  ;;  %v2779_v1 = vpop.f32.mrf.mxu0 }
 0x289   : > { %v2497_v45 = vadd.f32 %v6464_v61, %v2449_v63 }
 0x28a   : > { %2598 = vst [vmem:[%s6469_s10 + $0x118] sm:$0xff] %v2557_v37  ;;  %v2327_v43 = vpop.f32.mrf.mxu0 }
 0x28b   : > { %v2538_v53 = vmax.f32 %v2497_v45, 0.0  ;;  %v2450_v7 = vmul.f32 %v6457_v24, %v2327_v43 }
 0x28c   : > { %v2780_v48 = vpop.f32.mrf.mxu0 }
 0x28d   : > { %2579 = vst [vmem:[%s6469_s10 + $0x80] sm:$0xff] %v2538_v53  ;;  %v2498_v11 = vadd.f32 %v6464_v61, %v2450_v7 }
 0x28f   : > { %v2539_v49 = vmax.f32 %v2498_v11, 0.0 }
 0x291   : > { %v2404_v28 = vpop.f32.mrf.mxu1  ;;  %2580 = vst [vmem:[%s6469_s10 + $0x88] sm:$0xff] %v2539_v49 }
 0x292   : > { %v2469_v5 = vmul.f32 %v6457_v24, %v2404_v28 }
 0x293   : > { %v2819_v12 = vpop.f32.mrf.mxu1 }
 0x294   : > { %v2517_v10 = vadd.f32 %v6464_v61, %v2469_v5 }
 0x295   : > { %v2407_v44 = vpop.f32.mrf.mxu1 }
 0x296   : > { %v2558_v57 = vmax.f32 %v2517_v10, 0.0  ;;  %v2470_v13 = vmul.f32 %v6457_v24, %v2407_v44 }
 0x297   : > { %v2820_v59 = vpop.f32.mrf.mxu1 }
 0x298   : > { %2599 = vst [vmem:[%s6469_s10 + $0x120] sm:$0xff] %v2558_v57  ;;  %v2518_v51 = vadd.f32 %v6464_v61, %v2470_v13 }
 0x29a   : > { %v2559_v20 = vmax.f32 %v2518_v51, 0.0 }
 0x29c   : > { %2600 = vst [vmem:[%s6469_s10 + $0x128] sm:$0xff] %v2559_v20  ;;  %v2332_v32 = vpop.f32.mrf.mxu0 }
 0x29d   : > { %v2451_v25 = vmul.f32 %v6457_v24, %v2332_v32 }
 0x29e   : > { %v2783_v2 = vpop.f32.mrf.mxu0 }
 0x29f   : > { %v2499_v31 = vadd.f32 %v6464_v61, %v2451_v25 }
 0x2a0   : > { %v2335_v33 = vpop.f32.mrf.mxu0 }
 0x2a1   : > { %v2540_v34 = vmax.f32 %v2499_v31, 0.0  ;;  %v2452_v62 = vmul.f32 %v6457_v24, %v2335_v33 }
 0x2a2   : > { %v2784_v35 = vpop.f32.mrf.mxu0 }
 0x2a3   : > { %2581 = vst [vmem:[%s6469_s10 + $0x90] sm:$0xff] %v2540_v34  ;;  %v2500_v4 = vadd.f32 %v6464_v61, %v2452_v62 }
 0x2a5   : > { %v2412_v39 = vpop.f32.mrf.mxu1  ;;  %v2541_v40 = vmax.f32 %v2500_v4, 0.0 }
 0x2a6   : > { %v2471_v54 = vmul.f32 %v6457_v24, %v2412_v39 }
 0x2a7   : > { %v2823_v27 = vpop.f32.mrf.mxu1  ;;  %2582 = vst [vmem:[%s6469_s10 + $0x98] sm:$0xff] %v2541_v40 }
 0x2a8   : > { %v2519_v18 = vadd.f32 %v6464_v61, %v2471_v54 }
 0x2a9   : > { %v2415_v52 = vpop.f32.mrf.mxu1 }
 0x2aa   : > { %v2560_v26 = vmax.f32 %v2519_v18, 0.0  ;;  %v2472_v50 = vmul.f32 %v6457_v24, %v2415_v52 }
 0x2ab   : > { %v2824_v9 = vpop.f32.mrf.mxu1  ;;  %v2340_v46 = vpop.f32.mrf.mxu0 }
 0x2ac   : > { %2601 = vst [vmem:[%s6469_s10 + $0x130] sm:$0xff] %v2560_v26  ;;  %v2520_v14 = vadd.f32 %v6464_v61, %v2472_v50  ;;  %v2453_v15 = vmul.f32 %v6457_v24, %v2340_v46 }
 0x2ad   : > { %v2787_v19 = vpop.f32.mrf.mxu0 }
 0x2ae   : > { %v2561_v23 = vmax.f32 %v2520_v14, 0.0  ;;  %v2501_v47 = vadd.f32 %v6464_v61, %v2453_v15 }
 0x2af   : > { %v2343_v8 = vpop.f32.mrf.mxu0 }
 0x2b0   : > { %2602 = vst [vmem:[%s6469_s10 + $0x138] sm:$0xff] %v2561_v23  ;;  %v2542_v55 = vmax.f32 %v2501_v47, 0.0  ;;  %v2454_v30 = vmul.f32 %v6457_v24, %v2343_v8 }
 0x2b1   : > { %v2788_v22 = vpop.f32.mrf.mxu0 }
 0x2b2   : > { %2583 = vst [vmem:[%s6469_s10 + $0xa0] sm:$0xff] %v2542_v55  ;;  %v2502_v29 = vadd.f32 %v6464_v61, %v2454_v30 }
 0x2b4   : > { %v2420_v38 = vpop.f32.mrf.mxu1  ;;  %v2543_v36 = vmax.f32 %v2502_v29, 0.0 }
 0x2b5   : > { %v2473_v17 = vmul.f32 %v6457_v24, %v2420_v38 }
 0x2b6   : > { %v2827_v3 = vpop.f32.mrf.mxu1  ;;  %2584 = vst [vmem:[%s6469_s10 + $0xa8] sm:$0xff] %v2543_v36 }
 0x2b7   : > { %v2521_v42 = vadd.f32 %v6464_v61, %v2473_v17 }
 0x2b8   : > { %v2423_v0 = vpop.f32.mrf.mxu1 }
 0x2b9   : > { %v2562_v58 = vmax.f32 %v2521_v42, 0.0 }
 0x2ba   : > { %v2828_v60 = vpop.f32.mrf.mxu1 }
 0x2bb   : > { %2603 = vst [vmem:[%s6469_s10 + $0x140] sm:$0xff] %v2562_v58 }
 0x2bc   : > { %3743 = shalt.err (!%p3740_p3)
}
 0x2bd   : > { %s3744_s29 = scalar_lea.hbm %s6595_s20, 5248  ;;  %s3748_s6 = scalar_lea.hbm %s6647_s4, 10496 }
 0x2be   : > { %p3745_p4 = scmp.ne.s32.totalorder %s6595_s20, %s3744_s29  ;;  %p3749_p9 = scmp.lt.s32.totalorder %s6595_s20, %s6647_s4 }
 0x2bf   : > { %p3750_p10 = scmp.lt.s32.totalorder %s3748_s6, %s3744_s29 }
 0x2c0   : > { %p3746_p7 = pnand %p3745_p4, %p3867_p5 }
 0x2c1   : > { %p3751_p11 = por %p3750_p10, %p3749_p9 }
 0x2c2   : > { %p3747_p8 = pneg %p3746_p7 }
 0x2c4   : > { %p3752_p12 = pnand %p3751_p11, %p3747_p8 }
 0x2c6   : > { %3755 = shalt.err (!%p3752_p12)
}
 0x2c7   : > { %s3803_s10 = smov 128  }
 0x2c8   : > { %2836 = dma.vmem_to_hbm [thread:$0]  (%p3867_p5), %s6597_s12, 5248, %s6595_s20, %s6602_s19, %s3803_s10, %s3803_s10, %s3793_s7  }
 0x2c9 PF: > { %p2842_p13 = scmp.ge.s32.totalorder %s3790_s18, 2  ;;  %s2633_s11 = sand.u32 1, %s3778_s15  }
 0x2ca   : > { %s2634_s13 = scalar_lea.sflag [#allocation3], %s2633_s11 }
 0x2cb   : > { %p2839_p0 = pnand %p2842_p13, %p3871_p6 }
 0x2cd   : > { %p2840_p1 = pneg %p2839_p0 }
 0x2cf   : > { %3773 = dma.done.wait (%p2840_p1), %s2634_s13, 5248  }
 0x2d0   : > { %3775 = vsyncadd (%p2840_p1), %s2634_s13, 4294962048  ;;  %p14_p2 = scmp.ge.s32.totalorder %s3854_s21, 4   ;;  %s7068_s15 = smov %s3782_s16 }
 0x2d1   : > { %s7069_s16 = smov %s3786_s17  ;;  %s7070_s17 = smov %s3865_s24 }
 0x2d2   : > { %s7071_s18 = smov %s3854_s21  ;;  %16 = sbr.rel (!%p14_p2) target bundleno = 3 (0x3), region = 71 }
 0x2d7   :  { %2639 = vsyncpa [#allocation3], 1 }
 0x2d8   :  { %2641 = vsyncpa [#allocation3 + $0x1], 1 }

// kernel: tpu_custom_call.1
= control target key start
LH: loop header
LB: loop body
LE: loop exit
PB: predicated region body
PF: predicated region fallthrough
CT: control target
= control target key end

     0   :  { %9 = vsyncpa [#allocation3], 0  ;;  %s6643_s0 = inlined_call_operand.vmem [shape: f32[656,4], index: 0, kind: input, shape index: {}]   ;;  %s6644_s1 = inlined_call_operand.vmem [shape: bf16[36,128], index: 1, kind: input, shape index: {}]   ;;  %s6645_s2 = inlined_call_operand.vmem [shape: f32[1,128], index: 2, kind: input, shape index: {}]   ;;  %s6646_s3 = inlined_call_operand.vmem [shape: f32[1,128], index: 3, kind: input, shape index: {}]   ;;  %s6647_s4 = inlined_call_operand.hbm [shape: f32[656,128], index: 4, kind: output, shape index: {}]  }
   0x1   :  { %11 = vsyncpa [#allocation3 + $0x1], 0  ;;  %s3829_s15 = smov 0   ;;  %s3831_s16 = smov 0  }
   0x2   :  { %s3833_s17 = smov 0   ;;  %s3835_s18 = smov 0  }
   0x3 LB: > { %s3850_s19 = sadd.s32 4294967295, %s3790_s18   ;;  %s2680_s20 = sadd.s32 4294967294, %s3790_s18   ;;  %s3790_s18 = sphi %s3835_s18, %s7071_s18   ;;  %s3786_s17 = sphi %s3833_s17, %s7070_s17   ;;  %s3782_s16 = sphi %s3831_s16, %s7069_s16   ;;  %s3778_s15 = sphi %s3829_s15, %s7068_s15  }
   0x4   : > { %s3854_s21 = sadd.s32 1, %s3790_s18   ;;  %s113_s22 = sadd.s32 1, %s3786_s17 }
   0x5   : > { %s110_s23 = ssub.s32 %s3790_s18, %s3854_s21  ;;  %p123_p0 = scmp.ne.s32.totalorder %s3786_s17, %s3782_s16 }
   0x6   : > { %p111_p1 = scmp.eq.s32.totalorder %s110_s23, 0  ;;  %p124_p2 = scmp.eq.s32.totalorder %s3850_s19, 1 }
   0x7   : > { %p129_p3 = scmp.ne.s32.totalorder %s3782_s16, %s3778_s15  ;;  %p130_p4 = scmp.eq.s32.totalorder %s2680_s20, 1 }
   0x8   : > { %s3865_s24 = scalar_select %p111_p1, %s3786_s17, %s113_s22  }
   0x9   : > { %p3867_p5 = por %p124_p2, %p123_p0  ;;  %p3871_p6 = por %p130_p4, %p129_p3 }
   0xa   : > { %p2683_p7 = scmp.ge.s32.totalorder %s3790_s18, 1  ;;  %p166_p8 = scmp.lt.s32.totalorder %s3790_s18, 3 }
   0xc   : > { %p167_p9 = pnand %p2683_p7, %p166_p8 }
   0xe   : > { %170 = sbr.rel (%p167_p9) target bundleno = 713 (0x2c9), region = 36 }
  0x13   : > { %s192_s27 = smul.u32 41, %s3850_s19  ;;  %vm282_vm0 = vcmask 1046528   ;;  %s3792_s6 = smov 4   ;;  %vm367_vm1 = vcmask 1045504   ;;  %vm537_vm2 = vcmask 1043456   ;;  %vm452_vm3 = vcmask 1044480  }
  0x14   : > { %s3793_s7 = smov 8   ;;  %s3794_s8 = smov 12   ;;  %vm622_vm4 = vcmask 1042432   ;;  %vm707_vm5 = vcmask 1041408   ;;  %vm1782_vm6 = vcmask 31744   ;;  %vm1824_vm7 = vcmask 64512  }
  0x15   : > { %p193_p10 = scmp.lt.s32.totalorder %s192_s27, 81  ;;  %s3795_s9 = smov 16   ;;  %vm3801_vm8 = vmmov 0   ;;  %vm1866_vm9 = vcmask 97280   ;;  %vm1908_vm10 = vcmask 130048   ;;  %vm1950_vm11 = vcmask 162816  }
  0x16   : > { %s3796_s12 = smov 20   ;;  %s3798_s20 = smov 28   ;;  %vm1992_vm12 = vcmask 195584   ;;  %vm2034_vm13 = vcmask 228352   ;;  %vm2076_vm14 = vcmask 261120   ;;  %vm2159_vm15 = vcmask 293888  }
  0x17   : > { %s7073_s27 = smov (!%p193_p10, %s192_s27), 81  ;;  %s3799_s22 = smov 24  }
  0x18   : > { %s2684_s28 = sshll.u32 %s7073_s27, 3  ;;  %s189_s29 = sand.u32 1, %s3782_s16  }
  0x19   : > { %s3881_s5 = scalar_lea.vmem %s6643_s0, %s2684_s28  ;;  %s3800_s28 = smov 32  }
  0x1a   : > { %v3884_v0 = vld [vmem:[%s3881_s5 + $0x20] sm:$0xff]  ;;  %v3887_v1 = vld [vmem:[%s3881_s5 + $0x28] sm:$0xff]  ;;  %v3890_v2 = vld [vmem:[%s3881_s5 + $0x30] sm:$0xff]  ;;  %s2714_s11 = smul.u32 5248, %s3850_s19  ;;  %s6602_s19 = scalar_lea.sflag [#allocation3], %s189_s29 }
  0x1b   : > { %6745 = vst [vmem:[#allocation5_spill] sm:$0xff] %v3884_v0  ;;  %v290_v3 = vrot.slane %v3884_v0, 1  ;;  %v292_v4 = vrot.slane %v3887_v1, 1  ;;  %v294_v5 = vrot.slane %v3890_v2, 1  ;;  %v3896_v6 = vld [vmem:[%s3881_s5] sm:$0xff]  ;;  %v3899_v7 = vld [vmem:[%s3881_s5 + $0x8] sm:$0xff] }
  0x1c   : > { %6746 = vst [vmem:[#allocation6_spill] sm:$0xff] %v3899_v7  ;;  %v3902_v8 = vld [vmem:[%s3881_s5 + $0x10] sm:$0xff]  ;;  %v283_v9 = vrot.slane %v3896_v6, 1  ;;  %v284_v10 = vrot.slane %v3899_v7, 1  ;;  %v3908_v12 = vld [vmem:[%s3881_s5 + $0x38] sm:$0xff]  ;;  %v3911_v13 = vld [vmem:[%s3881_s5 + $0x40] sm:$0xff] }
  0x1d   : > { %6747 = vst [vmem:[#allocation7_spill] sm:$0xff] %v3902_v8  ;;  %v286_v11 = vrot.slane %v3902_v8, 1  ;;  %v3914_v14 = vld [vmem:[%s3881_s5 + $0x18] sm:$0xff]  ;;  %v293_v15 = vsel %vm282_vm0, %v290_v3, %v292_v4  ;;  %v295_v16 = vsel %vm282_vm0, %v292_v4, %v294_v5  ;;  %v296_v17 = vrot.slane %v3908_v12, 1  ;;  %v3921_v19 = vld [vmem:[%s3881_s5 + $0x50] sm:$0xff]  ;;  %v3932_v25 = vld [vmem:[%s3881_s5 + $0x60] sm:$0xff] }
  0x1e   : > { %v298_v18 = vrot.slane %v3911_v13, 1  ;;  %v3924_v20 = vld [vmem:[%s3881_s5 + $0x58] sm:$0xff]  ;;  %v2896_v21 = vpack.i.bf16 %v295_v16, %v293_v15  ;;  %v285_v22 = vsel %vm282_vm0, %v283_v9, %v284_v10  ;;  %v288_v24 = vrot.slane %v3914_v14, 1  ;;  %v3935_v26 = vld [vmem:[%s3881_s5 + $0x48] sm:$0xff]  ;;  %v3938_v27 = vld [vmem:[%s3881_s5 + $0x70] sm:$0xff]  ;;  %s3802_s23 = smov [#allocation2]  }
  0x1f   : > { %v287_v23 = vsel %vm282_vm0, %v284_v10, %v286_v11  ;;  %v297_v29 = vsel %vm282_vm0, %v294_v5, %v296_v17  ;;  %v302_v31 = vrot.slane %v3921_v19, 1  ;;  %v3944_v32 = vld [vmem:[%s3881_s5 + $0x78] sm:$0xff]  ;;  %v3947_v33 = vld [vmem:[%s3881_s5 + $0x80] sm:$0xff]  ;;  %v3950_v34 = vld [vmem:[%s3881_s5 + $0x68] sm:$0xff]  ;;  %v304_v38 = vrot.slane %v3924_v20, 1  ;;  %s3734_s27 = sshll.u32 %s3802_s23, 4  ;;  %s3735_s27 = int_to_ptr.vmem [resolvable:$false] %s3734_s27 }
  0x20   : > { %v2886_v28 = vpack.i.bf16 %v287_v23, %v285_v22  ;;  %v299_v30 = vsel %vm282_vm0, %v296_v17, %v298_v18  ;;  %2897 = vrot.lane.b32.xlu1 %v2896_v21, %s3792_s6  ;;  %v289_v36 = vsel %vm282_vm0, %v286_v11, %v288_v24  ;;  %v291_v37 = vsel %vm282_vm0, %v288_v24, %v290_v3  ;;  %v3961_v43 = vld [vmem:[%s3881_s5 + $0x90] sm:$0xff]  ;;  %v3968_v48 = vld [vmem:[%s3881_s5 + $0x98] sm:$0xff]  ;;  %v3974_v52 = vld [vmem:[%s3881_s5 + $0xa0] sm:$0xff] }
  0x21   : > { %v2901_v35 = vpack.i.bf16 %v299_v30, %v297_v29  ;;  %v2891_v39 = vpack.i.bf16 %v291_v37, %v289_v36  ;;  %v306_v40 = vrot.slane %v3932_v25, 1  ;;  %v300_v41 = vrot.slane %v3935_v26, 1  ;;  %6748 = vst [vmem:[#allocation8_spill] sm:$0xff] %v3974_v52  ;;  %v3977_v53 = vld [vmem:[%s3881_s5 + $0x88] sm:$0xff]  ;;  %v3984_v58 = vld [vmem:[%s3881_s5 + $0xb0] sm:$0xff]  ;;  %v3989_v61 = vld [vmem:[%s3881_s5 + $0xb8] sm:$0xff] }
  0x22   : > { %2887 = vrot.lane.b32.xlu0 %v2886_v28, %s3792_s6  ;;  %v310_v42 = vrot.slane %v3938_v27, 1  ;;  %v305_v44 = vsel %vm282_vm0, %v302_v31, %v304_v38  ;;  %v312_v45 = vrot.slane %v3944_v32, 1  ;;  %v314_v46 = vrot.slane %v3947_v33, 1  ;;  %6749 = vst [vmem:[#allocation9_spill] sm:$0xff] %v3977_v53  ;;  %6750 = vst [vmem:[#allocation10_spill] sm:$0xff] %v3984_v58  ;;  %v3992_v62 = vld [vmem:[%s3881_s5 + $0xc0] sm:$0xff] }
  0x23   : > { %v308_v47 = vrot.slane %v3950_v34, 1  ;;  %v307_v49 = vsel %vm282_vm0, %v304_v38, %v306_v40  ;;  %v301_v50 = vsel %vm282_vm0, %v298_v18, %v300_v41  ;;  %v303_v51 = vsel %vm282_vm0, %v300_v41, %v302_v31  ;;  %6751 = vst [vmem:[#allocation11_spill] sm:$0xff] %v3992_v62  ;;  %v4000_v15 = vld [vmem:[%s3881_s5 + $0xa8] sm:$0xff]  ;;  %v4008_v22 = vld [vmem:[%s3881_s5 + $0xd0] sm:$0xff]  ;;  %v4012_v24 = vld [vmem:[%s3881_s5 + $0xd8] sm:$0xff] }
  0x24   : > { %2902 = vrot.lane.b32.xlu1 %v2901_v35, %s3792_s6  ;;  %v2911_v54 = vpack.i.bf16 %v307_v49, %v305_v44  ;;  %v313_v55 = vsel %vm282_vm0, %v310_v42, %v312_v45  ;;  %v315_v56 = vsel %vm282_vm0, %v312_v45, %v314_v46  ;;  %v318_v57 = vrot.slane %v3961_v43, 1  ;;  %6752 = vst [vmem:[#allocation12_spill] sm:$0xff] %v4000_v15  ;;  %v4015_v28 = vld [vmem:[%s3881_s5 + $0xe0] sm:$0xff]  ;;  %v4022_v37 = vld [vmem:[%s3881_s5 + $0xc8] sm:$0xff]  ;;  %v4033_v44 = vld [vmem:[%s3881_s5 + $0xf8] sm:$0xff] }
  0x25   : > { %v2906_v59 = vpack.i.bf16 %v303_v51, %v301_v50  ;;  %v320_v60 = vrot.slane %v3968_v48, 1  ;;  %v309_v63 = vsel %vm282_vm0, %v306_v40, %v308_v47  ;;  %v311_v3 = vsel %vm282_vm0, %v308_v47, %v310_v42  ;;  %6753 = vst [vmem:[#allocation13_spill] sm:$0xff] %v4008_v22  ;;  %6754 = vst [vmem:[#allocation14_spill] sm:$0xff] %v4015_v28  ;;  %v4030_v42 = vld [vmem:[%s3881_s5 + $0xf0] sm:$0xff]  ;;  %v4040_v47 = vld [vmem:[%s3881_s5 + $0xe8] sm:$0xff] }
  0x26   : > { %2892 = vrot.lane.b32.xlu0 %v2891_v39, %s3792_s6  ;;  %v322_v4 = vrot.slane %v3974_v52, 1  ;;  %v316_v5 = vrot.slane %v3977_v53, 1  ;;  %v2921_v10 = vpack.i.bf16 %v315_v56, %v313_v55  ;;  %v326_v11 = vrot.slane %v3984_v58, 1  ;;  %6756 = vst [vmem:[#allocation16_spill] sm:$0xff] %v4040_v47 }
  0x27   : > { %v321_v16 = vsel %vm282_vm0, %v318_v57, %v320_v60  ;;  %v328_v18 = vrot.slane %v3989_v61, 1  ;;  %v330_v21 = vrot.slane %v3992_v62, 1  ;;  %v2916_v23 = vpack.i.bf16 %v311_v3, %v309_v63  ;;  %v4053_v3 = vld [vmem:[%s3881_s5 + $0x110] sm:$0xff] }
  0x28   : > { %2912 = vrot.lane.b32.xlu1 %v2911_v54, %s3792_s6  ;;  %v323_v17 = vsel %vm282_vm0, %v320_v60, %v322_v4  ;;  %v317_v29 = vsel %vm282_vm0, %v314_v46, %v316_v5  ;;  %v319_v30 = vsel %vm282_vm0, %v316_v5, %v318_v57  ;;  %v324_v31 = vrot.slane %v4000_v15, 1  ;;  %v4037_v46 = vld [vmem:[%s3881_s5 + $0x100] sm:$0xff]  ;;  %6757 = vst [vmem:[#allocation17_spill] sm:$0xff] %v4053_v3  ;;  %v4057_v5 = vld [vmem:[%s3881_s5 + $0x118] sm:$0xff] }
  0x29   : > { %v2931_v35 = vpack.i.bf16 %v323_v17, %v321_v16  ;;  %v334_v36 = vrot.slane %v4008_v22, 1  ;;  %v329_v38 = vsel %vm282_vm0, %v326_v11, %v328_v18  ;;  %v331_v39 = vsel %vm282_vm0, %v328_v18, %v330_v21  ;;  %6755 = vst [vmem:[#allocation15_spill] sm:$0xff] %v4037_v46  ;;  %v4062_v16 = vld [vmem:[%s3881_s5 + $0x120] sm:$0xff]  ;;  %v4065_v17 = vld [vmem:[%s3881_s5 + $0x108] sm:$0xff] }
  0x2a   : > { %2907 = vrot.lane.b32.xlu0 %v2906_v59, %s3792_s6  ;;  %v336_v40 = vrot.slane %v4012_v24, 1  ;;  %v338_v41 = vrot.slane %v4015_v28, 1  ;;  %v2926_v45 = vpack.i.bf16 %v319_v30, %v317_v29  ;;  %v325_v49 = vsel %vm282_vm0, %v322_v4, %v324_v31  ;;  %6758 = vst [vmem:[#allocation18_spill] sm:$0xff] %v4065_v17 }
  0x2b   : > { %v327_v50 = vsel %vm282_vm0, %v324_v31, %v326_v11  ;;  %v332_v51 = vrot.slane %v4022_v37, 1  ;;  %v2941_v54 = vpack.i.bf16 %v331_v39, %v329_v38  ;;  %v342_v55 = vrot.slane %v4030_v42, 1 }
  0x2c   : > { %2922 = vrot.lane.b32.xlu1 %v2921_v10, %s3792_s6  ;;  %v344_v56 = vrot.slane %v4033_v44, 1  ;;  %v337_v57 = vsel %vm282_vm0, %v334_v36, %v336_v40  ;;  %v339_v59 = vsel %vm282_vm0, %v336_v40, %v338_v41  ;;  %v346_v60 = vrot.slane %v4037_v46, 1  ;;  %v4078_v40 = vld [vmem:[%s3881_s5 + $0x130] sm:$0xff] }
  0x2d   : > { %v340_v63 = vrot.slane %v4040_v47, 1  ;;  %v2936_v4 = vpack.i.bf16 %v327_v50, %v325_v49  ;;  %v333_v10 = vsel %vm282_vm0, %v330_v21, %v332_v51  ;;  %v335_v11 = vsel %vm282_vm0, %v332_v51, %v334_v36  ;;  %v4084_v49 = vld [vmem:[%s3881_s5 + $0x140] sm:$0xff]  ;;  %v4087_v50 = vld [vmem:[%s3881_s5 + $0x128] sm:$0xff] }
  0x2e   : > { %2917 = vrot.lane.b32.xlu0 %v2916_v23, %s3792_s6  ;;  %v2951_v18 = vpack.i.bf16 %v339_v59, %v337_v57  ;;  %v345_v23 = vsel %vm282_vm0, %v342_v55, %v344_v56  ;;  %v350_v29 = vrot.slane %v4053_v3, 1  ;;  %v347_v30 = vsel %vm282_vm0, %v344_v56, %v346_v60 }
  0x2f   : > { %v341_v21 = vsel %vm282_vm0, %v338_v41, %v340_v63  ;;  %v343_v31 = vsel %vm282_vm0, %v340_v63, %v342_v55  ;;  %v2946_v36 = vpack.i.bf16 %v335_v11, %v333_v10  ;;  %v354_v38 = vrot.slane %v4062_v16, 1 }
  0x30   : > { %2932 = vrot.lane.b32.xlu1 %v2931_v35, %s3792_s6  ;;  %v352_v35 = vrot.slane %v4057_v5, 1  ;;  %v348_v39 = vrot.slane %v4065_v17, 1  ;;  %v2961_v41 = vpack.i.bf16 %v347_v30, %v345_v23  ;;  %v2956_v51 = vpack.i.bf16 %v343_v31, %v341_v21 }
  0x31   : > { %v358_v55 = vrot.slane %v4078_v40, 1  ;;  %v362_v57 = vrot.slane %v4084_v49, 1  ;;  %v356_v10 = vrot.slane %v4087_v50, 1  ;;  %v6648_v11 = vrot.slane %v3896_v6, 2 }
  0x32   : > { %2927 = vrot.lane.b32.xlu0 %v2926_v45, %s3792_s6  ;;  %v4081_v45 = vld [vmem:[%s3881_s5 + $0x138] sm:$0xff]  ;;  %v355_v59 = vsel %vm282_vm0, %v352_v35, %v354_v38  ;;  %v349_v63 = vsel %vm282_vm0, %v346_v60, %v348_v39 }
  0x33   : > { %v360_v56 = vrot.slane %v4081_v45, 1  ;;  %v357_v31 = vsel %vm282_vm0, %v354_v38, %v356_v10  ;;  %v359_v60 = vsel %vm282_vm0, %v356_v10, %v358_v55  ;;  %v387_v10 = vrot.slane %v3921_v19, 2 }
  0x34   : > { %2942 = vrot.lane.b32.xlu1 %v2941_v54, %s3792_s6  ;;  %v353_v54 = vsel %vm282_vm0, %v350_v29, %v352_v35  ;;  %v371_v35 = vrot.slane %v3902_v8, 2 }
  0x35   : > { %v361_v30 = vsel %vm282_vm0, %v358_v55, %v360_v56  ;;  %v363_v21 = vsel %vm282_vm0, %v360_v56, %v362_v57  ;;  %v379_v55 = vrot.slane %v3890_v2, 2  ;;  %v373_v56 = vrot.slane %v3914_v14, 2 }
  0x36   : > { %2937 = vrot.lane.b32.xlu0 %v2936_v4, %s3792_s6  ;;  %v351_v4 = vsel %vm282_vm0, %v348_v39, %v350_v29  ;;  %v369_v29 = vrot.slane %v3899_v7, 2  ;;  %v2976_v39 = vpack.i.bf16 %v359_v60, %v357_v31  ;;  %v381_v60 = vrot.slane %v3908_v12, 2 }
  0x37   : > { %v2966_v23 = vpack.i.bf16 %v351_v4, %v349_v63  ;;  %v383_v63 = vrot.slane %v3911_v13, 2  ;;  %v385_v4 = vrot.slane %v3935_v26, 2 }
  0x38   : > { %2952 = vrot.lane.b32.xlu1 %v2951_v18, %s3792_s6  ;;  %v2971_v18 = vpack.i.bf16 %v355_v59, %v353_v54  ;;  %v4117_v38 = vsel %vm367_vm1, %v369_v29, %v371_v35  ;;  %v377_v54 = vrot.slane %v3887_v1, 2 }
  0x3a   : > { %2947 = vrot.lane.b32.xlu0 %v2946_v36, %s3792_s6  ;;  %v2981_v36 = vpack.i.bf16 %v363_v21, %v361_v30  ;;  %v366_v30 = vsel %vm282_vm0, %v362_v57, %v283_v9  ;;  %v374_v21 = vsel %vm367_vm1, %v371_v35, %v373_v56  ;;  %v391_v9 = vrot.slane %v3932_v25, 2 }
  0x3b   : > { %v393_v57 = vrot.slane %v3950_v34, 2  ;;  %v395_v35 = vrot.slane %v3938_v27, 2 }
  0x3c   : > { %2962 = vrot.lane.b32.xlu1 %v2961_v41, %s3792_s6  ;;  %v375_v41 = vrot.slane %v3884_v0, 2 }
  0x3e   : > { %2957 = vrot.lane.b32.xlu0 %v2956_v51, %s3792_s6  ;;  %v4114_v51 = vsel %vm367_vm1, %v6648_v11, %v369_v29  ;;  %v376_v31 = vsel %vm367_vm1, %v373_v56, %v375_v41  ;;  %v384_v56 = vsel %vm367_vm1, %v381_v60, %v383_v63 }
  0x3f   : > { %v2986_v59 = vpack.i.bf16 %v4117_v38, %v4114_v51 }
  0x40   : > { %2972 = vrot.lane.b32.xlu1 %v2971_v18, %s3792_s6  ;;  %v378_v18 = vsel %vm367_vm1, %v375_v41, %v377_v54  ;;  %v382_v41 = vsel %vm367_vm1, %v379_v55, %v381_v60 }
  0x42   : > { %2967 = vrot.lane.b32.xlu0 %v2966_v23, %s3792_s6  ;;  %v380_v23 = vsel %vm367_vm1, %v377_v54, %v379_v55  ;;  %v4143_v54 = vpack.i.bf16 %v376_v31, %v374_v21  ;;  %v4160_v21 = vpack.i.bf16 %v384_v56, %v382_v41  ;;  %v394_v55 = vsel %vm367_vm1, %v391_v9, %v393_v57 }
  0x43   : > { %v4138_v29 = vpack.i.bf16 %v380_v23, %v378_v18  ;;  %v399_v18 = vrot.slane %v3947_v33, 2  ;;  %v401_v23 = vrot.slane %v3977_v53, 2  ;;  %v419_v53 = vrot.slane %v4008_v22, 2 }
  0x44   : > { %2982 = vrot.lane.b32.xlu1 %v2981_v36, %s3792_s6  ;;  %v386_v36 = vsel %vm367_vm1, %v383_v63, %v385_v4  ;;  %v396_v63 = vsel %vm367_vm1, %v393_v57, %v395_v35  ;;  %v411_v57 = vrot.slane %v3984_v58, 2 }
  0x45   : > { %v402_v11 = vsel %vm367_vm1, %v399_v18, %v401_v23 }
  0x46   : > { %2977 = vrot.lane.b32.xlu0 %v2976_v39, %s3792_s6  ;;  %v388_v39 = vsel %vm367_vm1, %v385_v4, %v387_v10 }
  0x47   : > { %v4153_v4 = vpack.i.bf16 %v388_v39, %v386_v36  ;;  %v397_v36 = vrot.slane %v3944_v32, 2  ;;  %v4169_v39 = vpack.i.bf16 %v396_v63, %v394_v55  ;;  %v405_v63 = vrot.slane %v3968_v48, 2 }
  0x48   : > { %2987 = vrot.lane.b32.xlu1 %v2986_v59, %s3793_s7  ;;  %v389_v59 = vrot.slane %v3924_v20, 2 }
  0x49   : > { %v400_v55 = vsel %vm367_vm1, %v397_v36, %v399_v18 }
  0x4a   : > { %873 = vrot.lane.b32.xlu0 %v366_v30, %s3792_s6  ;;  %v403_v30 = vrot.slane %v3961_v43, 2  ;;  %v390_v31 = vsel %vm367_vm1, %v387_v10, %v389_v59  ;;  %v392_v60 = vsel %vm367_vm1, %v389_v59, %v391_v9  ;;  %v407_v10 = vrot.slane %v3974_v52, 2  ;;  %s2835_s6 = smul.u32 328, %s189_s29 }
  0x4b   : > { %v4175_v56 = vpack.i.bf16 %v392_v60, %v390_v31  ;;  %v409_v9 = vrot.slane %v4000_v15, 2  ;;  %v398_v59 = vsel %vm367_vm1, %v395_v35, %v397_v36  ;;  %v415_v31 = vrot.slane %v3992_v62, 2 }
  0x4c   : > { %2997 = vrot.lane.b32.xlu1 %v4138_v29, %s3793_s7  ;;  %v404_v41 = vsel %vm367_vm1, %v401_v23, %v403_v30  ;;  %v417_v60 = vrot.slane %v4022_v37, 2  ;;  %v4192_v15 = vpack.i.bf16 %v400_v55, %v398_v59  ;;  %v406_v36 = vsel %vm367_vm1, %v403_v30, %v405_v63  ;;  %s6469_s10 = scalar_lea.vmem [#allocation2], %s2835_s6 }
  0x4d   : > { %v4185_v23 = vpack.i.bf16 %v404_v41, %v402_v11  ;;  %v410_v35 = vsel %vm367_vm1, %v407_v10, %v409_v9  ;;  %v412_v18 = vsel %vm367_vm1, %v409_v9, %v411_v57  ;;  %v408_v11 = vsel %vm367_vm1, %v405_v63, %v407_v10 }
  0x4e   : > { %2992 = vrot.lane.b32.xlu0 %v4143_v54, %s3793_s7  ;;  %v413_v41 = vrot.slane %v3989_v61, 2  ;;  %v4201_v58 = vpack.i.bf16 %v412_v18, %v410_v35  ;;  %v418_v52 = vsel %vm367_vm1, %v415_v31, %v417_v60  ;;  %v420_v59 = vsel %vm367_vm1, %v417_v60, %v419_v53 }
  0x4f   : > { %v4207_v55 = vpack.i.bf16 %v408_v11, %v406_v36  ;;  %v423_v30 = vrot.slane %v4015_v28, 2  ;;  %v425_v10 = vrot.slane %v4040_v47, 2  ;;  %v427_v9 = vrot.slane %v4030_v42, 2 }
  0x50   : > { %3007 = vrot.lane.b32.xlu1 %v4153_v4, %s3793_s7  ;;  %v414_v63 = vsel %vm367_vm1, %v411_v57, %v413_v41  ;;  %v416_v35 = vsel %vm367_vm1, %v413_v41, %v415_v31  ;;  %v421_v18 = vrot.slane %v4012_v24, 2  ;;  %v4217_v60 = vpack.i.bf16 %v420_v59, %v418_v52 }
  0x51   : > { %v431_v36 = vrot.slane %v4037_v46, 2  ;;  %v433_v11 = vrot.slane %v4065_v17, 2  ;;  %v435_v28 = vrot.slane %v4053_v3, 2  ;;  %v4224_v47 = vpack.i.bf16 %v416_v35, %v414_v63 }
  0x52   : > { %3002 = vrot.lane.b32.xlu0 %v4160_v21, %s3793_s7  ;;  %v426_v57 = vsel %vm367_vm1, %v423_v30, %v425_v10  ;;  %v428_v31 = vsel %vm367_vm1, %v425_v10, %v427_v9  ;;  %v422_v41 = vsel %vm367_vm1, %v419_v53, %v421_v18  ;;  %v424_v52 = vsel %vm367_vm1, %v421_v18, %v423_v30 }
  0x53   : > { %v429_v59 = vrot.slane %v4033_v44, 2  ;;  %v3056_v17 = vpack.i.bf16 %v428_v31, %v426_v57  ;;  %v434_v3 = vsel %vm367_vm1, %v431_v36, %v433_v11  ;;  %v436_v46 = vsel %vm367_vm1, %v433_v11, %v435_v28 }
  0x54   : > { %3017 = vrot.lane.b32.xlu1 %v4169_v39, %s3793_s7  ;;  %v3051_v63 = vpack.i.bf16 %v424_v52, %v422_v41  ;;  %v439_v10 = vrot.slane %v4062_v16, 2  ;;  %v441_v53 = vrot.slane %v4087_v50, 2  ;;  %v443_v30 = vrot.slane %v4078_v40, 2 }
  0x55   : > { %v430_v35 = vsel %vm367_vm1, %v427_v9, %v429_v59  ;;  %v432_v18 = vsel %vm367_vm1, %v429_v59, %v431_v36  ;;  %v437_v57 = vrot.slane %v4057_v5, 2  ;;  %v3066_v31 = vpack.i.bf16 %v436_v46, %v434_v3 }
  0x56   : > { %3012 = vrot.lane.b32.xlu0 %v4175_v56, %s3793_s7  ;;  %v3061_v11 = vpack.i.bf16 %v432_v18, %v430_v35  ;;  %v442_v41 = vsel %vm367_vm1, %v439_v10, %v441_v53  ;;  %v444_v16 = vsel %vm367_vm1, %v441_v53, %v443_v30  ;;  %v447_v50 = vrot.slane %v4084_v49, 2 }
  0x57   : > { %v438_v40 = vsel %vm367_vm1, %v435_v28, %v437_v57  ;;  %v440_v9 = vsel %vm367_vm1, %v437_v57, %v439_v10  ;;  %v445_v36 = vrot.slane %v4081_v45, 2  ;;  %v538_v5 = vrot.slane %v3902_v8, 4 }
  0x58   : > { %3027 = vrot.lane.b32.xlu1 %v4185_v23, %s3793_s7  ;;  %v539_v46 = vrot.slane %v3914_v14, 4  ;;  %v6663_v3 = vrot.slane %v3899_v7, 4  ;;  %v3076_v52 = vpack.i.bf16 %v444_v16, %v442_v41  ;;  %v3071_v59 = vpack.i.bf16 %v440_v9, %v438_v40 }
  0x59   : > { %v446_v49 = vsel %vm367_vm1, %v443_v30, %v445_v36  ;;  %v448_v10 = vsel %vm367_vm1, %v445_v36, %v447_v50  ;;  %v6761_v35 = vrot.slane %v3896_v6, 2  ;;  %v6662_v30 = vrot.slane %v3992_v62, 4 }
  0x5a   : > { %3022 = vrot.lane.b32.xlu0 %v4192_v15, %s3793_s7  ;;  %v4259_v28 = vsel %vm537_vm2, %v538_v5, %v539_v46  ;;  %v4264_v45 = vsel %vm537_vm2, %v6663_v3, %v538_v5  ;;  %v3081_v57 = vpack.i.bf16 %v448_v10, %v446_v49  ;;  %v583_v41 = vrot.slane %v4022_v37, 4 }
  0x5b   : > { %6759 = vst [vmem:[#allocation19_spill] sm:$0xff] %v4259_v28  ;;  %6760 = vst [vmem:[#allocation20_spill] sm:$0xff] %v4264_v45  ;;  %v451_v18 = vsel %vm367_vm1, %v447_v50, %v6761_v35  ;;  %v585_v16 = vrot.slane %v4008_v22, 4  ;;  %v466_v36 = vrot.slane %v3935_v26, 3 }
  0x5c   : > { %3037 = vrot.lane.b32.xlu1 %v4201_v58, %s3793_s7  ;;  %v584_v40 = vsel %vm537_vm2, %v6662_v30, %v583_v41 }
  0x5d   : > { %v586_v6 = vsel %vm537_vm2, %v583_v41, %v585_v16  ;;  %v480_v41 = vrot.slane %v3947_v33, 3 }
  0x5e   : > { %3032 = vrot.lane.b32.xlu0 %v4207_v55, %s3793_s7  ;;  %v4288_v50 = vpack.i.bf16 %v586_v6, %v584_v40 }
  0x60   : > { %3047 = vrot.lane.b32.xlu1 %v4217_v60, %s3793_s7  ;;  %6762 = vst [vmem:[#allocation21_spill] sm:$0xff] %v4288_v50 }
  0x62   : > { %3042 = vrot.lane.b32.xlu0 %v4224_v47, %s3793_s7 }
  0x64   : > { %3057 = vrot.lane.b32.xlu1 %v3056_v17, %s3793_s7 }
  0x66   : > { %3052 = vrot.lane.b32.xlu0 %v3051_v63, %s3793_s7 }
  0x68   : > { %3067 = vrot.lane.b32.xlu1 %v3066_v31, %s3793_s7 }
  0x6a   : > { %3062 = vrot.lane.b32.xlu0 %v3061_v11, %s3793_s7 }
  0x6c   : > { %3077 = vrot.lane.b32.xlu1 %v3076_v52, %s3793_s7 }
  0x6e   : > { %3072 = vrot.lane.b32.xlu0 %v3071_v59, %s3793_s7 }
  0x70   : > { %997 = vrot.lane.b32.xlu1 %v451_v18, %s3793_s7 }
  0x72   : > { %3082 = vrot.lane.b32.xlu0 %v3081_v57, %s3793_s7 }
  0x74   : > { %3092 = vrot.lane.b32.xlu1 %v4138_v29, %s3794_s8  ;;  %v456_v29 = vrot.slane %v3884_v0, 3 }
  0x76   : > { %3087 = vrot.lane.b32.xlu0 %v4143_v54, %s3794_s8 }
  0x78   : > { %3102 = vrot.lane.b32.xlu1 %v4153_v4, %s3794_s8 }
  0x7a   : > { %3097 = vrot.lane.b32.xlu0 %v4160_v21, %s3794_s8 }
  0x7c   : > { %3112 = vrot.lane.b32.xlu1 %v4169_v39, %s3794_s8 }
  0x7e   : > { %3107 = vrot.lane.b32.xlu0 %v4175_v56, %s3794_s8  ;;  %v462_v56 = vrot.slane %v3908_v12, 3 }
  0x80   : > { %3122 = vrot.lane.b32.xlu1 %v4185_v23, %s3794_s8  ;;  %v464_v23 = vrot.slane %v3911_v13, 3 }
  0x82   : > { %3117 = vrot.lane.b32.xlu0 %v4192_v15, %s3794_s8  ;;  %v6661_v15 = vrot.slane %v3902_v8, 3  ;;  %v467_v6 = vsel %vm452_vm3, %v464_v23, %v466_v36  ;;  %v6784_v8 = vrot.slane %v3911_v13, 4 }
  0x84   : > { %3132 = vrot.lane.b32.xlu1 %v4201_v58, %s3794_s8  ;;  %v454_v58 = vrot.slane %v3914_v14, 3 }
  0x86   : > { %3127 = vrot.lane.b32.xlu0 %v4207_v55, %s3794_s8  ;;  %v455_v21 = vsel %vm452_vm3, %v6661_v15, %v454_v58  ;;  %v457_v39 = vsel %vm452_vm3, %v454_v58, %v456_v29 }
  0x87   : > { %v3186_v9 = vpack.i.bf16 %v457_v39, %v455_v21 }
  0x88   : > { %3142 = vrot.lane.b32.xlu1 %v4217_v60, %s3794_s8  ;;  %v468_v60 = vrot.slane %v3921_v19, 3 }
  0x8a   : > { %3137 = vrot.lane.b32.xlu0 %v4224_v47, %s3794_s8  ;;  %v3181_v47 = vpack.i.bf16 %v4114_v51, %v451_v18  ;;  %v458_v51 = vrot.slane %v3887_v1, 3  ;;  %v476_v18 = vrot.slane %v3938_v27, 3  ;;  %v469_v58 = vsel %vm452_vm3, %v466_v36, %v468_v60  ;;  %v6766_v36 = vld [vmem:[#allocation10_spill] sm:$0xff] }
  0x8b   : > { %v3201_v33 = vpack.i.bf16 %v469_v58, %v467_v6 }
  0x8c   : > { %3152 = vrot.lane.b32.xlu1 %v3056_v17, %s3794_s8  ;;  %v460_v17 = vrot.slane %v3890_v2, 3  ;;  %v459_v49 = vsel %vm452_vm3, %v456_v29, %v458_v51  ;;  %v474_v29 = vrot.slane %v3950_v34, 3 }
  0x8e   : > { %3147 = vrot.lane.b32.xlu0 %v3051_v63, %s3794_s8  ;;  %v470_v63 = vrot.slane %v3924_v20, 3  ;;  %v463_v5 = vsel %vm452_vm3, %v460_v17, %v462_v56  ;;  %v461_v20 = vsel %vm452_vm3, %v458_v51, %v460_v17  ;;  %v6764_v51 = vld [vmem:[#allocation8_spill] sm:$0xff] }
  0x90   : > { %3162 = vrot.lane.b32.xlu1 %v3066_v31, %s3794_s8  ;;  %v471_v10 = vsel %vm452_vm3, %v468_v60, %v470_v63  ;;  %v488_v60 = vrot.slane %v6764_v51, 3 }
  0x92   : > { %3157 = vrot.lane.b32.xlu0 %v3061_v11, %s3794_s8  ;;  %v4319_v54 = vpop.permute.xlu1 %2897  ;;  %v472_v11 = vrot.slane %v3932_v25, 3 }
  0x94   : > { %v4321_v4 = vpop.permute.xlu0 %2887  ;;  %3172 = vrot.lane.b32.xlu1 %v3076_v52, %s3794_s8  ;;  %v465_v52 = vsel %vm452_vm3, %v462_v56, %v464_v23  ;;  %v473_v35 = vsel %vm452_vm3, %v470_v63, %v472_v11  ;;  %v484_v56 = vrot.slane %v3961_v43, 3  ;;  %v475_v34 = vsel %vm452_vm3, %v472_v11, %v474_v29  ;;  %v6765_v63 = vld [vmem:[#allocation9_spill] sm:$0xff] }
  0x95   : > { %v3196_v40 = vpack.i.bf16 %v465_v52, %v463_v5  ;;  %v3206_v27 = vpack.i.bf16 %v473_v35, %v471_v10  ;;  %v477_v23 = vsel %vm452_vm3, %v474_v29, %v476_v18  ;;  %v492_v5 = vrot.slane %v6766_v36, 3  ;;  %v6771_v36 = vld [vmem:[#allocation16_spill] sm:$0xff] }
  0x96   : > { %3167 = vrot.lane.b32.xlu0 %v3071_v59, %s3794_s8  ;;  %v4333_v55 = vpop.permute.xlu1 %2902  ;;  %v494_v52 = vrot.slane %v3989_v61, 3  ;;  %v496_v43 = vrot.slane %v3992_v62, 3  ;;  %v3211_v6 = vpack.i.bf16 %v477_v23, %v475_v34  ;;  %v498_v29 = vrot.slane %v4022_v37, 3 }
  0x97   : > { %v508_v23 = vrot.slane %v4030_v42, 3  ;;  %v510_v37 = vrot.slane %v4033_v44, 3  ;;  %v672_v45 = vrot.slane %v6771_v36, 5 }
  0x98   : > { %v4338_v31 = vpop.permute.xlu0 %2892  ;;  %3182 = vrot.lane.b32.xlu1 %v3181_v47, %s3794_s8  ;;  %v3191_v47 = vpack.i.bf16 %v461_v20, %v459_v49  ;;  %v6767_v20 = vld [vmem:[#allocation12_spill] sm:$0xff]  ;;  %v497_v51 = vsel %vm452_vm3, %v494_v52, %v496_v43 }
  0x99   : > { %v490_v11 = vrot.slane %v6767_v20, 3 }
  0x9a   : > { %3177 = vrot.lane.b32.xlu0 %v3081_v57, %s3794_s8  ;;  %v4346_v59 = vpop.permute.xlu1 %2912  ;;  %v478_v57 = vrot.slane %v3944_v32, 3 }
  0x9b   : > { %v493_v34 = vsel %vm452_vm3, %v490_v11, %v492_v5  ;;  %v2915_v7 = vunpack.i.h.bf16 %v4346_v59 }
  0x9c   : > { %v4351_v25 = vpop.permute.xlu0 %2907  ;;  %3187 = vrot.lane.b32.xlu1 %v3186_v9, %s3795_s9  ;;  %v479_v21 = vsel %vm452_vm3, %v476_v18, %v478_v57  ;;  %v481_v39 = vsel %vm452_vm3, %v478_v57, %v480_v41  ;;  %v482_v9 = vrot.slane %v6765_v63, 3  ;;  %v502_v18 = vrot.slane %v4012_v24, 3  ;;  %v6768_v57 = vld [vmem:[#allocation14_spill] sm:$0xff] }
  0x9d   : > { %6763 = vst [vmem:[#allocation22_spill] sm:$0xff] %v4351_v25  ;;  %v3216_v35 = vpack.i.bf16 %v481_v39, %v479_v21  ;;  %v495_v39 = vsel %vm452_vm3, %v492_v5, %v494_v52  ;;  %v506_v52 = vrot.slane %v6771_v36, 3  ;;  %v4795_v25 = vld [vmem:[%s3881_s5 + $0x98] sm:$0xff] }
  0x9e   : > { %1120 = vrot.lane.b32.xlu0 %v4117_v38, %s3794_s8  ;;  %v4363_v17 = vpop.permute.xlu1 %2922  ;;  %v486_v38 = vrot.slane %v3968_v48, 3  ;;  %v500_v48 = vrot.slane %v4008_v22, 3  ;;  %v485_v21 = vsel %vm452_vm3, %v482_v9, %v484_v56  ;;  %v3236_v15 = vpack.i.bf16 %v497_v51, %v495_v39  ;;  %6805 = vst [vmem:[#allocation28_spill] sm:$0xff] %v4795_v25 }
  0x9f   : > { %v624_v39 = vrot.slane %v3887_v1, 5  ;;  %v543_v51 = vrot.slane %v3887_v1, 4 }
  0xa0   : > { %v4365_v32 = vpop.permute.xlu0 %2917  ;;  %3197 = vrot.lane.b32.xlu1 %v3196_v40, %s3795_s9  ;;  %v504_v40 = vrot.slane %v6768_v57, 3  ;;  %v487_v61 = vsel %vm452_vm3, %v484_v56, %v486_v38  ;;  %v489_v58 = vsel %vm452_vm3, %v486_v38, %v488_v60  ;;  %v6770_v56 = vld [vmem:[#allocation15_spill] sm:$0xff]  ;;  %v501_v5 = vsel %vm452_vm3, %v498_v29, %v500_v48 }
  0xa1   : > { %v3226_v20 = vpack.i.bf16 %v489_v58, %v487_v61  ;;  %v6774_v61 = vld [vmem:[#allocation18_spill] sm:$0xff] }
  0xa2   : > { %3192 = vrot.lane.b32.xlu0 %v3191_v47, %s3795_s9  ;;  %v4380_v49 = vpop.permute.xlu1 %2932  ;;  %v483_v47 = vsel %vm452_vm3, %v480_v41, %v482_v9  ;;  %v503_v41 = vsel %vm452_vm3, %v500_v48, %v502_v18  ;;  %v512_v9 = vrot.slane %v6770_v56, 3  ;;  %v4425_v48 = vsel %vm452_vm3, %v506_v52, %v508_v23 }
  0xa3   : > { %v3221_v44 = vpack.i.bf16 %v485_v21, %v483_v47  ;;  %v514_v58 = vrot.slane %v6774_v61, 3  ;;  %v6664_v21 = vrot.slane %v3884_v0, 5 }
  0xa4   : > { %v4383_v10 = vpop.permute.xlu0 %2927  ;;  %3207 = vrot.lane.b32.xlu1 %v3206_v27, %s3795_s9  ;;  %v491_v27 = vsel %vm452_vm3, %v488_v60, %v490_v11  ;;  %v499_v60 = vsel %vm452_vm3, %v496_v43, %v498_v29  ;;  %v4422_v43 = vsel %vm452_vm3, %v504_v40, %v506_v52  ;;  %v6775_v29 = vld [vmem:[#allocation17_spill] sm:$0xff] }
  0xa5   : > { %v3231_v53 = vpack.i.bf16 %v493_v34, %v491_v27  ;;  %v3241_v3 = vpack.i.bf16 %v501_v5, %v499_v60  ;;  %v6666_v47 = vrot.slane %v6775_v29, 3  ;;  %v545_v34 = vrot.slane %v3890_v2, 4 }
  0xa6   : > { %3202 = vrot.lane.b32.xlu0 %v3201_v33, %s3795_s9  ;;  %v4397_v63 = vpop.permute.xlu1 %2942  ;;  %v505_v33 = vsel %vm452_vm3, %v502_v18, %v504_v40  ;;  %v4416_v18 = vsel %vm452_vm3, %v508_v23, %v510_v37  ;;  %v626_v40 = vrot.slane %v3890_v2, 5  ;;  %v6665_v23 = vrot.slane %v3884_v0, 6 }
  0xa7   : > { %6769 = vst [vmem:[#allocation8_spill] sm:$0xff] %v4397_v63  ;;  %v3246_v30 = vpack.i.bf16 %v505_v33, %v503_v41  ;;  %v711_v41 = vrot.slane %v3890_v2, 6  ;;  %v6667_v60 = vrot.slane %v3911_v13, 5  ;;  %v3251_v5 = vpack.i.bf16 %v4425_v48, %v4422_v43  ;;  %v4773_v63 = vld [vmem:[%s3881_s5 + $0xf8] sm:$0xff] }
  0xa8   : > { %v4403_v38 = vpop.permute.xlu0 %2937  ;;  %3217 = vrot.lane.b32.xlu1 %v3216_v35, %s3795_s9  ;;  %v513_v35 = vsel %vm452_vm3, %v510_v37, %v512_v9  ;;  %v709_v37 = vrot.slane %v3887_v1, 6  ;;  %v547_v2 = vrot.slane %v3908_v12, 4  ;;  %v4468_v14 = vsel %vm622_vm4, %v624_v39, %v626_v40 }
  0xa9   : > { %v3256_v52 = vpack.i.bf16 %v513_v35, %v4416_v18  ;;  %v515_v18 = vsel %vm452_vm3, %v512_v9, %v514_v58  ;;  %v4465_v35 = vsel %vm622_vm4, %v6664_v21, %v624_v39 }
  0xaa   : > { %3212 = vrot.lane.b32.xlu0 %v3211_v6, %s3795_s9  ;;  %v4413_v11 = vpop.permute.xlu1 %2952  ;;  %v541_v6 = vrot.slane %v3884_v0, 4  ;;  %v4477_v9 = vsel %vm707_vm5, %v6665_v23, %v709_v37  ;;  %v4480_v48 = vsel %vm707_vm5, %v709_v37, %v711_v41  ;;  %v548_v23 = vsel %vm537_vm2, %v545_v34, %v547_v2 }
  0xab   : > { %6772 = vst [vmem:[#allocation9_spill] sm:$0xff] %v4413_v11  ;;  %v2934_v11 = vunpack.i.l.bf16 %v4380_v49 }
  0xac   : > { %v4418_v56 = vpop.permute.xlu0 %2947  ;;  %3227 = vrot.lane.b32.xlu1 %v3226_v20, %s3795_s9  ;;  %v628_v20 = vrot.slane %v3908_v12, 5  ;;  %v4453_v1 = vsel %vm537_vm2, %v539_v46, %v541_v6  ;;  %v544_v43 = vsel %vm537_vm2, %v541_v6, %v543_v51  ;;  %v713_v6 = vrot.slane %v3908_v12, 6 }
  0xad   : > { %6773 = vst [vmem:[#allocation10_spill] sm:$0xff] %v4418_v56  ;;  %6776 = vst [vmem:[#allocation12_spill] sm:$0xff] %v4453_v1  ;;  %v3266_v37 = vpack.i.bf16 %v4453_v1, %v4259_v28  ;;  %v6668_v12 = vrot.slane %v4008_v22, 5  ;;  %v6677_v1 = vmov 0.0  }
  0xae   : > { %3222 = vrot.lane.b32.xlu0 %v3221_v44, %s3795_s9  ;;  %v4436_v27 = vpop.permute.xlu1 %2962  ;;  %v6669_v44 = vrot.slane %v3911_v13, 4  ;;  %v4490_v39 = vsel %vm622_vm4, %v628_v20, %v6667_v60  ;;  %2739 = vmatprep.subr.bf16.mxu0 %v6677_v1 }
  0xaf   : > { %2829 = vmatprep.subr.bf16.mxu1 %v6677_v1 }
  0xb0   : > { %v4442_v33 = vpop.permute.xlu0 %2957  ;;  %3237 = vrot.lane.b32.xlu1 %v3236_v15, %s3795_s9  ;;  %v517_v15 = vsel %vm452_vm3, %v514_v58, %v6666_v47  ;;  %v4485_v58 = vsel %vm622_vm4, %v626_v40, %v628_v20  ;;  %v550_v40 = vsel %vm537_vm2, %v547_v2, %v6669_v44  ;;  %v3276_v20 = vpack.i.bf16 %v4468_v14, %v4465_v35 }
  0xb1   : > { %v3261_v21 = vpack.i.bf16 %v517_v15, %v515_v18  ;;  %v668_v47 = vrot.slane %v4012_v24, 5  ;;  %v4517_v15 = vpack.i.bf16 %v550_v40, %v548_v23  ;;  %v4520_v35 = vsel %vm707_vm5, %v711_v41, %v713_v6 }
  0xb2   : > { %3232 = vrot.lane.b32.xlu0 %v3231_v53, %s3795_s9  ;;  %v4470_v46 = vpop.permute.xlu1 %2972  ;;  %v546_v53 = vsel %vm537_vm2, %v543_v51, %v545_v34  ;;  %v715_v51 = vrot.slane %v3911_v13, 6  ;;  %v753_v2 = vrot.slane %v4012_v24, 6  ;;  %v551_v44 = vrot.slane %v3935_v26, 4 }
  0xb3   : > { %v4509_v18 = vpack.i.bf16 %v546_v53, %v544_v43  ;;  %v587_v43 = vrot.slane %v4012_v24, 4  ;;  %v4534_v23 = vsel %vm622_vm4, %v6668_v12, %v668_v47  ;;  %v3686_v24 = vld [vmem:[%s6644_s1 + $0x10] ss:$0 sps:$4 sm:$0x33]   ;;  %v6778_v12 = vrot.slane %v6768_v57, 4 }
  0xb4   : > { %v4482_v61 = vpop.permute.xlu0 %2967  ;;  %3247 = vrot.lane.b32.xlu1 %v3246_v30, %s3795_s9  ;;  %v6670_v30 = vrot.slane %v6768_v57, 5  ;;  %v4523_v14 = vsel %vm707_vm5, %v713_v6, %v715_v51  ;;  %v632_v6 = vrot.slane %v3935_v26, 5  ;;  %v6780_v53 = vrot.slane %v6768_v57, 6 }
  0xb6   : > { %3242 = vrot.lane.b32.xlu0 %v3241_v3, %s3795_s9  ;;  %v4507_v60 = vpop.permute.xlu1 %2982  ;;  %v4539_v41 = vsel %vm622_vm4, %v668_v47, %v6670_v30  ;;  %v590_v47 = vsel %vm537_vm2, %v587_v43, %v6778_v12  ;;  %v4576_v34 = vsel %vm707_vm5, %v753_v2, %v6780_v53  ;;  %v2224_v12 = vsel %vm707_vm5, %v3686_v24, 0  ;;  %v3687_v24 = vld [vmem:[%s6644_s1 + $0x8] sm:$0xff]  }
  0xb7   : > { %v6785_v53 = vrot.slane %v3921_v19, 4  ;;  %2740 = vmatpush3.bf16.msra.mxu0 %v2224_v12  ;;  %2832 = vmatpush3.bf16.msra.mxu1 %v2224_v12 }
  0xb8   : > { %v4515_v3 = vpop.permute.xlu0 %2977  ;;  %3257 = vrot.lane.b32.xlu1 %v3256_v52, %s3795_s9  ;;  %v717_v52 = vrot.slane %v3935_v26, 6  ;;  %v6779_v26 = vrot.slane %v4008_v22, 6  ;;  %v4659_v22 = vld [vmem:[%s3881_s5 + $0x60] sm:$0xff] }
  0xba   : > { %3252 = vrot.lane.b32.xlu0 %v3251_v5, %s3795_s9  ;;  %v4546_v40 = vpop.permute.xlu1 %2987  ;;  %v588_v5 = vsel %vm537_vm2, %v585_v16, %v587_v43  ;;  %v6781_v16 = vrot.slane %v3911_v13, 5  ;;  %v6783_v43 = vrot.slane %v3921_v19, 5 }
  0xbb   : > { %6777 = vst [vmem:[#allocation14_spill] sm:$0xff] %v4546_v40  ;;  %v4617_v12 = vpack.i.bf16 %v590_v47, %v588_v5  ;;  %v6793_v47 = vrot.slane %v6768_v57, 4 }
  0xbc   : > { %v4553_v30 = vpop.permute.xlu0 %873  ;;  %3267 = vrot.lane.b32.xlu1 %v3266_v37, %s3796_s12  ;;  %v4571_v37 = vsel %vm707_vm5, %v6779_v26, %v753_v2  ;;  %v4581_v0 = vsel %vm622_vm4, %v6781_v16, %v632_v6  ;;  %v4590_v26 = vsel %vm622_vm4, %v632_v6, %v6783_v43  ;;  %v552_v2 = vsel %vm537_vm2, %v6784_v8, %v551_v44 }
  0xbd   : > { %v554_v16 = vsel %vm537_vm2, %v551_v44, %v6785_v53  ;;  %v4605_v6 = vsel %vm707_vm5, %v715_v51, %v717_v52  ;;  %v6787_v8 = vrot.slane %v3921_v19, 6  ;;  %v591_v43 = vrot.slane %v6771_v36, 4 }
  0xbe   : > { %3262 = vrot.lane.b32.xlu0 %v3261_v21, %s3795_s9  ;;  %v4585_v21 = vpop.permute.xlu1 %2997  ;;  %v6788_v53 = vmov 0.0   ;;  %v4627_v44 = vpack.i.bf16 %v554_v16, %v552_v2  ;;  %v6792_v16 = vrot.slane %v4030_v42, 5 }
  0xbf   : > { %6782 = vst [vmem:[#allocation15_spill] sm:$0xff] %v4585_v21  ;;  %v4610_v13 = vsel %vm707_vm5, %v717_v52, %v6787_v8  ;;  %2741 = vmatprep.subr.bf16.mxu0 %v6788_v53  ;;  %2830 = vmatprep.subr.bf16.mxu1 %v6788_v53  ;;  %v757_v52 = vrot.slane %v6771_v36, 6  ;;  %v6790_v36 = vrot.slane %v6768_v57, 5  ;;  %v3688_v8 = vld [vmem:[%s6644_s1] sm:$0xff]   ;;  %v4652_v28 = vsel %vm537_vm2, %v6793_v47, %v591_v43  ;;  %v3692_v21 = vld [vmem:[%s3881_s5 + $0x50] sm:$0xff] }
  0xc0   : > { %v4602_v1 = vpop.permute.xlu0 %2992  ;;  %3277 = vrot.lane.b32.xlu1 %v3276_v20, %s3798_s20  ;;  %2742 = vmatpush3.bf16.msra.mxu0 %v3687_v24  ;;  %v4647_v20 = vsel %vm622_vm4, %v672_v45, %v6792_v16  ;;  %v2919_v16 = vunpack.i.l.bf16 %v4365_v32  ;;  %v6794_v47 = vrot.slane %v4030_v42, 4 }
  0xc1   : > { %6786 = vst [vmem:[#allocation16_spill] sm:$0xff] %v4602_v1  ;;  %v4637_v51 = vsel %vm622_vm4, %v6790_v36, %v672_v45  ;;  %2833 = vmatpush3.bf16.msra.mxu1 %v3687_v24  ;;  %v4655_v36 = vld [vmem:[%s3881_s5 + $0x58] sm:$0xff]  ;;  %2743 = vmatprep.subr.bf16.mxu0 %v6788_v53  ;;  %v2920_v45 = vunpack.i.h.bf16 %v4365_v32  ;;  %v6796_v32 = vpack.i.bf16 %v4480_v48, %v4477_v9  ;;  %v2930_v9 = vunpack.i.h.bf16 %v4383_v10 }
  0xc2   : > { %3272 = vrot.lane.b32.xlu0 %v4509_v18, %s3799_s22  ;;  %v4630_v5 = vpop.permute.xlu1 %3007  ;;  %2831 = vmatprep.subr.bf16.mxu1 %v6788_v53  ;;  %v4671_v62 = vsel %vm537_vm2, %v591_v43, %v6794_v47  ;;  %v2924_v47 = vunpack.i.l.bf16 %v4363_v17  ;;  %v2929_v48 = vunpack.i.l.bf16 %v4383_v10  ;;  %v1795_v10 = vsel %vm1782_vm6, %v4659_v22, %v2919_v16 }
  0xc3   : > { %6789 = vst [vmem:[#allocation18_spill] sm:$0xff] %v4630_v5  ;;  %v6795_v5 = vrot.slane %v6768_v57, 6  ;;  %2745 = vmatprep.mubr.msk.bf16.mxu0 %vm3801_vm8, %v6788_v53  ;;  %2789 = vmatprep.mubr.msk.bf16.mxu1 %vm3801_vm8, %v6788_v53  ;;  %v6798_v57 = vpack.i.bf16 %v4490_v39, %v4485_v58  ;;  %v1794_v53 = vsel %vm1782_vm6, %v4655_v36, %v2915_v7  ;;  %v4728_v39 = vld [vmem:[%s3881_s5 + $0x70] sm:$0xff]  ;;  %v721_v29 = vrot.slane %v4655_v36, 6 }
  0xc4   : > { %v4642_v2 = vpop.permute.xlu0 %3002  ;;  %3287 = vrot.lane.b32.xlu1 %v4509_v18, %s3796_s12  ;;  %v6797_v18 = vrot.slane %v4030_v42, 6  ;;  %2744 = vmatpush3.bf16.msra.mxu0 %v3688_v8  ;;  %v1797_v7 = vsel %vm1782_vm6, %v4728_v39, %v2924_v47 }
  0xc5   : > { %6791 = vst [vmem:[#allocation23_spill] sm:$0xff] %v4642_v2  ;;  %v4676_v24 = vsel %vm707_vm5, %v6795_v5, %v757_v52  ;;  %v2914_v2 = vunpack.i.l.bf16 %v4346_v59  ;;  %v2925_v5 = vunpack.i.h.bf16 %v4363_v17  ;;  %2834 = vmatpush3.bf16.msra.mxu1 %v3688_v8  ;;  %v4700_v17 = vld [vmem:[%s3881_s5 + $0x68] sm:$0xff] }
  0xc6   : > { %3282 = vrot.lane.b32.xlu0 %v6796_v32, %s3800_s28  ;;  %v4687_v43 = vsel %vm707_vm5, %v757_v52, %v6797_v18  ;;  %v3018_v1 = vpop.permute.xlu1 %3017  ;;  %v1796_v8 = vsel %vm1782_vm6, %v4700_v17, %v2920_v45 }
  0xc7   : > { %v3020_v32 = vunpack.i.h.bf16 %v3018_v1  ;;  %v3019_v52 = vunpack.i.l.bf16 %v3018_v1  ;;  %v1793_v40 = vsel %vm1782_vm6, %v3692_v21, %v2914_v2 }
  0xc8   : > { %v3013_v18 = vpop.permute.xlu0 %3012  ;;  %3297 = vrot.lane.b32.xlu1 %v6798_v57, %s3798_s20 }
  0xc9   : > { %v3015_v59 = vunpack.i.h.bf16 %v3013_v18  ;;  %v3014_v1 = vunpack.i.l.bf16 %v3013_v18  ;;  %v4715_v45 = vsel %vm1824_vm7, %v1795_v10, %v3019_v52  ;;  %v4718_v16 = vsel %vm1824_vm7, %v1796_v8, %v3020_v32  ;;  %v4723_v18 = vld [vmem:[%s3881_s5 + $0x78] sm:$0xff]  ;;  %v4739_v32 = vld [vmem:[%s3881_s5 + $0x88] sm:$0xff]  ;;  %v4744_v8 = vld [vmem:[%s3881_s5 + $0x80] sm:$0xff] }
  0xca   : > { %3292 = vrot.lane.b32.xlu0 %v4517_v15, %s3799_s22  ;;  %v1798_v58 = vsel %vm1782_vm6, %v4723_v18, %v2925_v5  ;;  %v3028_v57 = vpop.permute.xlu1 %3027  ;;  %6799 = vst [vmem:[#allocation24_spill] sm:$0xff] %v4739_v32  ;;  %v1800_v52 = vsel %vm1782_vm6, %v4739_v32, %v2930_v9  ;;  %v1799_v5 = vsel %vm1782_vm6, %v4744_v8, %v2929_v48  ;;  %v2935_v9 = vunpack.i.h.bf16 %v4380_v49 }
  0xcb   : > { %v4733_v21 = vsel %vm1824_vm7, %v1794_v53, %v3015_v59  ;;  %v4736_v2 = vsel %vm1824_vm7, %v1793_v40, %v3014_v1  ;;  %v3030_v10 = vunpack.i.h.bf16 %v3028_v57  ;;  %v3029_v56 = vunpack.i.l.bf16 %v3028_v57 }
  0xcc   : > { %v3023_v47 = vpop.permute.xlu0 %3022  ;;  %v2940_v53 = vunpack.i.h.bf16 %v4403_v38  ;;  %v2939_v59 = vunpack.i.l.bf16 %v4403_v38  ;;  %3307 = vrot.lane.b32.xlu1 %v4288_v50, %s3796_s12  ;;  %v6801_v38 = vpack.i.bf16 %v4523_v14, %v4520_v35  ;;  %v676_v35 = vrot.slane %v4773_v63, 5  ;;  %v4777_v14 = vld [vmem:[%s3881_s5 + $0x100] sm:$0xff] }
  0xcd   : > { %v3025_v40 = vunpack.i.h.bf16 %v3023_v47  ;;  %v3024_v1 = vunpack.i.l.bf16 %v3023_v47  ;;  %v4755_v48 = vsel %vm1824_vm7, %v1799_v5, %v3029_v56  ;;  %v4758_v57 = vsel %vm1824_vm7, %v1800_v52, %v3030_v10 }
  0xce   : > { %6800 = vst [vmem:[#allocation25_spill] sm:$0xff] %v4758_v57  ;;  %3302 = vrot.lane.b32.xlu0 %v6801_v38, %s3800_s28  ;;  %v3038_v49 = vpop.permute.xlu1 %3037  ;;  %v6804_v32 = vpack.i.bf16 %v4539_v41, %v4534_v23  ;;  %v4800_v57 = vld [vmem:[%s3881_s5 + $0x90] sm:$0xff] }
  0xcf   : > { %v4765_v47 = vsel %vm1824_vm7, %v1798_v58, %v3025_v40  ;;  %v4768_v50 = vsel %vm1824_vm7, %v1797_v7, %v3024_v1  ;;  %v3040_v52 = vunpack.i.h.bf16 %v3038_v49  ;;  %v3039_v5 = vunpack.i.l.bf16 %v3038_v49  ;;  %v4781_v7 = vld [vmem:[%s3881_s5 + $0xa8] sm:$0xff]  ;;  %v4786_v1 = vld [vmem:[%s3881_s5 + $0xa0] sm:$0xff] }
  0xd0   : > { %v3033_v10 = vpop.permute.xlu0 %3032  ;;  %6802 = vst [vmem:[#allocation26_spill] sm:$0xff] %v4781_v7  ;;  %v1804_v40 = vsel %vm1782_vm6, %v4781_v7, %v2940_v53  ;;  %6803 = vst [vmem:[#allocation27_spill] sm:$0xff] %v4786_v1  ;;  %v1803_v38 = vsel %vm1782_vm6, %v4786_v1, %v2939_v59  ;;  %3317 = vrot.lane.b32.xlu1 %v6804_v32, %s3798_s20  ;;  %v1802_v58 = vsel %vm1782_vm6, %v4795_v25, %v2935_v9  ;;  %v3704_v25 = vld [vmem:[%s3881_s5 + $0xe0] sm:$0xff] }
  0xd1   : > { %v3035_v49 = vunpack.i.h.bf16 %v3033_v10  ;;  %v3034_v56 = vunpack.i.l.bf16 %v3033_v10  ;;  %v1801_v53 = vsel %vm1782_vm6, %v4800_v57, %v2934_v11  ;;  %v4805_v7 = vsel %vm1824_vm7, %v1803_v38, %v3039_v5 }
  0xd2   : > { %v4808_v59 = vsel %vm1824_vm7, %v1804_v40, %v3040_v52  ;;  %3312 = vrot.lane.b32.xlu0 %v4617_v12, %s3799_s22  ;;  %v4818_v32 = vpop.permute.xlu1 %3047  ;;  %v4824_v9 = vpack.i.bf16 %v4671_v62, %v4652_v28  ;;  %v6808_v5 = vrot.slane %v4655_v36, 5  ;;  %v6809_v10 = vrot.slane %v3921_v19, 5 }
  0xd3   : > { %v4813_v23 = vsel %vm1824_vm7, %v1802_v58, %v3035_v49  ;;  %v4816_v41 = vsel %vm1824_vm7, %v1801_v53, %v3034_v56  ;;  %6806 = vst [vmem:[#allocation29_spill] sm:$0xff] %v4818_v32  ;;  %v6810_v56 = vrot.slane %v4659_v22, 5  ;;  %v6812_v49 = vrot.slane %v4655_v36, 4 }
  0xd4   : > { %v4826_v52 = vpop.permute.xlu0 %3042  ;;  %v4833_v58 = vsel %vm622_vm4, %v6809_v10, %v6808_v5  ;;  %v6811_v40 = vmov %v6808_v5  ;;  %v6813_v62 = vrot.slane %v3921_v19, 4  ;;  %v6814_v53 = vrot.slane %v4659_v22, 4  ;;  %3327 = vrot.lane.b32.xlu1 %v4517_v15, %s3796_s12 }
  0xd5   : > { %6807 = vst [vmem:[#allocation30_spill] sm:$0xff] %v4826_v52  ;;  %v4840_v38 = vsel %vm622_vm4, %v6811_v40, %v6810_v56  ;;  %v6815_v11 = vmov %v6812_v49  ;;  %v2960_v10 = vunpack.i.h.bf16 %v4442_v33  ;;  %v2959_v52 = vunpack.i.l.bf16 %v4442_v33 }
  0xd6   : > { %v556_v28 = vsel %vm537_vm2, %v6813_v62, %v6812_v49  ;;  %v558_v5 = vsel %vm537_vm2, %v6815_v11, %v6814_v53  ;;  %v6816_v40 = vpack.i.bf16 %v4576_v34, %v4571_v37  ;;  %v6817_v36 = vrot.slane %v3921_v19, 6  ;;  %v3058_v19 = vpop.permute.xlu1 %3057 }
  0xd7   : > { %v6818_v49 = vrot.slane %v4659_v22, 6  ;;  %v6819_v15 = vrot.slane %v4030_v42, 5  ;;  %v6820_v34 = vrot.slane %v4777_v14, 5  ;;  %v3060_v56 = vunpack.i.h.bf16 %v3058_v19 }
  0xd8   : > { %3322 = vrot.lane.b32.xlu0 %v6816_v40, %s3800_s28  ;;  %v4865_v11 = vsel %vm707_vm5, %v6817_v36, %v721_v29  ;;  %v4884_v40 = vpack.i.bf16 %v558_v5, %v556_v28  ;;  %v6707_v36 = vrot.slane %v4773_v63, 4  ;;  %v3059_v32 = vunpack.i.l.bf16 %v3058_v19  ;;  %v4890_v1 = vpop.permute.xlu0 %3052 }
  0xd9   : > { %v4870_v33 = vsel %vm707_vm5, %v721_v29, %v6818_v49  ;;  %v4875_v62 = vsel %vm622_vm4, %v6819_v15, %v676_v35  ;;  %v4880_v37 = vsel %vm622_vm4, %v676_v35, %v6820_v34  ;;  %v2970_v49 = vunpack.i.h.bf16 %v4482_v61  ;;  %6821 = vst [vmem:[#allocation31_spill] sm:$0xff] %v4890_v1  ;;  %v3703_v35 = vld [vmem:[%s3881_s5 + $0xe8] sm:$0xff] }
  0xda   : > { %v2969_v15 = vunpack.i.l.bf16 %v4482_v61  ;;  %v1812_v34 = vsel %vm1782_vm6, %v3703_v35, %v2960_v10  ;;  %v1811_v28 = vsel %vm1782_vm6, %v3704_v25, %v2959_v52  ;;  %v6822_v5 = vpack.i.bf16 %v4590_v26, %v4581_v0  ;;  %v3068_v52 = vpop.permute.xlu1 %3067 }
  0xdb   : > { %v2965_v19 = vunpack.i.h.bf16 %v4436_v27  ;;  %v2964_v29 = vunpack.i.l.bf16 %v4436_v27  ;;  %v4907_v10 = vsel %vm1824_vm7, %v1811_v28, %v3059_v32  ;;  %v4910_v25 = vsel %vm1824_vm7, %v1812_v34, %v3060_v56  ;;  %v4925_v56 = vld [vmem:[%s3881_s5 + $0x108] sm:$0xff]  ;;  %v3706_v32 = vld [vmem:[%s3881_s5 + $0xf0] sm:$0xff] }
  0xdc   : > { %3337 = vrot.lane.b32.xlu1 %v6822_v5, %s3798_s20  ;;  %6823 = vst [vmem:[#allocation32_spill] sm:$0xff] %v4910_v25  ;;  %3332 = vrot.lane.b32.xlu0 %v4627_v44, %s3799_s22  ;;  %v2975_v0 = vunpack.i.h.bf16 %v4470_v46  ;;  %v2974_v26 = vunpack.i.l.bf16 %v4470_v46  ;;  %v6824_v35 = vrot.slane %v4030_v42, 4  ;;  %v1816_v34 = vsel %vm1782_vm6, %v4925_v56, %v2970_v49  ;;  %v3063_v61 = vpop.permute.xlu0 %3062 }
  0xdd   : > { %v1815_v28 = vsel %vm1782_vm6, %v4777_v14, %v2969_v15  ;;  %v3070_v46 = vunpack.i.h.bf16 %v3068_v52  ;;  %v3069_v5 = vunpack.i.l.bf16 %v3068_v52  ;;  %v2980_v53 = vunpack.i.h.bf16 %v4515_v3 }
  0xde   : > { %v4921_v27 = vsel %vm537_vm2, %v6824_v35, %v6707_v36  ;;  %v2979_v1 = vunpack.i.l.bf16 %v4515_v3  ;;  %v3065_v35 = vunpack.i.h.bf16 %v3063_v61  ;;  %v3064_v36 = vunpack.i.l.bf16 %v3063_v61 }
  0xdf   : > { %v1814_v49 = vsel %vm1782_vm6, %v4773_v63, %v2965_v19  ;;  %v1813_v15 = vsel %vm1782_vm6, %v3706_v32, %v2964_v29  ;;  %v4940_v52 = vsel %vm1824_vm7, %v1815_v28, %v3069_v5  ;;  %v4943_v25 = vsel %vm1824_vm7, %v1816_v34, %v3070_v46  ;;  %v3078_v29 = vpop.permute.xlu1 %3077  ;;  %v4958_v28 = vld [vmem:[%s3881_s5 + $0x118] sm:$0xff]  ;;  %v4963_v46 = vld [vmem:[%s3881_s5 + $0x110] sm:$0xff] }
  0xe0   : > { %3347 = vrot.lane.b32.xlu1 %v4617_v12, %s3796_s12  ;;  %6825 = vst [vmem:[#allocation33_spill] sm:$0xff] %v4940_v52  ;;  %6826 = vst [vmem:[#allocation34_spill] sm:$0xff] %v4943_v25  ;;  %v6827_v3 = vpack.i.bf16 %v4610_v13, %v4605_v6  ;;  %v4950_v12 = vsel %vm1824_vm7, %v1814_v49, %v3065_v35  ;;  %v4953_v61 = vsel %vm1824_vm7, %v1813_v15, %v3064_v36  ;;  %v3073_v36 = vpop.permute.xlu0 %3072  ;;  %v4968_v35 = vld [vmem:[%s3881_s5 + $0x128] sm:$0xff]  ;;  %v4973_v15 = vld [vmem:[%s3881_s5 + $0x120] sm:$0xff] }
  0xe1   : > { %v640_v32 = vrot.slane %v4700_v17, 5  ;;  %v1818_v34 = vsel %vm1782_vm6, %v4958_v28, %v2975_v0  ;;  %v1817_v6 = vsel %vm1782_vm6, %v4963_v46, %v2974_v26  ;;  %v3080_v13 = vunpack.i.h.bf16 %v3078_v29 }
  0xe2   : > { %3342 = vrot.lane.b32.xlu0 %v6827_v3, %s3800_s28  ;;  %v3079_v5 = vunpack.i.l.bf16 %v3078_v29  ;;  %v1820_v49 = vsel %vm1782_vm6, %v4968_v35, %v2980_v53  ;;  %v1819_v3 = vsel %vm1782_vm6, %v4973_v15, %v2979_v1  ;;  %v3075_v0 = vunpack.i.h.bf16 %v3073_v36  ;;  %v4992_v1 = vld [vmem:[%s3881_s5 + $0x140] sm:$0xff] }
  0xe3   : > { %v3074_v19 = vunpack.i.l.bf16 %v3073_v36  ;;  %v6828_v26 = vpack.i.bf16 %v4647_v20, %v4637_v51  ;;  %v2985_v29 = vunpack.i.h.bf16 %v4507_v60  ;;  %v2984_v25 = vunpack.i.l.bf16 %v4507_v60  ;;  %6829 = vst [vmem:[#allocation35_spill] sm:$0xff] %v4992_v1 }
  0xe4   : > { %v4984_v52 = vsel %vm1824_vm7, %v1819_v3, %v3079_v5  ;;  %v4987_v53 = vsel %vm1824_vm7, %v1820_v49, %v3080_v13  ;;  %v1823_v51 = vsel %vm1782_vm6, %v4992_v1, %v4553_v30  ;;  %v4998_v20 = vsel %vm1824_vm7, %v1818_v34, %v3075_v0  ;;  %v998_v5 = vpop.permute.xlu1 %997  ;;  %v3083_v49 = vpop.permute.xlu0 %3082 }
  0xe5   : > { %3357 = vrot.lane.b32.xlu1 %v6828_v26, %s3798_s20  ;;  %v5001_v60 = vsel %vm1824_vm7, %v1817_v6, %v3074_v19  ;;  %v642_v13 = vrot.slane %v4728_v39, 5  ;;  %v5005_v36 = vsel %vm1824_vm7, %v1823_v51, %v998_v5  ;;  %v559_v3 = vrot.slane %v4700_v17, 4  ;;  %v5019_v5 = vld [vmem:[%s3881_s5 + $0x138] sm:$0xff] }
  0xe6   : > { %3352 = vrot.lane.b32.xlu0 %v4824_v9, %s3799_s22  ;;  %6830 = vst [vmem:[#allocation36_spill] sm:$0xff] %v5005_v36  ;;  %v725_v30 = vrot.slane %v4700_v17, 6  ;;  %v3085_v1 = vunpack.i.h.bf16 %v3083_v49  ;;  %v3084_v34 = vunpack.i.l.bf16 %v3083_v49  ;;  %v6831_v19 = vrot.slane %v4777_v14, 4  ;;  %6833 = vst [vmem:[#allocation37_spill] sm:$0xff] %v5019_v5  ;;  %v5024_v36 = vld [vmem:[%s3881_s5 + $0x130] sm:$0xff] }
  0xe7   : > { %v6832_v6 = vrot.slane %v4773_v63, 4  ;;  %v1822_v26 = vsel %vm1782_vm6, %v5019_v5, %v2985_v29  ;;  %v1821_v17 = vsel %vm1782_vm6, %v5024_v36, %v2984_v25  ;;  %v6835_v49 = vrot.slane %v4773_v63, 6 }
  0xe8   : > { %v6837_v51 = vrot.slane %v4777_v14, 6  ;;  %v5047_v25 = vsel %vm1824_vm7, %v1822_v26, %v3085_v1  ;;  %v5062_v63 = vpop.permute.xlu0 %3087  ;;  %v6843_v26 = vrot.slane %v4728_v39, 4 }
  0xe9   : > { %3367 = vrot.lane.b32.xlu1 %v4627_v44, %s3796_s12  ;;  %v598_v0 = vsel %vm537_vm2, %v6832_v6, %v6831_v19  ;;  %v6834_v44 = vpack.i.bf16 %v4687_v43, %v4676_v24  ;;  %v6836_v19 = vrot.slane %v4030_v42, 6  ;;  %v6838_v29 = vmov %v6835_v49  ;;  %v5052_v43 = vpop.permute.xlu1 %3092  ;;  %6841 = vst [vmem:[#allocation39_spill] sm:$0xff] %v5062_v63 }
  0xea   : > { %v5044_v5 = vsel %vm707_vm5, %v6838_v29, %v6837_v51  ;;  %v5050_v24 = vsel %vm1824_vm7, %v1821_v17, %v3084_v34  ;;  %6839 = vst [vmem:[#allocation38_spill] sm:$0xff] %v5052_v43  ;;  %v6840_v42 = vrot.slane %v4659_v22, 5  ;;  %v6842_v51 = vrot.slane %v4659_v22, 4 }
  0xeb   : > { %3362 = vrot.lane.b32.xlu0 %v6834_v44, %s3800_s28  ;;  %v5037_v6 = vsel %vm707_vm5, %v6836_v19, %v6835_v49  ;;  %v5060_v49 = vsel %vm622_vm4, %v640_v32, %v642_v13  ;;  %v562_v34 = vsel %vm537_vm2, %v559_v3, %v6843_v26  ;;  %v6844_v17 = vrot.slane %v4659_v22, 6 }
  0xec   : > { %v5057_v44 = vsel %vm622_vm4, %v6840_v42, %v640_v32  ;;  %v560_v1 = vsel %vm537_vm2, %v6842_v51, %v559_v3  ;;  %v680_v29 = vrot.slane %v4925_v56, 5  ;;  %v6845_v32 = vpack.i.bf16 %v4840_v38, %v4833_v58  ;;  %v5102_v3 = vpop.permute.xlu0 %3097 }
  0xed   : > { %v5073_v19 = vsel %vm707_vm5, %v6844_v17, %v725_v30  ;;  %v6846_v42 = vrot.slane %v4728_v39, 6  ;;  %v599_v22 = vrot.slane %v4925_v56, 4  ;;  %v5091_v17 = vpack.i.bf16 %v598_v0, %v4921_v27  ;;  %6848 = vst [vmem:[#allocation41_spill] sm:$0xff] %v5102_v3 }
  0xee   : > { %3377 = vrot.lane.b32.xlu1 %v6845_v32, %s3798_s20  ;;  %v765_v58 = vrot.slane %v4925_v56, 6  ;;  %v5095_v32 = vpop.permute.xlu1 %3102  ;;  %v644_v26 = vrot.slane %v4723_v18, 5  ;;  %v5104_v43 = vpack.i.bf16 %v562_v34, %v560_v1  ;;  %v6849_v0 = vrot.slane %v4777_v14, 5 }
  0xef   : > { %v5083_v51 = vsel %vm707_vm5, %v725_v30, %v6846_v42  ;;  %3372 = vrot.lane.b32.xlu0 %v4884_v40, %s3799_s22  ;;  %6847 = vst [vmem:[#allocation40_spill] sm:$0xff] %v5095_v32  ;;  %v3401_v30 = vpack.i.bf16 %v5044_v5, %v5037_v6  ;;  %v6850_v6 = vrot.slane %v4963_v46, 5  ;;  %v6851_v1 = vrot.slane %v4777_v14, 4 }
  0xf0   : > { %v5114_v5 = vsel %vm622_vm4, %v6849_v0, %v680_v29  ;;  %v6852_v27 = vrot.slane %v4963_v46, 4  ;;  %v6854_v0 = vrot.slane %v4777_v14, 6  ;;  %v5147_v14 = vsel %vm622_vm4, %v642_v13, %v644_v26 }
  0xf1   : > { %v5119_v42 = vsel %vm622_vm4, %v680_v29, %v6850_v6  ;;  %v600_v34 = vsel %vm537_vm2, %v6851_v1, %v599_v22  ;;  %v6855_v29 = vrot.slane %v4963_v46, 6  ;;  %v563_v1 = vrot.slane %v4723_v18, 4 }
  0xf2   : > { %3387 = vrot.lane.b32.xlu1 %v4824_v9, %s3796_s12  ;;  %v602_v56 = vsel %vm537_vm2, %v599_v22, %v6852_v27  ;;  %v6853_v9 = vpack.i.bf16 %v4870_v33, %v4865_v11  ;;  %v5134_v38 = vsel %vm707_vm5, %v6854_v0, %v765_v58  ;;  %v2900_v22 = vunpack.i.h.bf16 %v4319_v54  ;;  %v3113_v33 = vpop.permute.xlu1 %3112 }
  0xf3   : > { %v5139_v6 = vsel %vm707_vm5, %v765_v58, %v6855_v29  ;;  %v2899_v27 = vunpack.i.l.bf16 %v4319_v54  ;;  %v2890_v11 = vunpack.i.h.bf16 %v4321_v4  ;;  %v3115_v58 = vunpack.i.h.bf16 %v3113_v33  ;;  %v5150_v29 = vpop.permute.xlu0 %3107 }
  0xf4   : > { %3382 = vrot.lane.b32.xlu0 %v6853_v9, %s3800_s28  ;;  %v2889_v9 = vunpack.i.l.bf16 %v4321_v4  ;;  %v3114_v0 = vunpack.i.l.bf16 %v3113_v33  ;;  %6856 = vst [vmem:[#allocation42_spill] sm:$0xff] %v5150_v29  ;;  %v6857_v32 = vrot.slane %v4744_v8, 5  ;;  %v6858_v54 = vpack.i.bf16 %v4880_v37, %v4875_v62 }
  0xf5   : > { %v5163_v4 = vpack.i.bf16 %v602_v56, %v600_v34  ;;  %v729_v33 = vrot.slane %v4723_v18, 6  ;;  %v6861_v62 = vrot.slane %v4728_v39, 4  ;;  %v3714_v18 = vld [vmem:[%s3881_s5 + $0x28] sm:$0xff] }
  0xf6   : > { %v5155_v3 = vsel %vm622_vm4, %v644_v26, %v6857_v32  ;;  %3397 = vrot.lane.b32.xlu1 %v6858_v54, %s3798_s20  ;;  %v5168_v29 = vsel %vm1866_vm9, %v4736_v2, %v3114_v0  ;;  %v5172_v26 = vsel %vm1866_vm9, %v4733_v21, %v3115_v58  ;;  %v6862_v32 = vrot.slane %v4744_v8, 4  ;;  %v3715_v2 = vld [vmem:[%s3881_s5 + $0x20] sm:$0xff]  ;;  %v3123_v21 = vpop.permute.xlu1 %3122 }
  0xf7   : > { %6859 = vst [vmem:[#allocation43_spill] sm:$0xff] %v5168_v29  ;;  %6860 = vst [vmem:[#allocation44_spill] sm:$0xff] %v5172_v26  ;;  %v564_v37 = vsel %vm537_vm2, %v6861_v62, %v563_v1  ;;  %v5184_v34 = vsel %vm1782_vm6, %v3714_v18, %v2900_v22  ;;  %v5188_v0 = vsel %vm1782_vm6, %v3715_v2, %v2899_v27  ;;  %v5195_v62 = vld [vmem:[%s3881_s5 + $0x8] sm:$0xff]  ;;  %v3125_v27 = vunpack.i.h.bf16 %v3123_v21  ;;  %v3118_v2 = vpop.permute.xlu0 %3117 }
  0xf8   : > { %3392 = vrot.lane.b32.xlu0 %v5091_v17, %s3799_s22  ;;  %v566_v56 = vsel %vm537_vm2, %v563_v1, %v6862_v32  ;;  %6863 = vst [vmem:[#allocation45_spill] sm:$0xff] %v5195_v62  ;;  %v5199_v1 = vsel %vm1782_vm6, %v5195_v62, %v2890_v11  ;;  %v5202_v32 = vld [vmem:[%s3881_s5] sm:$0xff]  ;;  %v3124_v18 = vunpack.i.l.bf16 %v3123_v21  ;;  %v3120_v13 = vunpack.i.h.bf16 %v3118_v2 }
  0xf9   : > { %v5206_v22 = vsel %vm1782_vm6, %v5202_v32, %v2889_v9  ;;  %v3119_v58 = vunpack.i.l.bf16 %v3118_v2  ;;  %v5210_v54 = vpack.i.bf16 %v566_v56, %v564_v37  ;;  %v6864_v26 = vrot.slane %v4728_v39, 6 }
  0xfa   : > { %3407 = vrot.lane.b32.xlu1 %v4884_v40, %s3796_s12  ;;  %v2905_v29 = vunpack.i.h.bf16 %v4333_v55  ;;  %v2904_v9 = vunpack.i.l.bf16 %v4333_v55  ;;  %v5221_v21 = vsel %vm1866_vm9, %v4768_v50, %v3124_v18  ;;  %v5225_v2 = vsel %vm1866_vm9, %v4765_v47, %v3125_v27 }
  0xfb   : > { %v5215_v11 = vsel %vm707_vm5, %v6864_v26, %v729_v33  ;;  %v5230_v39 = vsel %vm1866_vm9, %v4715_v45, %v3119_v58  ;;  %v5234_v40 = vsel %vm1866_vm9, %v4718_v16, %v3120_v13  ;;  %v3133_v26 = vpop.permute.xlu1 %3132  ;;  %v684_v50 = vrot.slane %v4958_v28, 5  ;;  %v3128_v47 = vpop.permute.xlu0 %3127 }
  0xfc   : > { %3402 = vrot.lane.b32.xlu0 %v3401_v30, %s3800_s28  ;;  %6865 = vst [vmem:[#allocation46_spill] sm:$0xff] %v5230_v39  ;;  %6866 = vst [vmem:[#allocation47_spill] sm:$0xff] %v5234_v40  ;;  %v3135_v37 = vunpack.i.h.bf16 %v3133_v26  ;;  %v3134_v56 = vunpack.i.l.bf16 %v3133_v26  ;;  %v603_v30 = vrot.slane %v4958_v28, 4  ;;  %v2895_v45 = vunpack.i.h.bf16 %v4338_v31  ;;  %v3718_v40 = vld [vmem:[%s3881_s5 + $0x38] sm:$0xff] }
  0xfd   : > { %v3130_v58 = vunpack.i.h.bf16 %v3128_v47  ;;  %v3129_v18 = vunpack.i.l.bf16 %v3128_v47  ;;  %v6867_v16 = vpack.i.bf16 %v5060_v49, %v5057_v44  ;;  %v769_v47 = vrot.slane %v4958_v28, 6 }
  0xfe   : > { %v5248_v55 = vsel %vm1866_vm9, %v4816_v41, %v3134_v56  ;;  %v5252_v26 = vsel %vm1866_vm9, %v4813_v23, %v3135_v37  ;;  %v5260_v44 = vsel %vm1782_vm6, %v3718_v40, %v2905_v29  ;;  %v2894_v49 = vunpack.i.l.bf16 %v4338_v31  ;;  %v6869_v56 = vld [vmem:[#allocation25_spill] sm:$0xff] }
  0xff   : > { %3417 = vrot.lane.b32.xlu1 %v6867_v16, %s3798_s20  ;;  %6868 = vst [vmem:[#allocation48_spill] sm:$0xff] %v5260_v44  ;;  %v5265_v41 = vsel %vm1866_vm9, %v4755_v48, %v3129_v18  ;;  %v5269_v23 = vsel %vm1866_vm9, %v6869_v56, %v3130_v58  ;;  %v5271_v37 = vpop.permute.xlu1 %3142  ;;  %v3138_v16 = vpop.permute.xlu0 %3137  ;;  %v6871_v13 = vrot.slane %v4744_v8, 6  ;;  %v6872_v29 = vrot.slane %v4963_v46, 5  ;;  %v6875_v56 = vld [vmem:[#allocation22_spill] sm:$0xff]  ;;  %v3722_v44 = vld [vmem:[%s3881_s5 + $0x48] sm:$0xff] }
 0x100   : > { %3412 = vrot.lane.b32.xlu0 %v5104_v43, %s3799_s22  ;;  %6870 = vst [vmem:[#allocation25_spill] sm:$0xff] %v5271_v37  ;;  %v6873_v48 = vrot.slane %v4973_v15, 5  ;;  %v6874_v58 = vrot.slane %v4963_v46, 4  ;;  %v2910_v39 = vunpack.i.h.bf16 %v6875_v56  ;;  %v3140_v37 = vunpack.i.h.bf16 %v3138_v16 }
 0x101   : > { %v5276_v27 = vsel %vm707_vm5, %v729_v33, %v6871_v13  ;;  %v5281_v31 = vsel %vm622_vm4, %v6872_v29, %v684_v50  ;;  %v3139_v33 = vunpack.i.l.bf16 %v3138_v16  ;;  %v6876_v13 = vrot.slane %v4973_v15, 4 }
 0x102   : > { %v5286_v40 = vsel %vm622_vm4, %v684_v50, %v6873_v48  ;;  %v604_v18 = vsel %vm537_vm2, %v6874_v58, %v603_v30  ;;  %v6877_v50 = vpack.i.bf16 %v5083_v51, %v5073_v19  ;;  %v6878_v48 = vrot.slane %v4963_v46, 6 }
 0x103   : > { %3427 = vrot.lane.b32.xlu1 %v5091_v17, %s3796_s12  ;;  %v606_v29 = vsel %vm537_vm2, %v603_v30, %v6876_v13  ;;  %v6879_v16 = vrot.slane %v4973_v15, 6  ;;  %v6880_v17 = vld [vmem:[#allocation24_spill] sm:$0xff]  ;;  %v5315_v30 = vsel %vm1866_vm9, %v4805_v7, %v3139_v33  ;;  %v5319_v19 = vsel %vm1866_vm9, %v4808_v59, %v3140_v37  ;;  %v5321_v46 = vpop.permute.xlu1 %3152  ;;  %v3719_v13 = vld [vmem:[%s3881_s5 + $0x30] sm:$0xff]  ;;  %v5343_v37 = vpop.permute.xlu0 %3147 }
 0x104   : > { %3422 = vrot.lane.b32.xlu0 %v6877_v50, %s3800_s28  ;;  %v5304_v58 = vsel %vm707_vm5, %v6878_v48, %v769_v47  ;;  %v648_v62 = vrot.slane %v6880_v17, 5  ;;  %6881 = vst [vmem:[#allocation24_spill] sm:$0xff] %v5321_v46  ;;  %v567_v51 = vrot.slane %v6880_v17, 4  ;;  %v5327_v50 = vsel %vm1782_vm6, %v3719_v13, %v2904_v9  ;;  %v5330_v48 = vld [vmem:[%s3881_s5 + $0x18] sm:$0xff]  ;;  %v5337_v33 = vld [vmem:[%s3881_s5 + $0x10] sm:$0xff]  ;;  %6884 = vst [vmem:[#allocation51_spill] sm:$0xff] %v5343_v37 }
 0x105   : > { %v5309_v63 = vsel %vm707_vm5, %v769_v47, %v6879_v16  ;;  %6882 = vst [vmem:[#allocation49_spill] sm:$0xff] %v5330_v48  ;;  %v5334_v7 = vsel %vm1782_vm6, %v5330_v48, %v2895_v45  ;;  %6883 = vst [vmem:[#allocation50_spill] sm:$0xff] %v5337_v33  ;;  %v5341_v59 = vsel %vm1782_vm6, %v5337_v33, %v2894_v49  ;;  %v733_v47 = vrot.slane %v6880_v17, 6 }
 0x106   : > { %v6885_v13 = vpack.i.bf16 %v5119_v42, %v5114_v5  ;;  %v5357_v49 = vsel %vm1782_vm6, %v3722_v44, %v2910_v39  ;;  %v5361_v16 = vpack.i.bf16 %v606_v29, %v604_v18  ;;  %v6888_v17 = vrot.slane %v4800_v57, 5  ;;  %v6891_v42 = vld [vmem:[#allocation8_spill] sm:$0xff] }
 0x107   : > { %6886 = vst [vmem:[#allocation52_spill] sm:$0xff] %v5357_v49  ;;  %v3163_v5 = vpop.permute.xlu1 %3162  ;;  %v6889_v44 = vrot.slane %v4744_v8, 4  ;;  %v6890_v29 = vrot.slane %v4800_v57, 4  ;;  %v2945_v49 = vunpack.i.h.bf16 %v6891_v42  ;;  %v2944_v56 = vunpack.i.l.bf16 %v6891_v42  ;;  %v3158_v37 = vpop.permute.xlu0 %3157 }
 0x108   : > { %3437 = vrot.lane.b32.xlu1 %v6885_v13, %s3798_s20  ;;  %3432 = vrot.lane.b32.xlu0 %v5163_v4, %s3799_s22  ;;  %v6887_v13 = vrot.slane %v4744_v8, 5  ;;  %v5374_v39 = vsel %vm622_vm4, %v648_v62, %v6888_v17  ;;  %v3165_v46 = vunpack.i.h.bf16 %v3163_v5  ;;  %v3160_v48 = vunpack.i.h.bf16 %v3158_v37 }
 0x109   : > { %v568_v18 = vsel %vm537_vm2, %v6889_v44, %v567_v51  ;;  %v570_v9 = vsel %vm537_vm2, %v567_v51, %v6890_v29  ;;  %v3159_v33 = vunpack.i.l.bf16 %v3158_v37  ;;  %v518_v51 = vrot.slane %v4958_v28, 3  ;;  %v6897_v44 = vld [vmem:[#allocation32_spill] sm:$0xff]  ;;  %v5423_v29 = vld [vmem:[%s3881_s5 + $0xb8] sm:$0xff] }
 0x10a   : > { %v5369_v45 = vsel %vm622_vm4, %v6887_v13, %v648_v62  ;;  %v3164_v13 = vunpack.i.l.bf16 %v3163_v5  ;;  %v6892_v62 = vrot.slane %v4744_v8, 6  ;;  %v5398_v5 = vsel %vm1866_vm9, %v4950_v12, %v3165_v46 }
 0x10b   : > { %6894 = vst [vmem:[#allocation53_spill] sm:$0xff] %v5398_v5  ;;  %v6895_v37 = vpack.i.bf16 %v5139_v6, %v5134_v38  ;;  %v6896_v8 = vrot.slane %v4800_v57, 6  ;;  %v6727_v28 = vrot.slane %v4973_v15, 3  ;;  %v5416_v12 = vsel %vm1866_vm9, %v6897_v44, %v3160_v48  ;;  %v3173_v46 = vpop.permute.xlu1 %3172 }
 0x10c   : > { %3447 = vrot.lane.b32.xlu1 %v5104_v43, %s3796_s12  ;;  %v5389_v17 = vsel %vm707_vm5, %v6892_v62, %v733_v47  ;;  %v5394_v42 = vsel %vm1866_vm9, %v4953_v61, %v3164_v13  ;;  %v5412_v61 = vsel %vm1866_vm9, %v4907_v10, %v3159_v33  ;;  %v5420_v6 = vpack.i.bf16 %v570_v9, %v568_v18  ;;  %v5430_v13 = vld [vmem:[%s3881_s5 + $0xb0] sm:$0xff]  ;;  %v3168_v62 = vpop.permute.xlu0 %3167 }
 0x10d   : > { %6893 = vst [vmem:[#allocation8_spill] sm:$0xff] %v5394_v42  ;;  %3442 = vrot.lane.b32.xlu0 %v6895_v37, %s3800_s28  ;;  %v5407_v43 = vsel %vm707_vm5, %v733_v47, %v6896_v8  ;;  %v5427_v47 = vsel %vm1782_vm6, %v5423_v29, %v2945_v49  ;;  %v5434_v10 = vsel %vm1782_vm6, %v5430_v13, %v2944_v56  ;;  %v3175_v48 = vunpack.i.h.bf16 %v3173_v46  ;;  %v6899_v18 = vld [vmem:[#allocation17_spill] sm:$0xff] }
 0x10e   : > { %v3174_v33 = vunpack.i.l.bf16 %v3173_v46  ;;  %v3170_v37 = vunpack.i.h.bf16 %v3168_v62  ;;  %v3169_v8 = vunpack.i.l.bf16 %v3168_v62  ;;  %v6898_v9 = vpack.i.bf16 %v5155_v3, %v5147_v14  ;;  %v6903_v62 = vld [vmem:[#allocation9_spill] sm:$0xff] }
 0x10f   : > { %v6900_v44 = vrot.slane %v6899_v18, 3  ;;  %v5453_v46 = vsel %vm1866_vm9, %v4998_v20, %v3175_v48  ;;  %v5460_v3 = vsel %vm452_vm3, %v518_v51, %v6727_v28  ;;  %v607_v14 = vrot.slane %v4968_v35, 4  ;;  %v6906_v20 = vld [vmem:[#allocation34_spill] sm:$0xff] }
 0x110   : > { %3457 = vrot.lane.b32.xlu1 %v6898_v9, %s3798_s20  ;;  %v5449_v56 = vsel %vm1866_vm9, %v5001_v60, %v3174_v33  ;;  %6902 = vst [vmem:[#allocation17_spill] sm:$0xff] %v5453_v46  ;;  %v2955_v9 = vunpack.i.h.bf16 %v6903_v62  ;;  %v6904_v60 = vld [vmem:[#allocation33_spill] sm:$0xff]  ;;  %v5471_v48 = vsel %vm1866_vm9, %v6906_v20, %v3170_v37  ;;  %v773_v28 = vrot.slane %v4968_v35, 6  ;;  %v6935_v62 = vld [vmem:[#allocation14_spill] sm:$0xff] }
 0x111   : > { %v5445_v38 = vsel %vm452_vm3, %v6900_v44, %v518_v51  ;;  %6901 = vst [vmem:[#allocation32_spill] sm:$0xff] %v5449_v56  ;;  %3452 = vrot.lane.b32.xlu0 %v5210_v54, %s3799_s22  ;;  %v5467_v33 = vsel %vm1866_vm9, %v6904_v60, %v3169_v8  ;;  %6907 = vst [vmem:[#allocation34_spill] sm:$0xff] %v5471_v48  ;;  %v3183_v44 = vpop.permute.xlu1 %3182  ;;  %v3178_v56 = vpop.permute.xlu0 %3177  ;;  %v688_v60 = vrot.slane %v4968_v35, 5 }
 0x112   : > { %6905 = vst [vmem:[#allocation33_spill] sm:$0xff] %v5467_v33  ;;  %v3185_v49 = vunpack.i.h.bf16 %v3183_v44  ;;  %v3184_v46 = vunpack.i.l.bf16 %v3183_v44  ;;  %v3180_v5 = vunpack.i.h.bf16 %v3178_v56  ;;  %v3179_v42 = vunpack.i.l.bf16 %v3178_v56  ;;  %v6911_v44 = vld [vmem:[#allocation28_spill] sm:$0xff] }
 0x113   : > { %v6910_v56 = vpack.i.bf16 %v5276_v27, %v5215_v11  ;;  %v571_v18 = vrot.slane %v6911_v44, 4  ;;  %v6915_v27 = vld [vmem:[#allocation10_spill] sm:$0xff] }
 0x114   : > { %3467 = vrot.lane.b32.xlu1 %v5163_v4, %s3796_s12  ;;  %v5481_v37 = vsel %vm1866_vm9, %v5050_v24, %v3184_v46  ;;  %v5485_v20 = vsel %vm1866_vm9, %v5047_v25, %v3185_v49  ;;  %v5495_v8 = vsel %vm1866_vm9, %v4984_v52, %v3179_v42  ;;  %v5499_v24 = vsel %vm1866_vm9, %v4987_v53, %v3180_v5  ;;  %v6914_v49 = vld [vmem:[#allocation27_spill] sm:$0xff]  ;;  %v3725_v42 = vld [vmem:[%s3881_s5 + $0xd8] sm:$0xff]  ;;  %v6918_v5 = vld [vmem:[#allocation36_spill] sm:$0xff] }
 0x115   : > { %6908 = vst [vmem:[#allocation54_spill] sm:$0xff] %v5481_v37  ;;  %6909 = vst [vmem:[#allocation55_spill] sm:$0xff] %v5485_v20  ;;  %3462 = vrot.lane.b32.xlu0 %v6910_v56, %s3800_s28  ;;  %v5501_v46 = vpop.permute.xlu1 %3187  ;;  %v2950_v56 = vunpack.i.h.bf16 %v6915_v27  ;;  %v2949_v4 = vunpack.i.l.bf16 %v6915_v27  ;;  %v1121_v51 = vpop.permute.xlu0 %1120  ;;  %v6916_v20 = vrot.slane %v4973_v15, 4  ;;  %v5513_v53 = vsel %vm1782_vm6, %v3725_v42, %v2955_v9 }
 0x116   : > { %6912 = vst [vmem:[#allocation28_spill] sm:$0xff] %v5495_v8  ;;  %6913 = vst [vmem:[#allocation56_spill] sm:$0xff] %v5499_v24  ;;  %v5517_v37 = vsel %vm1866_vm9, %v6918_v5, %v1121_v51  ;;  %v6920_v25 = vpack.i.bf16 %v5286_v40, %v5281_v31  ;;  %v6921_v27 = vrot.slane %v5024_v36, 4  ;;  %v6923_v9 = vrot.slane %v5024_v36, 6  ;;  %v5560_v8 = vld [vmem:[%s3881_s5 + $0xc8] sm:$0xff] }
 0x117   : > { %v608_v52 = vsel %vm537_vm2, %v6916_v20, %v607_v14  ;;  %6917 = vst [vmem:[#allocation27_spill] sm:$0xff] %v5513_v53  ;;  %6919 = vst [vmem:[#allocation10_spill] sm:$0xff] %v5517_v37  ;;  %v6922_v20 = vrot.slane %v4973_v15, 6  ;;  %v6924_v31 = vrot.slane %v4973_v15, 5  ;;  %v6926_v42 = vrot.slane %v4800_v57, 4 }
 0x118   : > { %3477 = vrot.lane.b32.xlu1 %v6920_v25, %s3798_s20  ;;  %v610_v11 = vsel %vm537_vm2, %v607_v14, %v6921_v27  ;;  %v5536_v51 = vsel %vm707_vm5, %v773_v28, %v6923_v9  ;;  %v6925_v14 = vrot.slane %v5024_v36, 5  ;;  %v522_v9 = vrot.slane %v4968_v35, 3  ;;  %6929 = vst [vmem:[#allocation57_spill] sm:$0xff] %v5560_v8  ;;  %v6933_v35 = vld [vmem:[#allocation37_spill] sm:$0xff] }
 0x119   : > { %v5529_v24 = vsel %vm707_vm5, %v6922_v20, %v773_v28  ;;  %3472 = vrot.lane.b32.xlu0 %v5361_v16, %s3799_s22  ;;  %v5541_v40 = vsel %vm622_vm4, %v6924_v31, %v688_v60  ;;  %v572_v5 = vsel %vm537_vm2, %v6926_v42, %v571_v18  ;;  %v5551_v27 = vpop.permute.xlu1 %3197  ;;  %v6928_v20 = vrot.slane %v6914_v49, 4  ;;  %v5573_v48 = vpop.permute.xlu0 %3192 }
 0x11a   : > { %v5546_v25 = vsel %vm622_vm4, %v688_v60, %v6925_v14  ;;  %6927 = vst [vmem:[#allocation36_spill] sm:$0xff] %v5551_v27  ;;  %v652_v37 = vrot.slane %v6911_v44, 5  ;;  %v5564_v60 = vsel %vm1782_vm6, %v5560_v8, %v2950_v56  ;;  %v5567_v14 = vld [vmem:[%s3881_s5 + $0xc0] sm:$0xff]  ;;  %6931 = vst [vmem:[#allocation59_spill] sm:$0xff] %v5573_v48  ;;  %v737_v31 = vrot.slane %v6911_v44, 6 }
 0x11b   : > { %v574_v28 = vsel %vm537_vm2, %v571_v18, %v6928_v20  ;;  %6930 = vst [vmem:[#allocation58_spill] sm:$0xff] %v5567_v14  ;;  %v5571_v42 = vsel %vm1782_vm6, %v5567_v14, %v2949_v4  ;;  %v5575_v18 = vpack.i.bf16 %v610_v11, %v608_v52  ;;  %v6932_v11 = vpack.i.bf16 %v5309_v63, %v5304_v58 }
 0x11c   : > { %3487 = vrot.lane.b32.xlu1 %v5210_v54, %s3796_s12  ;;  %v5590_v52 = vpack.i.bf16 %v574_v28, %v572_v5  ;;  %v692_v33 = vrot.slane %v6933_v35, 5  ;;  %v6934_v54 = vld [vmem:[#allocation35_spill] sm:$0xff]  ;;  %v2989_v20 = vunpack.i.l.bf16 %v6935_v62  ;;  %v6937_v56 = vrot.slane %v4973_v15, 3 }
 0x11d   : > { %3482 = vrot.lane.b32.xlu0 %v6932_v11, %s3800_s28  ;;  %v5595_v8 = vpop.permute.xlu1 %3207  ;;  %v6938_v4 = vrot.slane %v5024_v36, 3  ;;  %v6939_v58 = vrot.slane %v4800_v57, 5  ;;  %v2990_v28 = vunpack.i.h.bf16 %v6935_v62  ;;  %v5613_v11 = vpop.permute.xlu0 %3202  ;;  %v6941_v53 = vrot.slane %v6914_v49, 5 }
 0x11e   : > { %6936 = vst [vmem:[#allocation37_spill] sm:$0xff] %v5595_v8  ;;  %v5600_v44 = vsel %vm452_vm3, %v6937_v56, %v522_v9  ;;  %6940 = vst [vmem:[#allocation35_spill] sm:$0xff] %v5613_v11  ;;  %v611_v56 = vrot.slane %v6933_v35, 4  ;;  %v6943_v62 = vpack.i.bf16 %v5374_v39, %v5369_v45  ;;  %v6946_v8 = vld [vmem:[#allocation16_spill] sm:$0xff]  ;;  %v6947_v45 = vrot.slane %v5024_v36, 5 }
 0x11f   : > { %v5605_v63 = vsel %vm452_vm3, %v522_v9, %v6938_v4  ;;  %v5610_v5 = vsel %vm622_vm4, %v6939_v58, %v652_v37  ;;  %v5618_v15 = vsel %vm622_vm4, %v652_v37, %v6941_v53  ;;  %v6942_v9 = vld [vmem:[#allocation15_spill] sm:$0xff]  ;;  %v6944_v58 = vrot.slane %v4800_v57, 6 }
 0x120   : > { %v3000_v4 = vunpack.i.h.bf16 %v6942_v9  ;;  %v2999_v27 = vunpack.i.l.bf16 %v6942_v9  ;;  %3497 = vrot.lane.b32.xlu1 %v6943_v62, %s3798_s20  ;;  %v6945_v37 = vrot.slane %v6914_v49, 6  ;;  %v2995_v48 = vunpack.i.h.bf16 %v6946_v8 }
 0x121   : > { %v5631_v11 = vsel %vm707_vm5, %v6944_v58, %v737_v31  ;;  %v2994_v9 = vunpack.i.l.bf16 %v6946_v8  ;;  %3492 = vrot.lane.b32.xlu0 %v5420_v6, %s3799_s22  ;;  %v5645_v39 = vsel %vm622_vm4, %v6947_v45, %v692_v33  ;;  %v6948_v57 = vrot.slane %v6934_v54, 5  ;;  %v5656_v58 = vpop.permute.xlu1 %3217  ;;  %v5666_v14 = vpop.permute.xlu0 %3212 }
 0x122   : > { %v5636_v53 = vsel %vm707_vm5, %v737_v31, %v6945_v37  ;;  %v5654_v31 = vsel %vm1824_vm7, %v5206_v22, %v2989_v20  ;;  %6949 = vst [vmem:[#allocation14_spill] sm:$0xff] %v5656_v58  ;;  %v5664_v45 = vsel %vm1824_vm7, %v5199_v1, %v2990_v28  ;;  %6950 = vst [vmem:[#allocation15_spill] sm:$0xff] %v5666_v14  ;;  %v6951_v22 = vrot.slane %v5024_v36, 4 }
 0x123   : > { %v5650_v62 = vsel %vm622_vm4, %v692_v33, %v6948_v57  ;;  %v6952_v57 = vrot.slane %v6934_v54, 4  ;;  %v5678_v37 = vsel %vm1824_vm7, %v5184_v34, %v3000_v4  ;;  %v5682_v1 = vsel %vm1824_vm7, %v5188_v0, %v2999_v27 }
 0x124   : > { %v612_v20 = vsel %vm537_vm2, %v6951_v22, %v611_v56  ;;  %v6953_v28 = vpack.i.bf16 %v5407_v43, %v5389_v17  ;;  %v777_v33 = vrot.slane %v6933_v35, 6  ;;  %v5697_v34 = vsel %vm1824_vm7, %v5334_v7, %v2995_v48  ;;  %v6955_v43 = vld [vmem:[#allocation23_spill] sm:$0xff] }
 0x125   : > { %v614_v8 = vsel %vm537_vm2, %v611_v56, %v6952_v57  ;;  %v5693_v56 = vsel %vm1824_vm7, %v5341_v59, %v2994_v9  ;;  %v6954_v0 = vpack.i.bf16 %v5460_v3, %v5445_v38  ;;  %v6739_v17 = vrot.slane %v6934_v54, 6  ;;  %v3228_v57 = vpop.permute.xlu1 %3227  ;;  %v6956_v59 = vld [vmem:[#allocation26_spill] sm:$0xff]  ;;  %v3223_v7 = vpop.permute.xlu0 %3222 }
 0x126   : > { %3507 = vrot.lane.b32.xlu1 %v6953_v28, %s3800_s28  ;;  %v3005_v27 = vunpack.i.h.bf16 %v6955_v43  ;;  %v3004_v4 = vunpack.i.l.bf16 %v6955_v43  ;;  %v5706_v28 = vpack.i.bf16 %v614_v8, %v612_v20  ;;  %v656_v9 = vrot.slane %v6956_v59, 5 }
 0x127   : > { %3502 = vrot.lane.b32.xlu0 %v6954_v0, %s3795_s9  ;;  %v3230_v22 = vunpack.i.h.bf16 %v3228_v57  ;;  %v3229_v58 = vunpack.i.l.bf16 %v3228_v57  ;;  %v575_v14 = vrot.slane %v6956_v59, 4  ;;  %v3225_v38 = vunpack.i.h.bf16 %v3223_v7 }
 0x128   : > { %v3224_v3 = vunpack.i.l.bf16 %v3223_v7  ;;  %v6957_v0 = vrot.slane %v5024_v36, 6  ;;  %v5732_v7 = vsel %vm707_vm5, %v777_v33, %v6739_v17 }
 0x129   : > { %v5721_v20 = vsel %vm1908_vm10, %v5265_v41, %v3229_v58  ;;  %v5725_v57 = vsel %vm1908_vm10, %v5269_v23, %v3230_v22  ;;  %v5741_v41 = vsel %vm1908_vm10, %v5225_v2, %v3225_v38  ;;  %v3238_v23 = vpop.permute.xlu1 %3237  ;;  %v6962_v58 = vrot.slane %v6914_v49, 5  ;;  %v3233_v48 = vpop.permute.xlu0 %3232 }
 0x12a   : > { %3517 = vrot.lane.b32.xlu1 %v5575_v18, %s3799_s22  ;;  %v5716_v43 = vsel %vm707_vm5, %v6957_v0, %v777_v33  ;;  %6958 = vst [vmem:[#allocation16_spill] sm:$0xff] %v5721_v20  ;;  %6959 = vst [vmem:[#allocation23_spill] sm:$0xff] %v5725_v57  ;;  %v741_v0 = vrot.slane %v6956_v59, 6  ;;  %v5737_v8 = vsel %vm1908_vm10, %v5221_v21, %v3224_v3  ;;  %v3240_v33 = vunpack.i.h.bf16 %v3238_v23 }
 0x12b   : > { %3512 = vrot.lane.b32.xlu0 %v5361_v16, %s3796_s12  ;;  %6960 = vst [vmem:[#allocation26_spill] sm:$0xff] %v5737_v8  ;;  %6961 = vst [vmem:[#allocation60_spill] sm:$0xff] %v5741_v41  ;;  %v5746_v16 = vsel %vm622_vm4, %v6962_v58, %v656_v9  ;;  %v3239_v17 = vunpack.i.l.bf16 %v3238_v23  ;;  %v6963_v59 = vrot.slane %v5430_v13, 5  ;;  %v6964_v3 = vrot.slane %v6914_v49, 4 }
 0x12c   : > { %v3235_v38 = vunpack.i.h.bf16 %v3233_v48  ;;  %v3234_v57 = vunpack.i.l.bf16 %v3233_v48  ;;  %v6965_v58 = vpack.i.bf16 %v5536_v51, %v5529_v24  ;;  %v6966_v22 = vrot.slane %v5430_v13, 4 }
 0x12d   : > { %v5752_v21 = vsel %vm622_vm4, %v656_v9, %v6963_v59  ;;  %v576_v2 = vsel %vm537_vm2, %v6964_v3, %v575_v14  ;;  %v526_v20 = vrot.slane %v6933_v35, 3  ;;  %v5767_v9 = vsel %vm1908_vm10, %v5315_v30, %v3239_v17  ;;  %v5791_v35 = vpop.permute.xlu1 %3247  ;;  %v6974_v17 = vld [vmem:[#allocation48_spill] sm:$0xff] }
 0x12e   : > { %3527 = vrot.lane.b32.xlu1 %v6965_v58, %s3800_s28  ;;  %v578_v23 = vsel %vm537_vm2, %v575_v14, %v6966_v22  ;;  %6967 = vst [vmem:[#allocation61_spill] sm:$0xff] %v5767_v9  ;;  %v5771_v59 = vsel %vm1908_vm10, %v5319_v19, %v3240_v33  ;;  %v6969_v48 = vpack.i.bf16 %v5546_v25, %v5541_v40  ;;  %v6970_v24 = vrot.slane %v6914_v49, 6  ;;  %v6977_v58 = vld [vmem:[#allocation30_spill] sm:$0xff] }
 0x12f   : > { %6968 = vst [vmem:[#allocation62_spill] sm:$0xff] %v5771_v59  ;;  %v6740_v14 = vrot.slane %v6934_v54, 3  ;;  %v5785_v30 = vsel %vm1908_vm10, %v5248_v55, %v3234_v57  ;;  %v5789_v19 = vsel %vm1908_vm10, %v5252_v26, %v3235_v38  ;;  %v6973_v40 = vrot.slane %v5430_v13, 6  ;;  %v5807_v57 = vpop.permute.xlu0 %3242 }
 0x130   : > { %3522 = vrot.lane.b32.xlu0 %v6969_v48, %s3798_s20  ;;  %v5780_v51 = vsel %vm707_vm5, %v6970_v24, %v741_v0  ;;  %6971 = vst [vmem:[#allocation63_spill] sm:$0xff] %v5785_v30  ;;  %6972 = vst [vmem:[#allocation64_spill] sm:$0xff] %v5789_v19  ;;  %v616_v49 = vrot.slane %v5202_v32, 4  ;;  %v5801_v22 = vsel %vm1824_vm7, %v6974_v17, %v3005_v27  ;;  %v3045_v48 = vunpack.i.h.bf16 %v6977_v58  ;;  %v6978_v17 = vld [vmem:[#allocation6_spill] sm:$0xff]  ;;  %v6981_v24 = vld [vmem:[#allocation45_spill] sm:$0xff] }
 0x131   : > { %v5796_v25 = vsel %vm707_vm5, %v741_v0, %v6973_v40  ;;  %v5805_v55 = vsel %vm1824_vm7, %v5327_v50, %v3004_v4  ;;  %v6975_v0 = vld [vmem:[#allocation29_spill] sm:$0xff]  ;;  %v5817_v27 = vpack.i.bf16 %v578_v23, %v576_v2  ;;  %v6976_v50 = vrot.slane %v5024_v36, 3  ;;  %v3258_v23 = vpop.permute.xlu1 %3257 }
 0x132   : > { %v3050_v3 = vunpack.i.h.bf16 %v6975_v0  ;;  %v3049_v38 = vunpack.i.l.bf16 %v6975_v0  ;;  %3537 = vrot.lane.b32.xlu1 %v5590_v52, %s3799_s22  ;;  %v5832_v40 = vsel %vm452_vm3, %v526_v20, %v6740_v14  ;;  %v782_v2 = vrot.slane %v5202_v32, 6 }
 0x133   : > { %v5822_v4 = vsel %vm452_vm3, %v6976_v50, %v526_v20  ;;  %v3044_v36 = vunpack.i.l.bf16 %v6977_v58  ;;  %v6979_v0 = vrot.slane %v6978_v17, 4  ;;  %v6741_v26 = vrot.slane %v6981_v24, 6  ;;  %v5843_v20 = vpop.permute.xlu0 %3252 }
 0x134   : > { %3532 = vrot.lane.b32.xlu0 %v5420_v6, %s3796_s12  ;;  %v6980_v6 = vrot.slane %v6934_v54, 4  ;;  %v3260_v59 = vunpack.i.h.bf16 %v3258_v23  ;;  %v3259_v9 = vunpack.i.l.bf16 %v3258_v23  ;;  %v697_v14 = vrot.slane %v5202_v32, 5 }
 0x135   : > { %v618_v50 = vsel %vm537_vm2, %v616_v49, %v6979_v0  ;;  %v6742_v58 = vrot.slane %v6981_v24, 5  ;;  %v5849_v17 = vsel %vm1824_vm7, %v5571_v42, %v3049_v38  ;;  %v5853_v0 = vsel %vm1824_vm7, %v5564_v60, %v3050_v3 }
 0x136   : > { %v621_v33 = vsel %vm537_vm2, %v6980_v6, %v616_v49  ;;  %v6982_v49 = vpack.i.bf16 %v5605_v63, %v5600_v44  ;;  %v5863_v6 = vsel %vm1824_vm7, %v5427_v47, %v3045_v48  ;;  %v5867_v42 = vsel %vm1908_vm10, %v5412_v61, %v3259_v9  ;;  %v3268_v47 = vpop.permute.xlu1 %3267 }
 0x137   : > { %v5871_v60 = vsel %vm1908_vm10, %v5416_v12, %v3260_v59  ;;  %v6983_v44 = vpack.i.bf16 %v5618_v15, %v5610_v5  ;;  %v5877_v63 = vpack.i.bf16 %v618_v50, %v621_v33  ;;  %v5881_v3 = vsel %vm1824_vm7, %v5434_v10, %v3044_v36  ;;  %v6985_v15 = vld [vmem:[#allocation39_spill] sm:$0xff]  ;;  %v3263_v10 = vpop.permute.xlu0 %3262 }
 0x138   : > { %3547 = vrot.lane.b32.xlu1 %v6982_v49, %s3795_s9  ;;  %v5886_v61 = vsel %vm707_vm5, %v782_v2, %v6741_v26  ;;  %v6984_v12 = vrot.slane %v6934_v54, 6  ;;  %v579_v5 = vrot.slane %v5423_v29, 4  ;;  %v3090_v59 = vunpack.i.h.bf16 %v6985_v15 }
 0x139   : > { %3542 = vrot.lane.b32.xlu0 %v6983_v44, %s3798_s20  ;;  %v3089_v33 = vunpack.i.l.bf16 %v6985_v15  ;;  %v5899_v38 = vsel %vm622_vm4, %v697_v14, %v6742_v58  ;;  %v6986_v48 = vrot.slane %v6934_v54, 5  ;;  %v3189_v50 = vunpack.i.l.bf16 %v5501_v46 }
 0x13a   : > { %v5891_v9 = vsel %vm707_vm5, %v6984_v12, %v782_v2  ;;  %v3190_v2 = vunpack.i.h.bf16 %v5501_v46  ;;  %v3265_v49 = vunpack.i.h.bf16 %v3263_v10  ;;  %v3264_v44 = vunpack.i.l.bf16 %v3263_v10  ;;  %v6987_v12 = vld [vmem:[#allocation31_spill] sm:$0xff]  ;;  %v6990_v10 = vld [vmem:[#allocation53_spill] sm:$0xff] }
 0x13b   : > { %v5904_v36 = vsel %vm622_vm4, %v6986_v48, %v697_v14  ;;  %v3270_v26 = vunpack.i.h.bf16 %v3268_v47  ;;  %v3269_v23 = vunpack.i.l.bf16 %v3268_v47  ;;  %v6988_v58 = vpack.i.bf16 %v5636_v53, %v5631_v11  ;;  %v6989_v48 = vld [vmem:[#allocation8_spill] sm:$0xff] }
 0x13c   : > { %3557 = vrot.lane.b32.xlu1 %v5575_v18, %s3796_s12  ;;  %v5919_v46 = vsel %vm1908_vm10, %v6989_v48, %v3264_v44  ;;  %v5923_v19 = vsel %vm1908_vm10, %v6990_v10, %v3265_v49  ;;  %v3278_v18 = vpop.permute.xlu1 %3277  ;;  %v6991_v15 = vrot.slane %v5430_v13, 4  ;;  %v1867_v53 = vsel %vm1866_vm9, %v5654_v31, %v3089_v33  ;;  %v3273_v44 = vpop.permute.xlu0 %3272  ;;  %v6992_v48 = vld [vmem:[#allocation11_spill] sm:$0xff] }
 0x13d   : > { %3552 = vrot.lane.b32.xlu0 %v6988_v58, %s3800_s28  ;;  %v1868_v58 = vsel %vm1866_vm9, %v5664_v45, %v3090_v59  ;;  %v6993_v14 = vrot.slane %v6992_v48, 4  ;;  %v531_v10 = vrot.slane %v5202_v32, 3  ;;  %v1909_v30 = vsel %vm1908_vm10, %v1867_v53, %v3189_v50 }
 0x13e   : > { %v580_v11 = vsel %vm537_vm2, %v6991_v15, %v579_v5  ;;  %v1910_v47 = vsel %vm1908_vm10, %v1868_v58, %v3190_v2  ;;  %v3275_v41 = vunpack.i.h.bf16 %v3273_v44  ;;  %v3274_v8 = vunpack.i.l.bf16 %v3273_v44 }
 0x13f   : > { %v582_v49 = vsel %vm537_vm2, %v579_v5, %v6993_v14  ;;  %v6994_v31 = vpack.i.bf16 %v5650_v62, %v5645_v39  ;;  %v1951_v45 = vsel %vm1950_vm11, %v1909_v30, %v3269_v23  ;;  %v1952_v59 = vsel %vm1950_vm11, %v1910_v47, %v3270_v26  ;;  %v6995_v39 = vld [vmem:[#allocation38_spill] sm:$0xff] }
 0x140   : > { %v3280_v33 = vunpack.i.h.bf16 %v3278_v18  ;;  %v3279_v15 = vunpack.i.l.bf16 %v3278_v18  ;;  %v1993_v32 = vsel %vm1992_vm12, %v1951_v45, %v3274_v8  ;;  %v1994_v5 = vsel %vm1992_vm12, %v1952_v59, %v3275_v41  ;;  %v3288_v2 = vpop.permute.xlu1 %3287  ;;  %v3283_v23 = vpop.permute.xlu0 %3282  ;;  %v6997_v47 = vld [vmem:[#allocation58_spill] sm:$0xff]  ;;  %v6998_v8 = vld [vmem:[#allocation59_spill] sm:$0xff] }
 0x141   : > { %3567 = vrot.lane.b32.xlu1 %v6994_v31, %s3798_s20  ;;  %3562 = vrot.lane.b32.xlu0 %v5706_v28, %s3799_s22  ;;  %v532_v50 = vrot.slane %v6981_v24, 3  ;;  %v660_v14 = vrot.slane %v5423_v29, 5  ;;  %v3095_v62 = vunpack.i.h.bf16 %v6995_v39  ;;  %v3094_v30 = vunpack.i.l.bf16 %v6995_v39 }
 0x142   : > { %v6996_v26 = vrot.slane %v6934_v54, 3  ;;  %v3195_v58 = vunpack.i.h.bf16 %v6998_v8  ;;  %v3194_v41 = vunpack.i.l.bf16 %v6998_v8  ;;  %v3285_v44 = vunpack.i.h.bf16 %v3283_v23 }
 0x143   : > { %v3284_v48 = vunpack.i.l.bf16 %v3283_v23  ;;  %v3290_v31 = vunpack.i.h.bf16 %v3288_v2  ;;  %v3289_v45 = vunpack.i.l.bf16 %v3288_v2  ;;  %v2035_v59 = vsel %vm2034_vm13, %v1993_v32, %v3279_v15 }
 0x144   : > { %v5957_v18 = vsel %vm452_vm3, %v6996_v26, %v531_v10  ;;  %v2036_v54 = vsel %vm2034_vm13, %v1994_v5, %v3280_v33  ;;  %v6999_v39 = vpack.i.bf16 %v5732_v7, %v5716_v43  ;;  %v3298_v53 = vpop.permute.xlu1 %3297  ;;  %v7000_v2 = vrot.slane %v5430_v13, 5  ;;  %v3293_v32 = vpop.permute.xlu0 %3292 }
 0x145   : > { %3577 = vrot.lane.b32.xlu1 %v5590_v52, %s3796_s12  ;;  %v2077_v26 = vsel %vm2076_vm14, %v2035_v59, %v3284_v48  ;;  %v2078_v8 = vsel %vm2076_vm14, %v2036_v54, %v3285_v44  ;;  %v5975_v52 = vsel %vm452_vm3, %v531_v10, %v532_v50  ;;  %v1869_v33 = vsel %vm1866_vm9, %v5693_v56, %v3094_v30 }
 0x146   : > { %3572 = vrot.lane.b32.xlu0 %v6999_v39, %s3800_s28  ;;  %v5980_v15 = vsel %vm622_vm4, %v7000_v2, %v660_v14  ;;  %v1870_v43 = vsel %vm1866_vm9, %v5697_v34, %v3095_v62  ;;  %v2118_v7 = vpack.c.bf16 %v2078_v8, %v2077_v26  ;;  %v7001_v5 = vrot.slane %v6997_v47, 5 }
 0x147   : > { %v1911_v10 = vsel %vm1908_vm10, %v1869_v33, %v3194_v41  ;;  %v1912_v44 = vsel %vm1908_vm10, %v1870_v43, %v3195_v58  ;;  %v3295_v48 = vunpack.i.h.bf16 %v3293_v32  ;;  %v3294_v59 = vunpack.i.l.bf16 %v3293_v32 }
 0x148   : > { %v5989_v23 = vsel %vm622_vm4, %v660_v14, %v7001_v5  ;;  %v7002_v56 = vpack.i.bf16 %v5752_v21, %v5746_v16  ;;  %v1953_v34 = vsel %vm1950_vm11, %v1911_v10, %v3289_v45  ;;  %v1954_v62 = vsel %vm1950_vm11, %v1912_v44, %v3290_v31  ;;  %2746 = vmatmul.mubr.msk.bf16.vlgmr.msra.gmra.mxu0 %vm2159_vm15, %v2118_v7  ;;  %v3308_v41 = vpop.permute.xlu1 %3307  ;;  %v7004_v21 = vld [vmem:[#allocation25_spill] sm:$0xff] }
 0x149   : > { %v3300_v30 = vunpack.i.h.bf16 %v3298_v53  ;;  %v3299_v54 = vunpack.i.l.bf16 %v3298_v53  ;;  %v1995_v14 = vsel %vm1992_vm12, %v1953_v34, %v3294_v59  ;;  %v1996_v58 = vsel %vm1992_vm12, %v1954_v62, %v3295_v48  ;;  %v3303_v53 = vpop.permute.xlu0 %3302 }
 0x14a   : > { %3587 = vrot.lane.b32.xlu1 %v7002_v56, %s3798_s20  ;;  %3582 = vrot.lane.b32.xlu0 %v5817_v27, %s3799_s22  ;;  %v7003_v39 = vmov 0.0   ;;  %v6006_v16 = vpack.i.bf16 %v582_v49, %v580_v11  ;;  %v3145_v45 = vunpack.i.h.bf16 %v7004_v21  ;;  %v3144_v31 = vunpack.i.l.bf16 %v7004_v21 }
 0x14b   : > { %2749 = vmatprep.mubr.msk.bf16.mxu0 %vm3801_vm8, %v7003_v39  ;;  %v3636_v26 = vpack.i.bf16 %v5975_v52, %v5957_v18  ;;  %v3631_v8 = vpack.i.bf16 %v5989_v23, %v5980_v15  ;;  %v3245_v2 = vunpack.i.h.bf16 %v5807_v57  ;;  %v3244_v33 = vunpack.i.l.bf16 %v5807_v57  ;;  %v7017_v52 = vld [vmem:[#allocation57_spill] sm:$0xff] }
 0x14c   : > { %v3305_v43 = vunpack.i.h.bf16 %v3303_v53  ;;  %v3304_v7 = vunpack.i.l.bf16 %v3303_v53  ;;  %v7005_v11 = vpack.i.bf16 %v5796_v25, %v5780_v51  ;;  %v3310_v49 = vunpack.i.h.bf16 %v3308_v41  ;;  %v3318_v59 = vpop.permute.xlu1 %3317 }
 0x14d   : > { %v3309_v32 = vunpack.i.l.bf16 %v3308_v41  ;;  %v2037_v5 = vsel %vm2034_vm13, %v1995_v14, %v3299_v54  ;;  %v2038_v10 = vsel %vm2034_vm13, %v1996_v58, %v3300_v30  ;;  %v7006_v44 = vpack.i.bf16 %v5832_v40, %v5822_v4  ;;  %v3313_v62 = vpop.permute.xlu0 %3312 }
 0x14e   : > { %3597 = vrot.lane.b32.xlu1 %v7005_v11, %s3800_s28  ;;  %v2079_v57 = vsel %vm2076_vm14, %v2037_v5, %v3304_v7  ;;  %v2080_v48 = vsel %vm2076_vm14, %v2038_v10, %v3305_v43  ;;  %v745_v56 = vrot.slane %v5423_v29, 6  ;;  %v1889_v51 = vsel %vm1866_vm9, %v5881_v3, %v3144_v31  ;;  %v7007_v31 = vld [vmem:[#allocation50_spill] sm:$0xff]  ;;  %v7009_v43 = vld [vmem:[#allocation41_spill] sm:$0xff]  ;;  %v7011_v5 = vld [vmem:[#allocation36_spill] sm:$0xff] }
 0x14f   : > { %3592 = vrot.lane.b32.xlu0 %v7006_v44, %s3795_s9  ;;  %v1890_v25 = vsel %vm1866_vm9, %v5863_v6, %v3145_v45  ;;  %v2119_v34 = vpack.c.bf16 %v2080_v48, %v2079_v57  ;;  %v747_v30 = vrot.slane %v6997_v47, 6  ;;  %v1931_v4 = vsel %vm1908_vm10, %v1889_v51, %v3244_v33 }
 0x150   : > { %v1932_v40 = vsel %vm1908_vm10, %v1890_v25, %v3245_v2  ;;  %v3315_v54 = vunpack.i.h.bf16 %v3313_v62  ;;  %v3314_v14 = vunpack.i.l.bf16 %v3313_v62  ;;  %v1973_v29 = vsel %vm1950_vm11, %v1931_v4, %v3309_v32  ;;  %v3328_v45 = vpop.permute.xlu1 %3327  ;;  %v7008_v2 = vld [vmem:[#allocation49_spill] sm:$0xff] }
 0x151   : > { %v1974_v3 = vsel %vm1950_vm11, %v1932_v40, %v3310_v49  ;;  %v3320_v58 = vunpack.i.h.bf16 %v3318_v59  ;;  %v3319_v41 = vunpack.i.l.bf16 %v3318_v59  ;;  %2750 = vmatmul.mubr.msk.bf16.gmra.mxu0 %vm2159_vm15, %v2119_v34  ;;  %v700_v53 = vrot.slane %v7007_v31, 5  ;;  %v3323_v49 = vpop.permute.xlu0 %3322 }
 0x152   : > { %3607 = vrot.lane.b32.xlu1 %v5877_v63, %s3799_s22  ;;  %v2015_v6 = vsel %vm1992_vm12, %v1973_v29, %v3314_v14  ;;  %v2016_v21 = vsel %vm1992_vm12, %v1974_v3, %v3315_v54  ;;  %2753 = vmatprep.mubr.msk.bf16.mxu0 %vm3801_vm8, %v7003_v39  ;;  %v702_v33 = vrot.slane %v7008_v2, 5  ;;  %v3100_v7 = vunpack.i.h.bf16 %v7009_v43 }
 0x153   : > { %3602 = vrot.lane.b32.xlu0 %v5706_v28, %s3796_s12  ;;  %v3099_v11 = vunpack.i.l.bf16 %v7009_v43  ;;  %v7010_v28 = vrot.slane %v5430_v13, 6  ;;  %v3200_v10 = vunpack.i.h.bf16 %v7011_v5  ;;  %v3199_v44 = vunpack.i.l.bf16 %v7011_v5  ;;  %v7015_v5 = vld [vmem:[#allocation51_spill] sm:$0xff] }
 0x154   : > { %v3325_v57 = vunpack.i.h.bf16 %v3323_v49  ;;  %v3324_v48 = vunpack.i.l.bf16 %v3323_v49  ;;  %v7012_v59 = vpack.i.bf16 %v5886_v61, %v5891_v9  ;;  %v3330_v51 = vunpack.i.h.bf16 %v3328_v45  ;;  %v3338_v54 = vpop.permute.xlu1 %3337 }
 0x155   : > { %v6054_v32 = vsel %vm707_vm5, %v7010_v28, %v745_v56  ;;  %v3329_v25 = vunpack.i.l.bf16 %v3328_v45  ;;  %v2057_v34 = vsel %vm2034_vm13, %v2015_v6, %v3319_v41  ;;  %v2058_v13 = vsel %vm2034_vm13, %v2016_v21, %v3320_v58  ;;  %v3333_v3 = vpop.permute.xlu0 %3332 }
 0x156   : > { %3617 = vrot.lane.b32.xlu1 %v7012_v59, %s3800_s28  ;;  %v7013_v62 = vpack.i.bf16 %v5899_v38, %v5904_v36  ;;  %v2099_v4 = vsel %vm2076_vm14, %v2057_v34, %v3324_v48  ;;  %v2100_v40 = vsel %vm2076_vm14, %v2058_v13, %v3325_v57  ;;  %v748_v61 = vsel %vm707_vm5, %v745_v56, %v747_v30 }
 0x157   : > { %v7014_v9 = vrot.slane %v6981_v24, 5  ;;  %v1872_v29 = vsel %vm1866_vm9, %v5678_v37, %v3100_v7  ;;  %v1871_v38 = vsel %vm1866_vm9, %v5682_v1, %v3099_v11  ;;  %v2129_v36 = vpack.c.bf16 %v2100_v40, %v2099_v4 }
 0x158   : > { %3612 = vrot.lane.b32.xlu0 %v7013_v62, %s3798_s20  ;;  %v6085_v58 = vsel %vm622_vm4, %v700_v53, %v702_v33  ;;  %v1913_v56 = vsel %vm1908_vm10, %v1871_v38, %v3199_v44  ;;  %v1914_v41 = vsel %vm1908_vm10, %v1872_v29, %v3200_v10  ;;  %v3335_v6 = vunpack.i.h.bf16 %v3333_v3  ;;  %v3348_v11 = vpop.permute.xlu1 %3347 }
 0x159   : > { %v6076_v14 = vsel %vm622_vm4, %v7014_v9, %v700_v53  ;;  %v3334_v21 = vunpack.i.l.bf16 %v3333_v3  ;;  %v1955_v37 = vsel %vm1950_vm11, %v1913_v56, %v3329_v25  ;;  %v1956_v1 = vsel %vm1950_vm11, %v1914_v41, %v3330_v51  ;;  %2790 = vmatmul.mubr.msk.bf16.vlgmr.msra.gmra.mxu1 %vm2159_vm15, %v2129_v36  ;;  %v3343_v57 = vpop.permute.xlu0 %3342 }
 0x15a   : > { %3627 = vrot.lane.b32.xlu1 %v6006_v16, %s3799_s22  ;;  %v3340_v45 = vunpack.i.h.bf16 %v3338_v54  ;;  %v3339_v43 = vunpack.i.l.bf16 %v3338_v54  ;;  %v1998_v7 = vsel %vm1992_vm12, %v1956_v1, %v3335_v6  ;;  %v3641_v49 = vpack.i.bf16 %v748_v61, %v6054_v32  ;;  %2793 = vmatprep.mubr.msk.bf16.mxu1 %vm3801_vm8, %v7003_v39 }
 0x15b   : > { %v1997_v53 = vsel %vm1992_vm12, %v1955_v37, %v3334_v21  ;;  %v785_v28 = vrot.slane %v7007_v31, 6  ;;  %v3150_v10 = vunpack.i.h.bf16 %v7015_v5  ;;  %v3149_v44 = vunpack.i.l.bf16 %v7015_v5  ;;  %v7018_v37 = vld [vmem:[#allocation40_spill] sm:$0xff]  ;;  %v7022_v5 = vld [vmem:[#allocation35_spill] sm:$0xff] }
 0x15c   : > { %3622 = vrot.lane.b32.xlu0 %v5817_v27, %s3796_s12  ;;  %v3656_v27 = vpack.i.bf16 %v6085_v58, %v6076_v14  ;;  %v787_v48 = vrot.slane %v7008_v2, 6  ;;  %v3250_v59 = vunpack.i.h.bf16 %v5791_v35  ;;  %v3249_v51 = vunpack.i.l.bf16 %v5791_v35  ;;  %v3358_v40 = vpop.permute.xlu1 %3357 }
 0x15d   : > { %v3345_v32 = vunpack.i.h.bf16 %v3343_v57  ;;  %v3344_v25 = vunpack.i.l.bf16 %v3343_v57  ;;  %v3350_v31 = vunpack.i.h.bf16 %v3348_v11  ;;  %v3349_v34 = vunpack.i.l.bf16 %v3348_v11  ;;  %v3353_v15 = vpop.permute.xlu0 %3352  ;;  %v7020_v11 = vld [vmem:[#allocation13_spill] sm:$0xff] }
 0x15e   : > { %3637 = vrot.lane.b32.xlu1 %v3636_v26, %s3795_s9  ;;  %v2039_v13 = vsel %vm2034_vm13, %v1997_v53, %v3339_v43  ;;  %v2040_v62 = vsel %vm2034_vm13, %v1998_v7, %v3340_v45  ;;  %v7016_v54 = vrot.slane %v6981_v24, 6  ;;  %v664_v26 = vrot.slane %v7017_v52, 5 }
 0x15f   : > { %v2081_v35 = vsel %vm2076_vm14, %v2039_v13, %v3344_v25  ;;  %v2082_v4 = vsel %vm2076_vm14, %v2040_v62, %v3345_v32  ;;  %v1891_v61 = vsel %vm1866_vm9, %v5849_v17, %v3149_v44  ;;  %v1892_v9 = vsel %vm1866_vm9, %v5853_v0, %v3150_v10  ;;  %v7024_v13 = vld [vmem:[#allocation20_spill] sm:$0xff] }
 0x160   : > { %3632 = vrot.lane.b32.xlu0 %v3631_v8, %s3798_s20  ;;  %v786_v18 = vsel %vm707_vm5, %v7016_v54, %v785_v28  ;;  %v2120_v14 = vpack.c.bf16 %v2082_v4, %v2081_v35  ;;  %v788_v23 = vsel %vm707_vm5, %v785_v28, %v787_v48  ;;  %v1933_v8 = vsel %vm1908_vm10, %v1891_v61, %v3249_v51  ;;  %v3368_v6 = vpop.permute.xlu1 %3367 }
 0x161   : > { %v1934_v29 = vsel %vm1908_vm10, %v1892_v9, %v3250_v59  ;;  %v3355_v38 = vunpack.i.h.bf16 %v3353_v15  ;;  %v3354_v36 = vunpack.i.l.bf16 %v3353_v15  ;;  %v1975_v17 = vsel %vm1950_vm11, %v1933_v8, %v3349_v34  ;;  %v3363_v43 = vpop.permute.xlu0 %3362  ;;  %v7023_v34 = vld [vmem:[#allocation19_spill] sm:$0xff] }
 0x162   : > { %3647 = vrot.lane.b32.xlu1 %v5877_v63, %s3796_s12  ;;  %v1976_v3 = vsel %vm1950_vm11, %v1934_v29, %v3350_v31  ;;  %v3360_v0 = vunpack.i.h.bf16 %v3358_v40  ;;  %v3359_v58 = vunpack.i.l.bf16 %v3358_v40  ;;  %2754 = vmatmul.mubr.msk.bf16.gmra.mxu0 %vm2159_vm15, %v2120_v14  ;;  %v3661_v21 = vpack.i.bf16 %v788_v23, %v786_v18 }
 0x163   : > { %v2017_v56 = vsel %vm1992_vm12, %v1975_v17, %v3354_v36  ;;  %v2018_v41 = vsel %vm1992_vm12, %v1976_v3, %v3355_v38  ;;  %2757 = vmatprep.mubr.msk.bf16.mxu0 %vm3801_vm8, %v7003_v39  ;;  %v749_v63 = vrot.slane %v7017_v52, 6  ;;  %v3105_v1 = vunpack.i.h.bf16 %v7018_v37  ;;  %v3728_v38 = vld [vmem:[%s3881_s5 + $0xd0] sm:$0xff] }
 0x164   : > { %3642 = vrot.lane.b32.xlu0 %v3641_v49, %s3800_s28  ;;  %v3104_v45 = vunpack.i.l.bf16 %v7018_v37  ;;  %v7019_v53 = vrot.slane %v6997_v47, 5  ;;  %v7021_v49 = vrot.slane %v7020_v11, 5  ;;  %v3205_v10 = vunpack.i.h.bf16 %v7022_v5  ;;  %v3378_v40 = vpop.permute.xlu1 %3377  ;;  %v7027_v36 = vld [vmem:[#allocation9_spill] sm:$0xff] }
 0x165   : > { %v3204_v44 = vunpack.i.l.bf16 %v7022_v5  ;;  %v3365_v57 = vunpack.i.h.bf16 %v3363_v43  ;;  %v3364_v59 = vunpack.i.l.bf16 %v3363_v43  ;;  %v3370_v51 = vunpack.i.h.bf16 %v3368_v6  ;;  %v3373_v61 = vpop.permute.xlu0 %3372 }
 0x166   : > { %v665_v7 = vsel %vm622_vm4, %v7019_v53, %v664_v26  ;;  %v667_v28 = vsel %vm622_vm4, %v664_v26, %v7021_v49  ;;  %3657 = vrot.lane.b32.xlu1 %v3656_v27, %s3798_s20  ;;  %v3369_v32 = vunpack.i.l.bf16 %v3368_v6  ;;  %v2059_v25 = vsel %vm2034_vm13, %v2017_v56, %v3359_v58  ;;  %v7030_v6 = vld [vmem:[#allocation27_spill] sm:$0xff] }
 0x167   : > { %v2060_v31 = vsel %vm2034_vm13, %v2018_v41, %v3360_v0  ;;  %v7025_v62 = vpack.i.bf16 %v7023_v34, %v7024_v13  ;;  %v2101_v35 = vsel %vm2076_vm14, %v2059_v25, %v3364_v59  ;;  %v3676_v54 = vpack.i.bf16 %v667_v28, %v665_v7  ;;  %v7035_v34 = vld [vmem:[#allocation18_spill] sm:$0xff] }
 0x168   : > { %v2102_v4 = vsel %vm2076_vm14, %v2060_v31, %v3365_v57  ;;  %v750_v27 = vsel %vm707_vm5, %v747_v30, %v749_v63  ;;  %v1873_v18 = vsel %vm1866_vm9, %v5805_v55, %v3104_v45  ;;  %v1874_v52 = vsel %vm1866_vm9, %v5801_v22, %v3105_v1  ;;  %v3388_v56 = vpop.permute.xlu1 %3387 }
 0x169   : > { %3652 = vrot.lane.b32.xlu0 %v7025_v62, %s3799_s22  ;;  %v2130_v26 = vpack.c.bf16 %v2102_v4, %v2101_v35  ;;  %v7026_v9 = vrot.slane %v7020_v11, 6  ;;  %v1915_v15 = vsel %vm1908_vm10, %v1873_v18, %v3204_v44  ;;  %v1916_v23 = vsel %vm1908_vm10, %v1874_v52, %v3205_v10  ;;  %v3383_v45 = vpop.permute.xlu0 %3382  ;;  %v7032_v44 = vld [vmem:[#allocation21_spill] sm:$0xff] }
 0x16a   : > { %v3375_v47 = vunpack.i.h.bf16 %v3373_v61  ;;  %v3374_v8 = vunpack.i.l.bf16 %v3373_v61  ;;  %3667 = vrot.lane.b32.xlu1 %v6006_v16, %s3796_s12  ;;  %v1957_v55 = vsel %vm1950_vm11, %v1915_v15, %v3369_v32  ;;  %v1958_v30 = vsel %vm1950_vm11, %v1916_v23, %v3370_v51  ;;  %v7033_v32 = vld [vmem:[#allocation7_spill] sm:$0xff]  ;;  %v7036_v15 = vld [vmem:[#allocation22_spill] sm:$0xff] }
 0x16b   : > { %v752_v14 = vsel %vm707_vm5, %v749_v63, %v7026_v9  ;;  %v3380_v22 = vunpack.i.h.bf16 %v3378_v40  ;;  %v3379_v29 = vunpack.i.l.bf16 %v3378_v40  ;;  %2794 = vmatmul.mubr.msk.bf16.gmra.mxu1 %vm2159_vm15, %v2130_v26  ;;  %v7028_v17 = vunpack.i.l.bf16 %v7027_v36  ;;  %v7031_v63 = vld [vmem:[#allocation24_spill] sm:$0xff] }
 0x16c   : > { %v3054_v0 = vunpack.i.l.bf16 %v6987_v12  ;;  %v1999_v58 = vsel %vm1992_vm12, %v1957_v55, %v3374_v8  ;;  %v2000_v16 = vsel %vm1992_vm12, %v1958_v30, %v3375_v47  ;;  %2797 = vmatprep.mubr.msk.bf16.mxu1 %vm3801_vm8, %v7003_v39  ;;  %v7029_v41 = vunpack.i.h.bf16 %v6987_v12 }
 0x16d   : > { %3662 = vrot.lane.b32.xlu0 %v3661_v21, %s3800_s28  ;;  %v1809_v3 = vsel %vm1782_vm6, %v3728_v38, %v7028_v17  ;;  %v3155_v37 = vunpack.i.h.bf16 %v7031_v63  ;;  %v3154_v1 = vunpack.i.l.bf16 %v7031_v63  ;;  %v3681_v43 = vpack.i.bf16 %v752_v14, %v750_v27  ;;  %v3729_v14 = vld [vmem:[%s3881_s5 + $0x40] sm:$0xff]  ;;  %v7038_v38 = vld [vmem:[#allocation42_spill] sm:$0xff] }
 0x16e   : > { %v1852_v21 = vsel %vm1824_vm7, %v7030_v6, %v7029_v41  ;;  %v3255_v53 = vunpack.i.h.bf16 %v5843_v20  ;;  %v3254_v7 = vunpack.i.l.bf16 %v5843_v20  ;;  %v3385_v11 = vunpack.i.h.bf16 %v3383_v45  ;;  %3677 = vrot.lane.b32.xlu1 %v3676_v54, %s3798_s20  ;;  %v3398_v20 = vpop.permute.xlu1 %3397  ;;  %v3393_v54 = vpop.permute.xlu0 %3392 }
 0x16f   : > { %v3384_v49 = vunpack.i.l.bf16 %v3383_v45  ;;  %v3390_v28 = vunpack.i.h.bf16 %v3388_v56  ;;  %v3389_v5 = vunpack.i.l.bf16 %v3388_v56  ;;  %v2041_v12 = vsel %vm2034_vm13, %v1999_v58, %v3379_v29  ;;  %v7041_v56 = vld [vmem:[#allocation37_spill] sm:$0xff] }
 0x170   : > { %v2042_v10 = vsel %vm2034_vm13, %v2000_v16, %v3380_v22  ;;  %v1851_v57 = vsel %vm1824_vm7, %v1809_v3, %v3054_v0  ;;  %v7034_v25 = vrot.slane %v7033_v32, 3  ;;  %v3009_v62 = vunpack.i.l.bf16 %v7035_v34  ;;  %v7039_v0 = vld [vmem:[#allocation5_spill] sm:$0xff] }
 0x171   : > { %3672 = vrot.lane.b32.xlu0 %v7032_v44, %s3799_s22  ;;  %v2083_v59 = vsel %vm2076_vm14, %v2041_v12, %v3384_v49  ;;  %v2084_v51 = vsel %vm2076_vm14, %v2042_v10, %v3385_v11  ;;  %v1893_v35 = vsel %vm1866_vm9, %v1851_v57, %v3154_v1  ;;  %v1894_v4 = vsel %vm1866_vm9, %v1852_v21, %v3155_v37  ;;  %v7042_v37 = vld [vmem:[#allocation12_spill] sm:$0xff] }
 0x172   : > { %v534_v31 = vsel %vm452_vm3, %v532_v50, %v7034_v25  ;;  %v2121_v40 = vpack.c.bf16 %v2084_v51, %v2083_v59  ;;  %v1935_v27 = vsel %vm1908_vm10, %v1893_v35, %v3254_v7  ;;  %v1936_v18 = vsel %vm1908_vm10, %v1894_v4, %v3255_v53  ;;  %3682 = vrot.lane.b32.xlu1 %v3681_v43, %s3800_s28  ;;  %v3408_v22 = vpop.permute.xlu1 %3407  ;;  %v3403_v3 = vpop.permute.xlu0 %3402  ;;  %v7043_v7 = vld [vmem:[#allocation52_spill] sm:$0xff] }
 0x173   : > { %v3395_v52 = vunpack.i.h.bf16 %v3393_v54  ;;  %v3394_v26 = vunpack.i.l.bf16 %v3393_v54  ;;  %v1977_v24 = vsel %vm1950_vm11, %v1935_v27, %v3389_v5  ;;  %v1978_v50 = vsel %vm1950_vm11, %v1936_v18, %v3390_v28 }
 0x174   : > { %v3400_v61 = vunpack.i.h.bf16 %v3398_v20  ;;  %v3399_v9 = vunpack.i.l.bf16 %v3398_v20  ;;  %2758 = vmatmul.mubr.msk.bf16.gmra.mxu0 %vm2159_vm15, %v2121_v40  ;;  %v7037_v23 = vunpack.i.l.bf16 %v7036_v15  ;;  %v3010_v8 = vunpack.i.h.bf16 %v7035_v34 }
 0x175   : > { %1244 = vrot.lane.b32.xlu0 %v534_v31, %s3795_s9  ;;  %v2019_v55 = vsel %vm1992_vm12, %v1977_v24, %v3394_v26  ;;  %v2020_v30 = vsel %vm1992_vm12, %v1978_v50, %v3395_v52  ;;  %2761 = vmatprep.mubr.msk.bf16.mxu0 %vm3801_vm8, %v7003_v39  ;;  %v3110_v36 = vunpack.i.h.bf16 %v7038_v38  ;;  %v3109_v17 = vunpack.i.l.bf16 %v7038_v38 }
 0x176   : > { %v1791_v47 = vsel %vm1782_vm6, %v3729_v14, %v7037_v23  ;;  %v7040_v58 = vrot.slane %v7039_v0, 6  ;;  %v3210_v41 = vunpack.i.h.bf16 %v7041_v56  ;;  %v3209_v6 = vunpack.i.l.bf16 %v7041_v56  ;;  %1491 = vrot.lane.b32.xlu1 %v7042_v37, %s3799_s22  ;;  %v3418_v28 = vpop.permute.xlu1 %3417 }
 0x177   : > { %v1833_v29 = vsel %vm1824_vm7, %v1791_v47, %v3009_v62  ;;  %v3405_v21 = vunpack.i.h.bf16 %v3403_v3  ;;  %v3404_v63 = vunpack.i.l.bf16 %v3403_v3  ;;  %v3410_v1 = vunpack.i.h.bf16 %v3408_v22 }
 0x178   : > { %v789_v16 = vsel %vm707_vm5, %v787_v48, %v7040_v58  ;;  %v3409_v45 = vunpack.i.l.bf16 %v3408_v22  ;;  %v2061_v43 = vsel %vm2034_vm13, %v2019_v55, %v3399_v9  ;;  %v2062_v53 = vsel %vm2034_vm13, %v2020_v30, %v3400_v61 }
 0x179   : > { %1368 = vrot.lane.b32.xlu0 %v7024_v13, %s3796_s12  ;;  %v1834_v48 = vsel %vm1824_vm7, %v7043_v7, %v3010_v8  ;;  %v2103_v11 = vsel %vm2076_vm14, %v2061_v43, %v3404_v63  ;;  %v2104_v49 = vsel %vm2076_vm14, %v2062_v53, %v3405_v21  ;;  %v7044_v5 = vrot.slane %v7039_v0, 5  ;;  %v3413_v13 = vpop.permute.xlu0 %3412  ;;  %v7047_v53 = vld [vmem:[#allocation44_spill] sm:$0xff]  ;;  %s2618_s12 = sshll.u32 %s6469_s10, 4  ;;  %s6597_s12 = int_to_ptr.vmem [resolvable:$true] %s2618_s12 }
 0x17a   : > { %v1875_v10 = vsel %vm1866_vm9, %v1833_v29, %v3109_v17  ;;  %v1876_v44 = vsel %vm1866_vm9, %v1834_v48, %v3110_v36  ;;  %v2131_v57 = vpack.c.bf16 %v2104_v49, %v2103_v11  ;;  %v3415_v20 = vunpack.i.h.bf16 %v3413_v13  ;;  %1739 = vrot.lane.b32.xlu1 %v789_v16, %s3800_s28  ;;  %v3428_v35 = vpop.permute.xlu1 %3427  ;;  %v7045_v17 = vld [vmem:[#allocation15_spill] sm:$0xff]  ;;  %s3730_s22 = scalar_lea.vmem %s6597_s12, 5248  ;;  %s3736_s28 = scalar_lea.vmem %s3735_s27, 10496 }
 0x17b   : > { %v704_v12 = vsel %vm622_vm4, %v702_v33, %v7044_v5  ;;  %v1917_v59 = vsel %vm1908_vm10, %v1875_v10, %v3209_v6  ;;  %v1918_v51 = vsel %vm1908_vm10, %v1876_v44, %v3210_v41  ;;  %v3414_v32 = vunpack.i.l.bf16 %v3413_v13  ;;  %p3731_p11 = scmp.ne.s32.totalorder %s6597_s12, %s3730_s22  ;;  %p3737_p0 = scmp.lt.s32.totalorder %s6597_s12, %s3735_s27 }
 0x17c   : > { %v1959_v25 = vsel %vm1950_vm11, %v1917_v59, %v3409_v45  ;;  %v1960_v2 = vsel %vm1950_vm11, %v1918_v51, %v3410_v1  ;;  %v3420_v31 = vunpack.i.h.bf16 %v3418_v28  ;;  %v3419_v33 = vunpack.i.l.bf16 %v3418_v28  ;;  %2798 = vmatmul.mubr.msk.bf16.gmra.mxu1 %vm2159_vm15, %v2131_v57  ;;  %v7046_v45 = vld [vmem:[#allocation43_spill] sm:$0xff]  ;;  %p3738_p1 = scmp.lt.s32.totalorder %s3736_s28, %s3730_s22 }
 0x17d   : > { %1615 = vrot.lane.b32.xlu0 %v704_v12, %s3798_s20  ;;  %v2001_v34 = vsel %vm1992_vm12, %v1959_v25, %v3414_v32  ;;  %v2002_v62 = vsel %vm1992_vm12, %v1960_v2, %v3415_v20  ;;  %2801 = vmatprep.mubr.msk.bf16.mxu1 %vm3801_vm8, %v7003_v39  ;;  %v3423_v4 = vpop.permute.xlu0 %3422  ;;  %v3430_v27 = vunpack.i.h.bf16 %v3428_v35  ;;  %v3429_v18 = vunpack.i.l.bf16 %v3428_v35  ;;  %s6595_s20 = scalar_lea.hbm %s6647_s4, %s2714_s11  ;;  %p3732_p12 = pnand %p3731_p11, %p3867_p5 }
 0x17e   : > { %v3425_v40 = vunpack.i.h.bf16 %v3423_v4  ;;  %v3424_v54 = vunpack.i.l.bf16 %v3423_v4  ;;  %v2043_v52 = vsel %vm2034_vm13, %v2001_v34, %v3419_v33  ;;  %v2044_v26 = vsel %vm2034_vm13, %v2002_v62, %v3420_v31  ;;  %v3438_v61 = vpop.permute.xlu1 %3437  ;;  %p3739_p2 = por %p3738_p1, %p3737_p0 }
 0x17f   : > { %v1979_v47 = vsel %vm1950_vm11, %v5867_v42, %v3429_v18  ;;  %v1980_v8 = vsel %vm1950_vm11, %v5871_v60, %v3430_v27  ;;  %v3440_v55 = vunpack.i.h.bf16 %v3438_v61  ;;  %v3439_v30 = vunpack.i.l.bf16 %v3438_v61  ;;  %v7048_v61 = vld [vmem:[#allocation14_spill] sm:$0xff]  ;;  %p3733_p13 = pneg %p3732_p12 }
 0x180   : > { %v2085_v24 = vsel %vm2076_vm14, %v2043_v52, %v3424_v54  ;;  %v2086_v50 = vsel %vm2076_vm14, %v2044_v26, %v3425_v40  ;;  %v3215_v3 = vunpack.i.h.bf16 %v7045_v17  ;;  %v3214_v42 = vunpack.i.l.bf16 %v7045_v17  ;;  %v7050_v17 = vld [vmem:[#allocation47_spill] sm:$0xff] }
 0x181   : > { %v2122_v9 = vpack.c.bf16 %v2086_v50, %v2085_v24  ;;  %v3433_v14 = vpop.permute.xlu0 %3432  ;;  %p3740_p3 = pnand %p3739_p2, %p3733_p13 }
 0x182   : > { %v3435_v15 = vunpack.i.h.bf16 %v3433_v14  ;;  %v3434_v23 = vunpack.i.l.bf16 %v3433_v14  ;;  %v3448_v38 = vpop.permute.xlu1 %3447  ;;  %v1919_v43 = vsel %vm1908_vm10, %v7046_v45, %v3214_v42  ;;  %v1920_v7 = vsel %vm1908_vm10, %v7047_v53, %v3215_v3 }
 0x183   : > { %2762 = vmatmul.mubr.msk.bf16.gmra.mxu0 %vm2159_vm15, %v2122_v9  ;;  %v3450_v60 = vunpack.i.h.bf16 %v3448_v38  ;;  %v3449_v16 = vunpack.i.l.bf16 %v3448_v38  ;;  %v3220_v9 = vunpack.i.h.bf16 %v7048_v61  ;;  %v3219_v14 = vunpack.i.l.bf16 %v7048_v61  ;;  %v7049_v38 = vld [vmem:[#allocation46_spill] sm:$0xff] }
 0x184   : > { %v2021_v22 = vsel %vm1992_vm12, %v1979_v47, %v3434_v23  ;;  %v2022_v29 = vsel %vm1992_vm12, %v1980_v8, %v3435_v15  ;;  %2765 = vmatprep.mubr.msk.bf16.mxu0 %vm3801_vm8, %v7003_v39 }
 0x185   : > { %v3443_v36 = vpop.permute.xlu0 %3442  ;;  %v2063_v56 = vsel %vm2034_vm13, %v2021_v22, %v3439_v30  ;;  %v2064_v41 = vsel %vm2034_vm13, %v2022_v29, %v3440_v55  ;;  %v1961_v49 = vsel %vm1950_vm11, %v1919_v43, %v3449_v16  ;;  %v1962_v28 = vsel %vm1950_vm11, %v1920_v7, %v3450_v60 }
 0x186   : > { %v3445_v0 = vunpack.i.h.bf16 %v3443_v36  ;;  %v3444_v58 = vunpack.i.l.bf16 %v3443_v36  ;;  %v3458_v63 = vpop.permute.xlu1 %3457  ;;  %v1921_v36 = vsel %vm1908_vm10, %v7049_v38, %v3219_v14  ;;  %v1922_v3 = vsel %vm1908_vm10, %v7050_v17, %v3220_v9 }
 0x187   : > { %v3460_v5 = vunpack.i.h.bf16 %v3458_v63  ;;  %v3459_v12 = vunpack.i.l.bf16 %v3458_v63 }
 0x188   : > { %v2105_v6 = vsel %vm2076_vm14, %v2063_v56, %v3444_v58  ;;  %v2106_v21 = vsel %vm2076_vm14, %v2064_v41, %v3445_v0 }
 0x189   : > { %v2132_v37 = vpack.c.bf16 %v2106_v21, %v2105_v6  ;;  %v3453_v1 = vpop.permute.xlu0 %3452 }
 0x18a   : > { %v3455_v48 = vunpack.i.h.bf16 %v3453_v1  ;;  %v3454_v11 = vunpack.i.l.bf16 %v3453_v1  ;;  %v3468_v57 = vpop.permute.xlu1 %3467 }
 0x18b   : > { %2802 = vmatmul.mubr.msk.bf16.gmra.mxu1 %vm2159_vm15, %v2132_v37  ;;  %v3470_v20 = vunpack.i.h.bf16 %v3468_v57  ;;  %v3469_v32 = vunpack.i.l.bf16 %v3468_v57 }
 0x18c   : > { %v2003_v10 = vsel %vm1992_vm12, %v1961_v49, %v3454_v11  ;;  %v2004_v44 = vsel %vm1992_vm12, %v1962_v28, %v3455_v48  ;;  %2805 = vmatprep.mubr.msk.bf16.mxu1 %vm3801_vm8, %v7003_v39 }
 0x18d   : > { %v3463_v13 = vpop.permute.xlu0 %3462  ;;  %v2045_v25 = vsel %vm2034_vm13, %v2003_v10, %v3459_v12  ;;  %v2046_v2 = vsel %vm2034_vm13, %v2004_v44, %v3460_v5  ;;  %v1981_v54 = vsel %vm1950_vm11, %v5919_v46, %v3469_v32  ;;  %v1982_v27 = vsel %vm1950_vm11, %v5923_v19, %v3470_v20 }
 0x18e   : > { %v3465_v59 = vunpack.i.h.bf16 %v3463_v13  ;;  %v3464_v51 = vunpack.i.l.bf16 %v3463_v13  ;;  %v3478_v34 = vpop.permute.xlu1 %3477  ;;  %v7051_v13 = vld [vmem:[#allocation33_spill] sm:$0xff] }
 0x18f   : > { %v3480_v18 = vunpack.i.h.bf16 %v3478_v34  ;;  %v3479_v52 = vunpack.i.l.bf16 %v3478_v34 }
 0x190   : > { %v2087_v31 = vsel %vm2076_vm14, %v2045_v25, %v3464_v51  ;;  %v2088_v33 = vsel %vm2076_vm14, %v2046_v2, %v3465_v59  ;;  %v7052_v51 = vld [vmem:[#allocation34_spill] sm:$0xff] }
 0x191   : > { %v2123_v62 = vpack.c.bf16 %v2088_v33, %v2087_v31  ;;  %v3473_v35 = vpop.permute.xlu0 %3472 }
 0x192   : > { %v3475_v4 = vunpack.i.h.bf16 %v3473_v35  ;;  %v3474_v40 = vunpack.i.l.bf16 %v3473_v35  ;;  %v3488_v50 = vpop.permute.xlu1 %3487 }
 0x193   : > { %2766 = vmatmul.mubr.msk.bf16.gmra.mxu0 %vm2159_vm15, %v2123_v62  ;;  %v3490_v19 = vunpack.i.h.bf16 %v3488_v50  ;;  %v3489_v47 = vunpack.i.l.bf16 %v3488_v50 }
 0x194   : > { %v2023_v26 = vsel %vm1992_vm12, %v1981_v54, %v3474_v40  ;;  %v2024_v24 = vsel %vm1992_vm12, %v1982_v27, %v3475_v4  ;;  %2769 = vmatprep.mubr.msk.bf16.mxu0 %vm3801_vm8, %v7003_v39 }
 0x195   : > { %v3483_v46 = vpop.permute.xlu0 %3482  ;;  %v2065_v8 = vsel %vm2034_vm13, %v2023_v26, %v3479_v52  ;;  %v2066_v55 = vsel %vm2034_vm13, %v2024_v24, %v3480_v18  ;;  %v1963_v41 = vsel %vm1950_vm11, %v1921_v36, %v3489_v47  ;;  %v1964_v6 = vsel %vm1950_vm11, %v1922_v3, %v3490_v19 }
 0x196   : > { %v3485_v15 = vunpack.i.h.bf16 %v3483_v46  ;;  %v3484_v23 = vunpack.i.l.bf16 %v3483_v46  ;;  %v3498_v29 = vpop.permute.xlu1 %3497 }
 0x197   : > { %v3500_v58 = vunpack.i.h.bf16 %v3498_v29  ;;  %v3499_v60 = vunpack.i.l.bf16 %v3498_v29 }
 0x198   : > { %v2107_v30 = vsel %vm2076_vm14, %v2065_v8, %v3484_v23  ;;  %v2108_v22 = vsel %vm2076_vm14, %v2066_v55, %v3485_v15  ;;  %v7053_v8 = vld [vmem:[#allocation26_spill] sm:$0xff] }
 0x199   : > { %v2133_v42 = vpack.c.bf16 %v2108_v22, %v2107_v30  ;;  %v3493_v0 = vpop.permute.xlu0 %3492  ;;  %v7054_v30 = vld [vmem:[#allocation60_spill] sm:$0xff] }
 0x19a   : > { %v3495_v16 = vunpack.i.h.bf16 %v3493_v0  ;;  %v3494_v56 = vunpack.i.l.bf16 %v3493_v0  ;;  %v3508_v37 = vpop.permute.xlu1 %3507 }
 0x19b   : > { %2806 = vmatmul.mubr.msk.bf16.gmra.mxu1 %vm2159_vm15, %v2133_v42  ;;  %v3510_v1 = vunpack.i.h.bf16 %v3508_v37  ;;  %v3509_v45 = vunpack.i.l.bf16 %v3508_v37 }
 0x19c   : > { %v2005_v21 = vsel %vm1992_vm12, %v1963_v41, %v3494_v56  ;;  %v2006_v63 = vsel %vm1992_vm12, %v1964_v6, %v3495_v16  ;;  %2809 = vmatprep.mubr.msk.bf16.mxu1 %vm3801_vm8, %v7003_v39 }
 0x19d   : > { %v3503_v43 = vpop.permute.xlu0 %3502  ;;  %v2047_v53 = vsel %vm2034_vm13, %v2005_v21, %v3499_v60  ;;  %v2048_v7 = vsel %vm2034_vm13, %v2006_v63, %v3500_v58 }
 0x19e   : > { %v2089_v48 = vsel %vm2076_vm14, %v2047_v53, %v3509_v45  ;;  %v2090_v11 = vsel %vm2076_vm14, %v2048_v7, %v3510_v1  ;;  %v3505_v49 = vunpack.i.h.bf16 %v3503_v43  ;;  %v3504_v28 = vunpack.i.l.bf16 %v3503_v43  ;;  %v3518_v12 = vpop.permute.xlu1 %3517  ;;  %v7055_v53 = vld [vmem:[#allocation32_spill] sm:$0xff] }
 0x19f   : > { %v2124_v5 = vpack.c.bf16 %v2090_v11, %v2089_v48  ;;  %v3520_v32 = vunpack.i.h.bf16 %v3518_v12  ;;  %v3519_v25 = vunpack.i.l.bf16 %v3518_v12  ;;  %v7056_v48 = vld [vmem:[#allocation17_spill] sm:$0xff] }
 0x1a0   : > { %v1941_v59 = vsel %vm1908_vm10, %v7051_v13, %v3504_v28  ;;  %v1942_v20 = vsel %vm1908_vm10, %v7052_v51, %v3505_v49 }
 0x1a1   : > { %v3513_v10 = vpop.permute.xlu0 %3512  ;;  %2770 = vmatmul.mubr.msk.bf16.gmra.mxu0 %vm2159_vm15, %v2124_v5 }
 0x1a2   : > { %v3515_v44 = vunpack.i.h.bf16 %v3513_v10  ;;  %v3514_v57 = vunpack.i.l.bf16 %v3513_v10  ;;  %2773 = vmatprep.mubr.msk.bf16.mxu0 %vm3801_vm8, %v7003_v39  ;;  %v3528_v33 = vpop.permute.xlu1 %3527 }
 0x1a3   : > { %v3530_v34 = vunpack.i.h.bf16 %v3528_v33  ;;  %v3529_v62 = vunpack.i.l.bf16 %v3528_v33 }
 0x1a4   : > { %v1983_v2 = vsel %vm1950_vm11, %v1941_v59, %v3514_v57  ;;  %v1984_v31 = vsel %vm1950_vm11, %v1942_v20, %v3515_v44 }
 0x1a5   : > { %v3523_v35 = vpop.permute.xlu0 %3522  ;;  %v2025_v54 = vsel %vm1992_vm12, %v1983_v2, %v3519_v25  ;;  %v2026_v27 = vsel %vm1992_vm12, %v1984_v31, %v3520_v32 }
 0x1a6   : > { %v3525_v4 = vunpack.i.h.bf16 %v3523_v35  ;;  %v3524_v40 = vunpack.i.l.bf16 %v3523_v35  ;;  %v3538_v26 = vpop.permute.xlu1 %3537 }
 0x1a7   : > { %v3540_v19 = vunpack.i.h.bf16 %v3538_v26  ;;  %v3539_v47 = vunpack.i.l.bf16 %v3538_v26  ;;  %v7057_v26 = vld [vmem:[#allocation16_spill] sm:$0xff] }
 0x1a8   : > { %v2067_v18 = vsel %vm2034_vm13, %v2025_v54, %v3524_v40  ;;  %v2068_v52 = vsel %vm2034_vm13, %v2026_v27, %v3525_v4 }
 0x1a9   : > { %v3533_v24 = vpop.permute.xlu0 %3532  ;;  %v2109_v50 = vsel %vm2076_vm14, %v2067_v18, %v3529_v62  ;;  %v2110_v61 = vsel %vm2076_vm14, %v2068_v52, %v3530_v34 }
 0x1aa   : > { %v2134_v9 = vpack.c.bf16 %v2110_v61, %v2109_v50  ;;  %v3535_v14 = vunpack.i.h.bf16 %v3533_v24  ;;  %v3534_v46 = vunpack.i.l.bf16 %v3533_v24  ;;  %v3548_v15 = vpop.permute.xlu1 %3547  ;;  %v7058_v50 = vld [vmem:[#allocation23_spill] sm:$0xff] }
 0x1ab   : > { %v3550_v17 = vunpack.i.h.bf16 %v3548_v15  ;;  %v3549_v3 = vunpack.i.l.bf16 %v3548_v15 }
 0x1ac   : > { %2810 = vmatmul.mubr.msk.bf16.gmra.mxu1 %vm2159_vm15, %v2134_v9  ;;  %v1965_v55 = vsel %vm1950_vm11, %v7053_v8, %v3534_v46  ;;  %v1966_v22 = vsel %vm1950_vm11, %v7054_v30, %v3535_v14 }
 0x1ad   : > { %v3543_v23 = vpop.permute.xlu0 %3542  ;;  %2813 = vmatprep.mubr.msk.bf16.mxu1 %vm3801_vm8, %v7003_v39  ;;  %v2007_v0 = vsel %vm1992_vm12, %v1965_v55, %v3539_v47  ;;  %v2008_v58 = vsel %vm1992_vm12, %v1966_v22, %v3540_v19  ;;  %v1943_v7 = vsel %vm1908_vm10, %v7055_v53, %v3549_v3  ;;  %v1944_v11 = vsel %vm1908_vm10, %v7056_v48, %v3550_v17 }
 0x1ae   : > { %v3545_v29 = vunpack.i.h.bf16 %v3543_v23  ;;  %v3544_v38 = vunpack.i.l.bf16 %v3543_v23  ;;  %v3558_v36 = vpop.permute.xlu1 %3557 }
 0x1af   : > { %v3560_v6 = vunpack.i.h.bf16 %v3558_v36  ;;  %v3559_v21 = vunpack.i.l.bf16 %v3558_v36 }
 0x1b0   : > { %v2049_v56 = vsel %vm2034_vm13, %v2007_v0, %v3544_v38  ;;  %v2050_v41 = vsel %vm2034_vm13, %v2008_v58, %v3545_v29  ;;  %v7059_v0 = vld [vmem:[#allocation28_spill] sm:$0xff] }
 0x1b1   : > { %v3553_v42 = vpop.permute.xlu0 %3552  ;;  %v1985_v5 = vsel %vm1950_vm11, %v1943_v7, %v3559_v21  ;;  %v1986_v12 = vsel %vm1950_vm11, %v1944_v11, %v3560_v6 }
 0x1b2   : > { %v3555_v60 = vunpack.i.h.bf16 %v3553_v42  ;;  %v3554_v16 = vunpack.i.l.bf16 %v3553_v42 }
 0x1b3   : > { %v3568_v1 = vpop.permute.xlu1 %3567 }
 0x1b4   : > { %v2091_v63 = vsel %vm2076_vm14, %v2049_v56, %v3554_v16  ;;  %v2092_v37 = vsel %vm2076_vm14, %v2050_v41, %v3555_v60  ;;  %v3570_v10 = vunpack.i.h.bf16 %v3568_v1  ;;  %v3569_v44 = vunpack.i.l.bf16 %v3568_v1  ;;  %v7060_v60 = vld [vmem:[#allocation56_spill] sm:$0xff] }
 0x1b5   : > { %v2125_v45 = vpack.c.bf16 %v2092_v37, %v2091_v63  ;;  %v3563_v43 = vpop.permute.xlu0 %3562 }
 0x1b6   : > { %v3565_v49 = vunpack.i.h.bf16 %v3563_v43  ;;  %v3564_v28 = vunpack.i.l.bf16 %v3563_v43 }
 0x1b7   : > { %2774 = vmatmul.mubr.msk.bf16.gmra.mxu0 %vm2159_vm15, %v2125_v45  ;;  %v3578_v59 = vpop.permute.xlu1 %3577 }
 0x1b8   : > { %v2027_v57 = vsel %vm1992_vm12, %v1985_v5, %v3564_v28  ;;  %v2028_v13 = vsel %vm1992_vm12, %v1986_v12, %v3565_v49  ;;  %2777 = vmatprep.mubr.msk.bf16.mxu0 %vm3801_vm8, %v7003_v39  ;;  %v3580_v25 = vunpack.i.h.bf16 %v3578_v59  ;;  %v3579_v2 = vunpack.i.l.bf16 %v3578_v59 }
 0x1b9   : > { %v3573_v51 = vpop.permute.xlu0 %3572  ;;  %v2069_v31 = vsel %vm2034_vm13, %v2027_v57, %v3569_v44  ;;  %v2070_v33 = vsel %vm2034_vm13, %v2028_v13, %v3570_v10 }
 0x1ba   : > { %v3575_v20 = vunpack.i.h.bf16 %v3573_v51  ;;  %v3574_v32 = vunpack.i.l.bf16 %v3573_v51  ;;  %v1967_v24 = vsel %vm1950_vm11, %v7057_v26, %v3579_v2  ;;  %v1968_v61 = vsel %vm1950_vm11, %v7058_v50, %v3580_v25  ;;  %v7061_v25 = vld [vmem:[#allocation63_spill] sm:$0xff] }
 0x1bc   : > { %v2111_v34 = vsel %vm2076_vm14, %v2069_v31, %v3574_v32  ;;  %v2112_v62 = vsel %vm2076_vm14, %v2070_v33, %v3575_v20  ;;  %v3588_v35 = vpop.permute.xlu1 %3587  ;;  %v7062_v31 = vld [vmem:[#allocation64_spill] sm:$0xff] }
 0x1bd   : > { %v2135_v4 = vpack.c.bf16 %v2112_v62, %v2111_v34  ;;  %v3583_v40 = vpop.permute.xlu0 %3582  ;;  %v3590_v54 = vunpack.i.h.bf16 %v3588_v35  ;;  %v3589_v27 = vunpack.i.l.bf16 %v3588_v35 }
 0x1be   : > { %v3585_v18 = vunpack.i.h.bf16 %v3583_v40  ;;  %v3584_v52 = vunpack.i.l.bf16 %v3583_v40 }
 0x1bf   : > { %2814 = vmatmul.mubr.msk.bf16.gmra.mxu1 %vm2159_vm15, %v2135_v4 }
 0x1c0   : > { %v2009_v9 = vsel %vm1992_vm12, %v1967_v24, %v3584_v52  ;;  %v2010_v14 = vsel %vm1992_vm12, %v1968_v61, %v3585_v18  ;;  %v3598_v46 = vpop.permute.xlu1 %3597  ;;  %2817 = vmatprep.mubr.msk.bf16.mxu1 %vm3801_vm8, %v7003_v39 }
 0x1c1   : > { %v3600_v15 = vunpack.i.h.bf16 %v3598_v46  ;;  %v3599_v23 = vunpack.i.l.bf16 %v3598_v46  ;;  %v3593_v19 = vpop.permute.xlu0 %3592  ;;  %v2051_v47 = vsel %vm2034_vm13, %v2009_v9, %v3589_v27  ;;  %v2052_v8 = vsel %vm2034_vm13, %v2010_v14, %v3590_v54 }
 0x1c2   : > { %v3595_v22 = vunpack.i.h.bf16 %v3593_v19  ;;  %v3594_v29 = vunpack.i.l.bf16 %v3593_v19 }
 0x1c3   : > { %v2093_v55 = vsel %vm2076_vm14, %v2051_v47, %v3599_v23  ;;  %v2094_v30 = vsel %vm2076_vm14, %v2052_v8, %v3600_v15  ;;  %v7063_v47 = vld [vmem:[#allocation54_spill] sm:$0xff] }
 0x1c4   : > { %v2126_v38 = vpack.c.bf16 %v2094_v30, %v2093_v55  ;;  %v3608_v36 = vpop.permute.xlu1 %3607  ;;  %v1945_v58 = vsel %vm1908_vm10, %v7059_v0, %v3594_v29  ;;  %v1946_v16 = vsel %vm1908_vm10, %v7060_v60, %v3595_v22  ;;  %v7064_v55 = vld [vmem:[#allocation55_spill] sm:$0xff] }
 0x1c5   : > { %v3603_v17 = vpop.permute.xlu0 %3602  ;;  %v3610_v56 = vunpack.i.h.bf16 %v3608_v36  ;;  %v3609_v41 = vunpack.i.l.bf16 %v3608_v36 }
 0x1c6   : > { %v3605_v3 = vunpack.i.h.bf16 %v3603_v17  ;;  %v3604_v42 = vunpack.i.l.bf16 %v3603_v17  ;;  %2778 = vmatmul.mubr.msk.bf16.gmra.mxu0 %vm2159_vm15, %v2126_v38 }
 0x1c7   : > { %2781 = vmatprep.mubr.msk.bf16.mxu0 %vm3801_vm8, %v7003_v39 }
 0x1c8   : > { %v1987_v6 = vsel %vm1950_vm11, %v1945_v58, %v3604_v42  ;;  %v1988_v21 = vsel %vm1950_vm11, %v1946_v16, %v3605_v3  ;;  %v3618_v63 = vpop.permute.xlu1 %3617 }
 0x1c9   : > { %v3620_v37 = vunpack.i.h.bf16 %v3618_v63  ;;  %v3619_v1 = vunpack.i.l.bf16 %v3618_v63  ;;  %v2029_v7 = vsel %vm1992_vm12, %v1987_v6, %v3609_v41  ;;  %v2030_v48 = vsel %vm1992_vm12, %v1988_v21, %v3610_v56 }
 0x1ca   : > { %v3613_v45 = vpop.permute.xlu0 %3612 }
 0x1cb   : > { %v3615_v43 = vunpack.i.h.bf16 %v3613_v45  ;;  %v3614_v53 = vunpack.i.l.bf16 %v3613_v45 }
 0x1cc   : > { %v3628_v28 = vpop.permute.xlu1 %3627 }
 0x1cd   : > { %v2071_v11 = vsel %vm2034_vm13, %v2029_v7, %v3614_v53  ;;  %v2072_v49 = vsel %vm2034_vm13, %v2030_v48, %v3615_v43  ;;  %v3630_v20 = vunpack.i.h.bf16 %v3628_v28  ;;  %v3629_v32 = vunpack.i.l.bf16 %v3628_v28  ;;  %v7065_v28 = vld [vmem:[#allocation61_spill] sm:$0xff] }
 0x1ce   : > { %v3623_v5 = vpop.permute.xlu0 %3622  ;;  %v2113_v12 = vsel %vm2076_vm14, %v2071_v11, %v3619_v1  ;;  %v2114_v10 = vsel %vm2076_vm14, %v2072_v49, %v3620_v37 }
 0x1cf   : > { %v2136_v44 = vpack.c.bf16 %v2114_v10, %v2113_v12  ;;  %v3625_v57 = vunpack.i.h.bf16 %v3623_v5  ;;  %v3624_v13 = vunpack.i.l.bf16 %v3623_v5  ;;  %v7066_v12 = vld [vmem:[#allocation62_spill] sm:$0xff] }
 0x1d0   : > { %v3638_v59 = vpop.permute.xlu1 %3637 }
 0x1d1   : > { %2818 = vmatmul.mubr.msk.bf16.gmra.mxu1 %vm2159_vm15, %v2136_v44  ;;  %v1969_v2 = vsel %vm1950_vm11, %v7061_v25, %v3624_v13  ;;  %v1970_v33 = vsel %vm1950_vm11, %v7062_v31, %v3625_v57  ;;  %v3640_v4 = vunpack.i.h.bf16 %v3638_v59  ;;  %v3639_v40 = vunpack.i.l.bf16 %v3638_v59 }
 0x1d2   : > { %v3633_v51 = vpop.permute.xlu0 %3632  ;;  %2821 = vmatprep.mubr.msk.bf16.mxu1 %vm3801_vm8, %v7003_v39  ;;  %v2011_v27 = vsel %vm1992_vm12, %v1969_v2, %v3629_v32  ;;  %v2012_v18 = vsel %vm1992_vm12, %v1970_v33, %v3630_v20 }
 0x1d3   : > { %v3635_v34 = vunpack.i.h.bf16 %v3633_v51  ;;  %v3634_v62 = vunpack.i.l.bf16 %v3633_v51  ;;  %v1947_v8 = vsel %vm1908_vm10, %v7063_v47, %v3639_v40  ;;  %v1948_v30 = vsel %vm1908_vm10, %v7064_v55, %v3640_v4 }
 0x1d4   : > { %v3648_v35 = vpop.permute.xlu1 %3647 }
 0x1d5   : > { %v2053_v24 = vsel %vm2034_vm13, %v2011_v27, %v3634_v62  ;;  %v2054_v50 = vsel %vm2034_vm13, %v2012_v18, %v3635_v34  ;;  %v3650_v61 = vunpack.i.h.bf16 %v3648_v35  ;;  %v3649_v9 = vunpack.i.l.bf16 %v3648_v35  ;;  %v7067_v62 = vld [vmem:[#allocation10_spill] sm:$0xff] }
 0x1d6   : > { %v3643_v54 = vpop.permute.xlu0 %3642 }
 0x1d7   : > { %v3645_v52 = vunpack.i.h.bf16 %v3643_v54  ;;  %v3644_v26 = vunpack.i.l.bf16 %v3643_v54  ;;  %v1989_v38 = vsel %vm1950_vm11, %v1947_v8, %v3649_v9  ;;  %v1990_v36 = vsel %vm1950_vm11, %v1948_v30, %v3650_v61  ;;  %v6464_v61 = vld [vmem:[%s6646_s3] ss:$0 sm:$0xff] }
 0x1d8   : > { %v3658_v15 = vpop.permute.xlu1 %3657 }
 0x1d9   : > { %v2095_v14 = vsel %vm2076_vm14, %v2053_v24, %v3644_v26  ;;  %v2096_v46 = vsel %vm2076_vm14, %v2054_v50, %v3645_v52  ;;  %v3660_v17 = vunpack.i.h.bf16 %v3658_v15  ;;  %v3659_v3 = vunpack.i.l.bf16 %v3658_v15  ;;  %v6457_v24 = vld [vmem:[%s6645_s2] ss:$0 sm:$0xff] }
 0x1da   : > { %v2127_v23 = vpack.c.bf16 %v2096_v46, %v2095_v14 }
 0x1db   : > { %v3653_v19 = vpop.permute.xlu0 %3652 }
 0x1dc   : > { %v3655_v22 = vunpack.i.h.bf16 %v3653_v19  ;;  %v3654_v29 = vunpack.i.l.bf16 %v3653_v19  ;;  %2782 = vmatmul.mubr.msk.bf16.gmra.mxu0 %vm2159_vm15, %v2127_v23  ;;  %v3668_v58 = vpop.permute.xlu1 %3667 }
 0x1dd   : > { %2785 = vmatprep.mubr.msk.bf16.mxu0 %vm3801_vm8, %v7003_v39  ;;  %v3670_v41 = vunpack.i.h.bf16 %v3668_v58  ;;  %v3669_v6 = vunpack.i.l.bf16 %v3668_v58 }
 0x1de   : > { %v2031_v42 = vsel %vm1992_vm12, %v1989_v38, %v3654_v29  ;;  %v2032_v0 = vsel %vm1992_vm12, %v1990_v36, %v3655_v22 }
 0x1df   : > { %v3663_v60 = vpop.permute.xlu0 %3662  ;;  %v2073_v21 = vsel %vm2034_vm13, %v2031_v42, %v3659_v3  ;;  %v2074_v63 = vsel %vm2034_vm13, %v2032_v0, %v3660_v17  ;;  %v1971_v5 = vsel %vm1950_vm11, %v7065_v28, %v3669_v6  ;;  %v1972_v10 = vsel %vm1950_vm11, %v7066_v12, %v3670_v41 }
 0x1e0   : > { %v3665_v16 = vunpack.i.h.bf16 %v3663_v60  ;;  %v3664_v56 = vunpack.i.l.bf16 %v3663_v60  ;;  %v3678_v45 = vpop.permute.xlu1 %3677 }
 0x1e1   : > { %v3680_v7 = vunpack.i.h.bf16 %v3678_v45  ;;  %v3679_v48 = vunpack.i.l.bf16 %v3678_v45 }
 0x1e2   : > { %v2115_v37 = vsel %vm2076_vm14, %v2073_v21, %v3664_v56  ;;  %v2116_v1 = vsel %vm2076_vm14, %v2074_v63, %v3665_v16 }
 0x1e3   : > { %v2137_v43 = vpack.c.bf16 %v2116_v1, %v2115_v37  ;;  %v3673_v53 = vpop.permute.xlu0 %3672 }
 0x1e4   : > { %v3675_v11 = vunpack.i.h.bf16 %v3673_v53  ;;  %v3674_v49 = vunpack.i.l.bf16 %v3673_v53  ;;  %v3683_v13 = vpop.permute.xlu1 %3682 }
 0x1e5   : > { %2822 = vmatmul.mubr.msk.bf16.gmra.mxu1 %vm2159_vm15, %v2137_v43  ;;  %v3685_v59 = vunpack.i.h.bf16 %v3683_v13  ;;  %v3684_v51 = vunpack.i.l.bf16 %v3683_v13 }
 0x1e6   : > { %v2013_v44 = vsel %vm1992_vm12, %v1971_v5, %v3674_v49  ;;  %v2014_v57 = vsel %vm1992_vm12, %v1972_v10, %v3675_v11  ;;  %2825 = vmatprep.mubr.msk.bf16.mxu1 %vm3801_vm8, %v7003_v39 }
 0x1e7   : > { %v1245_v20 = vpop.permute.xlu0 %1244  ;;  %v2055_v32 = vsel %vm2034_vm13, %v2013_v44, %v3679_v48  ;;  %v2056_v25 = vsel %vm2034_vm13, %v2014_v57, %v3680_v7 }
 0x1e8   : > { %v2097_v2 = vsel %vm2076_vm14, %v2055_v32, %v3684_v51  ;;  %v2098_v31 = vsel %vm2076_vm14, %v2056_v25, %v3685_v59  ;;  %v1492_v34 = vpop.permute.xlu1 %1491  ;;  %v1949_v35 = vsel %vm1908_vm10, %v7067_v62, %v1245_v20 }
 0x1e9   : > { %v2128_v33 = vpack.c.bf16 %v2098_v31, %v2097_v2 }
 0x1eb   : > { %v1369_v4 = vpop.permute.xlu0 %1368  ;;  %2786 = vmatmul.mubr.msk.bf16.gmra.mxu0 %vm2159_vm15, %v2128_v33 }
 0x1ec   : > { %v1991_v39 = vsel %vm1950_vm11, %v1949_v35, %v1369_v4  ;;  %v1740_v40 = vpop.permute.xlu1 %1739 }
 0x1ed   : > { %v2033_v54 = vsel %vm1992_vm12, %v1991_v39, %v1492_v34 }
 0x1ef   : > { %v1616_v27 = vpop.permute.xlu0 %1615 }
 0x1f0   : > { %v2075_v18 = vsel %vm2034_vm13, %v2033_v54, %v1616_v27 }
 0x1f1   : > { %v2117_v52 = vsel %vm2076_vm14, %v2075_v18, %v1740_v40 }
 0x1f2   : > { %v2138_v26 = vpack.c.bf16 %v2117_v52, %v2117_v52 }
 0x1f4   : > { %2826 = vmatmul.mubr.msk.bf16.gmra.mxu1 %vm2159_vm15, %v2138_v26 }
 0x208   : > { %v2260_v50 = vpop.f32.mrf.mxu0 }
 0x209   : > { %v2433_v9 = vmul.f32 %v6457_v24, %v2260_v50 }
 0x20a   : > { %v2747_v14 = vpop.f32.mrf.mxu0 }
 0x20b   : > { %v2481_v46 = vadd.f32 %v6464_v61, %v2433_v9 }
 0x20c   : > { %v2263_v15 = vpop.f32.mrf.mxu0 }
 0x20d   : > { %v2522_v23 = vmax.f32 %v2481_v46, 0.0  ;;  %v2434_v19 = vmul.f32 %v6457_v24, %v2263_v15 }
 0x20e   : > { %v2748_v47 = vpop.f32.mrf.mxu0 }
 0x20f   : > { %2563 = vst [vmem:[%s6469_s10] sm:$0xff] %v2522_v23  ;;  %v2482_v8 = vadd.f32 %v6464_v61, %v2434_v19 }
 0x211   : > { %v2268_v55 = vpop.f32.mrf.mxu0  ;;  %v2523_v30 = vmax.f32 %v2482_v8, 0.0 }
 0x212   : > { %v2435_v22 = vmul.f32 %v6457_v24, %v2268_v55 }
 0x213   : > { %v2751_v29 = vpop.f32.mrf.mxu0  ;;  %2564 = vst [vmem:[%s6469_s10 + $0x8] sm:$0xff] %v2523_v30 }
 0x214   : > { %v2483_v38 = vadd.f32 %v6464_v61, %v2435_v22 }
 0x215   : > { %v2271_v36 = vpop.f32.mrf.mxu0 }
 0x216   : > { %v2524_v17 = vmax.f32 %v2483_v38, 0.0  ;;  %v2436_v3 = vmul.f32 %v6457_v24, %v2271_v36 }
 0x217   : > { %v2752_v42 = vpop.f32.mrf.mxu0 }
 0x218   : > { %2565 = vst [vmem:[%s6469_s10 + $0x10] sm:$0xff] %v2524_v17  ;;  %v2484_v0 = vadd.f32 %v6464_v61, %v2436_v3 }
 0x219   : > { %v2348_v58 = vpop.f32.mrf.mxu1 }
 0x21a   : > { %v2525_v60 = vmax.f32 %v2484_v0, 0.0  ;;  %v2455_v16 = vmul.f32 %v6457_v24, %v2348_v58 }
 0x21b   : > { %v2791_v56 = vpop.f32.mrf.mxu1 }
 0x21c   : > { %2566 = vst [vmem:[%s6469_s10 + $0x18] sm:$0xff] %v2525_v60  ;;  %v2503_v41 = vadd.f32 %v6464_v61, %v2455_v16 }
 0x21d   : > { %v2351_v6 = vpop.f32.mrf.mxu1 }
 0x21e   : > { %v2544_v21 = vmax.f32 %v2503_v41, 0.0  ;;  %v2456_v63 = vmul.f32 %v6457_v24, %v2351_v6 }
 0x21f   : > { %v2792_v37 = vpop.f32.mrf.mxu1 }
 0x220   : > { %2585 = vst [vmem:[%s6469_s10 + $0xb0] sm:$0xff] %v2544_v21  ;;  %v2504_v1 = vadd.f32 %v6464_v61, %v2456_v63 }
 0x222   : > { %v2276_v45 = vpop.f32.mrf.mxu0  ;;  %v2545_v43 = vmax.f32 %v2504_v1, 0.0 }
 0x223   : > { %v2437_v53 = vmul.f32 %v6457_v24, %v2276_v45 }
 0x224   : > { %v2755_v7 = vpop.f32.mrf.mxu0  ;;  %2586 = vst [vmem:[%s6469_s10 + $0xb8] sm:$0xff] %v2545_v43 }
 0x225   : > { %v2485_v48 = vadd.f32 %v6464_v61, %v2437_v53 }
 0x226   : > { %v2279_v11 = vpop.f32.mrf.mxu0 }
 0x227   : > { %v2526_v49 = vmax.f32 %v2485_v48, 0.0  ;;  %v2438_v28 = vmul.f32 %v6457_v24, %v2279_v11 }
 0x228   : > { %v2756_v5 = vpop.f32.mrf.mxu0 }
 0x229   : > { %2567 = vst [vmem:[%s6469_s10 + $0x20] sm:$0xff] %v2526_v49  ;;  %v2486_v12 = vadd.f32 %v6464_v61, %v2438_v28 }
 0x22b   : > { %v2356_v10 = vpop.f32.mrf.mxu1  ;;  %v2527_v44 = vmax.f32 %v2486_v12, 0.0 }
 0x22c   : > { %v2457_v57 = vmul.f32 %v6457_v24, %v2356_v10 }
 0x22d   : > { %v2795_v13 = vpop.f32.mrf.mxu1  ;;  %2568 = vst [vmem:[%s6469_s10 + $0x28] sm:$0xff] %v2527_v44 }
 0x22e   : > { %v2505_v59 = vadd.f32 %v6464_v61, %v2457_v57 }
 0x22f   : > { %v2359_v51 = vpop.f32.mrf.mxu1 }
 0x230   : > { %v2546_v20 = vmax.f32 %v2505_v59, 0.0  ;;  %v2458_v32 = vmul.f32 %v6457_v24, %v2359_v51 }
 0x231   : > { %v2796_v25 = vpop.f32.mrf.mxu1 }
 0x232   : > { %2587 = vst [vmem:[%s6469_s10 + $0xc0] sm:$0xff] %v2546_v20  ;;  %v2506_v2 = vadd.f32 %v6464_v61, %v2458_v32 }
 0x234   : > { %v2284_v31 = vpop.f32.mrf.mxu0  ;;  %v2547_v33 = vmax.f32 %v2506_v2, 0.0 }
 0x235   : > { %v2439_v34 = vmul.f32 %v6457_v24, %v2284_v31 }
 0x236   : > { %v2759_v62 = vpop.f32.mrf.mxu0  ;;  %2588 = vst [vmem:[%s6469_s10 + $0xc8] sm:$0xff] %v2547_v33 }
 0x237   : > { %v2487_v35 = vadd.f32 %v6464_v61, %v2439_v34 }
 0x238   : > { %v2287_v4 = vpop.f32.mrf.mxu0 }
 0x239   : > { %v2528_v39 = vmax.f32 %v2487_v35, 0.0  ;;  %v2440_v40 = vmul.f32 %v6457_v24, %v2287_v4 }
 0x23a   : > { %v2760_v54 = vpop.f32.mrf.mxu0 }
 0x23b   : > { %2569 = vst [vmem:[%s6469_s10 + $0x30] sm:$0xff] %v2528_v39  ;;  %v2488_v27 = vadd.f32 %v6464_v61, %v2440_v40 }
 0x23c   : > { %v2364_v18 = vpop.f32.mrf.mxu1 }
 0x23d   : > { %v2529_v52 = vmax.f32 %v2488_v27, 0.0  ;;  %v2459_v26 = vmul.f32 %v6457_v24, %v2364_v18 }
 0x23e   : > { %v2799_v50 = vpop.f32.mrf.mxu1 }
 0x23f   : > { %2570 = vst [vmem:[%s6469_s10 + $0x38] sm:$0xff] %v2529_v52  ;;  %v2507_v9 = vadd.f32 %v6464_v61, %v2459_v26 }
 0x240   : > { %v2367_v14 = vpop.f32.mrf.mxu1 }
 0x241   : > { %v2548_v46 = vmax.f32 %v2507_v9, 0.0  ;;  %v2460_v15 = vmul.f32 %v6457_v24, %v2367_v14 }
 0x242   : > { %v2800_v23 = vpop.f32.mrf.mxu1 }
 0x243   : > { %2589 = vst [vmem:[%s6469_s10 + $0xd0] sm:$0xff] %v2548_v46  ;;  %v2508_v19 = vadd.f32 %v6464_v61, %v2460_v15  ;;  %v2292_v47 = vpop.f32.mrf.mxu0 }
 0x244   : > { %v2441_v55 = vmul.f32 %v6457_v24, %v2292_v47 }
 0x245   : > { %v2549_v8 = vmax.f32 %v2508_v19, 0.0  ;;  %v2763_v30 = vpop.f32.mrf.mxu0 }
 0x246   : > { %v2489_v22 = vadd.f32 %v6464_v61, %v2441_v55 }
 0x247   : > { %2590 = vst [vmem:[%s6469_s10 + $0xd8] sm:$0xff] %v2549_v8  ;;  %v2295_v29 = vpop.f32.mrf.mxu0 }
 0x248   : > { %v2530_v38 = vmax.f32 %v2489_v22, 0.0  ;;  %v2442_v36 = vmul.f32 %v6457_v24, %v2295_v29 }
 0x249   : > { %v2764_v17 = vpop.f32.mrf.mxu0 }
 0x24a   : > { %2571 = vst [vmem:[%s6469_s10 + $0x40] sm:$0xff] %v2530_v38  ;;  %v2490_v3 = vadd.f32 %v6464_v61, %v2442_v36 }
 0x24b   : > { %v2372_v42 = vpop.f32.mrf.mxu1 }
 0x24c   : > { %v2531_v0 = vmax.f32 %v2490_v3, 0.0  ;;  %v2461_v58 = vmul.f32 %v6457_v24, %v2372_v42 }
 0x24d   : > { %v2803_v60 = vpop.f32.mrf.mxu1 }
 0x24e   : > { %2572 = vst [vmem:[%s6469_s10 + $0x48] sm:$0xff] %v2531_v0  ;;  %v2509_v16 = vadd.f32 %v6464_v61, %v2461_v58 }
 0x24f   : > { %v2375_v56 = vpop.f32.mrf.mxu1 }
 0x250   : > { %v2550_v41 = vmax.f32 %v2509_v16, 0.0  ;;  %v2462_v6 = vmul.f32 %v6457_v24, %v2375_v56 }
 0x251   : > { %v2804_v21 = vpop.f32.mrf.mxu1 }
 0x252   : > { %2591 = vst [vmem:[%s6469_s10 + $0xe0] sm:$0xff] %v2550_v41  ;;  %v2510_v63 = vadd.f32 %v6464_v61, %v2462_v6 }
 0x253   : > { %v2300_v37 = vpop.f32.mrf.mxu0 }
 0x254   : > { %v2551_v1 = vmax.f32 %v2510_v63, 0.0  ;;  %v2443_v45 = vmul.f32 %v6457_v24, %v2300_v37 }
 0x255   : > { %v2767_v43 = vpop.f32.mrf.mxu0 }
 0x256   : > { %2592 = vst [vmem:[%s6469_s10 + $0xe8] sm:$0xff] %v2551_v1  ;;  %v2491_v53 = vadd.f32 %v6464_v61, %v2443_v45 }
 0x257   : > { %v2303_v7 = vpop.f32.mrf.mxu0 }
 0x258   : > { %v2532_v48 = vmax.f32 %v2491_v53, 0.0  ;;  %v2444_v11 = vmul.f32 %v6457_v24, %v2303_v7 }
 0x259   : > { %v2768_v49 = vpop.f32.mrf.mxu0 }
 0x25a   : > { %2573 = vst [vmem:[%s6469_s10 + $0x50] sm:$0xff] %v2532_v48  ;;  %v2492_v28 = vadd.f32 %v6464_v61, %v2444_v11 }
 0x25b   : > { %v2380_v5 = vpop.f32.mrf.mxu1 }
 0x25c   : > { %v2533_v12 = vmax.f32 %v2492_v28, 0.0  ;;  %v2463_v10 = vmul.f32 %v6457_v24, %v2380_v5 }
 0x25d   : > { %v2807_v44 = vpop.f32.mrf.mxu1 }
 0x25e   : > { %2574 = vst [vmem:[%s6469_s10 + $0x58] sm:$0xff] %v2533_v12  ;;  %v2511_v57 = vadd.f32 %v6464_v61, %v2463_v10 }
 0x25f   : > { %v2383_v13 = vpop.f32.mrf.mxu1 }
 0x260   : > { %v2552_v59 = vmax.f32 %v2511_v57, 0.0  ;;  %v2464_v51 = vmul.f32 %v6457_v24, %v2383_v13 }
 0x261   : > { %v2808_v20 = vpop.f32.mrf.mxu1  ;;  %v2308_v25 = vpop.f32.mrf.mxu0 }
 0x262   : > { %2593 = vst [vmem:[%s6469_s10 + $0xf0] sm:$0xff] %v2552_v59  ;;  %v2512_v32 = vadd.f32 %v6464_v61, %v2464_v51  ;;  %v2445_v2 = vmul.f32 %v6457_v24, %v2308_v25 }
 0x263   : > { %v2771_v33 = vpop.f32.mrf.mxu0 }
 0x264   : > { %v2553_v31 = vmax.f32 %v2512_v32, 0.0  ;;  %v2493_v34 = vadd.f32 %v6464_v61, %v2445_v2 }
 0x265   : > { %v2311_v62 = vpop.f32.mrf.mxu0 }
 0x266   : > { %2594 = vst [vmem:[%s6469_s10 + $0xf8] sm:$0xff] %v2553_v31  ;;  %v2534_v35 = vmax.f32 %v2493_v34, 0.0  ;;  %v2446_v4 = vmul.f32 %v6457_v24, %v2311_v62 }
 0x267   : > { %v2772_v39 = vpop.f32.mrf.mxu0 }
 0x268   : > { %2575 = vst [vmem:[%s6469_s10 + $0x60] sm:$0xff] %v2534_v35  ;;  %v2494_v40 = vadd.f32 %v6464_v61, %v2446_v4 }
 0x26a   : > { %v2535_v54 = vmax.f32 %v2494_v40, 0.0 }
 0x26c   : > { %v2388_v27 = vpop.f32.mrf.mxu1  ;;  %2576 = vst [vmem:[%s6469_s10 + $0x68] sm:$0xff] %v2535_v54 }
 0x26d   : > { %v2465_v18 = vmul.f32 %v6457_v24, %v2388_v27 }
 0x26e   : > { %v2811_v52 = vpop.f32.mrf.mxu1 }
 0x26f   : > { %v2513_v26 = vadd.f32 %v6464_v61, %v2465_v18 }
 0x270   : > { %v2391_v50 = vpop.f32.mrf.mxu1 }
 0x271   : > { %v2554_v9 = vmax.f32 %v2513_v26, 0.0  ;;  %v2466_v14 = vmul.f32 %v6457_v24, %v2391_v50 }
 0x272   : > { %v2812_v46 = vpop.f32.mrf.mxu1 }
 0x273   : > { %2595 = vst [vmem:[%s6469_s10 + $0x100] sm:$0xff] %v2554_v9  ;;  %v2514_v15 = vadd.f32 %v6464_v61, %v2466_v14 }
 0x275   : > { %v2555_v23 = vmax.f32 %v2514_v15, 0.0 }
 0x277   : > { %2596 = vst [vmem:[%s6469_s10 + $0x108] sm:$0xff] %v2555_v23  ;;  %v2316_v19 = vpop.f32.mrf.mxu0 }
 0x278   : > { %v2447_v47 = vmul.f32 %v6457_v24, %v2316_v19 }
 0x279   : > { %v2775_v8 = vpop.f32.mrf.mxu0 }
 0x27a   : > { %v2495_v55 = vadd.f32 %v6464_v61, %v2447_v47 }
 0x27b   : > { %v2319_v30 = vpop.f32.mrf.mxu0 }
 0x27c   : > { %v2536_v22 = vmax.f32 %v2495_v55, 0.0  ;;  %v2448_v29 = vmul.f32 %v6457_v24, %v2319_v30 }
 0x27d   : > { %v2776_v38 = vpop.f32.mrf.mxu0 }
 0x27e   : > { %2577 = vst [vmem:[%s6469_s10 + $0x70] sm:$0xff] %v2536_v22  ;;  %v2496_v36 = vadd.f32 %v6464_v61, %v2448_v29 }
 0x27f   : > { %v2396_v17 = vpop.f32.mrf.mxu1 }
 0x280   : > { %v2537_v3 = vmax.f32 %v2496_v36, 0.0  ;;  %v2467_v42 = vmul.f32 %v6457_v24, %v2396_v17 }
 0x281   : > { %v2815_v0 = vpop.f32.mrf.mxu1 }
 0x282   : > { %2578 = vst [vmem:[%s6469_s10 + $0x78] sm:$0xff] %v2537_v3  ;;  %v2515_v58 = vadd.f32 %v6464_v61, %v2467_v42 }
 0x283   : > { %v2399_v60 = vpop.f32.mrf.mxu1 }
 0x284   : > { %v2556_v16 = vmax.f32 %v2515_v58, 0.0  ;;  %v2468_v56 = vmul.f32 %v6457_v24, %v2399_v60 }
 0x285   : > { %v2816_v41 = vpop.f32.mrf.mxu1 }
 0x286   : > { %2597 = vst [vmem:[%s6469_s10 + $0x110] sm:$0xff] %v2556_v16  ;;  %v2516_v6 = vadd.f32 %v6464_v61, %v2468_v56  ;;  %v2324_v21 = vpop.f32.mrf.mxu0 }
 0x287   : > { %v2449_v63 = vmul.f32 %v6457_v24, %v2324_v21 }
 0x288   : > { %v2557_v37 = vmax.f32 %v2516_v6, 0.0  ;;  %v2779_v1 = vpop.f32.mrf.mxu0 }
 0x289   : > { %v2497_v45 = vadd.f32 %v6464_v61, %v2449_v63 }
 0x28a   : > { %2598 = vst [vmem:[%s6469_s10 + $0x118] sm:$0xff] %v2557_v37  ;;  %v2327_v43 = vpop.f32.mrf.mxu0 }
 0x28b   : > { %v2538_v53 = vmax.f32 %v2497_v45, 0.0  ;;  %v2450_v7 = vmul.f32 %v6457_v24, %v2327_v43 }
 0x28c   : > { %v2780_v48 = vpop.f32.mrf.mxu0 }
 0x28d   : > { %2579 = vst [vmem:[%s6469_s10 + $0x80] sm:$0xff] %v2538_v53  ;;  %v2498_v11 = vadd.f32 %v6464_v61, %v2450_v7 }
 0x28f   : > { %v2539_v49 = vmax.f32 %v2498_v11, 0.0 }
 0x291   : > { %v2404_v28 = vpop.f32.mrf.mxu1  ;;  %2580 = vst [vmem:[%s6469_s10 + $0x88] sm:$0xff] %v2539_v49 }
 0x292   : > { %v2469_v5 = vmul.f32 %v6457_v24, %v2404_v28 }
 0x293   : > { %v2819_v12 = vpop.f32.mrf.mxu1 }
 0x294   : > { %v2517_v10 = vadd.f32 %v6464_v61, %v2469_v5 }
 0x295   : > { %v2407_v44 = vpop.f32.mrf.mxu1 }
 0x296   : > { %v2558_v57 = vmax.f32 %v2517_v10, 0.0  ;;  %v2470_v13 = vmul.f32 %v6457_v24, %v2407_v44 }
 0x297   : > { %v2820_v59 = vpop.f32.mrf.mxu1 }
 0x298   : > { %2599 = vst [vmem:[%s6469_s10 + $0x120] sm:$0xff] %v2558_v57  ;;  %v2518_v51 = vadd.f32 %v6464_v61, %v2470_v13 }
 0x29a   : > { %v2559_v20 = vmax.f32 %v2518_v51, 0.0 }
 0x29c   : > { %2600 = vst [vmem:[%s6469_s10 + $0x128] sm:$0xff] %v2559_v20  ;;  %v2332_v32 = vpop.f32.mrf.mxu0 }
 0x29d   : > { %v2451_v25 = vmul.f32 %v6457_v24, %v2332_v32 }
 0x29e   : > { %v2783_v2 = vpop.f32.mrf.mxu0 }
 0x29f   : > { %v2499_v31 = vadd.f32 %v6464_v61, %v2451_v25 }
 0x2a0   : > { %v2335_v33 = vpop.f32.mrf.mxu0 }
 0x2a1   : > { %v2540_v34 = vmax.f32 %v2499_v31, 0.0  ;;  %v2452_v62 = vmul.f32 %v6457_v24, %v2335_v33 }
 0x2a2   : > { %v2784_v35 = vpop.f32.mrf.mxu0 }
 0x2a3   : > { %2581 = vst [vmem:[%s6469_s10 + $0x90] sm:$0xff] %v2540_v34  ;;  %v2500_v4 = vadd.f32 %v6464_v61, %v2452_v62 }
 0x2a5   : > { %v2412_v39 = vpop.f32.mrf.mxu1  ;;  %v2541_v40 = vmax.f32 %v2500_v4, 0.0 }
 0x2a6   : > { %v2471_v54 = vmul.f32 %v6457_v24, %v2412_v39 }
 0x2a7   : > { %v2823_v27 = vpop.f32.mrf.mxu1  ;;  %2582 = vst [vmem:[%s6469_s10 + $0x98] sm:$0xff] %v2541_v40 }
 0x2a8   : > { %v2519_v18 = vadd.f32 %v6464_v61, %v2471_v54 }
 0x2a9   : > { %v2415_v52 = vpop.f32.mrf.mxu1 }
 0x2aa   : > { %v2560_v26 = vmax.f32 %v2519_v18, 0.0  ;;  %v2472_v50 = vmul.f32 %v6457_v24, %v2415_v52 }
 0x2ab   : > { %v2824_v9 = vpop.f32.mrf.mxu1  ;;  %v2340_v46 = vpop.f32.mrf.mxu0 }
 0x2ac   : > { %2601 = vst [vmem:[%s6469_s10 + $0x130] sm:$0xff] %v2560_v26  ;;  %v2520_v14 = vadd.f32 %v6464_v61, %v2472_v50  ;;  %v2453_v15 = vmul.f32 %v6457_v24, %v2340_v46 }
 0x2ad   : > { %v2787_v19 = vpop.f32.mrf.mxu0 }
 0x2ae   : > { %v2561_v23 = vmax.f32 %v2520_v14, 0.0  ;;  %v2501_v47 = vadd.f32 %v6464_v61, %v2453_v15 }
 0x2af   : > { %v2343_v8 = vpop.f32.mrf.mxu0 }
 0x2b0   : > { %2602 = vst [vmem:[%s6469_s10 + $0x138] sm:$0xff] %v2561_v23  ;;  %v2542_v55 = vmax.f32 %v2501_v47, 0.0  ;;  %v2454_v30 = vmul.f32 %v6457_v24, %v2343_v8 }
 0x2b1   : > { %v2788_v22 = vpop.f32.mrf.mxu0 }
 0x2b2   : > { %2583 = vst [vmem:[%s6469_s10 + $0xa0] sm:$0xff] %v2542_v55  ;;  %v2502_v29 = vadd.f32 %v6464_v61, %v2454_v30 }
 0x2b4   : > { %v2420_v38 = vpop.f32.mrf.mxu1  ;;  %v2543_v36 = vmax.f32 %v2502_v29, 0.0 }
 0x2b5   : > { %v2473_v17 = vmul.f32 %v6457_v24, %v2420_v38 }
 0x2b6   : > { %v2827_v3 = vpop.f32.mrf.mxu1  ;;  %2584 = vst [vmem:[%s6469_s10 + $0xa8] sm:$0xff] %v2543_v36 }
 0x2b7   : > { %v2521_v42 = vadd.f32 %v6464_v61, %v2473_v17 }
 0x2b8   : > { %v2423_v0 = vpop.f32.mrf.mxu1 }
 0x2b9   : > { %v2562_v58 = vmax.f32 %v2521_v42, 0.0 }
 0x2ba   : > { %v2828_v60 = vpop.f32.mrf.mxu1 }
 0x2bb   : > { %2603 = vst [vmem:[%s6469_s10 + $0x140] sm:$0xff] %v2562_v58 }
 0x2bc   : > { %3743 = shalt.err (!%p3740_p3)
}
 0x2bd   : > { %s3744_s29 = scalar_lea.hbm %s6595_s20, 5248  ;;  %s3748_s6 = scalar_lea.hbm %s6647_s4, 10496 }
 0x2be   : > { %p3745_p4 = scmp.ne.s32.totalorder %s6595_s20, %s3744_s29  ;;  %p3749_p9 = scmp.lt.s32.totalorder %s6595_s20, %s6647_s4 }
 0x2bf   : > { %p3750_p10 = scmp.lt.s32.totalorder %s3748_s6, %s3744_s29 }
 0x2c0   : > { %p3746_p7 = pnand %p3745_p4, %p3867_p5 }
 0x2c1   : > { %p3751_p11 = por %p3750_p10, %p3749_p9 }
 0x2c2   : > { %p3747_p8 = pneg %p3746_p7 }
 0x2c4   : > { %p3752_p12 = pnand %p3751_p11, %p3747_p8 }
 0x2c6   : > { %3755 = shalt.err (!%p3752_p12)
}
 0x2c7   : > { %s3803_s10 = smov 128  }
 0x2c8   : > { %2836 = dma.vmem_to_hbm [thread:$0]  (%p3867_p5), %s6597_s12, 5248, %s6595_s20, %s6602_s19, %s3803_s10, %s3803_s10, %s3793_s7  }
 0x2c9 PF: > { %p2842_p13 = scmp.ge.s32.totalorder %s3790_s18, 2  ;;  %s2633_s11 = sand.u32 1, %s3778_s15  }
 0x2ca   : > { %s2634_s13 = scalar_lea.sflag [#allocation3], %s2633_s11 }
 0x2cb   : > { %p2839_p0 = pnand %p2842_p13, %p3871_p6 }
 0x2cd   : > { %p2840_p1 = pneg %p2839_p0 }
 0x2cf   : > { %3773 = dma.done.wait (%p2840_p1), %s2634_s13, 5248  }
 0x2d0   : > { %3775 = vsyncadd (%p2840_p1), %s2634_s13, 4294962048  ;;  %p14_p2 = scmp.ge.s32.totalorder %s3854_s21, 4   ;;  %s7068_s15 = smov %s3782_s16 }
 0x2d1   : > { %s7069_s16 = smov %s3786_s17  ;;  %s7070_s17 = smov %s3865_s24 }
 0x2d2   : > { %s7071_s18 = smov %s3854_s21  ;;  %16 = sbr.rel (!%p14_p2) target bundleno = 3 (0x3), region = 71 }
 0x2d7   :  { %2639 = vsyncpa [#allocation3], 1 }
 0x2d8   :  { %2641 = vsyncpa [#allocation3 + $0x1], 1 }

</bundles_post_ra>
